<compile_context>
chip_gen: v6e
topology: v6e:2x2x1
jax: 0.10.0
libtpu: 0.0.40
codegen_flags: <defaults>
</compile_context>

<pallas_src>
import numpy as np
import jax
import jax.numpy as jnp
from jax.experimental import pallas as pl
from jax.experimental.pallas import tpu as pltpu

HIGHEST = jax.lax.Precision.HIGHEST


def _round_up(x, m):
    return (x + m - 1) // m * m


# --------------------------- host-side operator builders ---------------------------

def bilinear_matrix(n_in, n_out):
    """Interp matrix matching torch Upsample(scale=2, bilinear, align_corners=True)."""
    m = np.zeros((n_out, n_in), np.float32)
    if n_out == 1 or n_in == 1:
        m[:, 0] = 1.0
        return m
    scale = (n_in - 1) / (n_out - 1)
    for i in range(n_out):
        src = i * scale
        i0 = min(int(np.floor(src)), n_in - 1)
        i1 = min(i0 + 1, n_in - 1)
        f = src - i0
        m[i, i0] += 1.0 - f
        m[i, i1] += f
    return m


def pad_matrix(n_out, n_in, pad_before):
    """Selection matrix implementing F.pad (zero pad; negative values crop)."""
    m = np.zeros((n_out, n_in), np.float32)
    for j in range(n_out):
        i = j - pad_before
        if 0 <= i < n_in:
            m[j, i] = 1.0
    return m


def build_up_params(w1_oihw, w2_oihw, s1, b1, s2, b2, C1, C2, H1, W1, H2, W2):
    """Fold eval-mode BN into per-tap conv weights and build the small upsample
    operators.  Every operator is O(Cin*Cout) or O(H*H): no block-Toeplitz."""
    w1 = np.asarray(w1_oihw, np.float32)          # (Cmid, Cin, 3, 3)
    w2 = np.asarray(w2_oihw, np.float32)          # (Cout, Cmid, 3, 3)
    s1 = np.asarray(s1, np.float32)
    b1 = np.asarray(b1, np.float32)
    s2 = np.asarray(s2, np.float32)
    b2 = np.asarray(b2, np.float32)
    Cmid, Cin = w1.shape[0], w1.shape[1]
    Cout = w2.shape[0]
    assert Cin == C1 + C2

    # lane-dense channel padding (exactly a no-op for realistic UNet channel counts)
    Cmidp = _round_up(Cmid, 128)
    Coutp = _round_up(Cout, 128)

    Hu, Wu = 2 * H1, 2 * W1
    diffY, diffX = H2 - Hu, W2 - Wu
    ah = pad_matrix(H2, Hu, diffY // 2) @ bilinear_matrix(H1, Hu)   # (H2, H1)
    aw = pad_matrix(W2, Wu, diffX // 2) @ bilinear_matrix(W1, Wu)   # (W2, W1)

    Hp = H2 + 2
    # H interpolation straight onto the padded grid rows; first/last row are the
    # conv zero-pad rows (exact zeros).  Kept in f32 (interp fractions like 7/15).
    ahp = np.zeros((Hp, H1), np.float32)
    ahp[1:H2 + 1, :] = ah

    # static per-output-column lerp table (<=2 taps per column for x2 bilinear);
    # empty tuple == pure F.pad column (written as zeros in-kernel)
    w_taps = []
    for wo in range(W2):
        nz = np.nonzero(aw[wo])[0]
        w_taps.append(tuple((int(wi), float(aw[wo, wi])) for wi in nz))

    # per-tap conv weights with BN(eval) scale folded; channel-padded with zeros
    w1t = np.zeros((9, Cin, Cmidp), np.float32)
    w2t = np.zeros((9, Cmidp, Coutp), np.float32)
    for ky in range(3):
        for kx in range(3):
            k = ky * 3 + kx
            w1t[k, :, :Cmid] = w1[:, :, ky, kx].T * s1[None, :]
            w2t[k, :Cmid, :Cout] = w2[:, :, ky, kx].T * s2[None, :]
    b1r = np.zeros((1, Cmidp), np.float32)
    b1r[0, :Cmid] = b1
    b2r = np.zeros((1, Coutp), np.float32)
    b2r[0, :Cout] = b2

    return dict(
        ahp=jnp.asarray(ahp),                       # f32 upsample H-operator
        w1t=jnp.asarray(w1t, jnp.bfloat16),
        b1r=jnp.asarray(b1r),
        w2t=jnp.asarray(w2t, jnp.bfloat16),
        b2r=jnp.asarray(b2r),
        w_taps=tuple(w_taps),
        dims=dict(C1=C1, C2=C2, Cin=Cin, Cmid=Cmid, Cout=Cout,
                  Cmidp=Cmidp, Coutp=Coutp, H1=H1, W1=W1, H2=H2, W2=W2),
    )


# --------------------------- Pallas kernel ---------------------------

def _make_kernel(dims, w_taps):
    C1, C2, Cin = dims["C1"], dims["C2"], dims["Cin"]
    Cmidp = dims["Cmidp"]
    H1, W1, H2, W2 = dims["H1"], dims["W1"], dims["H2"], dims["W2"]
    Hp, Wp = H2 + 2, W2 + 2
    M1 = Hp * W2                 # output rows per step (incl. masked h-pad rows)
    Mfull = Hp * Wp + 2          # padded grid rows + 1 guard row at each end
    f32, bf16 = jnp.float32, jnp.bfloat16

    def kernel(x1_ref, x2_ref, ahp_ref, w1t_ref, b1r_ref, w2t_ref, b2r_ref,
               out_ref, xin, hbuf):
        # ---- build the conv1 input slab (padded, flat w-major, channels in lanes) ----
        # zero only the w-edge blocks + guard rows; everything else is overwritten
        xin[0:1 + Hp, :] = jnp.zeros((1 + Hp, Cin), bf16)
        xin[1 + Hp * (Wp - 1):Mfull, :] = jnp.zeros((Hp + 1, Cin), bf16)
        # skip connection x2 -> channel slots [0, C2)  (torch.cat([x2, x1_up], dim=1))
        xin[1:1 + Hp * Wp, 0:C2] = x2_ref[0]

        # bilinear x2 upsample (align_corners=True) of x1, f32:
        #   H-contraction on the MXU; W-contraction as per-column 2-tap lerps that
        #   also perform F.pad and the channel-slot placement while storing.
        y = jnp.dot(ahp_ref[...], x1_ref[0], preferred_element_type=f32)  # (Hp, W1*C1)
        for wo in range(W2):
            taps = w_taps[wo]
            if taps:
                w0, c0 = taps[0]
                blk = c0 * y[:, w0 * C1:(w0 + 1) * C1]
                for wi, ci in taps[1:]:
                    blk = blk + ci * y[:, wi * C1:(wi + 1) * C1]
            else:                                   # pure F.pad column
                blk = jnp.zeros((Hp, C1), f32)
            r0 = 1 + (wo + 1) * Hp
            xin[r0:r0 + Hp, C2:C2 + C1] = blk.astype(bf16)

        # interior-row mask: h-pad rows inside each w-block are conv garbage
        hp_idx = jax.lax.broadcasted_iota(jnp.int32, (M1, 1), 0) % Hp
        interior = jnp.logical_and(hp_idx >= 1, hp_idx <= H2)

        # ---- conv1 3x3 (pad=1, no bias) + BN(eval, folded) + ReLU ----
        # 9 per-tap matmuls on constant-row-shifted slices, f32 accumulation
        acc = None
        for k in range(9):
            ky, kx = k // 3, k % 3
            off = kx * Hp + ky
            p = jnp.dot(xin[off:off + M1, :], w1t_ref[k], preferred_element_type=f32)
            acc = p if acc is None else acc + p
        h = jnp.where(interior, jnp.maximum(acc + b1r_ref[...], 0.0), 0.0)
        hbuf[0:1 + Hp, :] = jnp.zeros((1 + Hp, Cmidp), bf16)
        hbuf[1 + Hp * (Wp - 1):Mfull, :] = jnp.zeros((Hp + 1, Cmidp), bf16)
        hbuf[1 + Hp:1 + Hp + M1, :] = h.astype(bf16)

        # ---- conv2 3x3 (pad=1, no bias) + BN(eval, folded) + ReLU, lane-dense out ----
        acc = None
        for k in range(9):
            ky, kx = k // 3, k % 3
            off = kx * Hp + ky
            p = jnp.dot(hbuf[off:off + M1, :], w2t_ref[k], preferred_element_type=f32)
            acc = p if acc is None else acc + p
        o = jnp.where(interior, jnp.maximum(acc + b2r_ref[...], 0.0), 0.0)
        out_ref[0] = o.astype(out_ref.dtype)

    return kernel, M1, Mfull


# --------------------------- wrapper ---------------------------

def up_forward(x1_nchw, x2_nchw, params):
    """_Up.forward(x1, x2) with PyTorch NCHW inputs/outputs."""
    d = params["dims"]
    N = x1_nchw.shape[0]
    C1, C2, Cin = d["C1"], d["C2"], d["Cin"]
    Cmidp, Coutp, Cout = d["Cmidp"], d["Coutp"], d["Cout"]
    H1, W1, H2, W2 = d["H1"], d["W1"], d["H2"], d["W2"]
    Hp, Wp = H2 + 2, W2 + 2

    kernel, M1, Mfull = _make_kernel(d, params["w_taps"])

    # layout plumbing (host side): x1 as (N, H1, W1*C1) rows=h lanes=(w,c), f32 for the
    # f32 interpolation; x2 zero-padded spatially, flattened w-major, bf16 (min DMA).
    x1f = jnp.transpose(x1_nchw, (0, 2, 3, 1)).reshape(N, H1, W1 * C1)
    x2p = jnp.pad(x2_nchw, ((0, 0), (0, 0), (1, 1), (1, 1)))
    x2p = jnp.transpose(x2p, (0, 3, 2, 1)).reshape(N, Wp * Hp, C2).astype(jnp.bfloat16)

    ahp, w1t, b1r, w2t, b2r = (params["ahp"], params["w1t"], params["b1r"],
                               params["w2t"], params["b2r"])

    def _const_spec(arr):
        nd = arr.ndim
        idx = lambda n: (0,) * nd
        try:
            # constant index map -> single buffer (halves weight VMEM; key on v7x)
            return pl.BlockSpec(arr.shape, idx, pipeline_mode=pl.Buffered(1))
        except Exception:
            return pl.BlockSpec(arr.shape, idx)

    in_specs = [
        pl.BlockSpec((1, H1, W1 * C1), lambda n: (n, 0, 0)),
        pl.BlockSpec((1, Wp * Hp, C2), lambda n: (n, 0, 0)),
        _const_spec(ahp), _const_spec(w1t), _const_spec(b1r),
        _const_spec(w2t), _const_spec(b2r),
    ]
    out_specs = pl.BlockSpec((1, M1, Coutp), lambda n: (n, 0, 0))
    scratch = [
        pltpu.VMEM((Mfull, Cin), jnp.bfloat16),      # padded conv1-input slab
        pltpu.VMEM((Mfull, Cmidp), jnp.bfloat16),    # padded conv2-input slab
    ]

    # generation-aware VMEM limit (v7x: 64 MiB physical; v5e/v6e: 128 MiB)
    buf_bytes = (x1f[0].size * 4 + x2p[0].size * 2 + ahp.size * 4 +
                 w1t.size * 2 + b1r.size * 4 + w2t.size * 2 + b2r.size * 4 +
                 M1 * Coutp * 2 + Mfull * (Cin + Cmidp) * 2)
    try:
        phys = int(pltpu.get_tpu_info().vmem_capacity_bytes)
    except Exception:
        phys = 64 * 1024 * 1024
    vmem_limit = int(min(max(4 * buf_bytes, 32 * 1024 * 1024), phys * 3 // 4))

    out_flat = pl.pallas_call(
        kernel,
        out_shape=jax.ShapeDtypeStruct((N, M1, Coutp), jnp.bfloat16),
        grid=(N,),
        in_specs=in_specs,
        out_specs=out_specs,
        scratch_shapes=scratch,
        compiler_params=pltpu.CompilerParams(
            dimension_semantics=("parallel",),       # batch elems independent (2 TC on v7x)
            vmem_limit_bytes=vmem_limit,
        ),
    )(x1f, x2p, ahp, w1t, b1r, w2t, b2r)

    # strip spatial/channel padding and return NCHW f32
    out = out_flat.reshape(N, W2, Hp, Coutp)[:, :, 1:1 + H2, :Cout]
    return jnp.transpose(out, (0, 3, 2, 1)).astype(jnp.float32)


# ---------- pure-JAX reference (f32, for correctness check) ----------

def reference_forward(x1, x2, w1_oihw, s1, b1, w2_oihw, s2, b2):
    N, C1, H1, W1 = x1.shape
    _, C2, H2, W2 = x2.shape
    Hu, Wu = 2 * H1, 2 * W1
    ah = jnp.asarray(pad_matrix(H2, Hu, (H2 - Hu) // 2) @ bilinear_matrix(H1, Hu))
    aw = jnp.asarray(pad_matrix(W2, Wu, (W2 - Wu) // 2) @ bilinear_matrix(W1, Wu))
    up = jnp.einsum('hi,ncij,wj->nchw', ah, x1, aw, precision=HIGHEST)
    x = jnp.concatenate([x2, up], axis=1)
    dn = ('NCHW', 'OIHW', 'NCHW')
    y = jax.lax.conv_general_dilated(x, w1_oihw, (1, 1), ((1, 1), (1, 1)),
                                     dimension_numbers=dn, precision=HIGHEST)
    y = jnp.maximum(y * s1.reshape(1, -1, 1, 1) + b1.reshape(1, -1, 1, 1), 0.0)
    z = jax.lax.conv_general_dilated(y, w2_oihw, (1, 1), ((1, 1), (1, 1)),
                                     dimension_numbers=dn, precision=HIGHEST)
    z = jnp.maximum(z * s2.reshape(1, -1, 1, 1) + b2.reshape(1, -1, 1, 1), 0.0)
    return z


if __name__ == "__main__":
    key = jax.random.PRNGKey(0)
    in_channels, out_channels = 8, 6       # _Up(in_channels=8, out_channels=6, bilinear=True)
    N = 2
    C1 = in_channels // 2                  # x1 (decoder feature) channels
    C2 = in_channels - C1                  # x2 (skip connection) channels
    H1 = W1 = 8
    H2 = W2 = 16
    Cin, Cmid, Cout = in_channels, in_channels // 2, out_channels
    eps = 1e-5

    keys = jax.random.split(key, 10)
    x1 = jax.random.normal(keys[0], (N, C1, H1, W1), jnp.float32)
    x2 = jax.random.normal(keys[1], (N, C2, H2, W2), jnp.float32)

    # deterministic synthetic parameters (shapes from the module's __init__)
    w1_oihw = 0.2 * jax.random.normal(keys[2], (Cmid, Cin, 3, 3), jnp.float32)
    w2_oihw = 0.2 * jax.random.normal(keys[3], (Cout, Cmid, 3, 3), jnp.float32)
    gamma1 = 1.0 + 0.1 * jax.random.normal(keys[4], (Cmid,), jnp.float32)
    beta1 = 0.1 * jax.random.normal(keys[5], (Cmid,), jnp.float32)
    mean1 = 0.1 * jax.random.normal(keys[6], (Cmid,), jnp.float32)
    var1 = 0.5 + jnp.abs(jax.random.normal(keys[7], (Cmid,), jnp.float32))
    gamma2 = 1.0 + 0.1 * jax.random.normal(keys[8], (Cout,), jnp.float32)
    beta2 = 0.1 * jax.random.normal(keys[9], (Cout,), jnp.float32)
    mean2 = jnp.zeros((Cout,), jnp.float32)
    var2 = jnp.ones((Cout,), jnp.float32)

    # eval-mode BatchNorm folded to per-channel scale/bias
    s1 = gamma1 / jnp.sqrt(var1 + eps)
    b1 = beta1 - mean1 * s1
    s2 = gamma2 / jnp.sqrt(var2 + eps)
    b2 = beta2 - mean2 * s2

    params = build_up_params(np.asarray(w1_oihw), np.asarray(w2_oihw),
                             np.asarray(s1), np.asarray(b1),
                             np.asarray(s2), np.asarray(b2),
                             C1, C2, H1, W1, H2, W2)

    out = up_forward(x1, x2, params)
    out = jax.block_until_ready(out)

    ref = reference_forward(x1, x2, w1_oihw, s1, b1, w2_oihw, s2, b2)
    assert out.shape == (N, Cout, H2, W2), out.shape
    # kernel uses bf16 activations/weights on the MXU with f32 accumulation (the
    # bilinear interpolation itself stays f32); reference is full f32.
    err = float(np.max(np.abs(np.asarray(out) - np.asarray(ref))))
    assert np.allclose(np.asarray(out), np.asarray(ref), atol=4e-2, rtol=4e-2), err
    print("KERNEL_OK")
</pallas_src>

<mosaic_0001>
module attributes {stable_mosaic.version = 11 : i64} {
  func.func @kernel(%arg0: i32, %arg1: memref<1x8x32xf32, #tpu.memory_space<vmem>>, %arg2: memref<1x324x4xbf16, #tpu.memory_space<vmem>>, %arg3: memref<18x8xf32, #tpu.memory_space<vmem>>, %arg4: memref<9x8x128xbf16, #tpu.memory_space<vmem>>, %arg5: memref<1x128xf32, #tpu.memory_space<vmem>>, %arg6: memref<9x128x128xbf16, #tpu.memory_space<vmem>>, %arg7: memref<1x128xf32, #tpu.memory_space<vmem>>, %arg8: memref<1x288x128xbf16, #tpu.memory_space<vmem>>, %arg9: memref<326x8xbf16, #tpu.memory_space<vmem>>, %arg10: memref<326x128xbf16, #tpu.memory_space<vmem>>) attributes {dimension_semantics = [#tpu.dimension_semantics<parallel>], iteration_bounds = array<i64: 2>, scalar_prefetch = 0 : i64, scratch_operands = 2 : i64, tpu.core_type = #tpu.core_type<tc>, window_params = [{transform_indices = @transform_0, window_bounds = array<i64: 1, 8, 32>}, {transform_indices = @transform_1, window_bounds = array<i64: 1, 324, 4>}, {pipeline_mode = #tpu.pipeline_mode<synchronous>, transform_indices = @transform_2, window_bounds = array<i64: 18, 8>}, {pipeline_mode = #tpu.pipeline_mode<synchronous>, transform_indices = @transform_3, window_bounds = array<i64: 9, 8, 128>}, {pipeline_mode = #tpu.pipeline_mode<synchronous>, transform_indices = @transform_4, window_bounds = array<i64: 1, 128>}, {pipeline_mode = #tpu.pipeline_mode<synchronous>, transform_indices = @transform_5, window_bounds = array<i64: 9, 128, 128>}, {pipeline_mode = #tpu.pipeline_mode<synchronous>, transform_indices = @transform_6, window_bounds = array<i64: 1, 128>}, {transform_indices = @transform_7, window_bounds = array<i64: 1, 288, 128>}]} {
    %cst = arith.constant 0.000000e+00 : bf16
    %0 = vector.broadcast %cst : bf16 to vector<19x8xbf16>
    %c0 = arith.constant 0 : index
    %c0_0 = arith.constant 0 : index
    %1 = vector.load %arg9[%c0, %c0_0] : memref<326x8xbf16, #tpu.memory_space<vmem>>, vector<19x8xbf16>
    tpu.vector_store %arg9[%c0, %c0_0], %0 {strides = array<i32>} : memref<326x8xbf16, #tpu.memory_space<vmem>>, vector<19x8xbf16>,
    %cst_1 = arith.constant 0.000000e+00 : bf16
    %2 = vector.broadcast %cst_1 : bf16 to vector<19x8xbf16>
    %c307 = arith.constant 307 : index
    %c0_2 = arith.constant 0 : index
    %3 = vector.load %arg9[%c307, %c0_2] : memref<326x8xbf16, #tpu.memory_space<vmem>>, vector<19x8xbf16>
    tpu.vector_store %arg9[%c307, %c0_2], %2 {strides = array<i32>} : memref<326x8xbf16, #tpu.memory_space<vmem>>, vector<19x8xbf16>,
    %c0_3 = arith.constant 0 : index
    %c0_4 = arith.constant 0 : index
    %c0_5 = arith.constant 0 : index
    %4 = vector.load %arg2[%c0_3, %c0_4, %c0_5] : memref<1x324x4xbf16, #tpu.memory_space<vmem>>, vector<1x324x4xbf16>
    %5 = vector.shape_cast %4 : vector<1x324x4xbf16> to vector<324x4xbf16>
    %c1 = arith.constant 1 : index
    %c0_6 = arith.constant 0 : index
    %6 = vector.load %arg9[%c1, %c0_6] : memref<326x8xbf16, #tpu.memory_space<vmem>>, vector<324x4xbf16>
    tpu.vector_store %arg9[%c1, %c0_6], %5 {strides = array<i32>} : memref<326x8xbf16, #tpu.memory_space<vmem>>, vector<324x4xbf16>,
    %c0_7 = arith.constant 0 : index
    %c0_8 = arith.constant 0 : index
    %7 = vector.load %arg3[%c0_7, %c0_8] : memref<18x8xf32, #tpu.memory_space<vmem>>, vector<18x8xf32>
    %c0_9 = arith.constant 0 : index
    %c0_10 = arith.constant 0 : index
    %c0_11 = arith.constant 0 : index
    %8 = vector.load %arg1[%c0_9, %c0_10, %c0_11] : memref<1x8x32xf32, #tpu.memory_space<vmem>>, vector<1x8x32xf32>
    %9 = vector.shape_cast %8 : vector<1x8x32xf32> to vector<8x32xf32>
    %cst_12 = arith.constant dense<0.000000e+00> : vector<18x32xf32>
    %10 = tpu.matmul %7, %9, %cst_12 {dimension_numbers = #tpu.dot_dimension_numbers<[1], [0], [0], [1], [0, 0, 1, 1], [], []>} : vector<18x8xf32>, vector<8x32xf32>, vector<18x32xf32> -> vector<18x32xf32>
    %11 = vector.extract_strided_slice %10 {offsets = [0, 0], sizes = [18, 4], strides = [1, 1]} : vector<18x32xf32> to vector<18x4xf32>
    %cst_13 = arith.constant 1.000000e+00 : f32
    %12 = vector.broadcast %cst_13 : f32 to vector<18x4xf32>
    %13 = arith.mulf %12, %11 : vector<18x4xf32>
    %14 = arith.truncf %13 : vector<18x4xf32> to vector<18x4xbf16>
    %c19 = arith.constant 19 : index
    %c4 = arith.constant 4 : index
    %15 = vector.load %arg9[%c19, %c4] : memref<326x8xbf16, #tpu.memory_space<vmem>>, vector<18x4xbf16>
    tpu.vector_store %arg9[%c19, %c4], %14 {strides = array<i32>} : memref<326x8xbf16, #tpu.memory_space<vmem>>, vector<18x4xbf16>,
    %16 = vector.extract_strided_slice %10 {offsets = [0, 0], sizes = [18, 4], strides = [1, 1]} : vector<18x32xf32> to vector<18x4xf32>
    %cst_14 = arith.constant 0.533333361 : f32
    %17 = vector.broadcast %cst_14 : f32 to vector<18x4xf32>
    %18 = arith.mulf %17, %16 : vector<18x4xf32>
    %19 = vector.extract_strided_slice %10 {offsets = [0, 4], sizes = [18, 4], strides = [1, 1]} : vector<18x32xf32> to vector<18x4xf32>
    %cst_15 = arith.constant 0.466666669 : f32
    %20 = vector.broadcast %cst_15 : f32 to vector<18x4xf32>
    %21 = arith.mulf %20, %19 : vector<18x4xf32>
    %22 = arith.addf %18, %21 : vector<18x4xf32>
    %23 = arith.truncf %22 : vector<18x4xf32> to vector<18x4xbf16>
    %c37 = arith.constant 37 : index
    %c4_16 = arith.constant 4 : index
    %24 = vector.load %arg9[%c37, %c4_16] : memref<326x8xbf16, #tpu.memory_space<vmem>>, vector<18x4xbf16>
    tpu.vector_store %arg9[%c37, %c4_16], %23 {strides = array<i32>} : memref<326x8xbf16, #tpu.memory_space<vmem>>, vector<18x4xbf16>,
    %25 = vector.extract_strided_slice %10 {offsets = [0, 0], sizes = [18, 4], strides = [1, 1]} : vector<18x32xf32> to vector<18x4xf32>
    %cst_17 = arith.constant 0.0666666701 : f32
    %26 = vector.broadcast %cst_17 : f32 to vector<18x4xf32>
    %27 = arith.mulf %26, %25 : vector<18x4xf32>
    %28 = vector.extract_strided_slice %10 {offsets = [0, 4], sizes = [18, 4], strides = [1, 1]} : vector<18x32xf32> to vector<18x4xf32>
    %cst_18 = arith.constant 0.933333337 : f32
    %29 = vector.broadcast %cst_18 : f32 to vector<18x4xf32>
    %30 = arith.mulf %29, %28 : vector<18x4xf32>
    %31 = arith.addf %27, %30 : vector<18x4xf32>
    %32 = arith.truncf %31 : vector<18x4xf32> to vector<18x4xbf16>
    %c55 = arith.constant 55 : index
    %c4_19 = arith.constant 4 : index
    %33 = vector.load %arg9[%c55, %c4_19] : memref<326x8xbf16, #tpu.memory_space<vmem>>, vector<18x4xbf16>
    tpu.vector_store %arg9[%c55, %c4_19], %32 {strides = array<i32>} : memref<326x8xbf16, #tpu.memory_space<vmem>>, vector<18x4xbf16>,
    %34 = vector.extract_strided_slice %10 {offsets = [0, 4], sizes = [18, 4], strides = [1, 1]} : vector<18x32xf32> to vector<18x4xf32>
    %cst_20 = arith.constant 6.000000e-01 : f32
    %35 = vector.broadcast %cst_20 : f32 to vector<18x4xf32>
    %36 = arith.mulf %35, %34 : vector<18x4xf32>
    %37 = vector.extract_strided_slice %10 {offsets = [0, 8], sizes = [18, 4], strides = [1, 1]} : vector<18x32xf32> to vector<18x4xf32>
    %cst_21 = arith.constant 4.000000e-01 : f32
    %38 = vector.broadcast %cst_21 : f32 to vector<18x4xf32>
    %39 = arith.mulf %38, %37 : vector<18x4xf32>
    %40 = arith.addf %36, %39 : vector<18x4xf32>
    %41 = arith.truncf %40 : vector<18x4xf32> to vector<18x4xbf16>
    %c73 = arith.constant 73 : index
    %c4_22 = arith.constant 4 : index
    %42 = vector.load %arg9[%c73, %c4_22] : memref<326x8xbf16, #tpu.memory_space<vmem>>, vector<18x4xbf16>
    tpu.vector_store %arg9[%c73, %c4_22], %41 {strides = array<i32>} : memref<326x8xbf16, #tpu.memory_space<vmem>>, vector<18x4xbf16>,
    %43 = vector.extract_strided_slice %10 {offsets = [0, 4], sizes = [18, 4], strides = [1, 1]} : vector<18x32xf32> to vector<18x4xf32>
    %cst_23 = arith.constant 0.13333334 : f32
    %44 = vector.broadcast %cst_23 : f32 to vector<18x4xf32>
    %45 = arith.mulf %44, %43 : vector<18x4xf32>
    %46 = vector.extract_strided_slice %10 {offsets = [0, 8], sizes = [18, 4], strides = [1, 1]} : vector<18x32xf32> to vector<18x4xf32>
    %cst_24 = arith.constant 0.866666674 : f32
    %47 = vector.broadcast %cst_24 : f32 to vector<18x4xf32>
    %48 = arith.mulf %47, %46 : vector<18x4xf32>
    %49 = arith.addf %45, %48 : vector<18x4xf32>
    %50 = arith.truncf %49 : vector<18x4xf32> to vector<18x4xbf16>
    %c91 = arith.constant 91 : index
    %c4_25 = arith.constant 4 : index
    %51 = vector.load %arg9[%c91, %c4_25] : memref<326x8xbf16, #tpu.memory_space<vmem>>, vector<18x4xbf16>
    tpu.vector_store %arg9[%c91, %c4_25], %50 {strides = array<i32>} : memref<326x8xbf16, #tpu.memory_space<vmem>>, vector<18x4xbf16>,
    %52 = vector.extract_strided_slice %10 {offsets = [0, 8], sizes = [18, 4], strides = [1, 1]} : vector<18x32xf32> to vector<18x4xf32>
    %cst_26 = arith.constant 0.666666686 : f32
    %53 = vector.broadcast %cst_26 : f32 to vector<18x4xf32>
    %54 = arith.mulf %53, %52 : vector<18x4xf32>
    %55 = vector.extract_strided_slice %10 {offsets = [0, 12], sizes = [18, 4], strides = [1, 1]} : vector<18x32xf32> to vector<18x4xf32>
    %cst_27 = arith.constant 0.333333343 : f32
    %56 = vector.broadcast %cst_27 : f32 to vector<18x4xf32>
    %57 = arith.mulf %56, %55 : vector<18x4xf32>
    %58 = arith.addf %54, %57 : vector<18x4xf32>
    %59 = arith.truncf %58 : vector<18x4xf32> to vector<18x4xbf16>
    %c109 = arith.constant 109 : index
    %c4_28 = arith.constant 4 : index
    %60 = vector.load %arg9[%c109, %c4_28] : memref<326x8xbf16, #tpu.memory_space<vmem>>, vector<18x4xbf16>
    tpu.vector_store %arg9[%c109, %c4_28], %59 {strides = array<i32>} : memref<326x8xbf16, #tpu.memory_space<vmem>>, vector<18x4xbf16>,
    %61 = vector.extract_strided_slice %10 {offsets = [0, 8], sizes = [18, 4], strides = [1, 1]} : vector<18x32xf32> to vector<18x4xf32>
    %cst_29 = arith.constant 2.000000e-01 : f32
    %62 = vector.broadcast %cst_29 : f32 to vector<18x4xf32>
    %63 = arith.mulf %62, %61 : vector<18x4xf32>
    %64 = vector.extract_strided_slice %10 {offsets = [0, 12], sizes = [18, 4], strides = [1, 1]} : vector<18x32xf32> to vector<18x4xf32>
    %cst_30 = arith.constant 8.000000e-01 : f32
    %65 = vector.broadcast %cst_30 : f32 to vector<18x4xf32>
    %66 = arith.mulf %65, %64 : vector<18x4xf32>
    %67 = arith.addf %63, %66 : vector<18x4xf32>
    %68 = arith.truncf %67 : vector<18x4xf32> to vector<18x4xbf16>
    %c127 = arith.constant 127 : index
    %c4_31 = arith.constant 4 : index
    %69 = vector.load %arg9[%c127, %c4_31] : memref<326x8xbf16, #tpu.memory_space<vmem>>, vector<18x4xbf16>
    tpu.vector_store %arg9[%c127, %c4_31], %68 {strides = array<i32>} : memref<326x8xbf16, #tpu.memory_space<vmem>>, vector<18x4xbf16>,
    %70 = vector.extract_strided_slice %10 {offsets = [0, 12], sizes = [18, 4], strides = [1, 1]} : vector<18x32xf32> to vector<18x4xf32>
    %cst_32 = arith.constant 0.733333349 : f32
    %71 = vector.broadcast %cst_32 : f32 to vector<18x4xf32>
    %72 = arith.mulf %71, %70 : vector<18x4xf32>
    %73 = vector.extract_strided_slice %10 {offsets = [0, 16], sizes = [18, 4], strides = [1, 1]} : vector<18x32xf32> to vector<18x4xf32>
    %cst_33 = arith.constant 0.266666681 : f32
    %74 = vector.broadcast %cst_33 : f32 to vector<18x4xf32>
    %75 = arith.mulf %74, %73 : vector<18x4xf32>
    %76 = arith.addf %72, %75 : vector<18x4xf32>
    %77 = arith.truncf %76 : vector<18x4xf32> to vector<18x4xbf16>
    %c145 = arith.constant 145 : index
    %c4_34 = arith.constant 4 : index
    %78 = vector.load %arg9[%c145, %c4_34] : memref<326x8xbf16, #tpu.memory_space<vmem>>, vector<18x4xbf16>
    tpu.vector_store %arg9[%c145, %c4_34], %77 {strides = array<i32>} : memref<326x8xbf16, #tpu.memory_space<vmem>>, vector<18x4xbf16>,
    %79 = vector.extract_strided_slice %10 {offsets = [0, 12], sizes = [18, 4], strides = [1, 1]} : vector<18x32xf32> to vector<18x4xf32>
    %cst_35 = arith.constant 0.266666681 : f32
    %80 = vector.broadcast %cst_35 : f32 to vector<18x4xf32>
    %81 = arith.mulf %80, %79 : vector<18x4xf32>
    %82 = vector.extract_strided_slice %10 {offsets = [0, 16], sizes = [18, 4], strides = [1, 1]} : vector<18x32xf32> to vector<18x4xf32>
    %cst_36 = arith.constant 0.733333349 : f32
    %83 = vector.broadcast %cst_36 : f32 to vector<18x4xf32>
    %84 = arith.mulf %83, %82 : vector<18x4xf32>
    %85 = arith.addf %81, %84 : vector<18x4xf32>
    %86 = arith.truncf %85 : vector<18x4xf32> to vector<18x4xbf16>
    %c163 = arith.constant 163 : index
    %c4_37 = arith.constant 4 : index
    %87 = vector.load %arg9[%c163, %c4_37] : memref<326x8xbf16, #tpu.memory_space<vmem>>, vector<18x4xbf16>
    tpu.vector_store %arg9[%c163, %c4_37], %86 {strides = array<i32>} : memref<326x8xbf16, #tpu.memory_space<vmem>>, vector<18x4xbf16>,
    %88 = vector.extract_strided_slice %10 {offsets = [0, 16], sizes = [18, 4], strides = [1, 1]} : vector<18x32xf32> to vector<18x4xf32>
    %cst_38 = arith.constant 8.000000e-01 : f32
    %89 = vector.broadcast %cst_38 : f32 to vector<18x4xf32>
    %90 = arith.mulf %89, %88 : vector<18x4xf32>
    %91 = vector.extract_strided_slice %10 {offsets = [0, 20], sizes = [18, 4], strides = [1, 1]} : vector<18x32xf32> to vector<18x4xf32>
    %cst_39 = arith.constant 2.000000e-01 : f32
    %92 = vector.broadcast %cst_39 : f32 to vector<18x4xf32>
    %93 = arith.mulf %92, %91 : vector<18x4xf32>
    %94 = arith.addf %90, %93 : vector<18x4xf32>
    %95 = arith.truncf %94 : vector<18x4xf32> to vector<18x4xbf16>
    %c181 = arith.constant 181 : index
    %c4_40 = arith.constant 4 : index
    %96 = vector.load %arg9[%c181, %c4_40] : memref<326x8xbf16, #tpu.memory_space<vmem>>, vector<18x4xbf16>
    tpu.vector_store %arg9[%c181, %c4_40], %95 {strides = array<i32>} : memref<326x8xbf16, #tpu.memory_space<vmem>>, vector<18x4xbf16>,
    %97 = vector.extract_strided_slice %10 {offsets = [0, 16], sizes = [18, 4], strides = [1, 1]} : vector<18x32xf32> to vector<18x4xf32>
    %cst_41 = arith.constant 0.333333343 : f32
    %98 = vector.broadcast %cst_41 : f32 to vector<18x4xf32>
    %99 = arith.mulf %98, %97 : vector<18x4xf32>
    %100 = vector.extract_strided_slice %10 {offsets = [0, 20], sizes = [18, 4], strides = [1, 1]} : vector<18x32xf32> to vector<18x4xf32>
    %cst_42 = arith.constant 0.666666686 : f32
    %101 = vector.broadcast %cst_42 : f32 to vector<18x4xf32>
    %102 = arith.mulf %101, %100 : vector<18x4xf32>
    %103 = arith.addf %99, %102 : vector<18x4xf32>
    %104 = arith.truncf %103 : vector<18x4xf32> to vector<18x4xbf16>
    %c199 = arith.constant 199 : index
    %c4_43 = arith.constant 4 : index
    %105 = vector.load %arg9[%c199, %c4_43] : memref<326x8xbf16, #tpu.memory_space<vmem>>, vector<18x4xbf16>
    tpu.vector_store %arg9[%c199, %c4_43], %104 {strides = array<i32>} : memref<326x8xbf16, #tpu.memory_space<vmem>>, vector<18x4xbf16>,
    %106 = vector.extract_strided_slice %10 {offsets = [0, 20], sizes = [18, 4], strides = [1, 1]} : vector<18x32xf32> to vector<18x4xf32>
    %cst_44 = arith.constant 0.866666674 : f32
    %107 = vector.broadcast %cst_44 : f32 to vector<18x4xf32>
    %108 = arith.mulf %107, %106 : vector<18x4xf32>
    %109 = vector.extract_strided_slice %10 {offsets = [0, 24], sizes = [18, 4], strides = [1, 1]} : vector<18x32xf32> to vector<18x4xf32>
    %cst_45 = arith.constant 0.13333334 : f32
    %110 = vector.broadcast %cst_45 : f32 to vector<18x4xf32>
    %111 = arith.mulf %110, %109 : vector<18x4xf32>
    %112 = arith.addf %108, %111 : vector<18x4xf32>
    %113 = arith.truncf %112 : vector<18x4xf32> to vector<18x4xbf16>
    %c217 = arith.constant 217 : index
    %c4_46 = arith.constant 4 : index
    %114 = vector.load %arg9[%c217, %c4_46] : memref<326x8xbf16, #tpu.memory_space<vmem>>, vector<18x4xbf16>
    tpu.vector_store %arg9[%c217, %c4_46], %113 {strides = array<i32>} : memref<326x8xbf16, #tpu.memory_space<vmem>>, vector<18x4xbf16>,
    %115 = vector.extract_strided_slice %10 {offsets = [0, 20], sizes = [18, 4], strides = [1, 1]} : vector<18x32xf32> to vector<18x4xf32>
    %cst_47 = arith.constant 4.000000e-01 : f32
    %116 = vector.broadcast %cst_47 : f32 to vector<18x4xf32>
    %117 = arith.mulf %116, %115 : vector<18x4xf32>
    %118 = vector.extract_strided_slice %10 {offsets = [0, 24], sizes = [18, 4], strides = [1, 1]} : vector<18x32xf32> to vector<18x4xf32>
    %cst_48 = arith.constant 6.000000e-01 : f32
    %119 = vector.broadcast %cst_48 : f32 to vector<18x4xf32>
    %120 = arith.mulf %119, %118 : vector<18x4xf32>
    %121 = arith.addf %117, %120 : vector<18x4xf32>
    %122 = arith.truncf %121 : vector<18x4xf32> to vector<18x4xbf16>
    %c235 = arith.constant 235 : index
    %c4_49 = arith.constant 4 : index
    %123 = vector.load %arg9[%c235, %c4_49] : memref<326x8xbf16, #tpu.memory_space<vmem>>, vector<18x4xbf16>
    tpu.vector_store %arg9[%c235, %c4_49], %122 {strides = array<i32>} : memref<326x8xbf16, #tpu.memory_space<vmem>>, vector<18x4xbf16>,
    %124 = vector.extract_strided_slice %10 {offsets = [0, 24], sizes = [18, 4], strides = [1, 1]} : vector<18x32xf32> to vector<18x4xf32>
    %cst_50 = arith.constant 0.933333337 : f32
    %125 = vector.broadcast %cst_50 : f32 to vector<18x4xf32>
    %126 = arith.mulf %125, %124 : vector<18x4xf32>
    %127 = vector.extract_strided_slice %10 {offsets = [0, 28], sizes = [18, 4], strides = [1, 1]} : vector<18x32xf32> to vector<18x4xf32>
    %cst_51 = arith.constant 0.0666666701 : f32
    %128 = vector.broadcast %cst_51 : f32 to vector<18x4xf32>
    %129 = arith.mulf %128, %127 : vector<18x4xf32>
    %130 = arith.addf %126, %129 : vector<18x4xf32>
    %131 = arith.truncf %130 : vector<18x4xf32> to vector<18x4xbf16>
    %c253 = arith.constant 253 : index
    %c4_52 = arith.constant 4 : index
    %132 = vector.load %arg9[%c253, %c4_52] : memref<326x8xbf16, #tpu.memory_space<vmem>>, vector<18x4xbf16>
    tpu.vector_store %arg9[%c253, %c4_52], %131 {strides = array<i32>} : memref<326x8xbf16, #tpu.memory_space<vmem>>, vector<18x4xbf16>,
    %133 = vector.extract_strided_slice %10 {offsets = [0, 24], sizes = [18, 4], strides = [1, 1]} : vector<18x32xf32> to vector<18x4xf32>
    %cst_53 = arith.constant 0.466666669 : f32
    %134 = vector.broadcast %cst_53 : f32 to vector<18x4xf32>
    %135 = arith.mulf %134, %133 : vector<18x4xf32>
    %136 = vector.extract_strided_slice %10 {offsets = [0, 28], sizes = [18, 4], strides = [1, 1]} : vector<18x32xf32> to vector<18x4xf32>
    %cst_54 = arith.constant 0.533333361 : f32
    %137 = vector.broadcast %cst_54 : f32 to vector<18x4xf32>
    %138 = arith.mulf %137, %136 : vector<18x4xf32>
    %139 = arith.addf %135, %138 : vector<18x4xf32>
    %140 = arith.truncf %139 : vector<18x4xf32> to vector<18x4xbf16>
    %c271 = arith.constant 271 : index
    %c4_55 = arith.constant 4 : index
    %141 = vector.load %arg9[%c271, %c4_55] : memref<326x8xbf16, #tpu.memory_space<vmem>>, vector<18x4xbf16>
    tpu.vector_store %arg9[%c271, %c4_55], %140 {strides = array<i32>} : memref<326x8xbf16, #tpu.memory_space<vmem>>, vector<18x4xbf16>,
    %142 = vector.extract_strided_slice %10 {offsets = [0, 28], sizes = [18, 4], strides = [1, 1]} : vector<18x32xf32> to vector<18x4xf32>
    %cst_56 = arith.constant 1.000000e+00 : f32
    %143 = vector.broadcast %cst_56 : f32 to vector<18x4xf32>
    %144 = arith.mulf %143, %142 : vector<18x4xf32>
    %145 = arith.truncf %144 : vector<18x4xf32> to vector<18x4xbf16>
    %c289 = arith.constant 289 : index
    %c4_57 = arith.constant 4 : index
    %146 = vector.load %arg9[%c289, %c4_57] : memref<326x8xbf16, #tpu.memory_space<vmem>>, vector<18x4xbf16>
    tpu.vector_store %arg9[%c289, %c4_57], %145 {strides = array<i32>} : memref<326x8xbf16, #tpu.memory_space<vmem>>, vector<18x4xbf16>,
    %147 = tpu.iota {dimensions = array<i32: 0>} : vector<288x1xi32>
    %c18_i32 = arith.constant 18 : i32
    %c0_i32 = arith.constant 0 : i32
    %148 = arith.cmpi eq, %c18_i32, %c0_i32 : i32
    %c1_i32 = arith.constant 1 : i32
    %149 = arith.select %148, %c1_i32, %c18_i32 : i32
    %150 = vector.broadcast %149 : i32 to vector<288x1xi32>
    %151 = arith.remsi %147, %150 : vector<288x1xi32>
    %c0_i32_58 = arith.constant 0 : i32
    %152 = vector.broadcast %c0_i32_58 : i32 to vector<288x1xi32>
    %153 = arith.cmpi ne, %151, %152 : vector<288x1xi32>
    %c0_i32_59 = arith.constant 0 : i32
    %154 = vector.broadcast %c0_i32_59 : i32 to vector<288x1xi32>
    %155 = arith.cmpi slt, %151, %154 : vector<288x1xi32>
    %c0_i32_60 = arith.constant 0 : i32
    %156 = arith.cmpi slt, %149, %c0_i32_60 : i32
    %157 = vector.broadcast %156 : i1 to vector<288x1xi1>
    %158 = vector.broadcast %157 : vector<288x1xi1> to vector<288x1xi1>
    %159 = arith.xori %155, %158 : vector<288x1xi1>
    %160 = arith.andi %159, %153 : vector<288x1xi1>
    %161 = vector.broadcast %149 : i32 to vector<288x1xi32>
    %162 = arith.addi %151, %161 : vector<288x1xi32>
    %163 = arith.select %160, %162, %151 : vector<288x1xi1>, vector<288x1xi32>
    %c1_i32_61 = arith.constant 1 : i32
    %164 = vector.broadcast %c1_i32_61 : i32 to vector<288x1xi32>
    %165 = arith.cmpi sge, %163, %164 : vector<288x1xi32>
    %c16_i32 = arith.constant 16 : i32
    %166 = vector.broadcast %c16_i32 : i32 to vector<288x1xi32>
    %167 = arith.cmpi sle, %163, %166 : vector<288x1xi32>
    %168 = arith.andi %165, %167 : vector<288x1xi1>
    %c0_62 = arith.constant 0 : index
    %c0_63 = arith.constant 0 : index
    %169 = vector.load %arg9[%c0_62, %c0_63] : memref<326x8xbf16, #tpu.memory_space<vmem>>, vector<288x8xbf16>
    %c0_64 = arith.constant 0 : index
    %c0_65 = arith.constant 0 : index
    %c0_66 = arith.constant 0 : index
    %170 = vector.load %arg4[%c0_64, %c0_65, %c0_66] : memref<9x8x128xbf16, #tpu.memory_space<vmem>>, vector<1x8x128xbf16>
    %171 = vector.shape_cast %170 : vector<1x8x128xbf16> to vector<8x128xbf16>
    %cst_67 = arith.constant dense<0.000000e+00> : vector<288x128xf32>
    %172 = tpu.matmul %169, %171, %cst_67 {dimension_numbers = #tpu.dot_dimension_numbers<[1], [0], [0], [1], [0, 0, 1, 1], [], []>} : vector<288x8xbf16>, vector<8x128xbf16>, vector<288x128xf32> -> vector<288x128xf32>
    %c18 = arith.constant 18 : index
    %c0_68 = arith.constant 0 : index
    %173 = vector.load %arg9[%c18, %c0_68] : memref<326x8xbf16, #tpu.memory_space<vmem>>, vector<288x8xbf16>
    %c1_69 = arith.constant 1 : index
    %c0_70 = arith.constant 0 : index
    %c0_71 = arith.constant 0 : index
    %174 = vector.load %arg4[%c1_69, %c0_70, %c0_71] : memref<9x8x128xbf16, #tpu.memory_space<vmem>>, vector<1x8x128xbf16>
    %175 = vector.shape_cast %174 : vector<1x8x128xbf16> to vector<8x128xbf16>
    %cst_72 = arith.constant dense<0.000000e+00> : vector<288x128xf32>
    %176 = tpu.matmul %173, %175, %cst_72 {dimension_numbers = #tpu.dot_dimension_numbers<[1], [0], [0], [1], [0, 0, 1, 1], [], []>} : vector<288x8xbf16>, vector<8x128xbf16>, vector<288x128xf32> -> vector<288x128xf32>
    %177 = arith.addf %172, %176 : vector<288x128xf32>
    %c36 = arith.constant 36 : index
    %c0_73 = arith.constant 0 : index
    %178 = vector.load %arg9[%c36, %c0_73] : memref<326x8xbf16, #tpu.memory_space<vmem>>, vector<288x8xbf16>
    %c2 = arith.constant 2 : index
    %c0_74 = arith.constant 0 : index
    %c0_75 = arith.constant 0 : index
    %179 = vector.load %arg4[%c2, %c0_74, %c0_75] : memref<9x8x128xbf16, #tpu.memory_space<vmem>>, vector<1x8x128xbf16>
    %180 = vector.shape_cast %179 : vector<1x8x128xbf16> to vector<8x128xbf16>
    %cst_76 = arith.constant dense<0.000000e+00> : vector<288x128xf32>
    %181 = tpu.matmul %178, %180, %cst_76 {dimension_numbers = #tpu.dot_dimension_numbers<[1], [0], [0], [1], [0, 0, 1, 1], [], []>} : vector<288x8xbf16>, vector<8x128xbf16>, vector<288x128xf32> -> vector<288x128xf32>
    %182 = arith.addf %177, %181 : vector<288x128xf32>
    %c1_77 = arith.constant 1 : index
    %c0_78 = arith.constant 0 : index
    %183 = vector.load %arg9[%c1_77, %c0_78] : memref<326x8xbf16, #tpu.memory_space<vmem>>, vector<288x8xbf16>
    %c3 = arith.constant 3 : index
    %c0_79 = arith.constant 0 : index
    %c0_80 = arith.constant 0 : index
    %184 = vector.load %arg4[%c3, %c0_79, %c0_80] : memref<9x8x128xbf16, #tpu.memory_space<vmem>>, vector<1x8x128xbf16>
    %185 = vector.shape_cast %184 : vector<1x8x128xbf16> to vector<8x128xbf16>
    %cst_81 = arith.constant dense<0.000000e+00> : vector<288x128xf32>
    %186 = tpu.matmul %183, %185, %cst_81 {dimension_numbers = #tpu.dot_dimension_numbers<[1], [0], [0], [1], [0, 0, 1, 1], [], []>} : vector<288x8xbf16>, vector<8x128xbf16>, vector<288x128xf32> -> vector<288x128xf32>
    %187 = arith.addf %182, %186 : vector<288x128xf32>
    %c19_82 = arith.constant 19 : index
    %c0_83 = arith.constant 0 : index
    %188 = vector.load %arg9[%c19_82, %c0_83] : memref<326x8xbf16, #tpu.memory_space<vmem>>, vector<288x8xbf16>
    %c4_84 = arith.constant 4 : index
    %c0_85 = arith.constant 0 : index
    %c0_86 = arith.constant 0 : index
    %189 = vector.load %arg4[%c4_84, %c0_85, %c0_86] : memref<9x8x128xbf16, #tpu.memory_space<vmem>>, vector<1x8x128xbf16>
    %190 = vector.shape_cast %189 : vector<1x8x128xbf16> to vector<8x128xbf16>
    %cst_87 = arith.constant dense<0.000000e+00> : vector<288x128xf32>
    %191 = tpu.matmul %188, %190, %cst_87 {dimension_numbers = #tpu.dot_dimension_numbers<[1], [0], [0], [1], [0, 0, 1, 1], [], []>} : vector<288x8xbf16>, vector<8x128xbf16>, vector<288x128xf32> -> vector<288x128xf32>
    %192 = arith.addf %187, %191 : vector<288x128xf32>
    %c37_88 = arith.constant 37 : index
    %c0_89 = arith.constant 0 : index
    %193 = vector.load %arg9[%c37_88, %c0_89] : memref<326x8xbf16, #tpu.memory_space<vmem>>, vector<288x8xbf16>
    %c5 = arith.constant 5 : index
    %c0_90 = arith.constant 0 : index
    %c0_91 = arith.constant 0 : index
    %194 = vector.load %arg4[%c5, %c0_90, %c0_91] : memref<9x8x128xbf16, #tpu.memory_space<vmem>>, vector<1x8x128xbf16>
    %195 = vector.shape_cast %194 : vector<1x8x128xbf16> to vector<8x128xbf16>
    %cst_92 = arith.constant dense<0.000000e+00> : vector<288x128xf32>
    %196 = tpu.matmul %193, %195, %cst_92 {dimension_numbers = #tpu.dot_dimension_numbers<[1], [0], [0], [1], [0, 0, 1, 1], [], []>} : vector<288x8xbf16>, vector<8x128xbf16>, vector<288x128xf32> -> vector<288x128xf32>
    %197 = arith.addf %192, %196 : vector<288x128xf32>
    %c2_93 = arith.constant 2 : index
    %c0_94 = arith.constant 0 : index
    %198 = vector.load %arg9[%c2_93, %c0_94] : memref<326x8xbf16, #tpu.memory_space<vmem>>, vector<288x8xbf16>
    %c6 = arith.constant 6 : index
    %c0_95 = arith.constant 0 : index
    %c0_96 = arith.constant 0 : index
    %199 = vector.load %arg4[%c6, %c0_95, %c0_96] : memref<9x8x128xbf16, #tpu.memory_space<vmem>>, vector<1x8x128xbf16>
    %200 = vector.shape_cast %199 : vector<1x8x128xbf16> to vector<8x128xbf16>
    %cst_97 = arith.constant dense<0.000000e+00> : vector<288x128xf32>
    %201 = tpu.matmul %198, %200, %cst_97 {dimension_numbers = #tpu.dot_dimension_numbers<[1], [0], [0], [1], [0, 0, 1, 1], [], []>} : vector<288x8xbf16>, vector<8x128xbf16>, vector<288x128xf32> -> vector<288x128xf32>
    %202 = arith.addf %197, %201 : vector<288x128xf32>
    %c20 = arith.constant 20 : index
    %c0_98 = arith.constant 0 : index
    %203 = vector.load %arg9[%c20, %c0_98] : memref<326x8xbf16, #tpu.memory_space<vmem>>, vector<288x8xbf16>
    %c7 = arith.constant 7 : index
    %c0_99 = arith.constant 0 : index
    %c0_100 = arith.constant 0 : index
    %204 = vector.load %arg4[%c7, %c0_99, %c0_100] : memref<9x8x128xbf16, #tpu.memory_space<vmem>>, vector<1x8x128xbf16>
    %205 = vector.shape_cast %204 : vector<1x8x128xbf16> to vector<8x128xbf16>
    %cst_101 = arith.constant dense<0.000000e+00> : vector<288x128xf32>
    %206 = tpu.matmul %203, %205, %cst_101 {dimension_numbers = #tpu.dot_dimension_numbers<[1], [0], [0], [1], [0, 0, 1, 1], [], []>} : vector<288x8xbf16>, vector<8x128xbf16>, vector<288x128xf32> -> vector<288x128xf32>
    %207 = arith.addf %202, %206 : vector<288x128xf32>
    %c38 = arith.constant 38 : index
    %c0_102 = arith.constant 0 : index
    %208 = vector.load %arg9[%c38, %c0_102] : memref<326x8xbf16, #tpu.memory_space<vmem>>, vector<288x8xbf16>
    %c8 = arith.constant 8 : index
    %c0_103 = arith.constant 0 : index
    %c0_104 = arith.constant 0 : index
    %209 = vector.load %arg4[%c8, %c0_103, %c0_104] : memref<9x8x128xbf16, #tpu.memory_space<vmem>>, vector<1x8x128xbf16>
    %210 = vector.shape_cast %209 : vector<1x8x128xbf16> to vector<8x128xbf16>
    %cst_105 = arith.constant dense<0.000000e+00> : vector<288x128xf32>
    %211 = tpu.matmul %208, %210, %cst_105 {dimension_numbers = #tpu.dot_dimension_numbers<[1], [0], [0], [1], [0, 0, 1, 1], [], []>} : vector<288x8xbf16>, vector<8x128xbf16>, vector<288x128xf32> -> vector<288x128xf32>
    %212 = arith.addf %207, %211 : vector<288x128xf32>
    %c0_106 = arith.constant 0 : index
    %c0_107 = arith.constant 0 : index
    %213 = vector.load %arg5[%c0_106, %c0_107] : memref<1x128xf32, #tpu.memory_space<vmem>>, vector<1x128xf32>
    %214 = vector.broadcast %213 : vector<1x128xf32> to vector<288x128xf32>
    %215 = arith.addf %212, %214 : vector<288x128xf32>
    %cst_108 = arith.constant 0.000000e+00 : f32
    %216 = vector.broadcast %cst_108 : f32 to vector<288x128xf32>
    %217 = arith.maximumf %215, %216 : vector<288x128xf32>
    %cst_109 = arith.constant 0.000000e+00 : f32
    %218 = vector.shape_cast %168 : vector<288x1xi1> to vector<288x1xi1>
    %219 = vector.broadcast %218 : vector<288x1xi1> to vector<288x128xi1>
    %220 = vector.broadcast %cst_109 : f32 to vector<288x128xf32>
    %221 = arith.select %219, %217, %220 : vector<288x128xi1>, vector<288x128xf32>
    %cst_110 = arith.constant 0.000000e+00 : bf16
    %222 = vector.broadcast %cst_110 : bf16 to vector<19x128xbf16>
    %c0_111 = arith.constant 0 : index
    %c0_112 = arith.constant 0 : index
    %223 = vector.load %arg10[%c0_111, %c0_112] : memref<326x128xbf16, #tpu.memory_space<vmem>>, vector<19x128xbf16>
    tpu.vector_store %arg10[%c0_111, %c0_112], %222 {strides = array<i32>} : memref<326x128xbf16, #tpu.memory_space<vmem>>, vector<19x128xbf16>,
    %cst_113 = arith.constant 0.000000e+00 : bf16
    %224 = vector.broadcast %cst_113 : bf16 to vector<19x128xbf16>
    %c307_114 = arith.constant 307 : index
    %c0_115 = arith.constant 0 : index
    %225 = vector.load %arg10[%c307_114, %c0_115] : memref<326x128xbf16, #tpu.memory_space<vmem>>, vector<19x128xbf16>
    tpu.vector_store %arg10[%c307_114, %c0_115], %224 {strides = array<i32>} : memref<326x128xbf16, #tpu.memory_space<vmem>>, vector<19x128xbf16>,
    %226 = arith.truncf %221 : vector<288x128xf32> to vector<288x128xbf16>
    %c19_116 = arith.constant 19 : index
    %c0_117 = arith.constant 0 : index
    %227 = vector.load %arg10[%c19_116, %c0_117] : memref<326x128xbf16, #tpu.memory_space<vmem>>, vector<288x128xbf16>
    tpu.vector_store %arg10[%c19_116, %c0_117], %226 {strides = array<i32>} : memref<326x128xbf16, #tpu.memory_space<vmem>>, vector<288x128xbf16>,
    %c0_118 = arith.constant 0 : index
    %c0_119 = arith.constant 0 : index
    %228 = vector.load %arg10[%c0_118, %c0_119] : memref<326x128xbf16, #tpu.memory_space<vmem>>, vector<288x128xbf16>
    %c0_120 = arith.constant 0 : index
    %c0_121 = arith.constant 0 : index
    %c0_122 = arith.constant 0 : index
    %229 = vector.load %arg6[%c0_120, %c0_121, %c0_122] : memref<9x128x128xbf16, #tpu.memory_space<vmem>>, vector<1x128x128xbf16>
    %230 = vector.shape_cast %229 : vector<1x128x128xbf16> to vector<128x128xbf16>
    %cst_123 = arith.constant dense<0.000000e+00> : vector<288x128xf32>
    %231 = tpu.matmul %228, %230, %cst_123 {dimension_numbers = #tpu.dot_dimension_numbers<[1], [0], [0], [1], [0, 0, 1, 1], [], []>} : vector<288x128xbf16>, vector<128x128xbf16>, vector<288x128xf32> -> vector<288x128xf32>
    %c18_124 = arith.constant 18 : index
    %c0_125 = arith.constant 0 : index
    %232 = vector.load %arg10[%c18_124, %c0_125] : memref<326x128xbf16, #tpu.memory_space<vmem>>, vector<288x128xbf16>
    %c1_126 = arith.constant 1 : index
    %c0_127 = arith.constant 0 : index
    %c0_128 = arith.constant 0 : index
    %233 = vector.load %arg6[%c1_126, %c0_127, %c0_128] : memref<9x128x128xbf16, #tpu.memory_space<vmem>>, vector<1x128x128xbf16>
    %234 = vector.shape_cast %233 : vector<1x128x128xbf16> to vector<128x128xbf16>
    %cst_129 = arith.constant dense<0.000000e+00> : vector<288x128xf32>
    %235 = tpu.matmul %232, %234, %cst_129 {dimension_numbers = #tpu.dot_dimension_numbers<[1], [0], [0], [1], [0, 0, 1, 1], [], []>} : vector<288x128xbf16>, vector<128x128xbf16>, vector<288x128xf32> -> vector<288x128xf32>
    %236 = arith.addf %231, %235 : vector<288x128xf32>
    %c36_130 = arith.constant 36 : index
    %c0_131 = arith.constant 0 : index
    %237 = vector.load %arg10[%c36_130, %c0_131] : memref<326x128xbf16, #tpu.memory_space<vmem>>, vector<288x128xbf16>
    %c2_132 = arith.constant 2 : index
    %c0_133 = arith.constant 0 : index
    %c0_134 = arith.constant 0 : index
    %238 = vector.load %arg6[%c2_132, %c0_133, %c0_134] : memref<9x128x128xbf16, #tpu.memory_space<vmem>>, vector<1x128x128xbf16>
    %239 = vector.shape_cast %238 : vector<1x128x128xbf16> to vector<128x128xbf16>
    %cst_135 = arith.constant dense<0.000000e+00> : vector<288x128xf32>
    %240 = tpu.matmul %237, %239, %cst_135 {dimension_numbers = #tpu.dot_dimension_numbers<[1], [0], [0], [1], [0, 0, 1, 1], [], []>} : vector<288x128xbf16>, vector<128x128xbf16>, vector<288x128xf32> -> vector<288x128xf32>
    %241 = arith.addf %236, %240 : vector<288x128xf32>
    %c1_136 = arith.constant 1 : index
    %c0_137 = arith.constant 0 : index
    %242 = vector.load %arg10[%c1_136, %c0_137] : memref<326x128xbf16, #tpu.memory_space<vmem>>, vector<288x128xbf16>
    %c3_138 = arith.constant 3 : index
    %c0_139 = arith.constant 0 : index
    %c0_140 = arith.constant 0 : index
    %243 = vector.load %arg6[%c3_138, %c0_139, %c0_140] : memref<9x128x128xbf16, #tpu.memory_space<vmem>>, vector<1x128x128xbf16>
    %244 = vector.shape_cast %243 : vector<1x128x128xbf16> to vector<128x128xbf16>
    %cst_141 = arith.constant dense<0.000000e+00> : vector<288x128xf32>
    %245 = tpu.matmul %242, %244, %cst_141 {dimension_numbers = #tpu.dot_dimension_numbers<[1], [0], [0], [1], [0, 0, 1, 1], [], []>} : vector<288x128xbf16>, vector<128x128xbf16>, vector<288x128xf32> -> vector<288x128xf32>
    %246 = arith.addf %241, %245 : vector<288x128xf32>
    %c19_142 = arith.constant 19 : index
    %c0_143 = arith.constant 0 : index
    %247 = vector.load %arg10[%c19_142, %c0_143] : memref<326x128xbf16, #tpu.memory_space<vmem>>, vector<288x128xbf16>
    %c4_144 = arith.constant 4 : index
    %c0_145 = arith.constant 0 : index
    %c0_146 = arith.constant 0 : index
    %248 = vector.load %arg6[%c4_144, %c0_145, %c0_146] : memref<9x128x128xbf16, #tpu.memory_space<vmem>>, vector<1x128x128xbf16>
    %249 = vector.shape_cast %248 : vector<1x128x128xbf16> to vector<128x128xbf16>
    %cst_147 = arith.constant dense<0.000000e+00> : vector<288x128xf32>
    %250 = tpu.matmul %247, %249, %cst_147 {dimension_numbers = #tpu.dot_dimension_numbers<[1], [0], [0], [1], [0, 0, 1, 1], [], []>} : vector<288x128xbf16>, vector<128x128xbf16>, vector<288x128xf32> -> vector<288x128xf32>
    %251 = arith.addf %246, %250 : vector<288x128xf32>
    %c37_148 = arith.constant 37 : index
    %c0_149 = arith.constant 0 : index
    %252 = vector.load %arg10[%c37_148, %c0_149] : memref<326x128xbf16, #tpu.memory_space<vmem>>, vector<288x128xbf16>
    %c5_150 = arith.constant 5 : index
    %c0_151 = arith.constant 0 : index
    %c0_152 = arith.constant 0 : index
    %253 = vector.load %arg6[%c5_150, %c0_151, %c0_152] : memref<9x128x128xbf16, #tpu.memory_space<vmem>>, vector<1x128x128xbf16>
    %254 = vector.shape_cast %253 : vector<1x128x128xbf16> to vector<128x128xbf16>
    %cst_153 = arith.constant dense<0.000000e+00> : vector<288x128xf32>
    %255 = tpu.matmul %252, %254, %cst_153 {dimension_numbers = #tpu.dot_dimension_numbers<[1], [0], [0], [1], [0, 0, 1, 1], [], []>} : vector<288x128xbf16>, vector<128x128xbf16>, vector<288x128xf32> -> vector<288x128xf32>
    %256 = arith.addf %251, %255 : vector<288x128xf32>
    %c2_154 = arith.constant 2 : index
    %c0_155 = arith.constant 0 : index
    %257 = vector.load %arg10[%c2_154, %c0_155] : memref<326x128xbf16, #tpu.memory_space<vmem>>, vector<288x128xbf16>
    %c6_156 = arith.constant 6 : index
    %c0_157 = arith.constant 0 : index
    %c0_158 = arith.constant 0 : index
    %258 = vector.load %arg6[%c6_156, %c0_157, %c0_158] : memref<9x128x128xbf16, #tpu.memory_space<vmem>>, vector<1x128x128xbf16>
    %259 = vector.shape_cast %258 : vector<1x128x128xbf16> to vector<128x128xbf16>
    %cst_159 = arith.constant dense<0.000000e+00> : vector<288x128xf32>
    %260 = tpu.matmul %257, %259, %cst_159 {dimension_numbers = #tpu.dot_dimension_numbers<[1], [0], [0], [1], [0, 0, 1, 1], [], []>} : vector<288x128xbf16>, vector<128x128xbf16>, vector<288x128xf32> -> vector<288x128xf32>
    %261 = arith.addf %256, %260 : vector<288x128xf32>
    %c20_160 = arith.constant 20 : index
    %c0_161 = arith.constant 0 : index
    %262 = vector.load %arg10[%c20_160, %c0_161] : memref<326x128xbf16, #tpu.memory_space<vmem>>, vector<288x128xbf16>
    %c7_162 = arith.constant 7 : index
    %c0_163 = arith.constant 0 : index
    %c0_164 = arith.constant 0 : index
    %263 = vector.load %arg6[%c7_162, %c0_163, %c0_164] : memref<9x128x128xbf16, #tpu.memory_space<vmem>>, vector<1x128x128xbf16>
    %264 = vector.shape_cast %263 : vector<1x128x128xbf16> to vector<128x128xbf16>
    %cst_165 = arith.constant dense<0.000000e+00> : vector<288x128xf32>
    %265 = tpu.matmul %262, %264, %cst_165 {dimension_numbers = #tpu.dot_dimension_numbers<[1], [0], [0], [1], [0, 0, 1, 1], [], []>} : vector<288x128xbf16>, vector<128x128xbf16>, vector<288x128xf32> -> vector<288x128xf32>
    %266 = arith.addf %261, %265 : vector<288x128xf32>
    %c38_166 = arith.constant 38 : index
    %c0_167 = arith.constant 0 : index
    %267 = vector.load %arg10[%c38_166, %c0_167] : memref<326x128xbf16, #tpu.memory_space<vmem>>, vector<288x128xbf16>
    %c8_168 = arith.constant 8 : index
    %c0_169 = arith.constant 0 : index
    %c0_170 = arith.constant 0 : index
    %268 = vector.load %arg6[%c8_168, %c0_169, %c0_170] : memref<9x128x128xbf16, #tpu.memory_space<vmem>>, vector<1x128x128xbf16>
    %269 = vector.shape_cast %268 : vector<1x128x128xbf16> to vector<128x128xbf16>
    %cst_171 = arith.constant dense<0.000000e+00> : vector<288x128xf32>
    %270 = tpu.matmul %267, %269, %cst_171 {dimension_numbers = #tpu.dot_dimension_numbers<[1], [0], [0], [1], [0, 0, 1, 1], [], []>} : vector<288x128xbf16>, vector<128x128xbf16>, vector<288x128xf32> -> vector<288x128xf32>
    %271 = arith.addf %266, %270 : vector<288x128xf32>
    %c0_172 = arith.constant 0 : index
    %c0_173 = arith.constant 0 : index
    %272 = vector.load %arg7[%c0_172, %c0_173] : memref<1x128xf32, #tpu.memory_space<vmem>>, vector<1x128xf32>
    %273 = vector.broadcast %272 : vector<1x128xf32> to vector<288x128xf32>
    %274 = arith.addf %271, %273 : vector<288x128xf32>
    %cst_174 = arith.constant 0.000000e+00 : f32
    %275 = vector.broadcast %cst_174 : f32 to vector<288x128xf32>
    %276 = arith.maximumf %274, %275 : vector<288x128xf32>
    %cst_175 = arith.constant 0.000000e+00 : f32
    %277 = vector.shape_cast %168 : vector<288x1xi1> to vector<288x1xi1>
    %278 = vector.broadcast %277 : vector<288x1xi1> to vector<288x128xi1>
    %279 = vector.broadcast %cst_175 : f32 to vector<288x128xf32>
    %280 = arith.select %278, %276, %279 : vector<288x128xi1>, vector<288x128xf32>
    %281 = arith.truncf %280 : vector<288x128xf32> to vector<288x128xbf16>
    %c0_176 = arith.constant 0 : index
    %c0_177 = arith.constant 0 : index
    %c0_178 = arith.constant 0 : index
    %282 = vector.load %arg8[%c0_176, %c0_177, %c0_178] : memref<1x288x128xbf16, #tpu.memory_space<vmem>>, vector<1x288x128xbf16>
    %283 = vector.shape_cast %282 : vector<1x288x128xbf16> to vector<288x128xbf16>
    %284 = vector.shape_cast %281 : vector<288x128xbf16> to vector<1x288x128xbf16>
    tpu.vector_store %arg8[%c0_176, %c0_177, %c0_178], %284 {strides = array<i32>} : memref<1x288x128xbf16, #tpu.memory_space<vmem>>, vector<1x288x128xbf16>,
    return
  }
  func.func @transform_0(%arg0: i32) -> (i32, i32, i32) {
    %c0_i32 = arith.constant 0 : i32
    %c0_i32_0 = arith.constant 0 : i32
    %c0_i32_1 = arith.constant 0 : i32
    return %arg0, %c0_i32, %c0_i32_0 : i32, i32, i32
  }
  func.func @transform_1(%arg0: i32) -> (i32, i32, i32) {
    %c0_i32 = arith.constant 0 : i32
    %c0_i32_0 = arith.constant 0 : i32
    %c0_i32_1 = arith.constant 0 : i32
    return %arg0, %c0_i32, %c0_i32_0 : i32, i32, i32
  }
  func.func @transform_2(%arg0: i32) -> (i32, i32) {
    %c0_i32 = arith.constant 0 : i32
    %c0_i32_0 = arith.constant 0 : i32
    %c0_i32_1 = arith.constant 0 : i32
    return %c0_i32, %c0_i32_0 : i32, i32
  }
  func.func @transform_3(%arg0: i32) -> (i32, i32, i32) {
    %c0_i32 = arith.constant 0 : i32
    %c0_i32_0 = arith.constant 0 : i32
    %c0_i32_1 = arith.constant 0 : i32
    %c0_i32_2 = arith.constant 0 : i32
    return %c0_i32, %c0_i32_0, %c0_i32_1 : i32, i32, i32
  }
  func.func @transform_4(%arg0: i32) -> (i32, i32) {
    %c0_i32 = arith.constant 0 : i32
    %c0_i32_0 = arith.constant 0 : i32
    %c0_i32_1 = arith.constant 0 : i32
    return %c0_i32, %c0_i32_0 : i32, i32
  }
  func.func @transform_5(%arg0: i32) -> (i32, i32, i32) {
    %c0_i32 = arith.constant 0 : i32
    %c0_i32_0 = arith.constant 0 : i32
    %c0_i32_1 = arith.constant 0 : i32
    %c0_i32_2 = arith.constant 0 : i32
    return %c0_i32, %c0_i32_0, %c0_i32_1 : i32, i32, i32
  }
  func.func @transform_6(%arg0: i32) -> (i32, i32) {
    %c0_i32 = arith.constant 0 : i32
    %c0_i32_0 = arith.constant 0 : i32
    %c0_i32_1 = arith.constant 0 : i32
    return %c0_i32, %c0_i32_0 : i32, i32
  }
  func.func @transform_7(%arg0: i32) -> (i32, i32, i32) {
    %c0_i32 = arith.constant 0 : i32
    %c0_i32_0 = arith.constant 0 : i32
    %c0_i32_1 = arith.constant 0 : i32
    return %arg0, %c0_i32, %c0_i32_0 : i32, i32, i32
  }
}

</mosaic_0001>

<bundles_post_ra>
// kernel: tpu_custom_call.1
= control target key start
LH: loop header
LB: loop body
LE: loop exit
PB: predicated region body
PF: predicated region fallthrough
CT: control target
= control target key end

     0   :  { %12 = vsyncpa [#allocation5], 0  ;;  %s18714_s0 = inlined_call_operand.vmem [shape: f32[2,8,32], index: 0, kind: input, shape index: {}]   ;;  %s18715_s1 = inlined_call_operand.vmem [shape: bf16[2,324,4], index: 1, kind: input, shape index: {}]   ;;  %s18716_s2 = inlined_call_operand.vmem [shape: f32[18,8], index: 2, kind: input, shape index: {}]   ;;  %s18717_s3 = inlined_call_operand.vmem [shape: bf16[9,8,128], index: 3, kind: input, shape index: {}]   ;;  %s18718_s4 = inlined_call_operand.vmem [shape: f32[1,128], index: 4, kind: input, shape index: {}]   ;;  %s18719_s5 = inlined_call_operand.hbm [shape: bf16[9,128,128], index: 5, kind: input, shape index: {}]   ;;  %s18720_s6 = inlined_call_operand.vmem [shape: f32[1,128], index: 6, kind: input, shape index: {}]   ;;  %s18721_s7 = inlined_call_operand.hbm [shape: bf16[2,288,128], index: 7, kind: output, shape index: {}]  }
   0x1   :  { %13 = vsyncpa [#allocation6], 0 }
   0x2   :  { %15 = vsyncpa [#allocation6 + $0x1], 0  ;;  %s13587_s24 = smov 0   ;;  %s13589_s25 = smov 0  }
   0x3   :  { %s13591_s26 = smov 0   ;;  %s13593_s27 = smov 0  }
   0x4 LB: > { %s13608_s28 = sadd.s32 4294967295, %s13530_s27   ;;  %s11041_s29 = sadd.s32 4294967294, %s13530_s27   ;;  %s13530_s27 = sphi %s13593_s27, %s19583_s27   ;;  %s13526_s26 = sphi %s13591_s26, %s19582_s26   ;;  %s13522_s25 = sphi %s13589_s25, %s19581_s25   ;;  %s13518_s24 = sphi %s13587_s24, %s19580_s24  }
   0x5   : > { %s13612_s30 = sadd.s32 1, %s13530_s27   ;;  %s185_s8 = sadd.s32 1, %s13526_s26 }
   0x6   : > { %s182_s9 = ssub.s32 %s13530_s27, %s13612_s30  ;;  %p195_p0 = scmp.ne.s32.totalorder %s13526_s26, %s13522_s25 }
   0x7   : > { %p183_p1 = scmp.eq.s32.totalorder %s182_s9, 0  ;;  %p196_p2 = scmp.eq.s32.totalorder %s13608_s28, 1 }
   0x8   : > { %p201_p3 = scmp.ne.s32.totalorder %s13522_s25, %s13518_s24  ;;  %p202_p4 = scmp.eq.s32.totalorder %s11041_s29, 1 }
   0x9   : > { %s13623_s10 = scalar_select %p183_p1, %s13526_s26, %s185_s8  }
   0xa   : > { %p13625_p5 = por %p196_p2, %p195_p0  ;;  %p13629_p6 = por %p202_p4, %p201_p3 }
   0xb   : > { %p11042_p7 = scmp.ge.s32.totalorder %s13530_s27, 1  ;;  %p209_p8 = scmp.lt.s32.totalorder %s13530_s27, 3 }
   0xc   : > { %s18838_s12 = scalar_select %p13629_p6, 1, 0 }
   0xd   : > { %p13102_p9 = scmp.eq.s32.totalorder %s13608_s28, 0  ;;  %p13636_p10 = pnand %p11042_p7, %p209_p8 }
   0xe   : > { %s13532_s14 = smov [#allocation4]  }
   0xf   : > { %s230_s15 = sshll.u32 %s13532_s14, 4  ;;  %p13094_p11 = pneg %p13636_p10  ;;  %s231_s15 = int_to_ptr.vmem [resolvable:$true] %s230_s15 }
  0x10   : > { %s13451_s16 = scalar_lea.vmem %s231_s15, 9216  ;;  %p13459_p3 = scmp.lt.s32.totalorder %s231_s15, %s231_s15 }
  0x11   : > { %p13095_p12 = pnand %p13102_p9, %p13094_p11  ;;  %p13452_p0 = scmp.ne.s32.totalorder %s231_s15, %s13451_s16 }
  0x12   : > { %p13460_p4 = scmp.lt.s32.totalorder %s13451_s16, %s13451_s16 }
  0x13   : > { %p13442_p13 = pneg %p13095_p12 }
  0x14   : > { %p13461_p6 = por %p13460_p4, %p13459_p3 }
  0x15   : > { %p13454_p1 = pnand %p13452_p0, %p13442_p13 }
  0x17   : > { %p13455_p2 = pneg %p13454_p1 }
  0x19   : > { %p13462_p7 = pnand %p13461_p6, %p13455_p2 }
  0x1b   : > { %13465 = shalt.err (!%p13462_p7)
}
  0x1c   : > { %s13533_s17 = smov 64   ;;  %s13534_s18 = smov 4  }
  0x1d   : > { %13097 = dma.hbm_to_vmem [thread:$0]  (!%p13095_p12), %s18719_s5, 9216, %s231_s15, [#allocation5], %s13533_s17, %s13533_s17, %s13534_s18  }
  0x1e   : > { %264 = sbr.rel (%p13636_p10) target bundleno = 1743 (0x6cf), region = 48 }
  0x23   : > { %13509 = dma.done.wait (%p13102_p9), [#allocation5], 9216  }
  0x24   : > { %13511 = vsyncadd (%p13102_p9), [#allocation5], 4294958080  ;;  %p300_p8 = scmp.lt.s32.totalorder %s13608_s28, 1  ;;  %v13535_v0 = vmov 0.0   ;;  %vm13536_vm0 = vmmov 0   ;;  %vm836_vm1 = vcmask 64512  }
  0x25   : > { %12181 = vmatprep.subr.mxu0 %v13535_v0  ;;  %13002 = vmatprep.subr.mxu1 %v13535_v0  ;;  %v832_v2 = vld [vmem:[%s18716_s2] sm:$0xff]  ;;  %v833_v3 = vld [vmem:[%s18716_s2 + $0x8] sm:$0xff]  ;;  %v834_v4 = vld [vmem:[%s18716_s2 + $0x10] sm:$0x3]  ;;  %s13537_s18 = smov 124   ;;  %vm326_vm6 = vcmask 59392  }
  0x26   : > { %s13655_s21 = scalar_select %p300_p8, %s13608_s28, 1  ;;  %12183 = vmatprep.mubr.msk.f32.mxu0 %vm13536_vm0, %v13535_v0  ;;  %12186 = vmatprep.mubr.msk.f32.mxu1 %vm13536_vm0, %v13535_v0  ;;  %vm18739_vm2 = vsmask.f32 1280  ;;  %vm936_vm3 = vsmask.f32 5392  ;;  %v18722_v42 = vmov 0  }
  0x27   : > { %vm369_vm4 = vsmask.f32 256  ;;  %vm370_vm5 = vsmask.f32 4368  ;;  %6402 = vst [vmem:[#allocation3] sm:$0xf] %v18722_v42  ;;  %vm13775_vm7 = vmor %vm18739_vm2, %vm936_vm3 }
  0x28   : > { %s11047_s22 = sshll.u32 %s13655_s21, 3  ;;  %s13014_s19 = smul.u32 164, %s13655_s21  ;;  %6403 = vst [vmem:[#allocation3 + $0x4] sm:$0xf] %v18722_v42  ;;  %6414 = vst [vmem:[#allocation3 + $0x9c] sm:$0xf] %v18722_v42 }
  0x29   : > { %s303_s8 = scalar_lea.vmem %s18714_s0, %s11047_s22  ;;  %6415 = vst [vmem:[#allocation3 + $0xa0] sm:$0x7] %v18722_v42  ;;  %v18840_v44 = vmov 0  ;;  %327 = vst.msk [vmem:[#allocation2 + $0xa0] sm:$0x7] %vm326_vm6, %v18722_v42  ;;  %vm826_vm8 = vcmask 26624  }
  0x2a   : > { %v835_v1 = vld [vmem:[%s303_s8] sm:$0xff]  ;;  %s13750_s22 = scalar_lea.vmem %s18715_s1, %s13014_s19  ;;  %v18841_v44 = vsel %vm13775_vm7, 4294967295, %v18840_v44  ;;  %vm827_vm9 = vsmask.f32 2304  ;;  %vm13795_vm10 = vmor %vm369_vm4, %vm370_vm5  ;;  %vm313_vm12 = vcmask 58368   ;;  %vm780_vm14 = vcmask 27648  }
  0x2b   : > { %12182 = vmatpush3.msra.mxu0 %v835_v1  ;;  %13003 = vmatpush3.msra.mxu1 %v835_v1  ;;  %v367_v38 = vld [vmem:[%s13750_s22 + $0x9c] sm:$0xf]  ;;  %v368_v41 = vld [vmem:[%s13750_s22 + $0xa0] sm:$0x3]  ;;  %18842 = vst [vmem:[#allocation10_spill] sm:$0xff] %v18841_v44  ;;  %vm828_vm11 = vmand %vm826_vm8, %vm827_vm9  ;;  %vm310_vm15 = vcmask 60416  }
  0x2c   : > { %12184 = vmatmul.mubr.msk.f32.vlgmr.msra.gmra.mxu0 %vm836_vm1, %v832_v2  ;;  %12187 = vmatmul.mubr.msk.f32.vlgmr.msra.gmra.mxu1 %vm836_vm1, %v833_v3  ;;  %v723_v47 = vshrl.u32 %v367_v38, 16  ;;  %v726_v49 = vshll.u32 %v367_v38, 16  ;;  %v732_v50 = vshrl.u32 %v368_v41, 16  ;;  %v735_v51 = vshll.u32 %v368_v41, 16  ;;  %vm315_vm13 = vmand %vm313_vm12, %vm18739_vm2  ;;  %s13539_s23 = smov 4   ;;  %s13540_s14 = smov 120  }
  0x2d   : > { %12189 = vmatprep.mubr.msk.f32.mxu1 %vm13536_vm0, %v13535_v0  ;;  %vm320_vm0 = vsmask.f32 7942  ;;  %vm319_vm3 = vcmask 60417   ;;  %vm6409_vm5 = vcmask 1043457   ;;  %s13541_s15 = smov 116   ;;  %s13542_s16 = smov 112  }
  0x2e   : > { %v725_v53 = vrot.slane %v723_v47, 7  ;;  %v734_v55 = vrot.slane %v732_v50, 7  ;;  %vm321_vm6 = vmand %vm319_vm3, %vm320_vm0  ;;  %vm18738_vm3 = vsmask.f32 3328  ;;  %s13543_s19 = smov 108   ;;  %s13544_s20 = smov 104  }
  0x2f   : > { %vm14001_vm8 = vmand %vm6409_vm5, %vm320_vm0  ;;  %vm1101_vm5 = vsmask.f32 7440  ;;  %s297_s13 = sand.u32 1, %s13522_s25   ;;  %s13545_s29 = smov [#allocation7]  }
  0x30   : > { %12190 = vmatmul.mubr.msk.f32.gmra.mxu1 %vm836_vm1, %v834_v4  ;;  %v13799_v60 = vor.u32 %v726_v49, %v725_v53  ;;  %v730_v61 = vrot.slane %v725_v53, 4  ;;  %v737_v63 = vor.u32 %v735_v51, %v734_v55  ;;  %v330_v49 = vld [vmem:[%s13750_s22 + $0x8] sm:$0xf] }
  0x31   : > { %v390_v51 = vshrl.u32 %v330_v49, 16 }
  0x32   : > { %18845 = vst [vmem:[#allocation11_spill] sm:$0xff] %v13799_v60  ;;  %v18859_v60 = vmov 0  }
  0x33   : > { %312 = vst.msk [vmem:[#allocation2 + $0x4] sm:$0xf] %vm310_vm15, %v18859_v60  ;;  %311 = vst.msk [vmem:[#allocation2] sm:$0xf] %vm310_vm15, %v18859_v60 }
  0x34   : > { %325 = vst.msk [vmem:[#allocation2 + $0x9c] sm:$0xf] %vm310_vm15, %v18859_v60  ;;  %vm1018_vm15 = vsmask.f32 6416 }
  0xec   : > { %v13673_v5 = vpop.f32.mrf.mxu0  ;;  %v13675_v6 = vpop.f32.mrf.mxu1 }
  0xed   : > { %v13678_v7 = vmul.f32 0.46666667, %v13675_v6  ;;  %v13681_v8 = vmul.f32 0.46666667, %v13673_v5  ;;  %v13688_v11 = vmul.f32 0.93333334, %v13673_v5  ;;  %v13707_v17 = vpack.c.bf16 %v13673_v5, %v13673_v5 }
  0xee   : > { %v12188_v9 = vpop.f32.mrf.mxu1  ;;  %v12185_v10 = vpop.f32.mrf.mxu0  ;;  %v13693_v13 = vmul.f32 0.93333334, %v13675_v6  ;;  %v13700_v15 = vmul.f32 0.8, %v13673_v5  ;;  %v13703_v16 = vmul.f32 0.33333334, %v13675_v6  ;;  %v13711_v18 = vpack.c.bf16 %v13675_v6, %v13675_v6 }
  0xef   : > { %998 = vrot.lane.b32.xlu0 %v13678_v7, %s13537_s18  ;;  %996 = vrot.lane.b32.xlu1 %v13681_v8, %s13537_s18  ;;  %v13723_v20 = vmul.f32 0.33333334, %v13673_v5  ;;  %v13726_v21 = vmul.f32 0.73333335, %v13675_v6  ;;  %v13729_v22 = vmul.f32 0.8, %v13675_v6  ;;  %v738_v9 = vsel %vm13795_vm10, %v730_v61, %v737_v63 }
  0xf0   : > { %v13690_v12 = vpop.f32.mrf.mxu1  ;;  %v13732_v23 = vmul.f32 0.26666668, %v13675_v6  ;;  %v939_v24 = vshrl.u32 %v13707_v17, 16  ;;  %v942_v25 = vshll.u32 %v13707_v17, 16  ;;  %v948_v26 = vshrl.u32 %v13711_v18, 16 }
  0xf1   : > { %v13720_v19 = vpack.c.bf16 %v13690_v12, %v13690_v12  ;;  %v13742_v27 = vmul.f32 0.26666668, %v13673_v5  ;;  %v951_v28 = vshll.u32 %v13711_v18, 16  ;;  %v13753_v31 = vmul.f32 0.2, %v13675_v6 }
  0xf2   : > { %v12191_v14 = vpop.f32.mrf.mxu1  ;;  %v941_v32 = vrot.slane %v939_v24, 6  ;;  %v944_v33 = vrot.slane %v942_v25, 7  ;;  %v950_v34 = vrot.slane %v948_v26, 6  ;;  %v13757_v39 = vmul.f32 0.73333335, %v13673_v5 }
  0xf3   : > { %1081 = vrot.lane.b32.xlu0 %v13693_v13, %s13537_s18  ;;  %1079 = vrot.lane.b32.xlu1 %v13688_v11, %s13537_s18  ;;  %v958_v29 = vshrl.u32 %v13720_v19, 16  ;;  %v961_v30 = vshll.u32 %v13720_v19, 16  ;;  %v953_v35 = vrot.slane %v951_v28, 7  ;;  %v13771_v43 = vmul.f32 0.6666667, %v13673_v5 }
  0xf4   : > { %v13759_v40 = vor.u32 %v944_v33, %v941_v32  ;;  %v2008_v56 = vrot.slane %v939_v24, 7  ;;  %v2011_v57 = vrot.slane %v948_v26, 7  ;;  %v829_v10 = vld [vmem:[#allocation2 + $0xa0] sm:$0x7]  ;;  %v13819_v19 = vmul.f32 0.2, %v13673_v5 }
  0xf5   : > { %v960_v36 = vrot.slane %v958_v29, 6  ;;  %v963_v37 = vrot.slane %v961_v30, 7  ;;  %v954_v45 = vor.u32 %v953_v35, %v950_v34  ;;  %v2015_v62 = vrot.slane %v958_v29, 7 }
  0xf6   : > { %v946_v48 = vrot.slane %v13759_v40, 4  ;;  %v13802_v0 = vor.u32 %v2008_v56, %v942_v25  ;;  %v2014_v1 = vrot.slane %v2011_v57, 4  ;;  %v2010_v2 = vrot.slane %v2008_v56, 4 }
  0xf7   : > { %1305 = vrot.lane.b32.xlu0 %v13703_v16, %s13537_s18  ;;  %1378 = vrot.lane.b32.xlu1 %v13700_v15, %s13537_s18  ;;  %v964_v46 = vor.u32 %v963_v37, %v960_v36  ;;  %v956_v52 = vrot.slane %v954_v45, 4  ;;  %v2016_v3 = vor.u32 %v2015_v62, %v961_v30  ;;  %v2012_v4 = vor.u32 %v2011_v57, %v951_v28 }
  0xf8   : > { %v13783_v54 = vsel %vm13775_vm7, %v946_v48, %v954_v45  ;;  %18846 = vst [vmem:[#allocation12_spill] sm:$0xff] %v13802_v0  ;;  %v830_v14 = vsel %vm828_vm11, %v738_v9, %v829_v10  ;;  %v13822_v24 = vmul.f32 0.06666667, %v13675_v6  ;;  %v13829_v25 = vmul.f32 0.46666667, %v13690_v12 }
  0xf9   : > { %v13791_v58 = vsel %vm13775_vm7, %v956_v52, %v964_v46  ;;  %v13812_v17 = vsel %vm13795_vm10, %v2014_v1, %v2016_v3  ;;  %v13816_v18 = vsel %vm13795_vm10, %v2010_v2, %v2012_v4  ;;  %831 = vst [vmem:[#allocation2 + $0xa0] sm:$0x7] %v830_v14  ;;  %v13832_v26 = vmul.f32 0.6, %v13673_v5  ;;  %v13905_v48 = vld [vmem:[%s13750_s22 + $0x4] sm:$0xf] }
  0xfa   : > { %18847 = vst [vmem:[#allocation13_spill] sm:$0xff] %v13812_v17  ;;  %18848 = vst [vmem:[#allocation14_spill] sm:$0xff] %v13816_v18  ;;  %v13839_v28 = vmul.f32 0.6, %v13675_v6  ;;  %v13842_v29 = vmul.f32 0.53333336, %v13673_v5 }
  0xfb   : > { %1303 = vrot.lane.b32.xlu0 %v13723_v20, %s13537_s18  ;;  %1525 = vrot.lane.b32.xlu1 %v13726_v21, %s13537_s18  ;;  %18849 = vst [vmem:[#allocation15_spill] sm:$0xff] %v13829_v25  ;;  %18850 = vst [vmem:[#allocation16_spill] sm:$0xff] %v13832_v26  ;;  %v13849_v30 = vmul.f32 0.13333334, %v13675_v6  ;;  %v13852_v32 = vmul.f32 0.93333334, %v13690_v12 }
  0xfc   : > { %v13859_v33 = vmul.f32 0.6666667, %v13675_v6  ;;  %v13862_v34 = vmul.f32 0.33333334, %v13690_v12  ;;  %v13869_v35 = vmul.f32 0.13333334, %v13673_v5 }
  0xfd   : > { %18851 = vst [vmem:[#allocation17_spill] sm:$0xff] %v13849_v30  ;;  %18852 = vst [vmem:[#allocation18_spill] sm:$0xff] %v13852_v32  ;;  %v13872_v36 = vmul.f32 0.4, %v13675_v6  ;;  %v13879_v37 = vmul.f32 0.06666667, %v13673_v5 }
  0xfe   : > { %18853 = vst [vmem:[#allocation19_spill] sm:$0xff] %v13862_v34  ;;  %18854 = vst [vmem:[#allocation20_spill] sm:$0xff] %v13869_v35  ;;  %v13882_v38 = vmul.f32 0.73333335, %v13690_v12  ;;  %v13889_v41 = vmul.f32 0.53333336, %v13675_v6 }
  0xff   : > { %1380 = vrot.lane.b32.xlu0 %v13729_v22, %s13537_s18  ;;  %1459 = vrot.lane.b32.xlu1 %v13732_v23, %s13537_s18  ;;  %v13892_v45 = vmul.f32 0.2, %v13690_v12  ;;  %v13899_v46 = vmul.f32 0.8, %v13690_v12  ;;  %v13902_v47 = vmul.f32 0.6666667, %v13690_v12 }
 0x100   : > { %18855 = vst [vmem:[#allocation21_spill] sm:$0xff] %v13882_v38  ;;  %v381_v50 = vshrl.u32 %v13905_v48, 16  ;;  %v13914_v52 = vmul.f32 0.26666668, %v13690_v12  ;;  %v13917_v53 = vmul.f32 0.13333334, %v13690_v12 }
 0x101   : > { %v13921_v56 = vrot.slane %v390_v51, 7  ;;  %v393_v57 = vshll.u32 %v330_v49, 16  ;;  %v13924_v61 = vmul.f32 0.8666667, %v13675_v6  ;;  %v13927_v62 = vmul.f32 0.6, %v13690_v12 }
 0x102   : > { %18856 = vst [vmem:[#allocation22_spill] sm:$0xff] %v13917_v53  ;;  %v13919_v55 = vrot.slane %v381_v50, 7  ;;  %v13934_v63 = vmul.f32 0.4, %v13673_v5  ;;  %v316_v1 = vld [vmem:[#allocation2 + $0x8] sm:$0x3] }
 0x103   : > { %1457 = vrot.lane.b32.xlu0 %v13742_v27, %s13537_s18  ;;  %1594 = vrot.lane.b32.xlu1 %v13753_v31, %s13537_s18  ;;  %18857 = vst [vmem:[#allocation23_spill] sm:$0xff] %v13927_v62  ;;  %v395_v2 = vor.u32 %v393_v57, %v13921_v56  ;;  %v13940_v3 = vmul.f32 0.8666667, %v13690_v12  ;;  %v337_v4 = vld [vmem:[%s13750_s22 + $0x24] sm:$0xf]  ;;  %v317_v9 = vsel %vm315_vm13, 0, %v316_v1 }
 0x104   : > { %v388_v6 = vrot.slane %v13919_v55, 4  ;;  %v338_v10 = vld [vmem:[%s13750_s22 + $0x28] sm:$0xf]  ;;  %v453_v14 = vshrl.u32 %v337_v4, 16  ;;  %v340_v49 = vld [vmem:[%s13750_s22 + $0x30] sm:$0xf] }
 0x105   : > { %18858 = vst [vmem:[#allocation24_spill] sm:$0xff] %v13940_v3  ;;  %318 = vst [vmem:[#allocation2 + $0x8] sm:$0x3] %v317_v9  ;;  %v462_v51 = vshrl.u32 %v338_v10, 16  ;;  %v465_v42 = vshll.u32 %v338_v10, 16  ;;  %v480_v57 = vshrl.u32 %v340_v49, 16 }
 0x106   : > { %v396_v50 = vsel %vm13795_vm10, %v388_v6, %v395_v2  ;;  %v331_v1 = vld [vmem:[%s13750_s22 + $0xc] sm:$0xf]  ;;  %v13956_v6 = vrot.slane %v453_v14, 7  ;;  %v328_v2 = vld [vmem:[%s13750_s22] sm:$0xf]  ;;  %vm2983_vm13 = vcmask 1043456  }
 0x107   : > { %1523 = vrot.lane.b32.xlu0 %v13757_v39, %s13537_s18  ;;  %1661 = vrot.lane.b32.xlu1 %v13771_v43, %s13537_s18  ;;  %788 = vst.msk [vmem:[#allocation2 + $0x8] sm:$0xf] %vm780_vm14, %v396_v50  ;;  %v399_v4 = vshrl.u32 %v331_v1, 16  ;;  %v332_v9 = vld [vmem:[%s13750_s22 + $0x10] sm:$0xf]  ;;  %v13963_v50 = vrot.slane %v462_v51, 7 }
 0x108   : > { %18860 = vst [vmem:[#allocation25_spill] sm:$0xff] %v13956_v6  ;;  %v13961_v10 = vmul.f32 0.8666667, %v13673_v5  ;;  %v373_v18 = vshrl.u32 %v328_v2, 16  ;;  %v408_v60 = vshrl.u32 %v332_v9, 16  ;;  %v460_v17 = vrot.slane %v13956_v6, 4 }
 0x109   : > { %v13966_v0 = vrot.slane %v480_v57, 7  ;;  %v467_v14 = vor.u32 %v465_v42, %v13963_v50  ;;  %v13976_v5 = vmul.f32 0.06666667, %v13690_v12  ;;  %v384_v57 = vshll.u32 %v13905_v48, 16 }
 0x10a   : > { %v402_v48 = vshll.u32 %v331_v1, 16  ;;  %vm18737_vm11 = vsmask.f32 7938 }
 0x10b   : > { %1592 = vrot.lane.b32.xlu0 %v13819_v19, %s13537_s18  ;;  %1871 = vrot.lane.b32.xlu1 %v13822_v24, %s13537_s18  ;;  %v468_v42 = vsel %vm13795_vm10, %v460_v17, %v467_v14  ;;  %v487_v1 = vrot.slane %v13966_v0, 4  ;;  %v18861_v14 = vmov 0  ;;  %vm782_vm12 = vmand %vm780_vm14, %vm18737_vm11  ;;  %vm982_vm11 = vcmask 59424  }
 0x10c   : > { %796 = vst.msk [vmem:[#allocation2 + $0x28] sm:$0xf] %vm780_vm14, %v468_v42  ;;  %v18862_v14 = vsel %vm14001_vm8, 4294967295, %v18861_v14 }
 0x10d   : > { %18863 = vst [vmem:[#allocation26_spill] sm:$0xff] %v18862_v14 }
 0x10f   : > { %1000 = vrot.lane.b32.xlu0 %v13829_v25, %s13537_s18  ;;  %1800 = vrot.lane.b32.xlu1 %v13832_v26, %s13537_s18  ;;  %v401_v25 = vrot.slane %v399_v4, 7  ;;  %v375_v26 = vrot.slane %v373_v18, 7  ;;  %v13979_v4 = vrot.slane %v408_v60, 7 }
 0x111   : > { %v379_v6 = vrot.slane %v375_v26, 4 }
 0x113   : > { %1802 = vrot.lane.b32.xlu0 %v13839_v28, %s13537_s18  ;;  %1938 = vrot.lane.b32.xlu1 %v13842_v29, %s13537_s18 }
 0x117   : > { %1736 = vrot.lane.b32.xlu0 %v13849_v30, %s13537_s18  ;;  %1083 = vrot.lane.b32.xlu1 %v13852_v32, %s13537_s18  ;;  %v341_v32 = vld [vmem:[%s13750_s22 + $0x34] sm:$0xf]  ;;  %v376_v30 = vshll.u32 %v328_v2, 16 }
 0x118   : > { %v489_v2 = vshrl.u32 %v341_v32, 16 }
 0x11b   : > { %1663 = vrot.lane.b32.xlu0 %v13859_v33, %s13537_s18  ;;  %1307 = vrot.lane.b32.xlu1 %v13862_v34, %s13537_s18  ;;  %v397_v34 = vrot.slane %v13921_v56, 4 }
 0x11f   : > { %1734 = vrot.lane.b32.xlu0 %v13869_v35, %s13537_s18  ;;  %1167 = vrot.lane.b32.xlu1 %v13872_v36, %s13537_s18  ;;  %v411_v35 = vshll.u32 %v332_v9, 16 }
 0x121   : > { %v413_v60 = vor.u32 %v411_v35, %v13979_v4  ;;  %v469_v35 = vrot.slane %v13963_v50, 4  ;;  %v492_v50 = vshll.u32 %v341_v32, 16  ;;  %v14024_v32 = vmul.f32 0.4, %v13690_v12 }
 0x123   : > { %1869 = vrot.lane.b32.xlu0 %v13879_v37, %s13537_s18  ;;  %1527 = vrot.lane.b32.xlu1 %v13882_v38, %s13537_s18  ;;  %v378_v38 = vor.u32 %v376_v30, %v375_v26  ;;  %v322_v26 = vld [vmem:[#allocation2 + $0x98] sm:$0xe]  ;;  %v404_v30 = vor.u32 %v402_v48, %v401_v25 }
 0x127   : > { %1940 = vrot.lane.b32.xlu0 %v13889_v41, %s13537_s18  ;;  %1596 = vrot.lane.b32.xlu1 %v13892_v45, %s13537_s18 }
 0x12b   : > { %1382 = vrot.lane.b32.xlu0 %v13899_v46, %s13537_s18  ;;  %1665 = vrot.lane.b32.xlu1 %v13902_v47, %s13537_s18 }
 0x12f   : > { %1461 = vrot.lane.b32.xlu0 %v13914_v52, %s13537_s18  ;;  %1738 = vrot.lane.b32.xlu1 %v13917_v53, %s13537_s18  ;;  %v483_v53 = vshll.u32 %v340_v49, 16  ;;  %v406_v49 = vrot.slane %v401_v25, 4 }
 0x131   : > { %v485_v18 = vor.u32 %v483_v53, %v13966_v0  ;;  %v6411_v53 = vld [vmem:[#allocation3 + $0x98] sm:$0xe]  ;;  %v405_v0 = vsel %vm13795_vm10, %v397_v34, %v404_v30 }
 0x132   : > { %v6412_v25 = vsel %vm14001_vm8, 0, %v6411_v53  ;;  %789 = vst.msk [vmem:[#allocation2 + $0xc] sm:$0xf] %vm780_vm14, %v405_v0 }
 0x133   : > { %1236 = vrot.lane.b32.xlu0 %v13924_v61, %s13537_s18  ;;  %1804 = vrot.lane.b32.xlu1 %v13927_v62, %s13537_s18  ;;  %v339_v62 = vld [vmem:[%s13750_s22 + $0x2c] sm:$0xf]  ;;  %6413 = vst [vmem:[#allocation3 + $0x98] sm:$0xe] %v6412_v25 }
 0x134   : > { %v471_v51 = vshrl.u32 %v339_v62, 16  ;;  %v474_v56 = vshll.u32 %v339_v62, 16 }
 0x136   : > { %v473_v9 = vrot.slane %v471_v51, 7  ;;  %v14007_v51 = vrot.slane %v489_v2, 7 }
 0x137   : > { %1165 = vrot.lane.b32.xlu0 %v13934_v63, %s13537_s18  ;;  %1238 = vrot.lane.b32.xlu1 %v13940_v3, %s13537_s18  ;;  %v386_v3 = vor.u32 %v384_v57, %v13919_v55  ;;  %v783_v57 = vld [vmem:[#allocation2] sm:$0xf] }
 0x138   : > { %v478_v17 = vrot.slane %v473_v9, 4  ;;  %18864 = vst [vmem:[#allocation27_spill] sm:$0xff] %v14007_v51  ;;  %v476_v62 = vor.u32 %v474_v56, %v473_v9  ;;  %v494_v34 = vor.u32 %v492_v50, %v14007_v51 }
 0x139   : > { %v387_v55 = vsel %vm13795_vm10, %v379_v6, %v386_v3  ;;  %v323_v3 = vsel %vm321_vm6, 0, %v322_v26  ;;  %v414_v6 = vsel %vm13795_vm10, %v406_v49, %v413_v60  ;;  %v2791_v49 = vld [vmem:[%s18717_s3] sm:$0xf]  ;;  %vm14066_vm6 = vmor %vm827_vm9, %vm1018_vm15  ;;  %vm975_vm15 = vcmask 60449  }
 0x13a   : > { %787 = vst.msk [vmem:[#allocation2 + $0x4] sm:$0xf] %vm780_vm14, %v387_v55  ;;  %324 = vst [vmem:[#allocation2 + $0x98] sm:$0xe] %v323_v3  ;;  %v477_v42 = vsel %vm13795_vm10, %v469_v35, %v476_v62  ;;  %13005 = vmatprep.subr.msk.bf16.mxu0 %vm2983_vm13, %v2791_v49  ;;  %v3227_v2 = vsel %vm2983_vm13, %v2791_v49, 0 }
 0x13b   : > { %1234 = vrot.lane.b32.xlu0 %v13961_v10, %s13537_s18  ;;  %966 = vrot.lane.b32.xlu1 %v13759_v40, %s13539_s23  ;;  %v486_v40 = vsel %vm13795_vm10, %v478_v17, %v485_v18  ;;  %790 = vst.msk [vmem:[#allocation2 + $0x10] sm:$0xf] %vm780_vm14, %v414_v6  ;;  %797 = vst.msk [vmem:[#allocation2 + $0x2c] sm:$0xf] %vm780_vm14, %v477_v42  ;;  %v784_v18 = vsel %vm782_vm12, %v378_v38, %v783_v57  ;;  %v14042_v38 = vmul.f32 0.53333336, %v13690_v12 }
 0x13c   : > { %798 = vst.msk [vmem:[#allocation2 + $0x30] sm:$0xf] %vm780_vm14, %v486_v40  ;;  %785 = vst [vmem:[#allocation2] sm:$0xf] %v784_v18  ;;  %12231 = vmatpush3.bf16.msra.mxu0 %v3227_v2 }
 0x13d   : > { %vm14078_vm12 = vmor %vm18738_vm3, %vm1101_vm5  ;;  %vm980_vm5 = vcmask 60448  }
 0x13e   : > { %vm14317_vm3 = vmand %vm975_vm15, %vm320_vm0  ;;  %vm1220_vm0 = vcmask 58400  }
 0x13f   : > { %1873 = vrot.lane.b32.xlu0 %v13976_v5, %s13537_s18  ;;  %968 = vrot.lane.b32.xlu1 %v13783_v54, %s13539_s23  ;;  %v495_v54 = vsel %vm13795_vm10, %v487_v1, %v494_v34  ;;  %vm14368_vm15 = vmand %vm982_vm11, %vm827_vm9  ;;  %vm1057_vm11 = vcmask 60450  }
 0x140   : > { %799 = vst.msk [vmem:[#allocation2 + $0x34] sm:$0xf] %vm780_vm14, %v495_v54  ;;  %vm14448_vm9 = vmand %vm1220_vm0, %vm18739_vm2  ;;  %vm18907_vm2 = vsmask.f32 3328 }
 0x143   : > { %1169 = vrot.lane.b32.xlu0 %v14024_v32, %s13537_s18  ;;  %970 = vrot.lane.b32.xlu1 %v13791_v58, %s13539_s23  ;;  %v13151_v58 = vld [vmem:[#allocation2] sm:$0xff]  }
 0x144   : > { %12232 = vmatprep.mubr.msk.bf16.mxu0 %vm836_vm1, %v13151_v58 }
 0x147   : > { %1942 = vrot.lane.b32.xlu0 %v14042_v38, %s13537_s18 }
 0x161   : > { %v999_v9 = vpop.permute.xlu0 %998  ;;  %v997_v48 = vpop.permute.xlu1 %996 }
 0x162   : > { %v1006_v60 = vadd.f32 %v999_v9, %v13889_v41  ;;  %v1005_v17 = vadd.f32 %v997_v48, %v13842_v29 }
 0x164   : > { %v11552_v53 = vpack.c.bf16 %v1006_v60, %v1006_v60  ;;  %v11551_v55 = vpack.c.bf16 %v1005_v17, %v1005_v17 }
 0x165   : > { %v1082_v26 = vpop.permute.xlu0 %1081  ;;  %v1080_v30 = vpop.permute.xlu1 %1079 }
 0x166   : > { %v1021_v35 = vshrl.u32 %v11551_v55, 16  ;;  %v1024_v12 = vshll.u32 %v11551_v55, 16  ;;  %v1089_v56 = vadd.f32 %v1082_v26, %v13822_v24  ;;  %v1088_v1 = vadd.f32 %v1080_v30, %v13879_v37 }
 0x167   : > { %v1030_v40 = vshrl.u32 %v11552_v53, 16  ;;  %v1033_v3 = vshll.u32 %v11552_v53, 16  ;;  %v14059_v53 = vld [vmem:[%s13750_s22 + $0x14] sm:$0xf] }
 0x168   : > { %v1023_v6 = vrot.slane %v1021_v35, 5  ;;  %v1026_v25 = vrot.slane %v1024_v12, 6  ;;  %v11555_v0 = vpack.c.bf16 %v1089_v56, %v1089_v56  ;;  %v11554_v62 = vpack.c.bf16 %v1088_v1, %v1088_v1 }
 0x169   : > { %v1306_v50 = vpop.permute.xlu0 %1305  ;;  %v1379_v41 = vpop.permute.xlu1 %1378  ;;  %v1032_v18 = vrot.slane %v1030_v40, 5  ;;  %v1035_v49 = vrot.slane %v1033_v3, 6 }
 0x16a   : > { %v1313_v29 = vadd.f32 %v1306_v50, %v13859_v33  ;;  %v1387_v57 = vadd.f32 %v1379_v41, %v13819_v19  ;;  %v1027_v42 = vor.u32 %v1026_v25, %v1023_v6  ;;  %v1113_v24 = vshll.u32 %v11555_v0, 16 }
 0x16b   : > { %v1117_v34 = vshrl.u32 %v11555_v0, 16  ;;  %v1104_v37 = vshll.u32 %v11554_v62, 16  ;;  %v1107_v54 = vshrl.u32 %v11554_v62, 16  ;;  %v14071_v6 = vor.u32 %v1035_v49, %v1032_v18 }
 0x16c   : > { %v11564_v2 = vpack.c.bf16 %v1313_v29, %v1313_v29  ;;  %v11566_v58 = vpack.c.bf16 %v1387_v57, %v1387_v57  ;;  %1048 = vrot.lane.b32.xlu0 %v1027_v42, %s13539_s23  ;;  %v14054_v9 = vrot.slane %v1113_v24, 5  ;;  %v1028_v35 = vrot.slane %v1027_v42, 4 }
 0x16d   : > { %v14056_v48 = vrot.slane %v1117_v34, 4  ;;  %v1106_v33 = vrot.slane %v1104_v37, 5  ;;  %v1109_v60 = vrot.slane %v1107_v54, 4  ;;  %v1304_v19 = vpop.permute.xlu0 %1303  ;;  %v1526_v17 = vpop.permute.xlu1 %1525 }
 0x16e   : > { %v1335_v55 = vshrl.u32 %v11564_v2, 16  ;;  %v1401_v26 = vshll.u32 %v11566_v58, 16  ;;  %v1404_v30 = vshrl.u32 %v11566_v58, 16  ;;  %v1312_v56 = vadd.f32 %v1304_v19, %v13771_v43 }
 0x16f   : > { %v1110_v12 = vor.u32 %v1109_v60, %v1106_v33  ;;  %v1533_v1 = vadd.f32 %v1526_v17, %v13732_v23  ;;  %1131 = vrot.lane.b32.xlu1 %v1106_v33, %s13539_s23  ;;  %v1120_v25 = vor.u32 %v14056_v48, %v14054_v9  ;;  %v1338_v0 = vshll.u32 %v11564_v2, 16 }
 0x170   : > { %v417_v43 = vshrl.u32 %v14059_v53, 16  ;;  %v1337_v23 = vrot.slane %v1335_v55, 5  ;;  %v11563_v50 = vpack.c.bf16 %v1312_v56, %v1312_v56  ;;  %v14082_v24 = vrot.slane %v1401_v26, 5 }
 0x171   : > { %v1111_v62 = vrot.slane %v1110_v12, 4  ;;  %v11573_v41 = vpack.c.bf16 %v1533_v1, %v1533_v1  ;;  %v1381_v29 = vpop.permute.xlu0 %1380  ;;  %v1460_v57 = vpop.permute.xlu1 %1459  ;;  %v1406_v34 = vrot.slane %v1404_v30, 4  ;;  %v1037_v37 = vsel %vm14066_vm6, %v1028_v35, %v14071_v6 }
 0x172   : > { %v1388_v54 = vadd.f32 %v1381_v29, %v13753_v31  ;;  %v1326_v18 = vshrl.u32 %v11563_v50, 16  ;;  %v1329_v49 = vshll.u32 %v11563_v50, 16  ;;  %1050 = vrot.lane.b32.xlu0 %v1037_v37, %s13539_s23  ;;  %v1340_v48 = vrot.slane %v1338_v0, 6 }
 0x173   : > { %v1555_v2 = vshrl.u32 %v11573_v41, 16  ;;  %v1558_v58 = vshll.u32 %v11573_v41, 16  ;;  %v1467_v60 = vadd.f32 %v1460_v57, %v13726_v21  ;;  %v1116_v19 = vsel %vm14078_vm12, %v1111_v62, %v14054_v9 }
 0x174   : > { %v11567_v33 = vpack.c.bf16 %v1388_v54, %v1388_v54  ;;  %v1328_v17 = vrot.slane %v1326_v18, 5  ;;  %v1331_v55 = vrot.slane %v1329_v49, 6  ;;  %v1407_v0 = vor.u32 %v1406_v34, %v14082_v24 }
 0x175   : > { %v1557_v26 = vrot.slane %v1555_v2, 6  ;;  %v1560_v30 = vrot.slane %v1558_v58, 7  ;;  %v1458_v35 = vpop.permute.xlu0 %1457  ;;  %v1595_v31 = vpop.permute.xlu1 %1594  ;;  %v11570_v1 = vpack.c.bf16 %v1467_v60, %v1467_v60  ;;  %v14097_v41 = vrot.slane %v417_v43, 7 }
 0x176   : > { %v1410_v12 = vshll.u32 %v11567_v33, 16  ;;  %v1414_v56 = vshrl.u32 %v11567_v33, 16  ;;  %v1466_v50 = vadd.f32 %v1458_v35, %v13757_v39  ;;  %1133 = vrot.lane.b32.xlu0 %v1116_v19, %s13539_s23  ;;  %v1602_v21 = vadd.f32 %v1595_v31, %v13729_v22 }
 0x177   : > { %v14100_v62 = vor.u32 %v1340_v48, %v1337_v23  ;;  %v14102_v29 = vor.u32 %v1560_v30, %v1557_v26  ;;  %v14106_v37 = vor.u32 %v1331_v55, %v1328_v17  ;;  %v1488_v39 = vshrl.u32 %v11570_v1, 16 }
 0x178   : > { %v14104_v57 = vrot.slane %v1410_v12, 5  ;;  %v1416_v54 = vrot.slane %v1414_v56, 4  ;;  %v11569_v18 = vpack.c.bf16 %v1466_v50, %v1466_v50  ;;  %v11576_v34 = vpack.c.bf16 %v1602_v21, %v1602_v21 }
 0x179   : > { %v1524_v49 = vpop.permute.xlu0 %1523  ;;  %v1662_v2 = vpop.permute.xlu1 %1661  ;;  %v14108_v58 = vrot.slane %v1120_v25, 4  ;;  %v14113_v48 = vrot.slane %v1407_v0, 4  ;;  %v1491_v17 = vshll.u32 %v11570_v1, 16  ;;  %v1333_v26 = vrot.slane %v14106_v37, 4 }
 0x17a   : > { %v1532_v22 = vadd.f32 %v1524_v49, %v13742_v27  ;;  %v1670_v43 = vadd.f32 %v1662_v2, %v13723_v20  ;;  %v1480_v33 = vshrl.u32 %v11569_v18, 16  ;;  %v1624_v60 = vshrl.u32 %v11576_v34, 16 }
 0x17b   : > { %v1627_v19 = vshll.u32 %v11576_v34, 16  ;;  %v1417_v25 = vor.u32 %v1416_v54, %v14104_v57  ;;  %v14118_v35 = vrot.slane %v1488_v39, 7  ;;  %v1483_v50 = vshll.u32 %v11569_v18, 16 }
 0x17c   : > { %v11572_v55 = vpack.c.bf16 %v1532_v22, %v1532_v22  ;;  %v11578_v27 = vpack.c.bf16 %v1670_v43, %v1670_v43  ;;  %v1482_v56 = vrot.slane %v1480_v33, 7  ;;  %v1626_v21 = vrot.slane %v1624_v60, 5 }
 0x17d   : > { %v1593_v31 = vpop.permute.xlu0 %1592  ;;  %v1872_v20 = vpop.permute.xlu1 %1871  ;;  %v1629_v34 = vrot.slane %v1627_v19, 6  ;;  %v14123_v9 = vrot.slane %v1417_v25, 4  ;;  %v1493_v43 = vor.u32 %v1491_v17, %v14118_v35 }
 0x17e   : > { %v1601_v0 = vadd.f32 %v1593_v31, %v13700_v15  ;;  %v1879_v1 = vadd.f32 %v1872_v20, %v13693_v13  ;;  %v1684_v49 = vshll.u32 %v11578_v27, 16  ;;  %v1687_v2 = vshrl.u32 %v11578_v27, 16 }
 0x17f   : > { %v1546_v22 = vshrl.u32 %v11572_v55, 16  ;;  %v1549_v3 = vshll.u32 %v11572_v55, 16  ;;  %v1486_v13 = vrot.slane %v1482_v56, 4  ;;  %v14129_v31 = vor.u32 %v1629_v34, %v1626_v21 }
 0x180   : > { %v11575_v54 = vpack.c.bf16 %v1601_v0, %v1601_v0  ;;  %v11588_v39 = vpack.c.bf16 %v1879_v1, %v1879_v1  ;;  %v14126_v30 = vrot.slane %v1684_v49, 5  ;;  %v1689_v33 = vrot.slane %v1687_v2, 4 }
 0x181   : > { %v1001_v18 = vpop.permute.xlu0 %1000  ;;  %v1801_v12 = vpop.permute.xlu1 %1800  ;;  %v1548_v25 = vrot.slane %v1546_v22, 6  ;;  %v1551_v0 = vrot.slane %v1549_v3, 7  ;;  %v14141_v21 = vsel %vm14066_vm6, %v1333_v26, %v14100_v62 }
 0x182   : > { %v1615_v60 = vshrl.u32 %v11575_v54, 16  ;;  %v1618_v19 = vshll.u32 %v11575_v54, 16  ;;  %v1901_v27 = vshrl.u32 %v11588_v39, 16  ;;  %v1904_v55 = vshll.u32 %v11588_v39, 16 }
 0x183   : > { %v1007_v20 = vadd.f32 %v1001_v18, %v14042_v38  ;;  %v1809_v17 = vadd.f32 %v1801_v12, %v13934_v63  ;;  %v1690_v49 = vor.u32 %v1689_v33, %v14126_v30  ;;  %v14143_v38 = vor.u32 %v1483_v50, %v1482_v56 }
 0x184   : > { %v1617_v3 = vrot.slane %v1615_v60, 5  ;;  %v1620_v34 = vrot.slane %v1618_v19, 6  ;;  %v1903_v22 = vrot.slane %v1901_v27, 5  ;;  %v1906_v39 = vrot.slane %v1904_v55, 6 }
 0x185   : > { %v11553_v2 = vpack.c.bf16 %v1007_v20, %v1007_v20  ;;  %v1803_v15 = vpop.permute.xlu0 %1802  ;;  %v1939_v54 = vpop.permute.xlu1 %1938  ;;  %v11584_v20 = vpack.c.bf16 %v1809_v17, %v1809_v17  ;;  %v14147_v14 = vor.u32 %v1551_v0, %v1548_v25  ;;  %v14149_v51 = vrot.slane %v1690_v49, 4 }
 0x186   : > { %v1810_v63 = vadd.f32 %v1803_v15, %v13872_v36  ;;  %v1947_v12 = vadd.f32 %v1939_v54, %v13681_v8  ;;  %v14153_v36 = vsel %vm13795_vm10, %v1486_v13, %v1493_v43  ;;  %v14155_v27 = vor.u32 %v1620_v34, %v1617_v3 }
 0x187   : > { %v1040_v18 = vshrl.u32 %v11553_v2, 16  ;;  %v1043_v33 = vshll.u32 %v11553_v2, 16  ;;  %v1823_v49 = vshrl.u32 %v11584_v20, 16  ;;  %v1826_v2 = vshll.u32 %v11584_v20, 16 }
 0x188   : > { %v11585_v1 = vpack.c.bf16 %v1810_v63, %v1810_v63  ;;  %v11590_v23 = vpack.c.bf16 %v1947_v12, %v1947_v12  ;;  %v1553_v63 = vrot.slane %v14147_v14, 4  ;;  %v14166_v3 = vor.u32 %v1906_v39, %v1903_v22 }
 0x189   : > { %v1042_v26 = vrot.slane %v1040_v18, 5  ;;  %v1045_v56 = vrot.slane %v1043_v33, 6  ;;  %v1737_v50 = vpop.permute.xlu0 %1736  ;;  %v1084_v60 = vpop.permute.xlu1 %1083  ;;  %v1622_v34 = vrot.slane %v14155_v27, 4 }
 0x18a   : > { %v1832_v8 = vshrl.u32 %v11585_v1, 16  ;;  %v1961_v15 = vshll.u32 %v11590_v23, 16  ;;  %v1964_v19 = vshrl.u32 %v11590_v23, 16  ;;  %v1835_v17 = vshll.u32 %v11585_v1, 16 }
 0x18b   : > { %v1046_v55 = vor.u32 %v1045_v56, %v1042_v26  ;;  %v1744_v25 = vadd.f32 %v1737_v50, %v13924_v61  ;;  %v1090_v0 = vadd.f32 %v1084_v60, %v13976_v5  ;;  %v18869_v23 = vrot.slane %v14071_v6, 4 }
 0x18c   : > { %v14159_v54 = vrot.slane %v1961_v15, 5  ;;  %v1966_v12 = vrot.slane %v1964_v19, 4  ;;  %v1834_v20 = vrot.slane %v1832_v8, 6  ;;  %v1837_v26 = vrot.slane %v1835_v17, 7 }
 0x18d   : > { %v11582_v43 = vpack.c.bf16 %v1744_v25, %v1744_v25  ;;  %v11556_v13 = vpack.c.bf16 %v1090_v0, %v1090_v0  ;;  %v1664_v18 = vpop.permute.xlu0 %1663  ;;  %v1308_v33 = vpop.permute.xlu1 %1307  ;;  %v1047_v1 = vsel %vm14066_vm6, %v18869_v23, %v1046_v55  ;;  %v14171_v60 = vrot.slane %v1823_v49, 6 }
 0x18e   : > { %v1671_v61 = vadd.f32 %v1664_v18, %v13703_v16  ;;  %v1314_v5 = vadd.f32 %v1308_v33, %v13902_v47  ;;  %v14173_v15 = vrot.slane %v1826_v2, 7  ;;  %v1967_v55 = vor.u32 %v1966_v12, %v14159_v54 }
 0x18f   : > { %v1123_v56 = vshll.u32 %v11556_v13, 16  ;;  %v1127_v50 = vshrl.u32 %v11556_v13, 16  ;;  %v1765_v22 = vshrl.u32 %v11582_v43, 16  ;;  %v14180_v8 = vsel %vm13775_vm7, %v1553_v63, %v14102_v29 }
 0x190   : > { %v11579_v6 = vpack.c.bf16 %v1671_v61, %v1671_v61  ;;  %v11565_v19 = vpack.c.bf16 %v1314_v5, %v1314_v5  ;;  %v14182_v2 = vor.u32 %v1837_v26, %v1834_v20  ;;  %v1768_v13 = vshll.u32 %v11582_v43, 16 }
 0x191   : > { %v1125_v39 = vrot.slane %v1123_v56, 5  ;;  %1137 = vrot.lane.b32.xlu1 %v1127_v50, %s13539_s23  ;;  %v1735_v16 = vpop.permute.xlu0 %1734  ;;  %v1168_v47 = vpop.permute.xlu1 %1167  ;;  %v14188_v56 = vrot.slane %v1765_v22, 7  ;;  %v14196_v26 = vrot.slane %v1967_v55, 4 }
 0x192   : > { %v1693_v17 = vshll.u32 %v11579_v6, 16  ;;  %v1697_v25 = vshrl.u32 %v11579_v6, 16  ;;  %v1345_v0 = vshrl.u32 %v11565_v19, 16  ;;  %v1348_v49 = vshll.u32 %v11565_v19, 16 }
 0x193   : > { %v1743_v12 = vadd.f32 %v1735_v16, %v13961_v10  ;;  %v1175_v18 = vadd.f32 %v1168_v47, %v13839_v28  ;;  %v1126_v20 = vsel %vm14078_vm12, %v14108_v58, %v1125_v39  ;;  %v1632_v19 = vrot.slane %v14129_v31, 4 }
 0x194   : > { %v14186_v33 = vrot.slane %v1693_v17, 5  ;;  %v1699_v23 = vrot.slane %v1697_v25, 4  ;;  %v1347_v61 = vrot.slane %v1345_v0, 5  ;;  %v1350_v5 = vrot.slane %v1348_v49, 6  ;;  %1135 = vrot.lane.b32.xlu0 %v1126_v20, %s13539_s23 }
 0x195   : > { %v14190_v63 = vpack.c.bf16 %v1743_v12, %v1743_v12  ;;  %v11558_v50 = vpack.c.bf16 %v1175_v18, %v1175_v18  ;;  %1052 = vrot.lane.b32.xlu1 %v1047_v1, %s13539_s23  ;;  %v1870_v43 = vpop.permute.xlu0 %1869  ;;  %v1528_v10 = vpop.permute.xlu1 %1527  ;;  %v14207_v58 = vsel %vm14066_vm6, %v1622_v34, %v14129_v31 }
 0x196   : > { %v1878_v28 = vadd.f32 %v1870_v43, %v13688_v11  ;;  %v1534_v6 = vadd.f32 %v1528_v10, %v13914_v52  ;;  %v1700_v22 = vor.u32 %v1699_v23, %v14186_v33  ;;  %v1351_v1 = vor.u32 %v1350_v5, %v1347_v61 }
 0x197   : > { %v1757_v16 = vshrl.u32 %v14190_v63, 16  ;;  %v1196_v47 = vshrl.u32 %v11558_v50, 16  ;;  %v14211_v11 = vor.u32 %v1768_v13, %v14188_v56  ;;  %v1772_v52 = vrot.slane %v14188_v56, 4 }
 0x198   : > { %v11587_v55 = vpack.c.bf16 %v1878_v28, %v1878_v28  ;;  %v11574_v39 = vpack.c.bf16 %v1534_v6, %v1534_v6  ;;  %v1760_v25 = vshll.u32 %v14190_v63, 16  ;;  %v14220_v5 = vrot.slane %v1700_v22, 4 }
 0x199   : > { %1353 = vrot.lane.b32.xlu1 %v14106_v37, %s13537_s18  ;;  %v1941_v0 = vpop.permute.xlu0 %1940  ;;  %v1597_v49 = vpop.permute.xlu1 %1596  ;;  %v1759_v12 = vrot.slane %v1757_v16, 7  ;;  %v14218_v18 = vrot.slane %v1196_v47, 7  ;;  %v1199_v13 = vshll.u32 %v11558_v50, 16  ;;  %v18870_v37 = vrot.slane %v14100_v62, 4 }
 0x19a   : > { %v1565_v23 = vshrl.u32 %v11574_v39, 16  ;;  %v1568_v61 = vshll.u32 %v11574_v39, 16  ;;  %v1892_v20 = vshrl.u32 %v11587_v55, 16  ;;  %v1948_v43 = vadd.f32 %v1941_v0, %v13678_v7 }
 0x19b   : > { %v1895_v10 = vshll.u32 %v11587_v55, 16  ;;  %v1352_v6 = vsel %vm14066_vm6, %v18870_v37, %v1351_v1  ;;  %v1603_v16 = vadd.f32 %v1597_v49, %v13899_v46  ;;  %v14236_v50 = vor.u32 %v14173_v15, %v14171_v60  ;;  %v18871_v55 = vld [vmem:[#allocation19_spill] sm:$0xff] }
 0x19c   : > { %v1567_v63 = vrot.slane %v1565_v23, 6  ;;  %v1570_v28 = vrot.slane %v1568_v61, 7  ;;  %v11591_v34 = vpack.c.bf16 %v1948_v43, %v1948_v43  ;;  %v1763_v62 = vrot.slane %v1759_v12, 4 }
 0x19d   : > { %1428 = vrot.lane.b32.xlu1 %v14082_v24, %s13537_s18  ;;  %v1383_v22 = vpop.permute.xlu0 %1382  ;;  %v1666_v47 = vpop.permute.xlu1 %1665  ;;  %v14239_v1 = vor.u32 %v1199_v13, %v14218_v18  ;;  %v1894_v24 = vrot.slane %v1892_v20, 5  ;;  %v11577_v23 = vpack.c.bf16 %v1603_v16, %v1603_v16  ;;  %v1897_v61 = vrot.slane %v1895_v10, 6 }
 0x19e   : > { %v1389_v46 = vadd.f32 %v1383_v22, %v13892_v45  ;;  %v1672_v39 = vadd.f32 %v1666_v47, %v18871_v55  ;;  %v1970_v0 = vshll.u32 %v11591_v34, 16  ;;  %v1974_v49 = vshrl.u32 %v11591_v34, 16  ;;  %v14259_v22 = vld [vmem:[%s18717_s3 + $0x4] sm:$0xf] }
 0x19f   : > { %v1571_v43 = vor.u32 %v1570_v28, %v1567_v63  ;;  %v1634_v17 = vshrl.u32 %v11577_v23, 16  ;;  %v1637_v13 = vshll.u32 %v11577_v23, 16  ;;  %v18872_v45 = vsel %vm14078_vm12, %v14113_v48, %v14104_v57  ;;  %13004 = vmatprep.subr.msk.bf16.mxu1 %vm2983_vm13, %v14259_v22 }
 0x1a0   : > { %v11568_v37 = vpack.c.bf16 %v1389_v46, %v1389_v46  ;;  %v14243_v7 = vpack.c.bf16 %v1672_v39, %v1672_v39  ;;  %v14245_v60 = vrot.slane %v1970_v0, 5  ;;  %v1976_v15 = vrot.slane %v1974_v49, 4  ;;  %v18873_v39 = vld [vmem:[#allocation21_spill] sm:$0xff]  ;;  %v18874_v0 = vld [vmem:[#allocation24_spill] sm:$0xff] }
 0x1a1   : > { %1430 = vrot.lane.b32.xlu1 %v18872_v45, %s13537_s18  ;;  %v1462_v34 = vpop.permute.xlu0 %1461  ;;  %v1739_v20 = vpop.permute.xlu1 %1738  ;;  %v14254_v16 = vor.u32 %v1760_v25, %v1759_v12  ;;  %v1636_v47 = vrot.slane %v1634_v17, 5  ;;  %v1639_v46 = vrot.slane %v1637_v13, 6  ;;  %v1830_v25 = vrot.slane %v14236_v50, 4 }
 0x1a2   : > { %v1420_v63 = vshll.u32 %v11568_v37, 16  ;;  %v1424_v28 = vshrl.u32 %v11568_v37, 16  ;;  %v1703_v55 = vshll.u32 %v14243_v7, 16  ;;  %v1468_v57 = vadd.f32 %v1462_v34, %v18873_v39 }
 0x1a3   : > { %v1977_v48 = vor.u32 %v1976_v15, %v14245_v60  ;;  %v1745_v49 = vadd.f32 %v1739_v20, %v18874_v0  ;;  %v14269_v12 = vor.u32 %v1897_v61, %v1894_v24  ;;  %v18875_v45 = vrot.slane %v14102_v29, 4  ;;  %v18876_v24 = vld [vmem:[#allocation17_spill] sm:$0xff] }
 0x1a4   : > { %1434 = vrot.lane.b32.xlu0 %v1424_v28, %s13537_s18  ;;  %v1422_v23 = vrot.slane %v1420_v63, 5  ;;  %v11571_v17 = vpack.c.bf16 %v1468_v57, %v1468_v57  ;;  %v14281_v15 = vsel %vm13795_vm10, %v1763_v62, %v14211_v11  ;;  %v1640_v29 = vor.u32 %v1639_v46, %v1636_v47 }
 0x1a5   : > { %1357 = vrot.lane.b32.xlu1 %v1352_v6, %s13537_s18  ;;  %v1237_v37 = vpop.permute.xlu0 %1236  ;;  %v1805_v13 = vpop.permute.xlu1 %1804  ;;  %v14276_v34 = vsel %vm13775_vm7, %v18875_v45, %v1571_v43  ;;  %v14283_v20 = vpack.c.bf16 %v1745_v49, %v1745_v49  ;;  %v14290_v6 = vsel %vm13775_vm7, %v1830_v25, %v14182_v2  ;;  %v14292_v28 = vrot.slane %v1703_v55, 5 }
 0x1a6   : > { %v1244_v61 = vadd.f32 %v1237_v37, %v18876_v24  ;;  %v1811_v63 = vadd.f32 %v1805_v13, %v14024_v32  ;;  %v1707_v43 = vshrl.u32 %v14243_v7, 16  ;;  %v1497_v39 = vshrl.u32 %v11571_v17, 16  ;;  %v14311_v37 = vld [vmem:[%s13750_s22 + $0x18] sm:$0xf]  ;;  %v18878_v24 = vld [vmem:[#allocation22_spill] sm:$0xff] }
 0x1a7   : > { %v14295_v11 = vrot.slane %v1977_v48, 4  ;;  %v1899_v32 = vrot.slane %v14269_v12, 4  ;;  %v1500_v49 = vshll.u32 %v11571_v17, 16  ;;  %v1423_v46 = vsel %vm14078_vm12, %v14123_v9, %v1422_v23  ;;  %v18877_v13 = vld [vmem:[#allocation16_spill] sm:$0xff]  ;;  %v977_v23 = vld [vmem:[#allocation2 + $0x8] sm:$0xe] }
 0x1a8   : > { %v11561_v62 = vpack.c.bf16 %v1244_v61, %v1244_v61  ;;  %v11586_v57 = vpack.c.bf16 %v1811_v63, %v1811_v63  ;;  %1355 = vrot.lane.b32.xlu0 %v14141_v21, %s13537_s18  ;;  %v1499_v0 = vrot.slane %v1497_v39, 7  ;;  %v1774_v55 = vshrl.u32 %v14283_v20, 16 }
 0x1a9   : > { %1504 = vrot.lane.b32.xlu1 %v14143_v38, %s13540_s14  ;;  %v1166_v47 = vpop.permute.xlu0 %1165  ;;  %v1239_v7 = vpop.permute.xlu1 %1238  ;;  %v14325_v63 = vsel %vm14066_vm6, %v1632_v19, %v1640_v29  ;;  %v426_v19 = vshrl.u32 %v14311_v37, 16 }
 0x1aa   : > { %v1266_v48 = vshrl.u32 %v11561_v62, 16  ;;  %v1269_v25 = vshll.u32 %v11561_v62, 16  ;;  %v1842_v17 = vshrl.u32 %v11586_v57, 16  ;;  %v1845_v38 = vshll.u32 %v11586_v57, 16 }
 0x1ab   : > { %v1174_v45 = vadd.f32 %v1166_v47, %v18877_v13  ;;  %v1245_v61 = vadd.f32 %v1239_v7, %v18878_v24  ;;  %v1502_v39 = vor.u32 %v1500_v49, %v1499_v0  ;;  %v18881_v47 = vshll.u32 %v14059_v53, 16  ;;  %v18882_v49 = vld [vmem:[#allocation20_spill] sm:$0xff] }
 0x1ac   : > { %v1268_v62 = vrot.slane %v1266_v48, 6  ;;  %v1271_v57 = vrot.slane %v1269_v25, 7  ;;  %1432 = vrot.lane.b32.xlu0 %v1423_v46, %s13537_s18  ;;  %v1777_v13 = vshll.u32 %v14283_v20, 16  ;;  %v1776_v29 = vrot.slane %v1774_v55, 7 }
 0x1ad   : > { %v422_v7 = vor.u32 %v18881_v47, %v14097_v41  ;;  %v11557_v24 = vpack.c.bf16 %v1174_v45, %v1174_v45  ;;  %v11562_v21 = vpack.c.bf16 %v1245_v61, %v1245_v61  ;;  %1717 = vrot.lane.b32.xlu1 %v1707_v43, %s13541_s15  ;;  %v1235_v31 = vpop.permute.xlu0 %1234  ;;  %v967_v10 = vpop.permute.xlu1 %966  ;;  %v14334_v0 = vrot.slane %v1842_v17, 6 }
 0x1ae   : > { %v1243_v46 = vadd.f32 %v1235_v31, %v18882_v49  ;;  %v978_v53 = vsel %vm14317_vm3, %v967_v10, %v977_v23  ;;  %v14339_v48 = vor.u32 %v1271_v57, %v1268_v62  ;;  %v14341_v25 = vrot.slane %v1845_v38, 7  ;;  %v335_v38 = vld [vmem:[%s13750_s22 + $0x1c] sm:$0xf] }
 0x1af   : > { %v1188_v45 = vshrl.u32 %v11557_v24, 16  ;;  %v1276_v61 = vshrl.u32 %v11562_v21, 16  ;;  %979 = vst [vmem:[#allocation2 + $0x8] sm:$0xe] %v978_v53  ;;  %v1279_v43 = vshll.u32 %v11562_v21, 16  ;;  %v18883_v55 = vrot.slane %v14118_v35, 4 }
 0x1b0   : > { %v11560_v47 = vpack.c.bf16 %v1243_v46, %v1243_v46  ;;  %1506 = vrot.lane.b32.xlu0 %v14153_v36, %s13540_s14  ;;  %v18884_v31 = vrot.slane %v13979_v4, 4  ;;  %v1191_v62 = vshll.u32 %v11557_v24, 16  ;;  %v14357_v35 = vrot.slane %v426_v19, 7  ;;  %v18885_v4 = vld [vmem:[#allocation18_spill] sm:$0xff] }
 0x1b1   : > { %v1503_v17 = vsel %vm13795_vm10, %v18883_v55, %v1502_v39  ;;  %v1190_v23 = vrot.slane %v1188_v45, 7  ;;  %v1278_v57 = vrot.slane %v1276_v61, 6  ;;  %1642 = vrot.lane.b32.xlu1 %v14155_v27, %s13541_s15  ;;  %v1874_v21 = vpop.permute.xlu0 %1873  ;;  %v969_v49 = vpop.permute.xlu1 %968  ;;  %v1281_v36 = vrot.slane %v1279_v43, 7  ;;  %v984_v43 = vld [vmem:[#allocation2 + $0x10] sm:$0x7] }
 0x1b2   : > { %v423_v10 = vsel %vm13795_vm10, %v18884_v31, %v422_v7  ;;  %v1257_v39 = vshrl.u32 %v11560_v47, 16  ;;  %v1260_v46 = vshll.u32 %v11560_v47, 16  ;;  %v1880_v53 = vadd.f32 %v1874_v21, %v18885_v4  ;;  %981 = vst.msk [vmem:[#allocation2 + $0xc] sm:$0xf] %vm980_vm5, %v969_v49  ;;  %v1291_v47 = vld [vmem:[#allocation2 + $0x34] sm:$0x7] }
 0x1b3   : > { %791 = vst.msk [vmem:[#allocation2 + $0x14] sm:$0xf] %vm780_vm14, %v423_v10  ;;  %v1274_v7 = vrot.slane %v14339_v48, 4  ;;  %v14362_v24 = vor.u32 %v1191_v62, %v1190_v23  ;;  %v1194_v45 = vrot.slane %v1190_v23, 4  ;;  %v435_v61 = vshrl.u32 %v335_v38, 16 }
 0x1b4   : > { %v1282_v27 = vor.u32 %v1281_v36, %v1278_v57  ;;  %v1259_v55 = vrot.slane %v1257_v39, 6  ;;  %v1262_v31 = vrot.slane %v1260_v46, 7  ;;  %v11589_v10 = vpack.c.bf16 %v1880_v53, %v1880_v53  ;;  %1573 = vrot.lane.b32.xlu0 %v14147_v14, %s13540_s14  ;;  %v336_v36 = vld [vmem:[%s13750_s22 + $0x20] sm:$0xf] }
 0x1b5   : > { %v1202_v23 = vsel %vm13795_vm10, %v1194_v45, %v14239_v1  ;;  %1508 = vrot.lane.b32.xlu1 %v1503_v17, %s13540_s14  ;;  %v1170_v62 = vpop.permute.xlu0 %1169  ;;  %v971_v57 = vpop.permute.xlu1 %970  ;;  %v433_v21 = vrot.slane %v14357_v35, 4  ;;  %v14377_v14 = vrot.slane %v435_v61, 7  ;;  %v438_v49 = vshll.u32 %v335_v38, 16  ;;  %v18888_v1 = vld [vmem:[#allocation23_spill] sm:$0xff] }
 0x1b6   : > { %1219 = vst.msk [vmem:[#allocation2 + $0x28] sm:$0xf] %vm980_vm5, %v1202_v23  ;;  %v1283_v39 = vsel %vm13775_vm7, %v1274_v7, %v1282_v27  ;;  %v14383_v46 = vor.u32 %v1262_v31, %v1259_v55  ;;  %v1911_v4 = vshrl.u32 %v11589_v10, 16  ;;  %v1914_v53 = vshll.u32 %v11589_v10, 16 }
 0x1b7   : > { %v1176_v45 = vadd.f32 %v1170_v62, %v18888_v1  ;;  %v985_v17 = vsel %vm14368_vm15, %v971_v57, %v984_v43  ;;  %v1292_v61 = vsel %vm14368_vm15, %v1283_v39, %v1291_v47  ;;  %v440_v38 = vor.u32 %v438_v49, %v14377_v14  ;;  %v2757_v43 = vld [vmem:[#allocation2 + $0x8] sm:$0xf]  ;;  %v18889_v62 = vld [vmem:[#allocation15_spill] sm:$0xff] }
 0x1b8   : > { %v1779_v23 = vor.u32 %v1777_v13, %v1776_v29  ;;  %v1848_v7 = vor.u32 %v14341_v25, %v14334_v0  ;;  %v1264_v27 = vrot.slane %v14383_v46, 4  ;;  %986 = vst [vmem:[#allocation2 + $0x10] sm:$0x7] %v985_v17  ;;  %1293 = vst [vmem:[#allocation2 + $0x34] sm:$0x7] %v1292_v61  ;;  %1575 = vrot.lane.b32.xlu0 %v14180_v8, %s13540_s14  ;;  %v444_v55 = vshrl.u32 %v336_v36, 16 }
 0x1b9   : > { %v1913_v31 = vrot.slane %v1911_v4, 5  ;;  %v11559_v10 = vpack.c.bf16 %v1176_v45, %v1176_v45  ;;  %1781 = vrot.lane.b32.xlu1 %v14254_v16, %s13542_s16  ;;  %v1943_v20 = vpop.permute.xlu0 %1942  ;;  %v14400_v13 = vld [vmem:[#allocation2 + $0xc] sm:$0xf]  ;;  %v441_v29 = vsel %vm13795_vm10, %v433_v21, %v440_v38  ;;  %v13349_v0 = vld [vmem:[%s13750_s22 + $0x24] sm:$0xf]  ;;  %v1916_v47 = vrot.slane %v1914_v53, 6 }
 0x1ba   : > { %v456_v25 = vshll.u32 %v13349_v0, 16  ;;  %v1273_v8 = vsel %vm13775_vm7, %v1264_v27, %v14339_v48  ;;  %v1949_v57 = vadd.f32 %v1943_v20, %v18889_v62  ;;  %v11140_v16 = vcombine.low %v2757_v43, %v14400_v13  ;;  %793 = vst.msk [vmem:[#allocation2 + $0x1c] sm:$0xf] %vm780_vm14, %v441_v29  ;;  %v18890_v53 = vld [vmem:[#allocation25_spill] sm:$0xff]  ;;  %v343_v61 = vld [vmem:[%s13750_s22 + $0x3c] sm:$0xf] }
 0x1bb   : > { %1290 = vst.msk [vmem:[#allocation2 + $0x30] sm:$0xf] %vm980_vm5, %v1273_v8  ;;  %v1205_v49 = vshrl.u32 %v11559_v10, 16  ;;  %v1706_v21 = vsel %vm14078_vm12, %v14220_v5, %v14292_v28  ;;  %v14421_v48 = vsel %vm14066_vm6, %v1899_v32, %v14166_v3  ;;  %v446_v39 = vrot.slane %v444_v55, 7  ;;  %v344_v38 = vld [vmem:[%s13750_s22 + $0x40] sm:$0xf] }
 0x1bc   : > { %v14423_v4 = vpack.c.bf16 %v1949_v57, %v1949_v57  ;;  %1577 = vrot.lane.b32.xlu0 %v14276_v34, %s13540_s14  ;;  %12233 = vmatmul.mubr.msk.bf16.vlgmr.msra.gmra.mxu0 %vm836_vm1, %v11140_v16  ;;  %v458_v1 = vor.u32 %v456_v25, %v18890_v53  ;;  %v442_v45 = vrot.slane %v14377_v14, 4  ;;  %v447_v17 = vshll.u32 %v336_v36, 16  ;;  %v342_v16 = vld [vmem:[%s13750_s22 + $0x38] sm:$0xf]  ;;  %v352_v28 = vld [vmem:[%s13750_s22 + $0x60] sm:$0xf] }
 0x1bd   : > { %v1207_v27 = vrot.slane %v1205_v49, 7  ;;  %v1208_v20 = vshll.u32 %v11559_v10, 16  ;;  %1646 = vrot.lane.b32.xlu1 %v14325_v63, %s13541_s15  ;;  %v1780_v34 = vsel %vm13795_vm10, %v1772_v52, %v1779_v23  ;;  %v451_v32 = vrot.slane %v446_v39, 4  ;;  %v14444_v10 = vld [vmem:[%s13750_s22 + $0x44] sm:$0xf]  ;;  %s13013_s14 = smul.u32 144, %s297_s13 }
 0x1be   : > { %v1917_v55 = vor.u32 %v1916_v47, %v1913_v31  ;;  %v1980_v43 = vshll.u32 %v14423_v4, 16  ;;  %v18891_v29 = vrot.slane %v14182_v2, 4  ;;  %v449_v36 = vor.u32 %v447_v17, %v446_v39  ;;  %v1222_v63 = vld [vmem:[#allocation2 + $0x2c] sm:$0x3]  ;;  %v346_v47 = vld [vmem:[%s13750_s22 + $0x48] sm:$0xf] }
 0x1bf   : > { %v1210_v52 = vor.u32 %v1208_v20, %v1207_v27  ;;  %v459_v23 = vsel %vm13795_vm10, %v451_v32, %v458_v1  ;;  %v424_v2 = vrot.slane %v14097_v41, 4  ;;  %v429_v31 = vshll.u32 %v14311_v37, 16  ;;  %v355_v32 = vld [vmem:[%s13750_s22 + $0x6c] sm:$0xf] }
 0x1c0   : > { %v1849_v14 = vsel %vm13775_vm7, %v18891_v29, %v1848_v7  ;;  %v1984_v7 = vshrl.u32 %v14423_v4, 16  ;;  %1644 = vrot.lane.b32.xlu0 %v14207_v58, %s13541_s15  ;;  %795 = vst.msk [vmem:[#allocation2 + $0x24] sm:$0xf] %vm780_vm14, %v459_v23  ;;  %v450_v0 = vsel %vm13795_vm10, %v442_v45, %v449_v36  ;;  %v507_v25 = vshrl.u32 %v343_v61, 16  ;;  %v14481_v45 = vld [vmem:[%s13750_s22 + $0x68] sm:$0xf] }
 0x1c1   : > { %v516_v8 = vshrl.u32 %v344_v38, 16  ;;  %v18894_v62 = vrot.slane %v14218_v18, 4  ;;  %1785 = vrot.lane.b32.xlu1 %v1780_v34, %s13542_s16  ;;  %794 = vst.msk [vmem:[#allocation2 + $0x20] sm:$0xf] %vm780_vm14, %v450_v0  ;;  %v431_v58 = vor.u32 %v429_v31, %v14357_v35  ;;  %v519_v37 = vshll.u32 %v344_v38, 16  ;;  %v18896_v36 = vld [vmem:[#allocation27_spill] sm:$0xff] }
 0x1c2   : > { %v525_v57 = vshrl.u32 %v14444_v10, 16  ;;  %v18895_v39 = vrot.slane %v14166_v3, 4  ;;  %v509_v53 = vrot.slane %v507_v25, 7  ;;  %v534_v38 = vshrl.u32 %v346_v47, 16 }
 0x1c3   : > { %v1211_v41 = vsel %vm13795_vm10, %v18894_v62, %v1210_v52  ;;  %v518_v1 = vrot.slane %v516_v8, 7  ;;  %v432_v35 = vsel %vm13795_vm10, %v424_v2, %v431_v58  ;;  %v537_v27 = vshll.u32 %v346_v47, 16  ;;  %v347_v47 = vld [vmem:[%s13750_s22 + $0x4c] sm:$0xf] }
 0x1c4   : > { %v1223_v49 = vsel %vm14448_vm9, %v1211_v41, %v1222_v63  ;;  %v14478_v18 = vsel %vm14066_vm6, %v18895_v39, %v1917_v55  ;;  %v527_v17 = vrot.slane %v525_v57, 7  ;;  %1711 = vrot.lane.b32.xlu0 %v14126_v30, %s13541_s15  ;;  %792 = vst.msk [vmem:[#allocation2 + $0x18] sm:$0xf] %vm780_vm14, %v432_v35  ;;  %v514_v40 = vrot.slane %v509_v53, 4  ;;  %v14496_v30 = vld [vmem:[%s18717_s3 + $0x8] sm:$0xf] }
 0x1c5   : > { %1224 = vst [vmem:[#allocation2 + $0x2c] sm:$0x3] %v1223_v49  ;;  %v521_v3 = vor.u32 %v519_v37, %v518_v1  ;;  %v498_v20 = vshrl.u32 %v342_v16, 16  ;;  %v510_v34 = vshll.u32 %v343_v61, 16  ;;  %1854 = vrot.lane.b32.xlu1 %v1849_v14, %s13542_s16  ;;  %v14490_v29 = vrot.slane %v534_v38, 7 }
 0x1c6   : > { %v532_v55 = vrot.slane %v527_v17, 4  ;;  %v496_v52 = vrot.slane %v18896_v36, 4  ;;  %v501_v63 = vshll.u32 %v342_v16, 16  ;;  %v2985_v14 = vsel %vm2983_vm13, %v14259_v22, 0  ;;  %v349_v49 = vld [vmem:[%s13750_s22 + $0x54] sm:$0xf] }
 0x1c7   : > { %v522_v23 = vsel %vm13795_vm10, %v514_v40, %v521_v3  ;;  %v500_v2 = vrot.slane %v498_v20, 7  ;;  %v512_v61 = vor.u32 %v510_v34, %v509_v53  ;;  %v539_v31 = vor.u32 %v537_v27, %v14490_v29  ;;  %12193 = vmatpush3.bf16.msra.mxu1 %v2985_v14 }
 0x1c8   : > { %802 = vst.msk [vmem:[#allocation2 + $0x40] sm:$0xf] %vm780_vm14, %v522_v23  ;;  %v523_v0 = vrot.slane %v518_v1, 4  ;;  %v528_v25 = vshll.u32 %v14444_v10, 16  ;;  %v606_v8 = vshrl.u32 %v14481_v45, 16  ;;  %v18897_v62 = vsel %vm14078_vm12, %v14149_v51, %v14186_v33  ;;  %13006 = vmatprep.subr.msk.bf16.mxu1 %vm2983_vm13, %v14496_v30 }
 0x1c9   : > { %1713 = vrot.lane.b32.xlu0 %v18897_v62, %s13541_s15  ;;  %v505_v22 = vrot.slane %v500_v2, 4  ;;  %v503_v41 = vor.u32 %v501_v63, %v500_v2  ;;  %v615_v58 = vshrl.u32 %v355_v32, 16  ;;  %v618_v37 = vshll.u32 %v355_v32, 16  ;;  %1783 = vrot.lane.b32.xlu1 %v14281_v15, %s13542_s16  ;;  %v348_v33 = vld [vmem:[%s13750_s22 + $0x50] sm:$0xf] }
 0x1ca   : > { %v540_v10 = vsel %vm13795_vm10, %v532_v55, %v539_v31  ;;  %v530_v57 = vor.u32 %v528_v25, %v527_v17  ;;  %v14519_v16 = vrot.slane %v606_v8, 7  ;;  %v541_v51 = vrot.slane %v14490_v29, 4  ;;  %v350_v17 = vld [vmem:[%s13750_s22 + $0x58] sm:$0xf]  ;;  %v351_v55 = vld [vmem:[%s13750_s22 + $0x5c] sm:$0xf] }
 0x1cb   : > { %804 = vst.msk [vmem:[#allocation2 + $0x48] sm:$0xf] %vm780_vm14, %v540_v10  ;;  %v513_v53 = vsel %vm13795_vm10, %v505_v22, %v512_v61  ;;  %v504_v1 = vsel %vm13795_vm10, %v496_v52, %v503_v41  ;;  %v14529_v15 = vrot.slane %v615_v58, 7  ;;  %v543_v35 = vshrl.u32 %v347_v47, 16  ;;  %v357_v58 = vld [vmem:[%s13750_s22 + $0x74] sm:$0xf] }
 0x1cc   : > { %v1287_v39 = vld [vmem:[#allocation2 + $0x2c] sm:$0xe]  ;;  %801 = vst.msk [vmem:[#allocation2 + $0x3c] sm:$0xf] %vm780_vm14, %v513_v53  ;;  %800 = vst.msk [vmem:[#allocation2 + $0x38] sm:$0xf] %vm780_vm14, %v504_v1  ;;  %v531_v27 = vsel %vm13795_vm10, %v523_v0, %v530_v57 }
 0x1cd   : > { %v1288_v38 = vsel %vm14317_vm3, %v14383_v46, %v1287_v39  ;;  %v613_v40 = vrot.slane %v14519_v16, 4  ;;  %v546_v3 = vshll.u32 %v347_v47, 16  ;;  %1715 = vrot.lane.b32.xlu0 %v1706_v21, %s13541_s15  ;;  %803 = vst.msk [vmem:[#allocation2 + $0x44] sm:$0xf] %vm780_vm14, %v531_v27  ;;  %v620_v46 = vor.u32 %v618_v37, %v14529_v15  ;;  %1923 = vrot.lane.b32.xlu1 %v14478_v18, %s13543_s19  ;;  %v14564_v47 = vld [vmem:[%s13750_s22 + $0x70] sm:$0xf] }
 0x1ce   : > { %1289 = vst [vmem:[#allocation2 + $0x2c] sm:$0xe] %v1288_v38  ;;  %v545_v20 = vrot.slane %v543_v35, 7  ;;  %v552_v34 = vshrl.u32 %v348_v33, 16  ;;  %v555_v32 = vshll.u32 %v348_v33, 16  ;;  %v14551_v29 = vrot.slane %v1980_v43, 5 }
 0x1cf   : > { %v561_v36 = vshrl.u32 %v349_v49, 16  ;;  %v564_v52 = vshll.u32 %v349_v49, 16  ;;  %v570_v5 = vshrl.u32 %v350_v17, 16  ;;  %v621_v21 = vsel %vm13795_vm10, %v613_v40, %v620_v46  ;;  %v14571_v37 = vld [vmem:[%s13750_s22 + $0x78] sm:$0xf]  ;;  %s18485_s15 = scalar_lea.vmem [#allocation7], %s13013_s14 }
 0x1d0   : > { %v548_v63 = vor.u32 %v546_v3, %v545_v20  ;;  %v550_v23 = vrot.slane %v545_v20, 4  ;;  %v554_v2 = vrot.slane %v552_v34, 7  ;;  %813 = vst.msk [vmem:[#allocation2 + $0x6c] sm:$0xf] %vm780_vm14, %v621_v21  ;;  %v573_v14 = vshll.u32 %v350_v17, 16  ;;  %s10955_s17 = sshll.u32 %s18485_s15, 4  ;;  %s18662_s17 = int_to_ptr.vmem [resolvable:$true] %s10955_s17 }
 0x1d1   : > { %v563_v61 = vrot.slane %v561_v36, 7  ;;  %v572_v43 = vrot.slane %v570_v5, 7  ;;  %v579_v31 = vshrl.u32 %v351_v55, 16  ;;  %1850 = vrot.lane.b32.xlu0 %v14236_v50, %s13542_s16  ;;  %v588_v8 = vshrl.u32 %v352_v28, 16  ;;  %1852 = vrot.lane.b32.xlu1 %v14290_v6, %s13542_s16  ;;  %v359_v49 = vld [vmem:[%s13750_s22 + $0x7c] sm:$0xf] }
 0x1d2   : > { %v549_v18 = vsel %vm13795_vm10, %v541_v51, %v548_v63  ;;  %v557_v0 = vor.u32 %v555_v32, %v554_v2  ;;  %v559_v25 = vrot.slane %v554_v2, 4  ;;  %vm1058_vm6 = vsmask.f32 7946  ;;  %v353_v20 = vld [vmem:[%s13750_s22 + $0x64] sm:$0xf]  ;;  %s13087_s16 = smul.u32 2304, %s13608_s28 }
 0x1d3   : > { %805 = vst.msk [vmem:[#allocation2 + $0x4c] sm:$0xf] %vm780_vm14, %v549_v18  ;;  %v566_v62 = vor.u32 %v564_v52, %v563_v61  ;;  %v568_v22 = vrot.slane %v563_v61, 4  ;;  %v575_v41 = vor.u32 %v573_v14, %v572_v43  ;;  %v581_v50 = vrot.slane %v579_v31, 7  ;;  %v14602_v52 = vld [vmem:[%s13750_s22 + $0x80] sm:$0xf]  ;;  %vm14637_vm0 = vmand %vm1057_vm11, %vm1058_vm6 }
 0x1d4   : > { %v558_v10 = vsel %vm13795_vm10, %v550_v23, %v557_v0  ;;  %v14575_v57 = vrot.slane %v588_v8, 7  ;;  %v591_v51 = vshll.u32 %v352_v28, 16  ;;  %v577_v33 = vrot.slane %v572_v43, 4  ;;  %v361_v63 = vld [vmem:[%s13750_s22 + $0x84] sm:$0xf]  ;;  %s13466_s21 = scalar_lea.vmem %s18662_s17, 2304 }
 0x1d5   : > { %806 = vst.msk [vmem:[#allocation2 + $0x50] sm:$0xf] %vm780_vm14, %v558_v10  ;;  %v567_v6 = vsel %vm13795_vm10, %v559_v25, %v566_v62  ;;  %v576_v39 = vsel %vm13795_vm10, %v568_v22, %v575_v41  ;;  %v586_v53 = vrot.slane %v581_v50, 4  ;;  %v582_v1 = vshll.u32 %v351_v55, 16  ;;  %1919 = vrot.lane.b32.xlu0 %v14269_v12, %s13543_s19  ;;  %1988 = vrot.lane.b32.xlu1 %v14159_v54, %s13543_s19  ;;  %p13467_p6 = scmp.ne.s32.totalorder %s18662_s17, %s13466_s21 }
 0x1d6   : > { %807 = vst.msk [vmem:[#allocation2 + $0x54] sm:$0xf] %vm780_vm14, %v567_v6  ;;  %808 = vst.msk [vmem:[#allocation2 + $0x58] sm:$0xf] %vm780_vm14, %v576_v39  ;;  %v593_v35 = vor.u32 %v591_v51, %v14575_v57  ;;  %v624_v17 = vshrl.u32 %v14564_v47, 16  ;;  %v633_v38 = vshrl.u32 %v357_v58, 16  ;;  %v1983_v12 = vsel %vm14078_vm12, %v14295_v11, %v14551_v29 }
 0x1d7   : > { %v636_v27 = vshll.u32 %v357_v58, 16  ;;  %v584_v40 = vor.u32 %v582_v1, %v581_v50  ;;  %v642_v3 = vshrl.u32 %v14571_v37, 16  ;;  %v651_v46 = vshrl.u32 %v359_v49, 16  ;;  %v18901_v51 = vld [vmem:[#allocation12_spill] sm:$0xff]  ;;  %v362_v39 = vld [vmem:[%s13750_s22 + $0x88] sm:$0xf]  ;;  %p13468_p9 = pnand %p13467_p6, %p13625_p5 }
 0x1d8   : > { %v594_v34 = vsel %vm13795_vm10, %v586_v53, %v593_v35  ;;  %v626_v32 = vrot.slane %v624_v17, 7  ;;  %v14599_v55 = vrot.slane %v633_v38, 7  ;;  %v654_v36 = vshll.u32 %v359_v49, 16  ;;  %v1060_v1 = vld [vmem:[#allocation2 + $0x10] sm:$0xc] }
 0x1d9   : > { %810 = vst.msk [vmem:[#allocation2 + $0x60] sm:$0xf] %vm780_vm14, %v594_v34  ;;  %v585_v54 = vsel %vm13795_vm10, %v577_v33, %v584_v40  ;;  %v644_v5 = vrot.slane %v642_v3, 7  ;;  %v14607_v28 = vrot.slane %v651_v46, 7  ;;  %v595_v21 = vrot.slane %v14575_v57, 4  ;;  %1994 = vrot.lane.b32.xlu0 %v1984_v7, %s13543_s19  ;;  %p13469_p10 = pneg %p13468_p9 }
 0x1da   : > { %809 = vst.msk [vmem:[#allocation2 + $0x5c] sm:$0xf] %vm780_vm14, %v585_v54  ;;  %v631_v23 = vrot.slane %v626_v32, 4  ;;  %v638_v2 = vor.u32 %v636_v27, %v14599_v55  ;;  %v597_v61 = vshrl.u32 %v353_v20, 16  ;;  %v600_v43 = vshll.u32 %v353_v20, 16 }
 0x1db   : > { %v18898_v14 = vsel %vm14078_vm12, %v14196_v26, %v14245_v60  ;;  %v649_v31 = vrot.slane %v644_v5, 4  ;;  %v656_v18 = vor.u32 %v654_v36, %v14607_v28  ;;  %v622_v4 = vrot.slane %v14529_v15, 4  ;;  %v363_v15 = vld [vmem:[%s13750_s22 + $0x8c] sm:$0xf]  ;;  %v364_v57 = vld [vmem:[%s13750_s22 + $0x90] sm:$0xf] }
 0x1dc   : > { %1990 = vrot.lane.b32.xlu1 %v18898_v14, %s13543_s19  ;;  %v627_v7 = vshll.u32 %v14564_v47, 16  ;;  %v639_v0 = vsel %vm13795_vm10, %v631_v23, %v638_v2  ;;  %v599_v25 = vrot.slane %v597_v61, 7  ;;  %v609_v8 = vshll.u32 %v14481_v45, 16  ;;  %v365_v46 = vld [vmem:[%s13750_s22 + $0x94] sm:$0xf] }
 0x1dd   : > { %v660_v62 = vshrl.u32 %v14602_v52, 16  ;;  %815 = vst.msk [vmem:[#allocation2 + $0x74] sm:$0xf] %vm780_vm14, %v639_v0  ;;  %v657_v26 = vsel %vm13795_vm10, %v649_v31, %v656_v18  ;;  %v669_v22 = vshrl.u32 %v361_v63, 16  ;;  %v672_v41 = vshll.u32 %v361_v63, 16  ;;  %1921 = vrot.lane.b32.xlu0 %v14421_v48, %s13543_s19  ;;  %v18903_v18 = vld [vmem:[#allocation14_spill] sm:$0xff] }
 0x1de   : > { %v629_v60 = vor.u32 %v627_v7, %v626_v32  ;;  %817 = vst.msk [vmem:[#allocation2 + $0x7c] sm:$0xf] %vm780_vm14, %v657_v26  ;;  %v602_v45 = vor.u32 %v600_v43, %v599_v25  ;;  %v604_v50 = vrot.slane %v599_v25, 4  ;;  %v611_v58 = vor.u32 %v609_v8, %v14519_v16  ;;  %v1049_v53 = vpop.permute.xlu0 %1048  ;;  %v11197_v20 = vld [vmem:[%s18717_s3 + $0xc] sm:$0xf] }
 0x1df   : > { %v662_v10 = vrot.slane %v660_v62, 7  ;;  %v671_v33 = vrot.slane %v669_v22, 7  ;;  %v640_v49 = vrot.slane %v14599_v55, 4  ;;  %v645_v6 = vshll.u32 %v14571_v37, 16  ;;  %v366_v54 = vld [vmem:[%s13750_s22 + $0x98] sm:$0xf]  ;;  %13007 = vmatprep.subr.msk.bf16.mxu0 %vm2983_vm13, %v11197_v20 }
 0x1e0   : > { %2018 = vrot.lane.b32.xlu1 %v18901_v51, %s13544_s20  ;;  %v630_v48 = vsel %vm13795_vm10, %v622_v4, %v629_v60  ;;  %v603_v16 = vsel %vm13795_vm10, %v595_v21, %v602_v45  ;;  %v612_v35 = vsel %vm13795_vm10, %v604_v50, %v611_v58  ;;  %v687_v38 = vshrl.u32 %v363_v15, 16  ;;  %s13470_s22 = sshll.u32 %s13545_s29, 4  ;;  %s13471_s22 = int_to_ptr.vmem [resolvable:$false] %s13470_s22 }
 0x1e1   : > { %814 = vst.msk [vmem:[#allocation2 + $0x70] sm:$0xf] %vm780_vm14, %v630_v48  ;;  %v667_v17 = vrot.slane %v662_v10, 4  ;;  %v1061_v27 = vsel %vm14637_vm0, %v1049_v53, %v1060_v1  ;;  %811 = vst.msk [vmem:[#allocation2 + $0x64] sm:$0xf] %vm780_vm14, %v603_v16  ;;  %v674_v37 = vor.u32 %v672_v41, %v671_v33  ;;  %v647_v40 = vor.u32 %v645_v6, %v644_v5  ;;  %v18902_v5 = vld [vmem:[#allocation13_spill] sm:$0xff]  ;;  %p13473_p11 = scmp.lt.s32.totalorder %s18662_s17, %s13471_s22 }
 0x1e2   : > { %812 = vst.msk [vmem:[#allocation2 + $0x68] sm:$0xf] %vm780_vm14, %v612_v35  ;;  %v696_v3 = vshrl.u32 %v364_v57, 16  ;;  %1062 = vst [vmem:[#allocation2 + $0x10] sm:$0xc] %v1061_v27  ;;  %1992 = vrot.lane.b32.xlu0 %v1983_v12, %s13543_s19  ;;  %v689_v34 = vrot.slane %v687_v38, 7  ;;  %s18668_s19 = scalar_lea.hbm %s18721_s7, %s13087_s16 }
 0x1e3   : > { %v699_v32 = vshll.u32 %v364_v57, 16  ;;  %v676_v55 = vrot.slane %v671_v33, 4  ;;  %v678_v36 = vshrl.u32 %v362_v39, 16  ;;  %v675_v21 = vsel %vm13795_vm10, %v667_v17, %v674_v37  ;;  %v5588_v37 = vld [vmem:[#allocation2 + $0x8] sm:$0xc]  ;;  %s13472_s8 = scalar_lea.vmem %s13471_s22, 4608 }
 0x1e4   : > { %2022 = vrot.lane.b32.xlu1 %v18902_v5, %s13544_s20  ;;  %v648_v42 = vsel %vm13795_vm10, %v640_v49, %v647_v40  ;;  %v698_v63 = vrot.slane %v696_v3, 7  ;;  %v681_v23 = vshll.u32 %v362_v39, 16  ;;  %819 = vst.msk [vmem:[#allocation2 + $0x84] sm:$0xf] %vm780_vm14, %v675_v21  ;;  %v694_v11 = vrot.slane %v689_v34, 4  ;;  %v1051_v8 = vpop.permute.xlu0 %1050  ;;  %v18904_v49 = vld [vmem:[#allocation11_spill] sm:$0xff]  ;;  %p13474_p12 = scmp.lt.s32.totalorder %s13472_s8, %s13466_s21 }
 0x1e5   : > { %816 = vst.msk [vmem:[#allocation2 + $0x78] sm:$0xf] %vm780_vm14, %v648_v42  ;;  %v680_v29 = vrot.slane %v678_v36, 7  ;;  %v658_v12 = vrot.slane %v14607_v28, 4  ;;  %v663_v2 = vshll.u32 %v14602_v52, 16  ;;  %v690_v43 = vshll.u32 %v363_v15, 16 }
 0x1e6   : > { %v701_v61 = vor.u32 %v699_v32, %v698_v63  ;;  %v705_v14 = vshrl.u32 %v365_v46, 16  ;;  %v714_v31 = vshrl.u32 %v366_v54, 16  ;;  %2020 = vrot.lane.b32.xlu0 %v18903_v18, %s13544_s20  ;;  %v717_v25 = vshll.u32 %v366_v54, 16  ;;  %1063 = vst.msk [vmem:[#allocation2 + $0x14] sm:$0xf] %vm980_vm5, %v1051_v8  ;;  %v14722_v32 = vld [vmem:[#allocation2 + $0x8] sm:$0xff]   ;;  %p13475_p13 = por %p13474_p12, %p13473_p11 }
 0x1e7   : > { %v683_v4 = vor.u32 %v681_v23, %v680_v29  ;;  %v665_v7 = vor.u32 %v663_v2, %v662_v10  ;;  %v685_v0 = vrot.slane %v680_v29, 4  ;;  %v692_v26 = vor.u32 %v690_v43, %v689_v34  ;;  %v2792_v39 = vld [vmem:[#allocation2 + $0x8] sm:$0xe]  ;;  %v1132_v2 = vpop.permute.xlu1 %1131  ;;  %v1153_v43 = vld [vmem:[#allocation2 + $0x24] sm:$0x1]  ;;  %s18673_s20 = scalar_lea.sflag [#allocation6], %s297_s13 }
 0x1e8   : > { %v702_v62 = vsel %vm13795_vm10, %v694_v11, %v701_v61  ;;  %v707_v60 = vrot.slane %v705_v14, 7  ;;  %v716_v28 = vrot.slane %v714_v31, 7  ;;  %v703_v41 = vrot.slane %v698_v63, 4  ;;  %v1134_v48 = vpop.permute.xlu0 %1133  ;;  %p13476_p0 = pnand %p13475_p13, %p13469_p10 }
 0x1e9   : > { %822 = vst.msk [vmem:[#allocation2 + $0x90] sm:$0xf] %vm780_vm14, %v702_v62  ;;  %v684_v52 = vsel %vm13795_vm10, %v676_v55, %v683_v4  ;;  %v666_v22 = vsel %vm13795_vm10, %v658_v12, %v665_v7  ;;  %v708_v15 = vshll.u32 %v365_v46, 16  ;;  %v693_v45 = vsel %vm13795_vm10, %v685_v0, %v692_v26  ;;  %v1067_v4 = vld [vmem:[#allocation2 + $0x18] sm:$0xf] }
 0x1ea   : > { %820 = vst.msk [vmem:[#allocation2 + $0x88] sm:$0xf] %vm780_vm14, %v684_v52  ;;  %818 = vst.msk [vmem:[#allocation2 + $0x80] sm:$0xf] %vm780_vm14, %v666_v22  ;;  %v712_v50 = vrot.slane %v707_v60, 4  ;;  %v719_v58 = vor.u32 %v717_v25, %v716_v28  ;;  %v721_v10 = vrot.slane %v716_v28, 4  ;;  %v11102_v1 = vcombine.low %v2792_v39, %v14400_v13 }
 0x1eb   : > { %821 = vst.msk [vmem:[#allocation2 + $0x8c] sm:$0xf] %vm780_vm14, %v693_v45  ;;  %v710_v57 = vor.u32 %v708_v15, %v707_v60  ;;  %v4182_v51 = vsel %vm2983_vm13, %v11197_v20, 0  ;;  %vm18742_vm12 = vcmask 1046528   ;;  %v11296_v40 = vcombine.low %v5588_v37, %v14400_v13  ;;  %v1362_v26 = vld [vmem:[#allocation2 + $0x34] sm:$0xc] }
 0x1ec   : > { %v720_v33 = vsel %vm13795_vm10, %v712_v50, %v719_v58  ;;  %v729_v6 = vsel %vm13795_vm10, %v721_v10, %v18904_v49  ;;  %12307 = vmatpush3.bf16.msra.mxu0 %v4182_v51  ;;  %1149 = vst.msk [vmem:[#allocation2 + $0x1c] sm:$0xf] %vm980_vm5, %v1134_v48  ;;  %v2892_v35 = vrot.slane %v11102_v1, 1  ;;  %v4405_v38 = vshrl.u32 %v11102_v1, 16  ;;  %v1445_v58 = vld [vmem:[#allocation2 + $0x48] sm:$0x1] }
 0x1ed   : > { %824 = vst.msk [vmem:[#allocation2 + $0x98] sm:$0xf] %vm780_vm14, %v720_v33  ;;  %825 = vst.msk [vmem:[#allocation2 + $0x9c] sm:$0xf] %vm780_vm14, %v729_v6  ;;  %v711_v53 = vsel %vm13795_vm10, %v703_v41, %v710_v57  ;;  %v14710_v16 = vld [vmem:[#allocation2 + $0x10] sm:$0xff]   ;;  %v4408_v27 = vshll.u32 %v11102_v1, 16 }
 0x1ee   : > { %823 = vst.msk [vmem:[#allocation2 + $0x94] sm:$0xf] %vm780_vm14, %v711_v53  ;;  %12236 = vmatprep.mubr.msk.bf16.mxu0 %vm836_vm1, %v14710_v16  ;;  %v2893_v17 = vrot.slane %v14710_v16, 1  ;;  %v4407_v3 = vrot.slane %v4405_v38, 1  ;;  %v4412_v20 = vshrl.u32 %v14710_v16, 16  ;;  %v4415_v34 = vshll.u32 %v14710_v16, 16 }
 0x1ef   : > { %v4410_v46 = vrot.slane %v4408_v27, 2  ;;  %v14724_v55 = vld [vmem:[#allocation2 + $0x10] sm:$0xff]   ;;  %vm18741_vm10 = vcmask 1045504   ;;  %vm18740_vm14 = vsmask.f32 6400  ;;  %v5594_v5 = vrot.slane %v11296_v40, 2 }
 0x1f0   : > { %v2894_v59 = vsel %vm18742_vm12, %v2892_v35, %v2893_v17  ;;  %v4414_v36 = vrot.slane %v4412_v20, 1  ;;  %v4417_v54 = vrot.slane %v4415_v34, 2  ;;  %v18747_v21 = vrot.slane %v14710_v16, 2  ;;  %v1366_v10 = vld [vmem:[#allocation2 + $0x3c] sm:$0xf] }
 0x1f1   : > { %12194 = vmatprep.mubr.msk.bf16.mxu1 %vm836_vm1, %v2894_v59  ;;  %v4411_v42 = vor.u32 %v4410_v46, %v4407_v3  ;;  %v18745_v23 = vrot.slane %v14722_v32, 1  ;;  %v18744_v11 = vrot.slane %v14724_v55, 1  ;;  %vm1151_vm11 = vcmask 57376   ;;  %v1728_v35 = vld [vmem:[#allocation2 + $0x6c] sm:$0x1] }
 0x1f2   : > { %v14727_v63 = vor.u32 %v4417_v54, %v4414_v36  ;;  %v14732_v13 = vsel %vm18741_vm10, %v5594_v5, %v18747_v21  ;;  %vm14748_vm6 = vmand %vm1151_vm11, %vm369_vm4  ;;  %vm18910_vm4 = vsmask.f32 7938  ;;  %vm1143_vm10 = vcmask 60451   ;;  %v14797_v40 = vld [vmem:[%s18717_s3 + $0x10] sm:$0xf] }
 0x1f3   : > { %v14745_v12 = vsel %vm18742_vm12, %v18745_v23, %v18744_v11  ;;  %vm14765_vm11 = vmand %vm980_vm5, %vm18910_vm4  ;;  %v3631_v38 = vsel %vm2983_vm13, %v14496_v30, 0  ;;  %v13156_v30 = vld [vmem:[#allocation2 + $0x28] sm:$0xff]  }
 0x1f4   : > { %v14738_v29 = vsel %vm18740_vm14, %v4411_v42, %v14727_v63  ;;  %vm14756_vm14 = vmand %vm980_vm5, %vm18907_vm2  ;;  %vm1144_vm2 = vsmask.f32 7950 }
 0x1f5   : > { %vm14774_vm12 = vmand %vm1143_vm10, %vm1144_vm2  ;;  %vm18915_vm10 = vcmask 1046528  }
 0x1f6   : > { %vm18916_vm4 = vmmov %vm18915_vm10 }
 0x1f7   : > { %vm18917_vm2 = vmmov %vm18916_vm4 }
 0x203   : > { %v1138_v14 = vpop.permute.xlu1 %1137 }
 0x204   : > { %v1154_v31 = vsel %vm14748_vm6, %v1138_v14, %v1153_v43  ;;  %v2899_v43 = vrot.slane %v13156_v30, 1  ;;  %v1517_v14 = vld [vmem:[#allocation2 + $0x50] sm:$0x3] }
 0x205   : > { %1155 = vst [vmem:[#allocation2 + $0x24] sm:$0x1] %v1154_v31 }
 0x206   : > { %v1136_v0 = vpop.permute.xlu0 %1135 }
 0x207   : > { %v1053_v7 = vpop.permute.xlu1 %1052  ;;  %1150 = vst.msk [vmem:[#allocation2 + $0x20] sm:$0xf] %vm980_vm5, %v1136_v0 }
 0x208   : > { %v1068_v25 = vsel %vm14756_vm14, %v1053_v7, %v1067_v4 }
 0x209   : > { %1069 = vst [vmem:[#allocation2 + $0x18] sm:$0xf] %v1068_v25 }
 0x20b   : > { %v1354_v62 = vpop.permute.xlu1 %1353 }
 0x20c   : > { %v1363_v60 = vsel %vm14637_vm0, %v1354_v62, %v1362_v26  ;;  %v1216_v28 = vld [vmem:[#allocation2 + $0x24] sm:$0xf] }
 0x20d   : > { %1364 = vst [vmem:[#allocation2 + $0x34] sm:$0xc] %v1363_v60  ;;  %v1217_v52 = vsel %vm14765_vm11, %v14362_v24, %v1216_v28 }
 0x20e   : > { %1218 = vst [vmem:[#allocation2 + $0x24] sm:$0xf] %v1217_v52 }
 0x20f   : > { %v1429_v41 = vpop.permute.xlu1 %1428 }
 0x210   : > { %v1146_v15 = vld [vmem:[#allocation2 + $0x18] sm:$0x8] }
 0x211   : > { %v1147_v45 = vsel %vm14774_vm12, %v1132_v2, %v1146_v15 }
 0x212   : > { %1148 = vst [vmem:[#allocation2 + $0x18] sm:$0x8] %v1147_v45 }
 0x213   : > { %v1431_v50 = vpop.permute.xlu1 %1430 }
 0x214   : > { %1443 = vst.msk [vmem:[#allocation2 + $0x40] sm:$0xf] %vm980_vm5, %v1431_v50  ;;  %v13157_v37 = vld [vmem:[#allocation2 + $0x30] sm:$0xff]   ;;  %v1586_v50 = vld [vmem:[#allocation2 + $0x58] sm:$0x7] }
 0x215   : > { %v13155_v48 = vld [vmem:[#allocation2 + $0x20] sm:$0xff]   ;;  %v2901_v5 = vrot.slane %v13157_v37, 1 }
 0x216   : > { %v1435_v57 = vpop.permute.xlu0 %1434  ;;  %v2897_v1 = vrot.slane %v13155_v48, 1 }
 0x217   : > { %v1446_v24 = vsel %vm14748_vm6, %v1435_v57, %v1445_v58  ;;  %v1358_v51 = vpop.permute.xlu1 %1357  ;;  %v1655_v58 = vld [vmem:[#allocation2 + $0x60] sm:$0xf] }
 0x218   : > { %1447 = vst [vmem:[#allocation2 + $0x48] sm:$0x1] %v1446_v24  ;;  %v1367_v33 = vsel %vm14756_vm14, %v1358_v51, %v1366_v10  ;;  %v2900_v31 = vsel %vm18917_vm2, %v2897_v1, %v2899_v43 }
 0x219   : > { %1368 = vst [vmem:[#allocation2 + $0x3c] sm:$0xf] %v1367_v33  ;;  %v13154_v49 = vld [vmem:[#allocation2 + $0x18] sm:$0xff]  }
 0x21a   : > { %v1356_v6 = vpop.permute.xlu0 %1355  ;;  %12237 = vmatmul.mubr.msk.bf16.gmra.mxu0 %vm836_vm1, %v13154_v49  ;;  %v2895_v53 = vrot.slane %v13154_v49, 1  ;;  %v14833_v49 = vld [vmem:[%s18717_s3 + $0x14] sm:$0xf] }
 0x21b   : > { %1365 = vst.msk [vmem:[#allocation2 + $0x38] sm:$0xf] %vm980_vm5, %v1356_v6  ;;  %v1505_v39 = vpop.permute.xlu1 %1504  ;;  %12240 = vmatprep.mubr.msk.bf16.mxu0 %vm836_vm1, %v13155_v48  ;;  %13009 = vmatprep.subr.msk.bf16.mxu0 %vm2983_vm13, %v14833_v49 }
 0x21c   : > { %v2896_v27 = vsel %vm18915_vm10, %v2893_v17, %v2895_v53  ;;  %v2898_v59 = vsel %vm18916_vm4, %v2895_v53, %v2897_v1  ;;  %vm18918_vm10 = vmmov %vm18917_vm2  ;;  %v1794_v1 = vld [vmem:[#allocation2 + $0x74] sm:$0x3] }
 0x21d   : > { %12195 = vmatmul.mubr.msk.bf16.vlgmr.msra.gmra.mxu1 %vm836_vm1, %v2896_v27  ;;  %v2902_v7 = vsel %vm18918_vm10, %v2899_v43, %v2901_v5  ;;  %vm18919_vm4 = vmmov %vm18917_vm2 }
 0x21e   : > { %v1433_v3 = vpop.permute.xlu0 %1432  ;;  %12198 = vmatprep.mubr.msk.bf16.mxu1 %vm836_vm1, %v2898_v59  ;;  %12269 = vmatpush3.bf16.msra.mxu1 %v3631_v38  ;;  %vm18920_vm10 = vmmov %vm18917_vm2 }
 0x21f   : > { %v1513_v46 = vld [vmem:[#allocation2 + $0x48] sm:$0xf]  ;;  %1444 = vst.msk [vmem:[#allocation2 + $0x44] sm:$0xf] %vm980_vm5, %v1433_v3  ;;  %v1718_v20 = vpop.permute.xlu1 %1717  ;;  %13008 = vmatprep.subr.msk.bf16.mxu1 %vm2983_vm13, %v14797_v40 }
 0x220   : > { %v1440_v17 = vld [vmem:[#allocation2 + $0x3c] sm:$0x8]  ;;  %v1514_v34 = vsel %vm14765_vm11, %v1505_v39, %v1513_v46  ;;  %v1729_v36 = vsel %vm14748_vm6, %v1718_v20, %v1728_v35 }
 0x221   : > { %v1441_v54 = vsel %vm14774_vm12, %v1429_v41, %v1440_v17  ;;  %1515 = vst [vmem:[#allocation2 + $0x48] sm:$0xf] %v1514_v34  ;;  %1730 = vst [vmem:[#allocation2 + $0x6c] sm:$0x1] %v1729_v36 }
 0x222   : > { %1442 = vst [vmem:[#allocation2 + $0x3c] sm:$0x8] %v1441_v54  ;;  %v1507_v42 = vpop.permute.xlu0 %1506  ;;  %12241 = vmatmul.mubr.msk.bf16.gmra.mxu0 %vm836_vm1, %v13156_v30 }
 0x223   : > { %1516 = vst.msk [vmem:[#allocation2 + $0x4c] sm:$0xf] %vm980_vm5, %v1507_v42  ;;  %v1643_v2 = vpop.permute.xlu1 %1642  ;;  %12244 = vmatprep.mubr.msk.bf16.mxu0 %vm836_vm1, %v13157_v37  ;;  %v1863_v37 = vld [vmem:[#allocation2 + $0x7c] sm:$0x7] }
 0x225   : > { %12199 = vmatmul.mubr.msk.bf16.gmra.mxu1 %vm836_vm1, %v2900_v31 }
 0x226   : > { %v1574_v4 = vpop.permute.xlu0 %1573  ;;  %12202 = vmatprep.mubr.msk.bf16.mxu1 %vm836_vm1, %v2902_v7  ;;  %v13159_v25 = vld [vmem:[#allocation2 + $0x40] sm:$0xff]  }
 0x227   : > { %v1509_v0 = vpop.permute.xlu1 %1508  ;;  %v2905_v15 = vrot.slane %v13159_v25, 1 }
 0x228   : > { %v1518_v62 = vsel %vm14448_vm9, %v1509_v0, %v1517_v14  ;;  %v1790_v52 = vld [vmem:[#allocation2 + $0x6c] sm:$0xf] }
 0x229   : > { %1519 = vst [vmem:[#allocation2 + $0x50] sm:$0x3] %v1518_v62  ;;  %v13158_v26 = vld [vmem:[#allocation2 + $0x38] sm:$0xff]  }
 0x22a   : > { %v1576_v60 = vpop.permute.xlu0 %1575  ;;  %12245 = vmatmul.mubr.msk.bf16.gmra.mxu0 %vm836_vm1, %v13158_v26  ;;  %v2903_v41 = vrot.slane %v13158_v26, 1  ;;  %v13160_v24 = vld [vmem:[#allocation2 + $0x48] sm:$0xff]  }
 0x22b   : > { %1585 = vst.msk [vmem:[#allocation2 + $0x54] sm:$0xf] %vm980_vm5, %v1576_v60  ;;  %v1782_v28 = vpop.permute.xlu1 %1781  ;;  %12248 = vmatprep.mubr.msk.bf16.mxu0 %vm836_vm1, %v13159_v25  ;;  %v2907_v35 = vrot.slane %v13160_v24, 1 }
 0x22c   : > { %v1791_v45 = vsel %vm14765_vm11, %v1782_v28, %v1790_v52  ;;  %v2904_v10 = vsel %vm18919_vm4, %v2901_v5, %v2903_v41  ;;  %v2906_v57 = vsel %vm18917_vm2, %v2903_v41, %v2905_v15  ;;  %vm18921_vm4 = vmmov %vm18917_vm2 }
 0x22d   : > { %1792 = vst [vmem:[#allocation2 + $0x6c] sm:$0xf] %v1791_v45  ;;  %12203 = vmatmul.mubr.msk.bf16.gmra.mxu1 %vm836_vm1, %v2904_v10  ;;  %v2908_v3 = vsel %vm18920_vm10, %v2905_v15, %v2907_v35  ;;  %vm18931_vm10 = vcmask 1045504  }
 0x22e   : > { %v1578_v51 = vpop.permute.xlu0 %1577  ;;  %12206 = vmatprep.mubr.msk.bf16.mxu1 %vm836_vm1, %v2906_v57 }
 0x22f   : > { %v1587_v48 = vsel %vm14368_vm15, %v1578_v51, %v1586_v50  ;;  %v1647_v33 = vpop.permute.xlu1 %1646 }
 0x230   : > { %v1582_v6 = vld [vmem:[#allocation2 + $0x50] sm:$0xe]  ;;  %1588 = vst [vmem:[#allocation2 + $0x58] sm:$0x7] %v1587_v48  ;;  %v1656_v39 = vsel %vm14756_vm14, %v1647_v33, %v1655_v58  ;;  %v3846_v33 = vld [vmem:[#allocation2] sm:$0xf] }
 0x231   : > { %v1583_v53 = vsel %vm14317_vm3, %v1574_v4, %v1582_v6  ;;  %1657 = vst [vmem:[#allocation2 + $0x60] sm:$0xf] %v1656_v39  ;;  %v3847_v6 = vld [vmem:[#allocation2 + $0x4] sm:$0xf] }
 0x232   : > { %1584 = vst [vmem:[#allocation2 + $0x50] sm:$0xe] %v1583_v53  ;;  %v1645_v38 = vpop.permute.xlu0 %1644  ;;  %12249 = vmatmul.mubr.msk.bf16.gmra.mxu0 %vm836_vm1, %v13160_v24  ;;  %v2005_v24 = vld [vmem:[#allocation2 + $0x90] sm:$0x1]  ;;  %v11198_v22 = vcombine.low %v3846_v33, %v3847_v6 }
 0x233   : > { %1654 = vst.msk [vmem:[#allocation2 + $0x5c] sm:$0xf] %vm980_vm5, %v1645_v38  ;;  %v1786_v27 = vpop.permute.xlu1 %1785 }
 0x234   : > { %v1795_v59 = vsel %vm14448_vm9, %v1786_v27, %v1794_v1 }
 0x235   : > { %1796 = vst [vmem:[#allocation2 + $0x74] sm:$0x3] %v1795_v59  ;;  %12207 = vmatmul.mubr.msk.bf16.gmra.mxu1 %vm836_vm1, %v2908_v3  ;;  %v2031_v3 = vld [vmem:[#allocation2 + $0x98] sm:$0x3] }
 0x236   : > { %v1712_v46 = vpop.permute.xlu0 %1711 }
 0x237   : > { %v1651_v20 = vld [vmem:[#allocation2 + $0x58] sm:$0xc]  ;;  %v1855_v30 = vpop.permute.xlu1 %1854 }
 0x238   : > { %v1652_v17 = vsel %vm14637_vm0, %v1643_v2, %v1651_v20  ;;  %v1723_v34 = vld [vmem:[#allocation2 + $0x60] sm:$0x8]  ;;  %v1864_v36 = vsel %vm14368_vm15, %v1855_v30, %v1863_v37  ;;  %v1932_v2 = vld [vmem:[#allocation2 + $0x84] sm:$0xf]  ;;  %vm18922_vm15 = vmmov %vm18917_vm2 }
 0x239   : > { %1653 = vst [vmem:[#allocation2 + $0x58] sm:$0xc] %v1652_v17  ;;  %v1724_v54 = vsel %vm14774_vm12, %v1712_v46, %v1723_v34  ;;  %1865 = vst [vmem:[#allocation2 + $0x7c] sm:$0x7] %v1864_v36  ;;  %v13161_v5 = vld [vmem:[#allocation2 + $0x50] sm:$0xff]   ;;  %v3982_v46 = vshll.u32 %v11198_v22, 16 }
 0x23a   : > { %1725 = vst [vmem:[#allocation2 + $0x60] sm:$0x8] %v1724_v54  ;;  %12252 = vmatprep.mubr.msk.bf16.mxu0 %vm836_vm1, %v13161_v5  ;;  %v2909_v14 = vrot.slane %v13161_v5, 1  ;;  %v3980_v54 = vshrl.u32 %v11198_v22, 16  ;;  %v5060_v22 = vsel %vm2983_vm13, %v14833_v49, 0 }
 0x23b   : > { %v1714_v42 = vpop.permute.xlu0 %1713  ;;  %v1784_v43 = vpop.permute.xlu1 %1783 }
 0x23c   : > { %1726 = vst.msk [vmem:[#allocation2 + $0x64] sm:$0xf] %vm980_vm5, %v1714_v42  ;;  %1793 = vst.msk [vmem:[#allocation2 + $0x70] sm:$0xf] %vm980_vm5, %v1784_v43  ;;  %v2910_v19 = vsel %vm18921_vm4, %v2907_v35, %v2909_v14  ;;  %v1859_v25 = vld [vmem:[#allocation2 + $0x74] sm:$0xe] }
 0x23d   : > { %12210 = vmatprep.mubr.msk.bf16.mxu1 %vm836_vm1, %v2910_v19  ;;  %v3984_v43 = vrot.slane %v3982_v46, 1  ;;  %vm18932_vm4 = vmmov %vm18931_vm10 }
 0x23f   : > { %v1716_v31 = vpop.permute.xlu0 %1715  ;;  %v1924_v4 = vpop.permute.xlu1 %1923 }
 0x240   : > { %1727 = vst.msk [vmem:[#allocation2 + $0x68] sm:$0xf] %vm980_vm5, %v1716_v31  ;;  %v1933_v7 = vsel %vm14756_vm14, %v1924_v4, %v1932_v2  ;;  %v13162_v0 = vld [vmem:[#allocation2 + $0x58] sm:$0xff]   ;;  %vm18923_vm14 = vmmov %vm18917_vm2  ;;  %v3985_v31 = vor.u32 %v3984_v43, %v3980_v54 }
 0x241   : > { %1934 = vst [vmem:[#allocation2 + $0x84] sm:$0xf] %v1933_v7  ;;  %12253 = vmatmul.mubr.msk.bf16.gmra.mxu0 %vm836_vm1, %v13162_v0  ;;  %v2911_v60 = vrot.slane %v13162_v0, 1  ;;  %v1928_v15 = vld [vmem:[#allocation2 + $0x7c] sm:$0xc] }
 0x242   : > { %v13173_v4 = vld [vmem:[#allocation2 + $0x18] sm:$0xff]  }
 0x243   : > { %v1851_v62 = vpop.permute.xlu0 %1850  ;;  %v14862_v26 = vld [vmem:[#allocation2 + $0x60] sm:$0xff]   ;;  %v1853_v52 = vpop.permute.xlu1 %1852  ;;  %v2912_v18 = vsel %vm18922_vm15, %v2909_v14, %v2911_v60  ;;  %v3987_v14 = vshll.u32 %v14722_v32, 16  ;;  %vm18933_vm15 = vmmov %vm18932_vm4 }
 0x244   : > { %v1860_v28 = vsel %vm14317_vm3, %v1851_v62, %v1859_v25  ;;  %1862 = vst.msk [vmem:[#allocation2 + $0x78] sm:$0xf] %vm980_vm5, %v1853_v52  ;;  %12256 = vmatprep.mubr.msk.bf16.mxu0 %vm836_vm1, %v14862_v26  ;;  %v2913_v41 = vrot.slane %v14862_v26, 1  ;;  %12211 = vmatmul.mubr.msk.bf16.gmra.mxu1 %vm836_vm1, %v2912_v18  ;;  %vm18924_vm3 = vmmov %vm18917_vm2  ;;  %v3995_v25 = vshll.u32 %v14724_v55, 16  ;;  %v13177_v62 = vld [vmem:[#allocation2 + $0x20] sm:$0xff]   ;;  %v4003_v52 = vshll.u32 %v13173_v4, 16 }
 0x245   : > { %1861 = vst [vmem:[#allocation2 + $0x74] sm:$0xe] %v1860_v28  ;;  %v3989_v56 = vrot.slane %v3987_v14, 1  ;;  %v3991_v18 = vshrl.u32 %v14722_v32, 16  ;;  %v14954_v14 = vld [vmem:[#allocation2 + $0x38] sm:$0xff]  }
 0x246   : > { %v2914_v50 = vsel %vm18923_vm14, %v2911_v60, %v2913_v41  ;;  %v4005_v33 = vrot.slane %v4003_v52, 1  ;;  %v4035_v52 = vshll.u32 %v14954_v14, 16  ;;  %vm18934_vm14 = vmmov %vm18932_vm4 }
 0x247   : > { %v1920_v45 = vpop.permute.xlu0 %1919  ;;  %v14873_v58 = vld [vmem:[#allocation2 + $0x68] sm:$0xff]   ;;  %v1989_v10 = vpop.permute.xlu1 %1988  ;;  %12214 = vmatprep.mubr.msk.bf16.mxu1 %vm836_vm1, %v2914_v50  ;;  %v3997_v50 = vrot.slane %v3995_v25, 1  ;;  %v3993_v6 = vor.u32 %v3991_v18, %v3989_v56 }
 0x248   : > { %v1929_v9 = vsel %vm14637_vm0, %v1920_v45, %v1928_v15  ;;  %v2000_v57 = vld [vmem:[#allocation2 + $0x84] sm:$0x8]  ;;  %v2915_v51 = vrot.slane %v14873_v58, 1  ;;  %vm18925_vm0 = vmmov %vm18917_vm2 }
 0x249   : > { %1930 = vst [vmem:[#allocation2 + $0x7c] sm:$0xc] %v1929_v9  ;;  %v2001_v48 = vsel %vm14774_vm12, %v1989_v10, %v2000_v57  ;;  %12257 = vmatmul.mubr.msk.bf16.gmra.mxu0 %vm836_vm1, %v14873_v58  ;;  %vm18926_vm12 = vmmov %vm18925_vm0  ;;  %v3406_v9 = vld [vmem:[#allocation2 + $0x10] sm:$0xc]  ;;  %v3999_v10 = vshrl.u32 %v14724_v55, 16 }
 0x24a   : > { %2002 = vst [vmem:[#allocation2 + $0x84] sm:$0x8] %v2001_v48  ;;  %v2916_v35 = vsel %vm18924_vm3, %v2913_v41, %v2915_v51  ;;  %v3407_v41 = vld [vmem:[#allocation2 + $0x14] sm:$0xf]  ;;  %vm18930_vm2 = vmmov %vm18925_vm0  ;;  %vm18935_vm3 = vsmask.f32 6400 }
 0x24b   : > { %v1995_v39 = vpop.permute.xlu0 %1994 }
 0x24c   : > { %v2006_v47 = vsel %vm14748_vm6, %v1995_v39, %v2005_v24  ;;  %v14885_v1 = vld [vmem:[#allocation2 + $0x70] sm:$0xff]   ;;  %12215 = vmatmul.mubr.msk.bf16.gmra.mxu1 %vm836_vm1, %v2916_v35  ;;  %vm18927_vm6 = vmmov %vm18925_vm0  ;;  %v14931_v24 = vld [vmem:[#allocation2 + $0x18] sm:$0xff]   ;;  %v14934_v39 = vcombine.low %v3406_v9, %v3407_v41  ;;  %v4500_v41 = vshrl.u32 %v14873_v58, 16 }
 0x24d   : > { %2007 = vst [vmem:[#allocation2 + $0x90] sm:$0x1] %v2006_v47  ;;  %12260 = vmatprep.mubr.msk.bf16.mxu0 %vm836_vm1, %v14885_v1  ;;  %v2917_v38 = vrot.slane %v14885_v1, 1  ;;  %v13178_v35 = vld [vmem:[#allocation2 + $0x28] sm:$0xff]  }
 0x24e   : > { %v1991_v53 = vpop.permute.xlu1 %1990  ;;  %v3539_v46 = vrot.slane %v14934_v39, 2 }
 0x24f   : > { %2003 = vst.msk [vmem:[#allocation2 + $0x88] sm:$0xf] %vm980_vm5, %v1991_v53  ;;  %v1922_v27 = vpop.permute.xlu0 %1921  ;;  %v2918_v59 = vsel %vm18925_vm0, %v2915_v51, %v2917_v38  ;;  %v4011_v51 = vshll.u32 %v13177_v62, 16  ;;  %v4001_v53 = vor.u32 %v3999_v10, %v3997_v50  ;;  %v4508_v10 = vshrl.u32 %v14885_v1, 16 }
 0x250   : > { %1931 = vst.msk [vmem:[#allocation2 + $0x80] sm:$0xf] %vm980_vm5, %v1922_v27  ;;  %v14895_v37 = vld [vmem:[#allocation2 + $0x78] sm:$0xff]   ;;  %12218 = vmatprep.mubr.msk.bf16.mxu1 %vm836_vm1, %v2918_v59  ;;  %v3540_v27 = vrot.slane %v14931_v24, 2 }
 0x251   : > { %v2919_v20 = vrot.slane %v14895_v37, 1  ;;  %12261 = vmatmul.mubr.msk.bf16.gmra.mxu0 %vm836_vm1, %v14895_v37 }
 0x252   : > { %v2019_v61 = vpop.permute.xlu1 %2018 }
 0x253   : > { %v2920_v36 = vsel %vm18926_vm12, %v2917_v38, %v2919_v20  ;;  %vm18937_vm12 = vmmov %vm18932_vm4 }
 0x254   : > { %v1993_v30 = vpop.permute.xlu0 %1992  ;;  %v2027_v17 = vld [vmem:[#allocation2 + $0x90] sm:$0xf]  ;;  %12219 = vmatmul.mubr.msk.bf16.gmra.mxu1 %vm836_vm1, %v2920_v36  ;;  %v3541_v36 = vsel %vm18931_vm10, %v3539_v46, %v3540_v27 }
 0x255   : > { %2004 = vst.msk [vmem:[#allocation2 + $0x8c] sm:$0xf] %vm980_vm5, %v1993_v30  ;;  %v2028_v5 = vsel %vm14765_vm11, %v2019_v61, %v2027_v17  ;;  %vm18929_vm11 = vmmov %vm18925_vm0  ;;  %v4015_v30 = vshrl.u32 %v13177_v62, 16  ;;  %v4019_v17 = vshll.u32 %v13178_v35, 16  ;;  %v4613_v62 = vsel %vm2983_vm13, %v14797_v40, 0 }
 0x256   : > { %v2023_v34 = vpop.permute.xlu1 %2022  ;;  %2029 = vst [vmem:[#allocation2 + $0x90] sm:$0xf] %v2028_v5  ;;  %v14949_v5 = vld [vmem:[#allocation2 + $0x20] sm:$0xff]   ;;  %v4503_v40 = vshll.u32 %v14873_v58, 16 }
 0x257   : > { %v2032_v42 = vsel %vm14448_vm9, %v2023_v34, %v2031_v3  ;;  %v14909_v19 = vld [vmem:[#allocation2 + $0x80] sm:$0xff]   ;;  %vm18765_vm9 = vsmask.f32 7424  ;;  %v4013_v3 = vrot.slane %v4011_v51, 1  ;;  %v13181_v34 = vld [vmem:[#allocation2 + $0x30] sm:$0xff]   ;;  %v3542_v25 = vrot.slane %v14949_v5, 2 }
 0x258   : > { %2033 = vst [vmem:[#allocation2 + $0x98] sm:$0x3] %v2032_v42  ;;  %v2021_v2 = vpop.permute.xlu0 %2020  ;;  %12264 = vmatprep.mubr.msk.bf16.mxu0 %vm836_vm1, %v14909_v19  ;;  %v2921_v8 = vrot.slane %v14909_v19, 1  ;;  %v3990_v60 = vsel %vm18765_vm9, %v3985_v31, %v3989_v56  ;;  %v3998_v38 = vsel %vm18765_vm9, %v3993_v6, %v3997_v50  ;;  %v4006_v61 = vsel %vm18765_vm9, %v4001_v53, %v4005_v33  ;;  %v14951_v42 = vld [vmem:[#allocation2 + $0x28] sm:$0xff]   ;;  %v14981_v6 = vld [vmem:[%s18717_s3 + $0x18] sm:$0xf] }
 0x259   : > { %2030 = vst.msk [vmem:[#allocation2 + $0x94] sm:$0xf] %vm980_vm5, %v2021_v2  ;;  %vm18928_vm5 = vmmov %vm18925_vm0  ;;  %v4017_v43 = vor.u32 %v4015_v30, %v4013_v3  ;;  %v14956_v2 = vld [vmem:[#allocation2 + $0x30] sm:$0xff]   ;;  %v4495_v31 = vshll.u32 %v14862_v26, 16  ;;  %v4021_v56 = vrot.slane %v4019_v17, 1  ;;  %v4023_v51 = vshrl.u32 %v13178_v35, 16 }
 0x25a   : > { %v2922_v7 = vsel %vm18927_vm6, %v2919_v20, %v2921_v8  ;;  %v4007_v20 = vshrl.u32 %v13173_v4, 16  ;;  %v4027_v4 = vshll.u32 %v13181_v34, 16  ;;  %v3546_v18 = vrot.slane %v14956_v2, 2  ;;  %vm18936_vm0 = vmmov %vm18935_vm3 }
 0x25b   : > { %12222 = vmatprep.mubr.msk.bf16.mxu1 %vm836_vm1, %v2922_v7  ;;  %v4497_v9 = vrot.slane %v4495_v31, 2  ;;  %v4025_v35 = vor.u32 %v4023_v51, %v4021_v56  ;;  %vm18938_vm6 = vmmov %vm18936_vm0 }
 0x25c   : > { %v14916_v0 = vld [vmem:[#allocation2 + $0x88] sm:$0xff]   ;;  %v4009_v54 = vor.u32 %v4007_v20, %v4005_v33  ;;  %v14976_v33 = vld [vmem:[#allocation2 + $0x38] sm:$0xff]   ;;  %vm18942_vm10 = vmmov %vm18936_vm0 }
 0x25d   : > { %12265 = vmatmul.mubr.msk.bf16.gmra.mxu0 %vm836_vm1, %v14916_v0  ;;  %v2923_v28 = vrot.slane %v14916_v0, 1 }
 0x25e   : > { %12308 = vmatprep.mubr.msk.bf16.mxu0 %vm836_vm1, %v3990_v60  ;;  %v4014_v7 = vsel %vm18765_vm9, %v4009_v54, %v4013_v3  ;;  %v3544_v60 = vrot.slane %v14951_v42, 2  ;;  %v4037_v3 = vrot.slane %v4035_v52, 1  ;;  %v4039_v52 = vshrl.u32 %v14954_v14, 16 }
 0x25f   : > { %v2924_v15 = vsel %vm18928_vm5, %v2921_v8, %v2923_v28  ;;  %v13174_v57 = vld [vmem:[#allocation2 + $0x98] ss:$0 sps:$4 sm:$0x11]   ;;  %v4492_v8 = vshrl.u32 %v14862_v26, 16  ;;  %v4532_v14 = vshrl.u32 %v14916_v0, 16  ;;  %vm18939_vm5 = vmmov %vm18936_vm0 }
 0x260   : > { %v14927_v45 = vld [vmem:[#allocation2 + $0x90] sm:$0xff]   ;;  %12223 = vmatmul.mubr.msk.bf16.gmra.mxu1 %vm836_vm1, %v2924_v15  ;;  %v2927_v59 = vrot.slane %v13174_v57, 1  ;;  %v14971_v15 = vld [vmem:[#allocation2 + $0x40] sm:$0xff]   ;;  %v3543_v57 = vsel %vm18932_vm4, %v3540_v27, %v3542_v25  ;;  %v3545_v53 = vsel %vm18933_vm15, %v3542_v25, %v3544_v60  ;;  %v4511_v27 = vshll.u32 %v14885_v1, 16 }
 0x261   : > { %v2925_v48 = vrot.slane %v14927_v45, 1  ;;  %v4494_v50 = vrot.slane %v4492_v8, 1  ;;  %v3547_v46 = vsel %vm18934_vm14, %v3544_v60, %v3546_v18  ;;  %v4043_v20 = vshll.u32 %v14971_v15, 16 }
 0x262   : > { %v4513_v17 = vrot.slane %v4511_v27, 2  ;;  %v4047_v8 = vshrl.u32 %v14971_v15, 16  ;;  %v4524_v60 = vshrl.u32 %v14909_v19, 16  ;;  %v13189_v15 = vld [vmem:[#allocation2 + $0x50] sm:$0xff]   ;;  %v15028_v27 = vld [vmem:[#allocation2 + $0x40] sm:$0xff]  }
 0x263   : > { %v2926_v47 = vsel %vm18929_vm11, %v2923_v28, %v2925_v48  ;;  %v2928_v49 = vsel %vm18930_vm2, %v2925_v48, %v2927_v59  ;;  %v4022_v28 = vsel %vm18765_vm9, %v4017_v43, %v4021_v56  ;;  %v4029_v48 = vrot.slane %v4027_v4, 1  ;;  %vm18940_vm11 = vmmov %vm18936_vm0 }
 0x264   : > { %12226 = vmatprep.mubr.msk.bf16.mxu1 %vm836_vm1, %v2926_v47  ;;  %v4502_v47 = vrot.slane %v4500_v41, 1  ;;  %v4031_v59 = vshrl.u32 %v13181_v34, 16  ;;  %v3548_v43 = vrot.slane %v14976_v33, 2  ;;  %v4045_v41 = vrot.slane %v4043_v20, 1  ;;  %vm18941_vm2 = vmmov %vm18932_vm4 }
 0x265   : > { %12309 = vmatmul.mubr.msk.bf16.vlgmr.msra.gmra.mxu0 %vm836_vm1, %v3998_v38  ;;  %v4505_v38 = vrot.slane %v4503_v40, 2  ;;  %v4030_v54 = vsel %vm18765_vm9, %v4025_v35, %v4029_v48  ;;  %v4544_v20 = vshll.u32 %v14927_v45, 16  ;;  %vm18943_vm4 = vmmov %vm18941_vm2 }
 0x266   : > { %12312 = vmatprep.mubr.msk.bf16.mxu0 %vm836_vm1, %v4006_v61  ;;  %12383 = vmatpush3.bf16.msra.mxu0 %v5060_v22  ;;  %v14985_v22 = vld [vmem:[#allocation2 + $0x48] sm:$0xff]   ;;  %v4510_v61 = vrot.slane %v4508_v10, 1  ;;  %v4033_v34 = vor.u32 %v4031_v59, %v4029_v48  ;;  %v3549_v40 = vsel %vm18937_vm12, %v3546_v18, %v3548_v43  ;;  %v4041_v48 = vor.u32 %v4039_v52, %v4037_v3  ;;  %vm18944_vm15 = vmmov %vm18941_vm2 }
 0x267   : > { %v4506_v30 = vor.u32 %v4505_v38, %v4502_v47  ;;  %v4051_v31 = vshll.u32 %v14985_v22, 16  ;;  %v13190_v38 = vld [vmem:[#allocation2 + $0x58] sm:$0xff]   ;;  %v4541_v59 = vshrl.u32 %v14927_v45, 16  ;;  %v3550_v52 = vrot.slane %v15028_v27, 2  ;;  %vm18945_vm14 = vmmov %vm18941_vm2 }
 0x268   : > { %12227 = vmatmul.mubr.msk.bf16.gmra.mxu1 %vm836_vm1, %v2928_v49  ;;  %v14993_v49 = vor.u32 %v4497_v9, %v4494_v50  ;;  %v4514_v4 = vor.u32 %v4513_v17, %v4510_v61  ;;  %v4038_v25 = vsel %vm18765_vm9, %v4033_v34, %v4037_v3  ;;  %v4535_v61 = vshll.u32 %v14916_v0, 16 }
 0x269   : > { %12270 = vmatprep.mubr.msk.bf16.mxu1 %vm836_vm1, %v3541_v36  ;;  %v14998_v36 = vld [vmem:[%s18717_s3 + $0x1c] sm:$0xf]  ;;  %v4053_v47 = vrot.slane %v4051_v31, 1  ;;  %v4059_v3 = vshll.u32 %v13189_v15, 16  ;;  %v4543_v31 = vrot.slane %v4541_v59, 1 }
 0x26a   : > { %13011 = vmatprep.subr.msk.bf16.mxu0 %vm2983_vm13, %v14998_v36  ;;  %v15008_v56 = vsel %vm18935_vm3, %v14993_v49, %v4506_v30  ;;  %v15019_v50 = vsel %vm18936_vm0, %v4506_v30, %v4514_v4  ;;  %v4534_v30 = vrot.slane %v4532_v14, 1  ;;  %v4537_v17 = vrot.slane %v4535_v61, 2  ;;  %vm18946_vm3 = vmmov %vm18941_vm2 }
 0x26b   : > { %v4055_v61 = vshrl.u32 %v14985_v22, 16  ;;  %vm18947_vm0 = vmmov %vm18941_vm2 }
 0x26c   : > { %vm18948_vm12 = vmmov %vm18947_vm0 }
 0x26d   : > { %12313 = vmatmul.mubr.msk.bf16.gmra.mxu0 %vm836_vm1, %v4014_v7  ;;  %v4516_v7 = vshrl.u32 %v14895_v37, 16 }
 0x26e   : > { %12316 = vmatprep.mubr.msk.bf16.mxu0 %vm836_vm1, %v4022_v28  ;;  %v4527_v28 = vshll.u32 %v14909_v19, 16 }
 0x26f   : > { %v4518_v9 = vrot.slane %v4516_v7, 1  ;;  %v4546_v7 = vrot.slane %v4544_v20, 2  ;;  %v15061_v20 = vld [vmem:[#allocation2 + $0x58] sm:$0xff]  }
 0x270   : > { %12271 = vmatmul.mubr.msk.bf16.vlgmr.msra.gmra.mxu1 %vm836_vm1, %v3543_v57  ;;  %v4526_v57 = vrot.slane %v4524_v60, 1  ;;  %v4529_v51 = vrot.slane %v4527_v28, 2  ;;  %v4067_v60 = vshll.u32 %v13190_v38, 16  ;;  %v4538_v28 = vor.u32 %v4537_v17, %v4534_v30  ;;  %v15065_v30 = vld [vmem:[#allocation2 + $0x60] sm:$0xff]  }
 0x271   : > { %12345 = vmatpush3.bf16.msra.mxu1 %v4613_v62  ;;  %12274 = vmatprep.mubr.msk.bf16.mxu1 %vm836_vm1, %v3545_v53  ;;  %v4519_v62 = vshll.u32 %v14895_v37, 16  ;;  %v15023_v53 = vld [vmem:[#allocation2 + $0x48] sm:$0xff]   ;;  %v4071_v17 = vshrl.u32 %v13190_v38, 16  ;;  %v5617_v38 = vrot.slane %v14873_v58, 2 }
 0x272   : > { %13010 = vmatprep.subr.msk.bf16.mxu1 %vm2983_vm13, %v14981_v6  ;;  %v4530_v18 = vor.u32 %v4529_v51, %v4526_v57  ;;  %v3551_v57 = vsel %vm18941_vm2, %v3548_v43, %v3550_v52  ;;  %v15052_v51 = vld [vmem:[#allocation2 + $0x68] sm:$0xff]   ;;  %v4069_v59 = vrot.slane %v4067_v60, 1  ;;  %v4057_v43 = vor.u32 %v4055_v61, %v4053_v47 }
 0x273   : > { %v4521_v10 = vrot.slane %v4519_v62, 2  ;;  %v3552_v62 = vrot.slane %v15023_v53, 2  ;;  %v3556_v60 = vrot.slane %v15061_v20, 2  ;;  %v5619_v61 = vrot.slane %v14885_v1, 2 }
 0x274   : > { %vm18953_vm2 = vcmask 1046528  }
 0x275   : > { %12317 = vmatmul.mubr.msk.bf16.gmra.mxu0 %vm836_vm1, %v4030_v54  ;;  %v4522_v35 = vor.u32 %v4521_v10, %v4518_v9  ;;  %v13193_v9 = vld [vmem:[#allocation2 + $0x60] sm:$0xff]   ;;  %v15046_v10 = vld [vmem:[#allocation2 + $0x50] sm:$0xff]   ;;  %v3553_v14 = vsel %vm18943_vm4, %v3550_v52, %v3552_v62  ;;  %v15100_v1 = vsel %vm18947_vm0, %v5617_v38, %v5619_v61  ;;  %vm18957_vm4 = vmmov %vm18947_vm0 }
 0x276   : > { %12320 = vmatprep.mubr.msk.bf16.mxu0 %vm836_vm1, %v4038_v25  ;;  %v4046_v25 = vsel %vm18765_vm9, %v4041_v48, %v4045_v41 }
 0x277   : > { %v15033_v54 = vsel %vm18938_vm6, %v4514_v4, %v4522_v35  ;;  %v15036_v34 = vsel %vm18939_vm5, %v4522_v35, %v4530_v18  ;;  %v15043_v4 = vor.u32 %v4546_v7, %v4543_v31  ;;  %v4063_v35 = vshrl.u32 %v13189_v15, 16  ;;  %v15068_v7 = vld [vmem:[#allocation2 + $0x68] sm:$0xff]   ;;  %vm18949_vm6 = vmmov %vm18947_vm0 }
 0x278   : > { %12275 = vmatmul.mubr.msk.bf16.gmra.mxu1 %vm836_vm1, %v3547_v46  ;;  %v4049_v46 = vor.u32 %v4047_v8, %v4045_v41  ;;  %v15049_v41 = vsel %vm18940_vm11, %v4530_v18, %v4538_v28  ;;  %v4075_v18 = vshll.u32 %v13193_v9, 16  ;;  %v4083_v31 = vshll.u32 %v15052_v51, 16  ;;  %vm18950_vm5 = vmmov %vm18947_vm0 }
 0x279   : > { %12278 = vmatprep.mubr.msk.bf16.mxu1 %vm836_vm1, %v3549_v40  ;;  %v4061_v40 = vrot.slane %v4059_v3, 1  ;;  %v15056_v48 = vsel %vm18942_vm10, %v4538_v28, %v15043_v4  ;;  %v3554_v3 = vrot.slane %v15046_v10, 2  ;;  %vm18951_vm11 = vmmov %vm18947_vm0 }
 0x27a   : > { %v4054_v8 = vsel %vm18765_vm9, %v4049_v46, %v4053_v47  ;;  %v4073_v47 = vor.u32 %v4071_v17, %v4069_v59  ;;  %v4077_v28 = vrot.slane %v4075_v18, 1  ;;  %v15095_v18 = vld [vmem:[#allocation2 + $0x88] sm:$0xff]   ;;  %v5621_v17 = vrot.slane %v14895_v37, 2  ;;  %vm18955_vm10 = vmmov %vm18953_vm2 }
 0x27b   : > { %v4065_v46 = vor.u32 %v4063_v35, %v4061_v40  ;;  %v4062_v22 = vsel %vm18765_vm9, %v4057_v43, %v4061_v40  ;;  %v3555_v52 = vsel %vm18944_vm15, %v3552_v62, %v3554_v3  ;;  %v15081_v40 = vld [vmem:[#allocation2 + $0x78] sm:$0xff]   ;;  %v4085_v35 = vrot.slane %v4083_v31, 1  ;;  %v15142_v43 = vld [vmem:[#allocation2 + $0x70] sm:$0xff]   ;;  %vm18959_vm15 = vmmov %vm18947_vm0 }
 0x27c   : > { %v3557_v62 = vsel %vm18946_vm3, %v3554_v3, %v3556_v60  ;;  %v4078_v31 = vsel %vm18765_vm9, %v4073_v47, %v4077_v28  ;;  %v18746_v3 = vrot.slane %v15052_v51, 1  ;;  %v5310_v37 = vrot.slane %v15081_v40, 1  ;;  %vm18962_vm3 = vmmov %vm18953_vm2 }
 0x27d   : > { %12321 = vmatmul.mubr.msk.bf16.gmra.mxu0 %vm836_vm1, %v4046_v25  ;;  %v15070_v25 = vld [vmem:[#allocation2 + $0x70] sm:$0xff]   ;;  %v4070_v15 = vsel %vm18765_vm9, %v4065_v46, %v4069_v59  ;;  %v15097_v46 = vld [vmem:[#allocation2 + $0x98] ss:$0 sps:$4 sm:$0x33]   ;;  %v4099_v47 = vshll.u32 %v15081_v40, 16  ;;  %vm18964_vm0 = vmmov %vm18953_vm2 }
 0x27e   : > { %12324 = vmatprep.mubr.msk.bf16.mxu0 %vm836_vm1, %v4054_v8  ;;  %v18743_v8 = vrot.slane %v14862_v26, 2  ;;  %v4091_v59 = vshll.u32 %v15070_v25, 16  ;;  %v5308_v11 = vrot.slane %v15070_v25, 1 }
 0x280   : > { %12279 = vmatmul.mubr.msk.bf16.gmra.mxu1 %vm836_vm1, %v3551_v57  ;;  %v4079_v57 = vshrl.u32 %v13193_v9, 16  ;;  %v15089_v58 = vsel %vm18945_vm14, %v18743_v8, %v5617_v38  ;;  %v15093_v9 = vld [vmem:[#allocation2 + $0x80] sm:$0xff]   ;;  %v15111_v8 = vsel %vm18948_vm12, %v5619_v61, %v5621_v17  ;;  %v5627_v38 = vrot.slane %v14927_v45, 2  ;;  %vm18960_vm14 = vmmov %vm18953_vm2 }
 0x281   : > { %12282 = vmatprep.mubr.msk.bf16.mxu1 %vm836_vm1, %v3553_v14  ;;  %v3558_v14 = vrot.slane %v15065_v30, 2  ;;  %v15129_v45 = vsel %vm18953_vm2, %v18746_v3, %v5308_v11  ;;  %v15132_v61 = vsel %vm18955_vm10, %v5308_v11, %v5310_v37  ;;  %v4087_v3 = vshrl.u32 %v15052_v51, 16  ;;  %vm18967_vm12 = vmmov %vm18957_vm4 }
 0x282   : > { %18954 = vst [vmem:[#allocation21_spill] sm:$0xff] %v15129_v45  ;;  %18956 = vst [vmem:[#allocation24_spill] sm:$0xff] %v15132_v61  ;;  %v4093_v21 = vrot.slane %v4091_v59, 1  ;;  %v18966_v59 = vrot.slane %v15068_v7, 2 }
 0x283   : > { %vm18974_vm2 = vmmov %vm18957_vm4 }
 0x284   : > { %vm18975_vm10 = vmmov %vm18974_vm2 }
 0x285   : > { %12325 = vmatmul.mubr.msk.bf16.gmra.mxu0 %vm836_vm1, %v4062_v22  ;;  %v15105_v22 = vld [vmem:[#allocation2 + $0x90] ss:$0 sps:$4 sm:$0x11]  }
 0x286   : > { %12328 = vmatprep.mubr.msk.bf16.mxu0 %vm836_vm1, %v4070_v15  ;;  %v5623_v15 = vrot.slane %v14909_v19, 2 }
 0x288   : > { %12283 = vmatmul.mubr.msk.bf16.gmra.mxu1 %vm836_vm1, %v3555_v52  ;;  %v5625_v52 = vrot.slane %v14916_v0, 2  ;;  %v15118_v23 = vsel %vm18949_vm6, %v5621_v17, %v5623_v15  ;;  %v5312_v17 = vrot.slane %v15093_v9, 1  ;;  %vm18969_vm6 = vmmov %vm18957_vm4 }
 0x289   : > { %12286 = vmatprep.mubr.msk.bf16.mxu1 %vm836_vm1, %v3557_v62  ;;  %v4081_v62 = vor.u32 %v4079_v57, %v4077_v28  ;;  %v5629_v28 = vrot.slane %v15097_v46, 2 }
 0x28a   : > { %v15121_v19 = vsel %vm18950_vm5, %v5623_v15, %v5625_v52  ;;  %v15124_v0 = vsel %vm18951_vm11, %v5625_v52, %v5627_v38  ;;  %v5314_v15 = vrot.slane %v15095_v18, 1  ;;  %v5316_v52 = vrot.slane %v15105_v22, 1  ;;  %vm18973_vm11 = vmmov %vm18957_vm4 }
 0x28b   : > { %18952 = vst [vmem:[#allocation19_spill] sm:$0xff] %v15124_v0  ;;  %v4086_v57 = vsel %vm18765_vm9, %v4081_v62, %v4085_v35  ;;  %v15145_v11 = vsel %vm18957_vm4, %v5627_v38, %v5629_v28  ;;  %v15149_v62 = vsel %vm18960_vm14, %v5310_v37, %v5312_v17  ;;  %v4095_v38 = vshrl.u32 %v15070_v25, 16  ;;  %vm18977_vm14 = vmmov %vm18974_vm2 }
 0x28c   : > { %18958 = vst [vmem:[#allocation17_spill] sm:$0xff] %v15145_v11  ;;  %18961 = vst [vmem:[#allocation16_spill] sm:$0xff] %v15149_v62  ;;  %v15152_v44 = vsel %vm18962_vm3, %v5312_v17, %v5314_v15  ;;  %v15155_v61 = vsel %vm18964_vm0, %v5314_v15, %v5316_v52  ;;  %v4101_v28 = vrot.slane %v4099_v47, 1  ;;  %v15162_v11 = vld [vmem:[#allocation2 + $0x78] sm:$0xff]   ;;  %v4089_v37 = vor.u32 %v4087_v3, %v4085_v35  ;;  %v15167_v17 = vld [vmem:[#allocation2 + $0x88] sm:$0xff]  }
 0x28d   : > { %12329 = vmatmul.mubr.msk.bf16.gmra.mxu0 %vm836_vm1, %v4078_v31  ;;  %v3559_v31 = vsel %vm18959_vm15, %v3556_v60, %v3558_v14  ;;  %18963 = vst [vmem:[#allocation22_spill] sm:$0xff] %v15152_v44  ;;  %18965 = vst [vmem:[#allocation20_spill] sm:$0xff] %v15155_v61  ;;  %v15164_v60 = vld [vmem:[#allocation2 + $0x80] sm:$0xff]   ;;  %v15169_v15 = vld [vmem:[#allocation2 + $0x90] sm:$0xff]   ;;  %v3562_v61 = vrot.slane %v15142_v43, 2  ;;  %v18750_v35 = vrot.slane %v15162_v11, 3 }
 0x28e   : > { %12332 = vmatprep.mubr.msk.bf16.mxu0 %vm836_vm1, %v4086_v57  ;;  %v3561_v57 = vsel %vm18967_vm12, %v3558_v14, %v18966_v59  ;;  %v15171_v52 = vld [vmem:[#allocation2 + $0x98] sm:$0xff]   ;;  %v4107_v14 = vshll.u32 %v15093_v9, 16  ;;  %v4094_v25 = vsel %vm18765_vm9, %v4089_v37, %v4093_v21  ;;  %v3564_v59 = vrot.slane %v15162_v11, 2  ;;  %vm18976_vm15 = vmmov %vm18974_vm2 }
 0x28f   : > { %v5935_v3 = vrot.slane %v15164_v60, 3  ;;  %v5939_v44 = vrot.slane %v15169_v15, 3  ;;  %v18751_v62 = vrot.slane %v15171_v52, 3  ;;  %vm18763_vm5 = vcmask 1044480   ;;  %vm18978_vm3 = vmmov %vm18974_vm2 }
 0x290   : > { %12287 = vmatmul.mubr.msk.bf16.gmra.mxu1 %vm836_vm1, %v3559_v31  ;;  %v4097_v31 = vor.u32 %v4095_v38, %v4093_v21  ;;  %v5937_v38 = vrot.slane %v15167_v17, 3  ;;  %v18968_v21 = vrot.slane %v15068_v7, 2  ;;  %vm18764_vm4 = vsmask.f32 5376 }
 0x291   : > { %12290 = vmatprep.mubr.msk.bf16.mxu1 %vm836_vm1, %v3561_v57  ;;  %v4115_v57 = vshll.u32 %v15095_v18, 16  ;;  %vm18979_vm0 = vsmask.f32 6400 }
 0x292   : > { %v4102_v47 = vsel %vm18765_vm9, %v4097_v31, %v4101_v28  ;;  %v3563_v37 = vsel %vm18969_vm6, %v18968_v21, %v3562_v61  ;;  %v4109_v31 = vrot.slane %v4107_v14, 1  ;;  %v15195_v45 = vsel %vm18763_vm5, %v5935_v3, %v5937_v38  ;;  %vm18980_vm12 = vmmov %vm18979_vm0 }
 0x293   : > { %18971 = vst [vmem:[#allocation23_spill] sm:$0xff] %v15195_v45  ;;  %v15198_v0 = vsel %vm18763_vm5, %v5937_v38, %v5939_v44  ;;  %v3565_v14 = vsel %vm18973_vm11, %v3562_v61, %v3564_v59  ;;  %v4103_v21 = vshrl.u32 %v15081_v40, 16  ;;  %v4844_v45 = vshrl.u32 %v14931_v24, 16  ;;  %vm18981_vm6 = vmmov %vm18979_vm0 }
 0x294   : > { %18972 = vst [vmem:[#allocation15_spill] sm:$0xff] %v15198_v0  ;;  %v4847_v38 = vshll.u32 %v14931_v24, 16  ;;  %v3568_v40 = vrot.slane %v15167_v17, 2  ;;  %vm18982_vm11 = vmmov %vm18979_vm0 }
 0x295   : > { %12333 = vmatmul.mubr.msk.bf16.gmra.mxu0 %vm836_vm1, %v4094_v25  ;;  %v15192_v25 = vsel %vm18763_vm5, %v18750_v35, %v5935_v3  ;;  %v4111_v35 = vshrl.u32 %v15093_v9, 16  ;;  %v4117_v3 = vrot.slane %v4115_v57, 1  ;;  %v4105_v0 = vor.u32 %v4103_v21, %v4101_v28 }
 0x296   : > { %12336 = vmatprep.mubr.msk.bf16.mxu0 %vm836_vm1, %v4102_v47  ;;  %18970 = vst [vmem:[#allocation18_spill] sm:$0xff] %v15192_v25  ;;  %v15203_v47 = vsel %vm18763_vm5, %v5939_v44, %v18751_v62  ;;  %v3566_v44 = vrot.slane %v15164_v60, 2  ;;  %v4836_v62 = vshrl.u32 %v14934_v39, 16  ;;  %v4846_v57 = vrot.slane %v4844_v45, 2 }
 0x297   : > { %v4113_v25 = vor.u32 %v4111_v35, %v4109_v31  ;;  %v4110_v61 = vsel %vm18765_vm9, %v4105_v0, %v4109_v31  ;;  %v4849_v24 = vrot.slane %v4847_v38, 3  ;;  %v4119_v28 = vshrl.u32 %v15095_v18, 16 }
 0x298   : > { %12291 = vmatmul.mubr.msk.bf16.gmra.mxu1 %vm836_vm1, %v3563_v37  ;;  %v4839_v37 = vshll.u32 %v14934_v39, 16  ;;  %v3567_v35 = vsel %vm18974_vm2, %v3564_v59, %v3566_v44  ;;  %v4838_v21 = vrot.slane %v4836_v62, 2  ;;  %v3569_v0 = vsel %vm18975_vm10, %v3566_v44, %v3568_v40  ;;  %vm18983_vm2 = vmmov %vm18979_vm0 }
 0x299   : > { %12294 = vmatprep.mubr.msk.bf16.mxu1 %vm836_vm1, %v3565_v14  ;;  %v4123_v14 = vshll.u32 %v15105_v22, 16  ;;  %v4118_v9 = vsel %vm18765_vm9, %v4113_v25, %v4117_v3  ;;  %v4121_v31 = vor.u32 %v4119_v28, %v4117_v3  ;;  %v4853_v45 = vshrl.u32 %v14949_v5, 16  ;;  %vm18984_vm10 = vmmov %vm18979_vm0 }
 0x29a   : > { %v4841_v39 = vrot.slane %v4839_v37, 3  ;;  %v4856_v25 = vshll.u32 %v14949_v5, 16  ;;  %v4862_v38 = vshrl.u32 %v14951_v42, 16  ;;  %v4865_v18 = vshll.u32 %v14951_v42, 16 }
 0x29b   : > { %v4125_v22 = vrot.slane %v4123_v14, 1  ;;  %v3570_v62 = vrot.slane %v15169_v15, 2  ;;  %v4855_v44 = vrot.slane %v4853_v45, 2  ;;  %v3572_v5 = vrot.slane %v15171_v52, 2 }
 0x29c   : > { %v4842_v59 = vor.u32 %v4841_v39, %v4838_v21  ;;  %v4858_v14 = vrot.slane %v4856_v25, 3  ;;  %v4874_v21 = vshll.u32 %v14956_v2, 16  ;;  %v15244_v25 = vld [vmem:[#allocation2 + $0x18] sm:$0xff]  }
 0x29d   : > { %12337 = vmatmul.mubr.msk.bf16.gmra.mxu0 %vm836_vm1, %v4110_v61  ;;  %v4850_v61 = vor.u32 %v4849_v24, %v4846_v57  ;;  %v4126_v37 = vsel %vm18765_vm9, %v4121_v31, %v4125_v22  ;;  %v4867_v57 = vrot.slane %v4865_v18, 3  ;;  %v13208_v24 = vld [vmem:[#allocation2 + $0xa0] ss:$0 sps:$4 sm:$0x33]   ;;  %v3571_v42 = vsel %vm18976_vm15, %v3568_v40, %v3570_v62  ;;  %vm18985_vm15 = vmmov %vm18979_vm0 }
 0x29e   : > { %12340 = vmatprep.mubr.msk.bf16.mxu0 %vm836_vm1, %v4118_v9  ;;  %v4864_v9 = vrot.slane %v4862_v38, 2  ;;  %v3573_v28 = vsel %vm18977_vm14, %v3570_v62, %v3572_v5  ;;  %v4859_v39 = vor.u32 %v4858_v14, %v4855_v44  ;;  %v4883_v31 = vshll.u32 %v14976_v33, 16  ;;  %v15248_v18 = vld [vmem:[#allocation2 + $0x20] sm:$0xff]   ;;  %vm18986_vm14 = vmmov %vm18979_vm0 }
 0x29f   : > { %v4851_v3 = vsel %vm18764_vm4, %v4842_v59, %v4850_v61  ;;  %v3574_v45 = vrot.slane %v13208_v24, 2  ;;  %v4420_v40 = vshrl.u32 %v15244_v25, 16  ;;  %v4423_v38 = vshll.u32 %v15244_v25, 16 }
 0x2a0   : > { %12295 = vmatmul.mubr.msk.bf16.gmra.mxu1 %vm836_vm1, %v3567_v35  ;;  %v4871_v35 = vshrl.u32 %v14956_v2, 16  ;;  %v4868_v22 = vor.u32 %v4867_v57, %v4864_v9  ;;  %v4428_v59 = vshrl.u32 %v15248_v18, 16  ;;  %v5686_v2 = vsel %vm2983_vm13, %v14998_v36, 0 }
 0x2a1   : > { %12298 = vmatprep.mubr.msk.bf16.mxu1 %vm836_vm1, %v3569_v0  ;;  %v4880_v0 = vshrl.u32 %v14976_v33, 16  ;;  %v4860_v62 = vsel %vm18764_vm4, %v4850_v61, %v4859_v39  ;;  %v4431_v33 = vshll.u32 %v15248_v18, 16  ;;  %v4885_v9 = vrot.slane %v4883_v31, 3 }
 0x2a2   : > { %v4869_v44 = vsel %vm18764_vm4, %v4859_v39, %v4868_v22  ;;  %v3575_v57 = vsel %vm18978_vm3, %v3572_v5, %v3574_v45  ;;  %v4422_v24 = vrot.slane %v4420_v40, 1  ;;  %v4430_v61 = vrot.slane %v4428_v59, 1  ;;  %v15266_v45 = vld [vmem:[#allocation2 + $0x28] sm:$0xff]   ;;  %v15270_v59 = vld [vmem:[#allocation2 + $0x30] sm:$0xff]   ;;  %vm18987_vm3 = vmmov %vm18979_vm0 }
 0x2a3   : > { %v4882_v14 = vrot.slane %v4880_v0, 2  ;;  %v4892_v39 = vshll.u32 %v15028_v27, 16  ;;  %v4898_v0 = vshrl.u32 %v15023_v53, 16  ;;  %v4901_v31 = vshll.u32 %v15023_v53, 16 }
 0x2a4   : > { %v4436_v40 = vshrl.u32 %v15266_v45, 16 }
 0x2a5   : > { %12341 = vmatmul.mubr.msk.bf16.gmra.mxu0 %vm836_vm1, %v4126_v37  ;;  %v4873_v37 = vrot.slane %v4871_v35, 2  ;;  %v4889_v35 = vshrl.u32 %v15028_v27, 16  ;;  %v4447_v27 = vshll.u32 %v15270_v59, 16 }
 0x2a6   : > { %12384 = vmatprep.mubr.msk.bf16.mxu0 %vm836_vm1, %v4851_v3  ;;  %v4876_v3 = vrot.slane %v4874_v21, 3  ;;  %v4886_v21 = vor.u32 %v4885_v9, %v4882_v14  ;;  %v5373_v14 = vsel %vm2983_vm13, %v14981_v6, 0  ;;  %v4910_v6 = vshll.u32 %v15046_v10, 16 }
 0x2a8   : > { %12299 = vmatmul.mubr.msk.bf16.gmra.mxu1 %vm836_vm1, %v3571_v42  ;;  %v4425_v42 = vrot.slane %v4423_v38, 2  ;;  %v4877_v36 = vor.u32 %v4876_v3, %v4873_v37  ;;  %v4439_v38 = vshll.u32 %v15266_v45, 16  ;;  %v4891_v37 = vrot.slane %v4889_v35, 2 }
 0x2a9   : > { %12302 = vmatprep.mubr.msk.bf16.mxu1 %vm836_vm1, %v3573_v28  ;;  %v4433_v28 = vrot.slane %v4431_v33, 2  ;;  %v4894_v3 = vrot.slane %v4892_v39, 3  ;;  %v4900_v33 = vrot.slane %v4898_v0, 2  ;;  %v4916_v39 = vshrl.u32 %v15061_v20, 16 }
 0x2aa   : > { %v4426_v5 = vor.u32 %v4425_v42, %v4422_v24  ;;  %v4887_v53 = vsel %vm18764_vm4, %v4877_v36, %v4886_v21  ;;  %v4441_v24 = vrot.slane %v4439_v38, 2  ;;  %v15286_v42 = vld [vmem:[%s18717_s3 + $0x20] sm:$0xf]  ;;  %v4919_v0 = vshll.u32 %v15061_v20, 16 }
 0x2ac   : > { %v4427_v9 = vsel %vm18979_vm0, %v14727_v63, %v4426_v5  ;;  %v4895_v63 = vor.u32 %v4894_v3, %v4891_v37  ;;  %v4912_v37 = vrot.slane %v4910_v6, 3  ;;  %v4918_v3 = vrot.slane %v4916_v39, 2 }
 0x2ad   : > { %12385 = vmatmul.mubr.msk.bf16.vlgmr.msra.gmra.mxu0 %vm836_vm1, %v4860_v62  ;;  %v4434_v62 = vor.u32 %v4433_v28, %v4430_v61  ;;  %v4449_v61 = vrot.slane %v4447_v27, 2  ;;  %v4907_v28 = vshrl.u32 %v15046_v10, 16  ;;  %v15301_v27 = vld [vmem:[#allocation2 + $0x40] sm:$0xff]   ;;  %v4937_v39 = vshll.u32 %v15068_v7, 16 }
 0x2ae   : > { %12388 = vmatprep.mubr.msk.bf16.mxu0 %vm836_vm1, %v4869_v44  ;;  %12459 = vmatpush3.bf16.msra.mxu0 %v5686_v2  ;;  %v4444_v2 = vshrl.u32 %v15270_v59, 16  ;;  %v4903_v44 = vrot.slane %v4901_v31, 3  ;;  %v15294_v31 = vld [vmem:[#allocation2 + $0x38] sm:$0xff]   ;;  %v4896_v10 = vsel %vm18764_vm4, %v4886_v21, %v4895_v63 }
 0x2b0   : > { %12303 = vmatmul.mubr.msk.bf16.gmra.mxu1 %vm836_vm1, %v3575_v57  ;;  %v4438_v57 = vrot.slane %v4436_v40, 1  ;;  %v4904_v35 = vor.u32 %v4903_v44, %v4900_v33  ;;  %v4455_v40 = vshll.u32 %v15294_v31, 16  ;;  %v4921_v33 = vrot.slane %v4919_v0, 3 }
 0x2b1   : > { %12346 = vmatprep.mubr.msk.bf16.mxu1 %vm836_vm1, %v14738_v29  ;;  %v4878_v29 = vsel %vm18764_vm4, %v4868_v22, %v4877_v36  ;;  %v4435_v22 = vsel %vm18980_vm12, %v4426_v5, %v4434_v62  ;;  %v4446_v36 = vrot.slane %v4444_v2, 1  ;;  %v4452_v5 = vshrl.u32 %v15294_v31, 16 }
 0x2b2   : > { %v4442_v38 = vor.u32 %v4441_v24, %v4438_v57  ;;  %v4905_v20 = vsel %vm18764_vm4, %v4895_v63, %v4904_v35  ;;  %v4463_v44 = vshll.u32 %v15301_v27, 16  ;;  %v4457_v21 = vrot.slane %v4455_v40, 2  ;;  %v15316_v40 = vld [vmem:[#allocation2 + $0x48] sm:$0xff]  }
 0x2b3   : > { %v4450_v2 = vor.u32 %v4449_v61, %v4446_v36  ;;  %v4928_v57 = vshll.u32 %v15065_v30, 16  ;;  %v4934_v63 = vshrl.u32 %v15068_v7, 16  ;;  %vm18989_vm12 = vcmask 1045504  }
 0x2b4   : > { %v4465_v6 = vrot.slane %v4463_v44, 2 }
 0x2b5   : > { %12389 = vmatmul.mubr.msk.bf16.gmra.mxu0 %vm836_vm1, %v4878_v29  ;;  %v4909_v29 = vrot.slane %v4907_v28, 2  ;;  %v4451_v24 = vsel %vm18982_vm11, %v4442_v38, %v4450_v2  ;;  %v4922_v28 = vor.u32 %v4921_v33, %v4918_v3  ;;  %v4936_v3 = vrot.slane %v4934_v63, 2  ;;  %vm18991_vm11 = vmmov %vm18979_vm0 }
 0x2b6   : > { %12392 = vmatprep.mubr.msk.bf16.mxu0 %vm836_vm1, %v4887_v53  ;;  %v4460_v53 = vshrl.u32 %v15301_v27, 16  ;;  %v4939_v33 = vrot.slane %v4937_v39, 3  ;;  %v15336_v39 = vld [vmem:[#allocation2 + $0x58] sm:$0xff]  }
 0x2b7   : > { %v4913_v36 = vor.u32 %v4912_v37, %v4909_v29  ;;  %v15321_v29 = vld [vmem:[#allocation2 + $0x50] sm:$0xff]  }
 0x2b8   : > { %12347 = vmatmul.mubr.msk.bf16.vlgmr.msra.gmra.mxu1 %vm836_vm1, %v4427_v9  ;;  %v4443_v9 = vsel %vm18981_vm6, %v4434_v62, %v4442_v38  ;;  %v4462_v61 = vrot.slane %v4460_v53, 1  ;;  %v4476_v37 = vshrl.u32 %v15321_v29, 16  ;;  %v4479_v53 = vshll.u32 %v15321_v29, 16  ;;  %vm18990_vm6 = vmmov %vm18989_vm12 }
 0x2b9   : > { %12421 = vmatpush3.bf16.msra.mxu1 %v5373_v14  ;;  %12350 = vmatprep.mubr.msk.bf16.mxu1 %vm836_vm1, %v4435_v22  ;;  %v4454_v14 = vrot.slane %v4452_v5, 1  ;;  %v4925_v22 = vshrl.u32 %v15065_v30, 16  ;;  %v4930_v5 = vrot.slane %v4928_v57, 3  ;;  %v4468_v30 = vshrl.u32 %v15316_v40, 16 }
 0x2ba   : > { %13012 = vmatprep.subr.msk.bf16.mxu1 %vm2983_vm13, %v15286_v42  ;;  %v4914_v38 = vsel %vm18764_vm4, %v4904_v35, %v4913_v36  ;;  %v4923_v7 = vsel %vm18764_vm4, %v4913_v36, %v4922_v28  ;;  %v4481_v57 = vrot.slane %v4479_v53, 2  ;;  %v4946_v36 = vshll.u32 %v15142_v43, 16 }
 0x2bb   : > { %v4458_v0 = vor.u32 %v4457_v21, %v4454_v14  ;;  %v4927_v62 = vrot.slane %v4925_v22, 2  ;;  %v4470_v21 = vrot.slane %v4468_v30, 1  ;;  %v4478_v22 = vrot.slane %v4476_v37, 1 }
 0x2bd   : > { %12393 = vmatmul.mubr.msk.bf16.gmra.mxu0 %vm836_vm1, %v4896_v10  ;;  %v4471_v10 = vshll.u32 %v15316_v40, 16  ;;  %v4459_v44 = vsel %vm18983_vm2, %v4450_v2, %v4458_v0  ;;  %v4931_v35 = vor.u32 %v4930_v5, %v4927_v62  ;;  %v4955_v2 = vshll.u32 %v15162_v11, 16 }
 0x2be   : > { %12396 = vmatprep.mubr.msk.bf16.mxu0 %vm836_vm1, %v4905_v20  ;;  %v4466_v20 = vor.u32 %v4465_v6, %v4462_v61  ;;  %v4940_v61 = vor.u32 %v4939_v33, %v4936_v3  ;;  %v4952_v6 = vshrl.u32 %v15162_v11, 16  ;;  %v4487_v62 = vshll.u32 %v15336_v39, 16 }
 0x2bf   : > { %v4932_v5 = vsel %vm18764_vm4, %v4922_v28, %v4931_v35  ;;  %v4482_v30 = vor.u32 %v4481_v57, %v4478_v22  ;;  %v4957_v53 = vrot.slane %v4955_v2, 3  ;;  %v4970_v22 = vshrl.u32 %v15167_v17, 16 }
 0x2c0   : > { %12351 = vmatmul.mubr.msk.bf16.gmra.mxu1 %vm836_vm1, %v4443_v9  ;;  %v4467_v14 = vsel %vm18984_vm10, %v4458_v0, %v4466_v20  ;;  %v4473_v9 = vrot.slane %v4471_v10, 2  ;;  %v4484_v0 = vshrl.u32 %v15336_v39, 16  ;;  %v4954_v37 = vrot.slane %v4952_v6, 2  ;;  %vm18994_vm10 = vmmov %vm18990_vm6 }
 0x2c1   : > { %12354 = vmatprep.mubr.msk.bf16.mxu1 %vm836_vm1, %v4451_v24  ;;  %v4943_v24 = vshrl.u32 %v15142_v43, 16  ;;  %v4941_v43 = vsel %vm18764_vm4, %v4931_v35, %v4940_v61  ;;  %v4973_v57 = vshll.u32 %v15167_v17, 16  ;;  %vm18993_vm2 = vcmask 1046528  }
 0x2c2   : > { %v4474_v63 = vor.u32 %v4473_v9, %v4470_v21  ;;  %v4486_v33 = vrot.slane %v4484_v0, 1  ;;  %v4961_v21 = vshrl.u32 %v15164_v60, 16  ;;  %v4964_v9 = vshll.u32 %v15164_v60, 16 }
 0x2c3   : > { %v4945_v10 = vrot.slane %v4943_v24, 2  ;;  %v4958_v35 = vor.u32 %v4957_v53, %v4954_v37  ;;  %v4972_v0 = vrot.slane %v4970_v22, 2  ;;  %v4975_v60 = vrot.slane %v4973_v57, 3 }
 0x2c4   : > { %v4475_v3 = vsel %vm18985_vm15, %v4466_v20, %v4474_v63  ;;  %v4483_v28 = vsel %vm18986_vm14, %v4474_v63, %v4482_v30  ;;  %v4963_v6 = vrot.slane %v4961_v21, 2  ;;  %v4966_v2 = vrot.slane %v4964_v9, 3  ;;  %vm18995_vm15 = vmmov %vm18990_vm6 }
 0x2c5   : > { %12397 = vmatmul.mubr.msk.bf16.gmra.mxu0 %vm836_vm1, %v4914_v38  ;;  %v4948_v38 = vrot.slane %v4946_v36, 3  ;;  %v4988_v53 = vshrl.u32 %v15171_v52, 16  ;;  %vm18997_vm14 = vmmov %vm18993_vm2 }
 0x2c6   : > { %12400 = vmatprep.mubr.msk.bf16.mxu0 %vm836_vm1, %v4923_v7  ;;  %v15343_v7 = vpop.f32.mrf.mxu0 }
 0x2c7   : > { %v4990_v9 = vrot.slane %v4988_v53, 2 }
 0x2c8   : > { %12355 = vmatmul.mubr.msk.bf16.gmra.mxu1 %vm836_vm1, %v4459_v44  ;;  %v4489_v44 = vrot.slane %v4487_v62, 2  ;;  %v15354_v24 = vpop.f32.mrf.mxu0 }
 0x2c9   : > { %12358 = vmatprep.mubr.msk.bf16.mxu1 %vm836_vm1, %v4467_v14  ;;  %v4949_v14 = vor.u32 %v4948_v38, %v4945_v10  ;;  %v4979_v10 = vshrl.u32 %v15169_v15, 16  ;;  %v4982_v38 = vshll.u32 %v15169_v15, 16 }
 0x2ca   : > { %v4490_v20 = vor.u32 %v4489_v44, %v4486_v33  ;;  %v15359_v62 = vpop.f32.mrf.mxu0 }
 0x2cb   : > { %v4950_v36 = vsel %vm18764_vm4, %v4940_v61, %v4949_v14  ;;  %v4959_v63 = vsel %vm18764_vm4, %v4949_v14, %v4958_v35  ;;  %v4967_v61 = vor.u32 %v4966_v2, %v4963_v6  ;;  %v4981_v44 = vrot.slane %v4979_v10, 2  ;;  %v15372_v14 = vld [vmem:[#allocation2 + $0xa0] ss:$0 sps:$4 sm:$0x77]  }
 0x2cc   : > { %v4499_v17 = vsel %vm18979_vm0, %v4490_v20, %v14993_v49  ;;  %v3266_v37 = vpop.f32.mrf.mxu0  ;;  %vm19000_vm0 = vmmov %vm18993_vm2 }
 0x2cd   : > { %12401 = vmatmul.mubr.msk.bf16.gmra.mxu0 %vm836_vm1, %v4932_v5  ;;  %v4491_v5 = vsel %vm18987_vm3, %v4482_v30, %v4490_v20  ;;  %v4968_v30 = vsel %vm18764_vm4, %v4958_v35, %v4967_v61  ;;  %v4997_v20 = vshrl.u32 %v15372_v14, 16  ;;  %vm18998_vm3 = vmmov %vm18990_vm6 }
 0x2ce   : > { %12404 = vmatprep.mubr.msk.bf16.mxu0 %vm836_vm1, %v4941_v43  ;;  %v4976_v43 = vor.u32 %v4975_v60, %v4972_v0 }
 0x2d0   : > { %12359 = vmatmul.mubr.msk.bf16.gmra.mxu1 %vm836_vm1, %v4475_v3  ;;  %v4991_v3 = vshll.u32 %v15171_v52, 16  ;;  %v4977_v49 = vsel %vm18764_vm4, %v4967_v61, %v4976_v43 }
 0x2d1   : > { %12362 = vmatprep.mubr.msk.bf16.mxu1 %vm836_vm1, %v4483_v28  ;;  %v4984_v28 = vrot.slane %v4982_v38, 3 }
 0x2d2   : > { %v4993_v22 = vrot.slane %v4991_v3, 3 }
 0x2d3   : > { %v4985_v35 = vor.u32 %v4984_v28, %v4981_v44 }
 0x2d4   : > { %v4994_v0 = vor.u32 %v4993_v22, %v4990_v9 }
 0x2d5   : > { %12405 = vmatmul.mubr.msk.bf16.gmra.mxu0 %vm836_vm1, %v4950_v36  ;;  %v5000_v36 = vshll.u32 %v15372_v14, 16 }
 0x2d6   : > { %12408 = vmatprep.mubr.msk.bf16.mxu0 %vm836_vm1, %v4959_v63  ;;  %v4995_v10 = vsel %vm18764_vm4, %v4985_v35, %v4994_v0 }
 0x2d7   : > { %v5002_v61 = vrot.slane %v5000_v36, 3  ;;  %v5275_v36 = vld [vmem:[#allocation2] sm:$0xe] }
 0x2d8   : > { %12363 = vmatmul.mubr.msk.bf16.gmra.mxu1 %vm836_vm1, %v4491_v5  ;;  %v4986_v5 = vsel %vm18764_vm4, %v4976_v43, %v4985_v35 }
 0x2d9   : > { %12366 = vmatprep.mubr.msk.bf16.mxu1 %vm836_vm1, %v4499_v17  ;;  %v4999_v17 = vrot.slane %v4997_v20, 2  ;;  %v4550_v20 = vshrl.u32 %v15097_v46, 16 }
 0x2da   : > { %v12238_v33 = vpop.f32.mrf.mxu0 }
 0x2db   : > { %v5003_v43 = vor.u32 %v5002_v61, %v4999_v17  ;;  %v13359_v61 = vld [vmem:[#allocation2 + $0x4] sm:$0xf] }
 0x2dc   : > { %v3279_v15 = vpop.f32.mrf.mxu0 }
 0x2dd   : > { %12409 = vmatmul.mubr.msk.bf16.gmra.mxu0 %vm836_vm1, %v4968_v30  ;;  %v15377_v21 = vpop.f32.mrf.mxu1  ;;  %v5004_v35 = vsel %vm18764_vm4, %v4994_v0, %v5003_v43  ;;  %v5597_v0 = vrot.slane %v15244_v25, 2 }
 0x2de   : > { %12412 = vmatprep.mubr.msk.bf16.mxu0 %vm836_vm1, %v4977_v49  ;;  %v12239_v57 = vpop.f32.mrf.mxu0 }
 0x2df   : > { %v15383_v6 = vpop.f32.mrf.mxu1 }
 0x2e0   : > { %12367 = vmatmul.mubr.msk.bf16.gmra.mxu1 %vm836_vm1, %v15008_v56  ;;  %v3282_v2 = vpop.f32.mrf.mxu0 }
 0x2e1   : > { %12370 = vmatprep.mubr.msk.bf16.mxu1 %vm836_vm1, %v15019_v50  ;;  %v15387_v63 = vpop.f32.mrf.mxu1 }
 0x2e2   : > { %v12242_v60 = vpop.f32.mrf.mxu0 }
 0x2e3   : > { %v3024_v56 = vpop.f32.mrf.mxu1 }
 0x2e4   : > { %v15392_v38 = vadd.f32 %v3266_v37, %v3024_v56  ;;  %v3295_v53 = vpop.f32.mrf.mxu0  ;;  %v11276_v56 = vcombine.low %v5275_v36, %v13359_v61 }
 0x2e5   : > { %12413 = vmatmul.mubr.msk.bf16.gmra.mxu0 %vm836_vm1, %v4986_v5  ;;  %v12200_v50 = vpop.f32.mrf.mxu1 }
 0x2e6   : > { %12416 = vmatprep.mubr.msk.bf16.mxu0 %vm836_vm1, %v4995_v10  ;;  %v15395_v3 = vadd.f32 %v12238_v33, %v12200_v50  ;;  %v12243_v30 = vpop.f32.mrf.mxu0 }
 0x2e7   : > { %v3037_v44 = vpop.f32.mrf.mxu1 }
 0x2e8   : > { %12371 = vmatmul.mubr.msk.bf16.gmra.mxu1 %vm836_vm1, %v15033_v54  ;;  %v15401_v28 = vadd.f32 %v3279_v15, %v3037_v44  ;;  %v3298_v49 = vpop.f32.mrf.mxu0  ;;  %v4553_v54 = vshll.u32 %v15097_v46, 16  ;;  %v4552_v46 = vrot.slane %v4550_v20, 1 }
 0x2e9   : > { %12374 = vmatprep.mubr.msk.bf16.mxu1 %vm836_vm1, %v15036_v34  ;;  %v12201_v37 = vpop.f32.mrf.mxu1 }
 0x2ea   : > { %v15403_v9 = vadd.f32 %v12239_v57, %v12201_v37  ;;  %v12246_v22 = vpop.f32.mrf.mxu0  ;;  %v5281_v37 = vrot.slane %v11276_v56, 1  ;;  %v5601_v56 = vrot.slane %v15266_v45, 2  ;;  %v6000_v45 = vsel %vm2983_vm13, %v15286_v42, 0  ;;  %vm18999_vm13 = vmmov %vm18998_vm3 }
 0x2eb   : > { %v3040_v33 = vpop.f32.mrf.mxu1 }
 0x2ec   : > { %v15409_v5 = vadd.f32 %v3282_v2, %v3040_v33  ;;  %v3311_v34 = vpop.f32.mrf.mxu0  ;;  %v4555_v2 = vrot.slane %v4553_v54, 2 }
 0x2ed   : > { %12417 = vmatmul.mubr.msk.bf16.gmra.mxu0 %vm836_vm1, %v5004_v35  ;;  %v12204_v15 = vpop.f32.mrf.mxu1 }
 0x2ee   : > { %12460 = vmatprep.mubr.msk.bf16.mxu0 %vm836_vm1, %v14732_v13  ;;  %v15413_v57 = vadd.f32 %v12242_v60, %v12204_v15  ;;  %v12247_v17 = vpop.f32.mrf.mxu0  ;;  %v5599_v60 = vrot.slane %v15248_v18, 2  ;;  %v4556_v20 = vor.u32 %v4555_v2, %v4552_v46  ;;  %v13360_v46 = vld [vmem:[#allocation2 + $0x18] sm:$0xff]  }
 0x2ef   : > { %v3053_v10 = vpop.f32.mrf.mxu1  ;;  %v5286_v2 = vrot.slane %v13360_v46, 1 }
 0x2f0   : > { %12375 = vmatmul.mubr.msk.bf16.gmra.mxu1 %vm836_vm1, %v15049_v41  ;;  %v15420_v50 = vadd.f32 %v3295_v53, %v3053_v10  ;;  %v3314_v13 = vpop.f32.mrf.mxu0  ;;  %v18988_v41 = vrot.slane %v14710_v16, 2  ;;  %v4557_v18 = vsel %vm18991_vm11, %v15043_v4, %v4556_v20  ;;  %v18992_v16 = vrot.slane %v14722_v32, 1  ;;  %vm19003_vm11 = vmmov %vm18998_vm3 }
 0x2f1   : > { %12378 = vmatprep.mubr.msk.bf16.mxu1 %vm836_vm1, %v15056_v48  ;;  %v12205_v43 = vpop.f32.mrf.mxu1  ;;  %v5600_v48 = vsel %vm18990_vm6, %v5597_v0, %v5599_v60  ;;  %vm19002_vm6 = vmmov %vm18998_vm3 }
 0x2f2   : > { %v15423_v44 = vadd.f32 %v12243_v30, %v12205_v43  ;;  %v5598_v25 = vsel %vm18989_vm12, %v18988_v41, %v5597_v0  ;;  %v12250_v35 = vpop.f32.mrf.mxu0  ;;  %v5283_v36 = vsel %vm18993_vm2, %v5281_v37, %v18992_v16  ;;  %v5607_v37 = vrot.slane %v15301_v27, 2  ;;  %vm19001_vm12 = vmmov %vm19000_vm0 }
 0x2f3   : > { %v3056_v33 = vpop.f32.mrf.mxu1  ;;  %vm19004_vm2 = vmmov %vm19000_vm0 }
 0x2f4   : > { %v15430_v53 = vadd.f32 %v3298_v49, %v3056_v33  ;;  %v3327_v15 = vpop.f32.mrf.mxu0  ;;  %v5603_v49 = vrot.slane %v15270_v59, 2  ;;  %v18996_v59 = vrot.slane %v14724_v55, 1 }
 0x2f5   : > { %12461 = vmatmul.mubr.msk.bf16.vlgmr.msra.gmra.mxu0 %vm836_vm1, %v5598_v25  ;;  %v12208_v54 = vpop.f32.mrf.mxu1 }
 0x2f6   : > { %12464 = vmatprep.mubr.msk.bf16.mxu0 %vm836_vm1, %v5600_v48  ;;  %v15435_v30 = vadd.f32 %v12246_v22, %v12208_v54  ;;  %v5602_v22 = vsel %vm18994_vm10, %v5599_v60, %v5601_v56  ;;  %v12251_v32 = vpop.f32.mrf.mxu0  ;;  %v5604_v41 = vsel %vm18995_vm15, %v5601_v56, %v5603_v49  ;;  %v13361_v48 = vld [vmem:[#allocation2 + $0x20] sm:$0xff]   ;;  %vm19005_vm10 = vmmov %vm19000_vm0 }
 0x2f7   : > { %v3069_v61 = vpop.f32.mrf.mxu1  ;;  %v5288_v42 = vrot.slane %v13361_v48, 1  ;;  %vm19006_vm15 = vmmov %vm18998_vm3 }
 0x2f8   : > { %12379 = vmatmul.mubr.msk.bf16.gmra.mxu1 %vm836_vm1, %v4557_v18  ;;  %v15443_v0 = vadd.f32 %v3311_v34, %v3069_v61  ;;  %v5287_v34 = vsel %vm18997_vm14, %v18996_v59, %v5286_v2  ;;  %v3330_v60 = vpop.f32.mrf.mxu0  ;;  %vm19008_vm14 = vmmov %vm18998_vm3 }
 0x2f9   : > { %12422 = vmatprep.mubr.msk.bf16.mxu1 %vm836_vm1, %v5283_v36  ;;  %v12209_v10 = vpop.f32.mrf.mxu1  ;;  %v5289_v36 = vsel %vm19000_vm0, %v5286_v2, %v5288_v42 }
 0x2fa   : > { %v15446_v4 = vadd.f32 %v12247_v17, %v12209_v10  ;;  %v5605_v17 = vrot.slane %v15294_v31, 2  ;;  %v13362_v31 = vld [vmem:[#allocation2 + $0x28] sm:$0xff]  }
 0x2fb   : > { %v3072_v43 = vpop.f32.mrf.mxu1  ;;  %v5290_v54 = vrot.slane %v13362_v31, 1 }
 0x2fc   : > { %v15451_v25 = vadd.f32 %v3314_v13, %v3072_v43  ;;  %v5606_v33 = vsel %vm18998_vm3, %v5603_v49, %v5605_v17  ;;  %v5608_v55 = vsel %vm18999_vm13, %v5605_v17, %v5607_v37  ;;  %v5609_v49 = vrot.slane %v15316_v40, 2  ;;  %vm19009_vm3 = vmmov %vm19000_vm0 }
 0x2fd   : > { %12465 = vmatmul.mubr.msk.bf16.gmra.mxu0 %vm836_vm1, %v5602_v22  ;;  %v5291_v61 = vsel %vm19001_vm12, %v5288_v42, %v5290_v54  ;;  %v5611_v22 = vrot.slane %v15321_v29, 2  ;;  %vm19010_vm13 = vmmov %vm19000_vm0 }
 0x2fe   : > { %12468 = vmatprep.mubr.msk.bf16.mxu0 %vm836_vm1, %v5604_v41  ;;  %v13363_v41 = vld [vmem:[#allocation2 + $0x30] sm:$0xff]   ;;  %v5610_v59 = vsel %vm19002_vm6, %v5607_v37, %v5609_v49  ;;  %vm19011_vm12 = vmmov %vm19000_vm0 }
 0x2ff   : > { %v5292_v2 = vrot.slane %v13363_v41, 1  ;;  %vm19012_vm6 = vmmov %vm19000_vm0 }
 0x300   : > { %12423 = vmatmul.mubr.msk.bf16.vlgmr.msra.gmra.mxu1 %vm836_vm1, %v14745_v12 }
 0x301   : > { %12497 = vmatpush3.bf16.msra.mxu1 %v6000_v45  ;;  %12426 = vmatprep.mubr.msk.bf16.mxu1 %vm836_vm1, %v5287_v34  ;;  %v12254_v13 = vpop.f32.mrf.mxu0  ;;  %v13364_v34 = vld [vmem:[#allocation2 + $0x38] sm:$0xff]   ;;  %v5293_v42 = vsel %vm19004_vm2, %v5290_v54, %v5292_v2  ;;  %v13365_v54 = vld [vmem:[#allocation2 + $0x48] sm:$0xff]   ;;  %vm19043_vm2 = vsmask.f32 1280 }
 0x302   : > { %v5294_v17 = vrot.slane %v13364_v34, 1 }
 0x303   : > { %v3343_v20 = vpop.f32.mrf.mxu0 }
 0x304   : > { %v12212_v12 = vpop.f32.mrf.mxu1  ;;  %v5295_v37 = vsel %vm19005_vm10, %v5292_v2, %v5294_v17  ;;  %v13366_v2 = vld [vmem:[#allocation2 + $0x40] sm:$0xff]  }
 0x305   : > { %12469 = vmatmul.mubr.msk.bf16.gmra.mxu0 %vm836_vm1, %v5606_v33  ;;  %v15468_v18 = vadd.f32 %v12250_v35, %v12212_v12  ;;  %v12255_v16 = vpop.f32.mrf.mxu0 }
 0x306   : > { %12472 = vmatprep.mubr.msk.bf16.mxu0 %vm836_vm1, %v5608_v55  ;;  %v3085_v27 = vpop.f32.mrf.mxu1 }
 0x307   : > { %v15474_v56 = vadd.f32 %v3327_v15, %v3085_v27  ;;  %v3346_v10 = vpop.f32.mrf.mxu0  ;;  %v5612_v15 = vsel %vm19003_vm11, %v5609_v49, %v5611_v22  ;;  %vm19014_vm11 = vmmov %vm19000_vm0 }
 0x308   : > { %12427 = vmatmul.mubr.msk.bf16.gmra.mxu1 %vm836_vm1, %v5289_v36  ;;  %v12213_v46 = vpop.f32.mrf.mxu1 }
 0x309   : > { %12430 = vmatprep.mubr.msk.bf16.mxu1 %vm836_vm1, %v5291_v61  ;;  %v15478_v35 = vadd.f32 %v12251_v32, %v12213_v46  ;;  %v12258_v43 = vpop.f32.mrf.mxu0  ;;  %v5298_v46 = vrot.slane %v13365_v54, 1 }
 0x30a   : > { %v3088_v45 = vpop.f32.mrf.mxu1 }
 0x30b   : > { %v15481_v33 = vadd.f32 %v3330_v60, %v3088_v45  ;;  %v3359_v40 = vpop.f32.mrf.mxu0  ;;  %v5613_v60 = vrot.slane %v15336_v39, 2  ;;  %v19007_v39 = vrot.slane %v14862_v26, 2 }
 0x30c   : > { %v12216_v48 = vpop.f32.mrf.mxu1 }
 0x30d   : > { %12473 = vmatmul.mubr.msk.bf16.gmra.mxu0 %vm836_vm1, %v5610_v59  ;;  %v15486_v29 = vadd.f32 %v12254_v13, %v12216_v48  ;;  %v12259_v32 = vpop.f32.mrf.mxu0  ;;  %v5614_v49 = vsel %vm19006_vm15, %v5611_v22, %v5613_v60  ;;  %v5296_v59 = vrot.slane %v13366_v2, 1 }
 0x30e   : > { %12476 = vmatprep.mubr.msk.bf16.mxu0 %vm836_vm1, %v5612_v15  ;;  %v3101_v55 = vpop.f32.mrf.mxu1 }
 0x30f   : > { %v15492_v12 = vadd.f32 %v3343_v20, %v3101_v55  ;;  %v3362_v31 = vpop.f32.mrf.mxu0  ;;  %v5616_v20 = vsel %vm19008_vm14, %v5613_v60, %v19007_v39  ;;  %v5297_v22 = vsel %vm19009_vm3, %v5294_v17, %v5296_v59  ;;  %v13367_v60 = vld [vmem:[#allocation2 + $0x50] sm:$0xff]  }
 0x310   : > { %12431 = vmatmul.mubr.msk.bf16.gmra.mxu1 %vm836_vm1, %v5293_v42  ;;  %v12217_v36 = vpop.f32.mrf.mxu1 }
 0x311   : > { %12434 = vmatprep.mubr.msk.bf16.mxu1 %vm836_vm1, %v5295_v37  ;;  %v15495_v27 = vadd.f32 %v12255_v16, %v12217_v36  ;;  %v12262_v13 = vpop.f32.mrf.mxu0  ;;  %v5300_v36 = vrot.slane %v13367_v60, 1 }
 0x312   : > { %v3104_v61 = vpop.f32.mrf.mxu1 }
 0x313   : > { %v15498_v41 = vadd.f32 %v3346_v10, %v3104_v61  ;;  %v3375_v45 = vpop.f32.mrf.mxu0  ;;  %v5299_v10 = vsel %vm19010_vm13, %v5296_v59, %v5298_v46  ;;  %v13368_v61 = vld [vmem:[#allocation2 + $0x58] sm:$0xff]   ;;  %v5301_v39 = vsel %vm19000_vm0, %v5298_v46, %v5300_v36 }
 0x314   : > { %v12220_v34 = vpop.f32.mrf.mxu1 }
 0x315   : > { %12477 = vmatmul.mubr.msk.bf16.gmra.mxu0 %vm836_vm1, %v5614_v49  ;;  %v15505_v16 = vadd.f32 %v12258_v43, %v12220_v34  ;;  %v12263_v15 = vpop.f32.mrf.mxu0  ;;  %v5302_v49 = vrot.slane %v13368_v61, 1 }
 0x316   : > { %12480 = vmatprep.mubr.msk.bf16.mxu0 %vm836_vm1, %v5616_v20  ;;  %v3117_v48 = vpop.f32.mrf.mxu1 }
 0x317   : > { %v15510_v42 = vadd.f32 %v3359_v40, %v3117_v48  ;;  %v3378_v55 = vpop.f32.mrf.mxu0 }
 0x318   : > { %12435 = vmatmul.mubr.msk.bf16.gmra.mxu1 %vm836_vm1, %v5297_v22  ;;  %v12221_v26 = vpop.f32.mrf.mxu1  ;;  %v13369_v22 = vld [vmem:[#allocation2 + $0x60] sm:$0xff]  }
 0x319   : > { %12438 = vmatprep.mubr.msk.bf16.mxu1 %vm836_vm1, %v5299_v10  ;;  %v15513_v37 = vadd.f32 %v12259_v32, %v12221_v26  ;;  %v5303_v32 = vsel %vm19011_vm12, %v5300_v36, %v5302_v49 }
 0x31a   : > { %v3120_v43 = vpop.f32.mrf.mxu1 }
 0x31b   : > { %v15515_v54 = vadd.f32 %v3362_v31, %v3120_v43  ;;  %v19013_v43 = vrot.slane %v15052_v51, 1 }
 0x31d   : > { %v12266_v17 = vpop.f32.mrf.mxu0  ;;  %12481 = vmatmul.mubr.msk.bf16.gmra.mxu0 %vm836_vm1, %v15089_v58 }
 0x31e   : > { %12484 = vmatprep.mubr.msk.bf16.mxu0 %vm836_vm1, %v15100_v1  ;;  %v5304_v1 = vrot.slane %v13369_v22, 1 }
 0x31f   : > { %v3391_v40 = vpop.f32.mrf.mxu0 }
 0x320   : > { %v12224_v20 = vpop.f32.mrf.mxu1  ;;  %12439 = vmatmul.mubr.msk.bf16.gmra.mxu1 %vm836_vm1, %v5301_v39 }
 0x321   : > { %v15524_v2 = vadd.f32 %v12262_v13, %v12224_v20  ;;  %v12267_v59 = vpop.f32.mrf.mxu0  ;;  %12442 = vmatprep.mubr.msk.bf16.mxu1 %vm836_vm1, %v5303_v32 }
 0x322   : > { %v3133_v31 = vpop.f32.mrf.mxu1 }
 0x323   : > { %v15527_v34 = vadd.f32 %v3375_v45, %v3133_v31  ;;  %v15529_v58 = vpop.f32.mrf.mxu0  ;;  %v5305_v45 = vsel %vm19012_vm6, %v5302_v49, %v5304_v1  ;;  %v19015_v31 = vld [vmem:[#allocation19_spill] sm:$0xff] }
 0x324   : > { %v12225_v48 = vpop.f32.mrf.mxu1 }
 0x325   : > { %v15531_v10 = vadd.f32 %v12263_v15, %v12225_v48  ;;  %v12310_v46 = vpop.f32.mrf.mxu0  ;;  %12485 = vmatmul.mubr.msk.bf16.gmra.mxu0 %vm836_vm1, %v15111_v8  ;;  %v5307_v15 = vsel %vm19014_vm11, %v5304_v1, %v19013_v43  ;;  %v19016_v1 = vld [vmem:[#allocation21_spill] sm:$0xff] }
 0x326   : > { %v3136_v26 = vpop.f32.mrf.mxu1  ;;  %12488 = vmatprep.mubr.msk.bf16.mxu0 %vm836_vm1, %v15118_v23 }
 0x327   : > { %v15537_v13 = vadd.f32 %v3378_v55, %v3136_v26  ;;  %v4218_v60 = vpop.f32.mrf.mxu0 }
 0x328   : > { %v12228_v36 = vpop.f32.mrf.mxu1  ;;  %12443 = vmatmul.mubr.msk.bf16.gmra.mxu1 %vm836_vm1, %v5305_v45  ;;  %v19017_v45 = vld [vmem:[#allocation24_spill] sm:$0xff] }
 0x329   : > { %v15544_v61 = vadd.f32 %v12266_v17, %v12228_v36  ;;  %v12311_v39 = vpop.f32.mrf.mxu0  ;;  %12446 = vmatprep.mubr.msk.bf16.mxu1 %vm836_vm1, %v5307_v15  ;;  %v3272_v17 = vadd.f32 %v15343_v7, %v15377_v21  ;;  %v3275_v36 = vadd.f32 %v15359_v62, %v15387_v63  ;;  %v19020_v63 = vld [vmem:[#allocation16_spill] sm:$0xff] }
 0x32a   : > { %v3149_v8 = vpop.f32.mrf.mxu1 }
 0x32b   : > { %v15547_v20 = vadd.f32 %v3391_v40, %v3149_v8  ;;  %v15549_v23 = vpop.f32.mrf.mxu0 }
 0x32c   : > { %v12229_v55 = vpop.f32.mrf.mxu1 }
 0x32d   : > { %v15551_v32 = vadd.f32 %v12267_v59, %v12229_v55  ;;  %v12314_v49 = vpop.f32.mrf.mxu0  ;;  %12489 = vmatmul.mubr.msk.bf16.gmra.mxu0 %vm836_vm1, %v15121_v19  ;;  %v3264_v59 = vadd.f32 %v15354_v24, %v15383_v6 }
 0x32e   : > { %v15555_v51 = vpop.f32.mrf.mxu1  ;;  %12492 = vmatprep.mubr.msk.bf16.mxu0 %vm836_vm1, %v19015_v31  ;;  %v19019_v31 = vld [vmem:[#allocation17_spill] sm:$0xff] }
 0x32f   : > { %v4234_v22 = vpop.f32.mrf.mxu0 }
 0x330   : > { %v12272_v40 = vpop.f32.mrf.mxu1  ;;  %12447 = vmatmul.mubr.msk.bf16.gmra.mxu1 %vm836_vm1, %v19016_v1 }
 0x331   : > { %v3812_v48 = vadd.f32 %v12272_v40, %v3272_v17  ;;  %v12315_v26 = vpop.f32.mrf.mxu0  ;;  %12450 = vmatprep.mubr.msk.bf16.mxu1 %vm836_vm1, %v19017_v45  ;;  %v5901_v45 = vld [vmem:[#allocation2 + $0x10] sm:$0x8] }
 0x332   : > { %v3667_v19 = vpop.f32.mrf.mxu1 }
 0x333   : > { %v3810_v43 = vadd.f32 %v3667_v19, %v3264_v59  ;;  %v15569_v15 = vpop.f32.mrf.mxu0  ;;  %v15571_v7 = vadd.f32 %v12310_v46, %v3812_v48  ;;  %v19021_v48 = vld [vmem:[#allocation22_spill] sm:$0xff]  ;;  %v13370_v19 = vld [vmem:[#allocation2 + $0x14] sm:$0xf] }
 0x334   : > { %19018 = vst [vmem:[#allocation25_spill] sm:$0xff] %v15569_v15  ;;  %v12273_v21 = vpop.f32.mrf.mxu1 }
 0x335   : > { %v3813_v8 = vadd.f32 %v12273_v21, %v3275_v36  ;;  %v12318_v55 = vpop.f32.mrf.mxu0  ;;  %12493 = vmatmul.mubr.msk.bf16.gmra.mxu0 %vm836_vm1, %v19019_v31  ;;  %v15575_v24 = vadd.f32 %v4218_v60, %v3810_v43  ;;  %v11316_v36 = vcombine.low %v5901_v45, %v13370_v19 }
 0x336   : > { %v3670_v6 = vpop.f32.mrf.mxu1 }
 0x337   : > { %v15578_v17 = vadd.f32 %v3670_v6, %v15392_v38  ;;  %v4250_v40 = vpop.f32.mrf.mxu0  ;;  %v15580_v1 = vadd.f32 %v12311_v39, %v3813_v8  ;;  %v13371_v8 = vld [vmem:[#allocation2 + $0x18] sm:$0xff]  }
 0x338   : > { %v12276_v62 = vpop.f32.mrf.mxu1  ;;  %12451 = vmatmul.mubr.msk.bf16.gmra.mxu1 %vm836_vm1, %v19020_v63  ;;  %v5909_v31 = vrot.slane %v13371_v8, 3 }
 0x339   : > { %v3816_v46 = vadd.f32 %v12276_v62, %v15395_v3  ;;  %v12319_v59 = vpop.f32.mrf.mxu0  ;;  %12454 = vmatprep.mubr.msk.bf16.mxu1 %vm836_vm1, %v19021_v48  ;;  %v5908_v48 = vrot.slane %v11316_v36, 3 }
 0x33a   : > { %v3683_v60 = vpop.f32.mrf.mxu1 }
 0x33b   : > { %v3814_v38 = vadd.f32 %v3683_v60, %v15401_v28  ;;  %v15588_v43 = vpop.f32.mrf.mxu0  ;;  %v15590_v39 = vadd.f32 %v12314_v49, %v3816_v46  ;;  %v19023_v60 = vld [vmem:[#allocation20_spill] sm:$0xff]  ;;  %v5910_v49 = vsel %vm18763_vm5, %v5908_v48, %v5909_v31 }
 0x33c   : > { %19022 = vst [vmem:[#allocation27_spill] sm:$0xff] %v15588_v43  ;;  %v12277_v21 = vpop.f32.mrf.mxu1 }
 0x33d   : > { %v3817_v6 = vadd.f32 %v12277_v21, %v15403_v9  ;;  %v12322_v3 = vpop.f32.mrf.mxu0  ;;  %v15593_v62 = vadd.f32 %v4234_v22, %v3814_v38  ;;  %v13372_v21 = vld [vmem:[#allocation2 + $0x20] sm:$0xff]  }
 0x33e   : > { %v3686_v63 = vpop.f32.mrf.mxu1  ;;  %v5911_v8 = vrot.slane %v13372_v21, 3  ;;  %v13374_v21 = vld [vmem:[#allocation2 + $0x30] sm:$0xff]  }
 0x33f   : > { %v15596_v15 = vadd.f32 %v3686_v63, %v15409_v5  ;;  %v4266_v45 = vpop.f32.mrf.mxu0  ;;  %v15598_v19 = vadd.f32 %v12315_v26, %v3817_v6 }
 0x340   : > { %v12280_v28 = vpop.f32.mrf.mxu1  ;;  %12455 = vmatmul.mubr.msk.bf16.gmra.mxu1 %vm836_vm1, %v19023_v60 }
 0x341   : > { %v3820_v46 = vadd.f32 %v12280_v28, %v15413_v57  ;;  %v12323_v9 = vpop.f32.mrf.mxu0  ;;  %12498 = vmatprep.mubr.msk.bf16.mxu1 %vm836_vm1, %v5910_v49  ;;  %v13373_v57 = vld [vmem:[#allocation2 + $0x28] sm:$0xff]  }
 0x342   : > { %v3699_v22 = vpop.f32.mrf.mxu1  ;;  %v5913_v28 = vrot.slane %v13373_v57, 3 }
 0x343   : > { %v3818_v36 = vadd.f32 %v3699_v22, %v15420_v50  ;;  %v15606_v38 = vpop.f32.mrf.mxu0  ;;  %v15608_v5 = vadd.f32 %v12318_v55, %v3820_v46  ;;  %v5912_v50 = vsel %vm18763_vm5, %v5909_v31, %v5911_v8 }
 0x344   : > { %19024 = vst [vmem:[#allocation12_spill] sm:$0xff] %v15606_v38  ;;  %v12281_v26 = vpop.f32.mrf.mxu1  ;;  %v5914_v46 = vsel %vm18763_vm5, %v5911_v8, %v5913_v28 }
 0x345   : > { %v3821_v6 = vadd.f32 %v12281_v26, %v15423_v44  ;;  %v12326_v63 = vpop.f32.mrf.mxu0  ;;  %v15611_v60 = vadd.f32 %v4250_v40, %v3818_v36 }
 0x346   : > { %v3702_v48 = vpop.f32.mrf.mxu1 }
 0x347   : > { %v15614_v49 = vadd.f32 %v3702_v48, %v15430_v53  ;;  %v4282_v43 = vpop.f32.mrf.mxu0  ;;  %v15617_v22 = vadd.f32 %v12319_v59, %v3821_v6  ;;  %v5915_v48 = vrot.slane %v13374_v21, 3  ;;  %v13375_v6 = vld [vmem:[#allocation2 + $0x38] sm:$0xff]  }
 0x348   : > { %v12284_v55 = vpop.f32.mrf.mxu1  ;;  %12499 = vmatmul.mubr.msk.bf16.vlgmr.msra.gmra.mxu1 %vm836_vm1, %v5912_v50  ;;  %v5917_v57 = vrot.slane %v13375_v6, 3 }
 0x349   : > { %v3824_v44 = vadd.f32 %v12284_v55, %v15435_v30  ;;  %v12327_v40 = vpop.f32.mrf.mxu0  ;;  %12502 = vmatprep.mubr.msk.bf16.mxu1 %vm836_vm1, %v5914_v46 }
 0x34a   : > { %v3715_v36 = vpop.f32.mrf.mxu1 }
 0x34b   : > { %v3822_v26 = vadd.f32 %v3715_v36, %v15443_v0  ;;  %v15624_v53 = vpop.f32.mrf.mxu0  ;;  %v15626_v31 = vadd.f32 %v12322_v3, %v3824_v44  ;;  %v5916_v0 = vsel %vm18763_vm5, %v5913_v28, %v5915_v48  ;;  %v5918_v3 = vsel %vm18763_vm5, %v5915_v48, %v5917_v57 }
 0x34c   : > { %19025 = vst [vmem:[#allocation13_spill] sm:$0xff] %v15624_v53  ;;  %v12285_v59 = vpop.f32.mrf.mxu1 }
 0x34d   : > { %v3825_v50 = vadd.f32 %v12285_v59, %v15446_v4  ;;  %v12330_v8 = vpop.f32.mrf.mxu0  ;;  %v15629_v38 = vadd.f32 %v4266_v45, %v3822_v26 }
 0x34e   : > { %v3718_v30 = vpop.f32.mrf.mxu1 }
 0x34f   : > { %v15632_v55 = vadd.f32 %v3718_v30, %v15451_v25  ;;  %v4298_v46 = vpop.f32.mrf.mxu0  ;;  %v15635_v36 = vadd.f32 %v12323_v9, %v3825_v50  ;;  %v13376_v9 = vld [vmem:[#allocation2 + $0x48] sm:$0xff]  }
 0x350   : > { %v12288_v21 = vpop.f32.mrf.mxu1  ;;  %12503 = vmatmul.mubr.msk.bf16.gmra.mxu1 %vm836_vm1, %v5916_v0  ;;  %v5921_v6 = vrot.slane %v13376_v9, 3  ;;  %v13377_v0 = vld [vmem:[#allocation2 + $0x40] sm:$0xff]   ;;  %v13378_v9 = vld [vmem:[#allocation2 + $0x50] sm:$0xff]  }
 0x351   : > { %v3828_v44 = vadd.f32 %v12288_v21, %v15468_v18  ;;  %v12331_v4 = vpop.f32.mrf.mxu0  ;;  %12506 = vmatprep.mubr.msk.bf16.mxu1 %vm836_vm1, %v5918_v3  ;;  %v5919_v48 = vrot.slane %v13377_v0, 3  ;;  %v5923_v0 = vrot.slane %v13378_v9, 3 }
 0x352   : > { %v3731_v45 = vpop.f32.mrf.mxu1 }
 0x353   : > { %v3826_v26 = vadd.f32 %v3731_v45, %v15474_v56  ;;  %v15642_v25 = vpop.f32.mrf.mxu0  ;;  %v15644_v59 = vadd.f32 %v12326_v63, %v3828_v44  ;;  %v5920_v56 = vsel %vm18763_vm5, %v5917_v57, %v5919_v48  ;;  %v5922_v44 = vsel %vm18763_vm5, %v5919_v48, %v5921_v6 }
 0x354   : > { %19026 = vst [vmem:[#allocation14_spill] sm:$0xff] %v15642_v25  ;;  %v12289_v28 = vpop.f32.mrf.mxu1 }
 0x355   : > { %v3829_v50 = vadd.f32 %v12289_v28, %v15478_v35  ;;  %v12334_v30 = vpop.f32.mrf.mxu0  ;;  %v15647_v53 = vadd.f32 %v4282_v43, %v3826_v26 }
 0x356   : > { %v3734_v18 = vpop.f32.mrf.mxu1 }
 0x357   : > { %v15650_v21 = vadd.f32 %v3734_v18, %v15481_v33  ;;  %v4314_v3 = vpop.f32.mrf.mxu0  ;;  %v15653_v45 = vadd.f32 %v12327_v40, %v3829_v50  ;;  %v13379_v50 = vld [vmem:[#allocation2 + $0x58] sm:$0xff]  }
 0x358   : > { %v12292_v63 = vpop.f32.mrf.mxu1  ;;  %12507 = vmatmul.mubr.msk.bf16.gmra.mxu1 %vm836_vm1, %v5920_v56  ;;  %v5925_v18 = vrot.slane %v13379_v50, 3 }
 0x359   : > { %v3832_v35 = vadd.f32 %v12292_v63, %v15486_v29  ;;  %v12335_v28 = vpop.f32.mrf.mxu0  ;;  %12510 = vmatprep.mubr.msk.bf16.mxu1 %vm836_vm1, %v5922_v44 }
 0x35a   : > { %v3747_v43 = vpop.f32.mrf.mxu1 }
 0x35b   : > { %v3830_v26 = vadd.f32 %v3747_v43, %v15492_v12  ;;  %v15660_v33 = vpop.f32.mrf.mxu0  ;;  %v15662_v57 = vadd.f32 %v12330_v8, %v3832_v35  ;;  %v5924_v12 = vsel %vm18763_vm5, %v5921_v6, %v5923_v0  ;;  %v5926_v8 = vsel %vm18763_vm5, %v5923_v0, %v5925_v18 }
 0x35c   : > { %19027 = vst [vmem:[#allocation11_spill] sm:$0xff] %v15660_v33  ;;  %v12293_v40 = vpop.f32.mrf.mxu1 }
 0x35d   : > { %v3833_v56 = vadd.f32 %v12293_v40, %v15495_v27  ;;  %v12338_v48 = vpop.f32.mrf.mxu0  ;;  %v15665_v25 = vadd.f32 %v4298_v46, %v3830_v26  ;;  %v13380_v40 = vld [vmem:[#allocation2 + $0x60] sm:$0xff]  }
 0x35e   : > { %v3750_v29 = vpop.f32.mrf.mxu1  ;;  %v5927_v50 = vrot.slane %v13380_v40, 3 }
 0x35f   : > { %v15668_v63 = vadd.f32 %v3750_v29, %v15498_v41  ;;  %v4330_v44 = vpop.f32.mrf.mxu0  ;;  %v15671_v43 = vadd.f32 %v12331_v4, %v3833_v56  ;;  %v13381_v56 = vld [vmem:[#allocation2 + $0x68] sm:$0xff]  }
 0x360   : > { %v12296_v9 = vpop.f32.mrf.mxu1  ;;  %12511 = vmatmul.mubr.msk.bf16.gmra.mxu1 %vm836_vm1, %v5924_v12  ;;  %v5929_v29 = vrot.slane %v13381_v56, 3 }
 0x361   : > { %v3836_v35 = vadd.f32 %v12296_v9, %v15505_v16  ;;  %v12339_v27 = vpop.f32.mrf.mxu0  ;;  %12514 = vmatprep.mubr.msk.bf16.mxu1 %vm836_vm1, %v5926_v8 }
 0x362   : > { %v3763_v46 = vpop.f32.mrf.mxu1 }
 0x363   : > { %v3834_v26 = vadd.f32 %v3763_v46, %v15510_v42  ;;  %v15678_v41 = vpop.f32.mrf.mxu0  ;;  %v15680_v6 = vadd.f32 %v12334_v30, %v3836_v35  ;;  %v5928_v42 = vsel %vm18763_vm5, %v5925_v18, %v5927_v50  ;;  %v5930_v30 = vsel %vm18763_vm5, %v5927_v50, %v5929_v29 }
 0x364   : > { %v12297_v4 = vpop.f32.mrf.mxu1 }
 0x365   : > { %v3837_v12 = vadd.f32 %v12297_v4, %v15513_v37  ;;  %v12342_v0 = vpop.f32.mrf.mxu0  ;;  %v15683_v33 = vadd.f32 %v4314_v3, %v3834_v26  ;;  %v13382_v4 = vld [vmem:[#allocation2 + $0x70] sm:$0xff]  }
 0x366   : > { %v3766_v16 = vpop.f32.mrf.mxu1  ;;  %v5931_v56 = vrot.slane %v13382_v4, 3 }
 0x367   : > { %v15686_v9 = vadd.f32 %v3766_v16, %v15515_v54  ;;  %v4346_v8 = vpop.f32.mrf.mxu0  ;;  %v15689_v46 = vadd.f32 %v12335_v28, %v3837_v12  ;;  %v13213_v28 = vld [vmem:[#allocation4 + $0x78] sm:$0xff]  }
 0x368   : > { %v12300_v40 = vpop.f32.mrf.mxu1  ;;  %12515 = vmatmul.mubr.msk.bf16.gmra.mxu1 %vm836_vm1, %v5928_v42  ;;  %12534 = vmatprep.subr.bf16.mxu0 %v13213_v28 }
 0x369   : > { %v3840_v35 = vadd.f32 %v12300_v40, %v15524_v2  ;;  %v12343_v37 = vpop.f32.mrf.mxu0  ;;  %12518 = vmatprep.mubr.msk.bf16.mxu1 %vm836_vm1, %v5930_v30  ;;  %12535 = vmatpush3.bf16.msra.mxu0 %v13213_v28  ;;  %v5932_v30 = vsel %vm18763_vm5, %v5929_v29, %v5931_v56 }
 0x36a   : > { %v3779_v3 = vpop.f32.mrf.mxu1 }
 0x36b   : > { %v3838_v26 = vadd.f32 %v3779_v3, %v15527_v34  ;;  %v15696_v54 = vpop.f32.mrf.mxu0  ;;  %v15698_v18 = vadd.f32 %v12338_v48, %v3840_v35  ;;  %v19028_v35 = vrot.slane %v15162_v11, 3  ;;  %v13214_v11 = vld [vmem:[#allocation4 + $0x70] sm:$0xff]  }
 0x36c   : > { %v12301_v12 = vpop.f32.mrf.mxu1  ;;  %12536 = vmatprep.subr.bf16.mxu0 %v13214_v11 }
 0x36d   : > { %v3841_v16 = vadd.f32 %v12301_v12, %v15531_v10  ;;  %v12386_v42 = vpop.f32.mrf.mxu0  ;;  %v15701_v50 = vadd.f32 %v4330_v44, %v3838_v26  ;;  %v5934_v10 = vsel %vm18763_vm5, %v5931_v56, %v19028_v35  ;;  %v19030_v35 = vld [vmem:[#allocation18_spill] sm:$0xff]  ;;  %12537 = vmatpush3.bf16.msra.mxu0 %v13214_v11  ;;  %v13215_v11 = vld [vmem:[#allocation4 + $0x68] sm:$0xff]  }
 0x36e   : > { %v3782_v2 = vpop.f32.mrf.mxu1  ;;  %12538 = vmatprep.subr.bf16.mxu0 %v13215_v11 }
 0x36f   : > { %v15704_v40 = vadd.f32 %v3782_v2, %v15537_v13  ;;  %v5096_v34 = vpop.f32.mrf.mxu0  ;;  %v15707_v3 = vadd.f32 %v12339_v27, %v3841_v16 }
 0x370   : > { %v12304_v48 = vpop.f32.mrf.mxu1  ;;  %12519 = vmatmul.mubr.msk.bf16.gmra.mxu1 %vm836_vm1, %v5932_v30 }
 0x371   : > { %v3844_v44 = vadd.f32 %v12304_v48, %v15544_v61  ;;  %v12387_v26 = vpop.f32.mrf.mxu0  ;;  %12522 = vmatprep.mubr.msk.bf16.mxu1 %vm836_vm1, %v5934_v10  ;;  %v19031_v10 = vld [vmem:[#allocation23_spill] sm:$0xff]  ;;  %12539 = vmatpush3.bf16.msra.mxu0 %v13215_v11 }
 0x372   : > { %v3795_v4 = vpop.f32.mrf.mxu1 }
 0x373   : > { %v3842_v13 = vadd.f32 %v3795_v4, %v15547_v20  ;;  %v15716_v28 = vpop.f32.mrf.mxu0  ;;  %v15718_v29 = vadd.f32 %v12342_v0, %v3844_v44 }
 0x374   : > { %v12305_v27 = vpop.f32.mrf.mxu1 }
 0x375   : > { %v3845_v12 = vadd.f32 %v12305_v27, %v15551_v32  ;;  %v12390_v16 = vpop.f32.mrf.mxu0  ;;  %v15721_v2 = vadd.f32 %v4346_v8, %v3842_v13 }
 0x376   : > { %v15723_v56 = vpop.f32.mrf.mxu1 }
 0x377   : > { %v5112_v61 = vpop.f32.mrf.mxu0  ;;  %v15725_v30 = vadd.f32 %v12343_v37, %v3845_v12 }
 0x378   : > { %v12348_v48 = vpop.f32.mrf.mxu1  ;;  %12523 = vmatmul.mubr.msk.bf16.gmra.mxu1 %vm836_vm1, %v19030_v35 }
 0x379   : > { %19029 = vst [vmem:[#allocation19_spill] sm:$0xff] %v15725_v30  ;;  %v4794_v20 = vadd.f32 %v12348_v48, %v15571_v7  ;;  %v12391_v0 = vpop.f32.mrf.mxu0  ;;  %12526 = vmatprep.mubr.msk.bf16.mxu1 %vm836_vm1, %v19031_v10  ;;  %v19033_v30 = vld [vmem:[#allocation15_spill] sm:$0xff] }
 0x37a   : > { %v4649_v32 = vpop.f32.mrf.mxu1 }
 0x37b   : > { %v4792_v8 = vadd.f32 %v4649_v32, %v15575_v24  ;;  %v15733_v44 = vpop.f32.mrf.mxu0  ;;  %v15735_v4 = vadd.f32 %v12386_v42, %v4794_v20 }
 0x37c   : > { %v12349_v37 = vpop.f32.mrf.mxu1 }
 0x37d   : > { %v4795_v13 = vadd.f32 %v12349_v37, %v15580_v1  ;;  %v12394_v27 = vpop.f32.mrf.mxu0  ;;  %v15738_v12 = vadd.f32 %v5096_v34, %v4792_v8 }
 0x37e   : > { %v15740_v35 = vpop.f32.mrf.mxu1 }
 0x37f   : > { %v5128_v7 = vpop.f32.mrf.mxu0  ;;  %v15742_v48 = vadd.f32 %v12387_v26, %v4795_v13  ;;  %v5943_v26 = vrot.slane %v15372_v14, 3 }
 0x380   : > { %v12352_v10 = vpop.f32.mrf.mxu1  ;;  %12527 = vmatmul.mubr.msk.bf16.gmra.mxu1 %vm836_vm1, %v19033_v30 }
 0x381   : > { %19032 = vst [vmem:[#allocation21_spill] sm:$0xff] %v15742_v48  ;;  %v4798_v24 = vadd.f32 %v12352_v10, %v15590_v39  ;;  %v12395_v42 = vpop.f32.mrf.mxu0  ;;  %12530 = vmatprep.mubr.msk.bf16.mxu1 %vm836_vm1, %v15203_v47  ;;  %v19034_v47 = vrot.slane %v15171_v52, 3 }
 0x382   : > { %v4665_v1 = vpop.f32.mrf.mxu1 }
 0x383   : > { %v4796_v34 = vadd.f32 %v4665_v1, %v15593_v62  ;;  %v15750_v20 = vpop.f32.mrf.mxu0  ;;  %v15753_v32 = vadd.f32 %v12390_v16, %v4798_v24  ;;  %v5944_v10 = vsel %vm18763_vm5, %v19034_v47, %v5943_v26  ;;  %v13216_v1 = vld [vmem:[#allocation4 + $0x60] sm:$0xff]  }
 0x384   : > { %v12353_v8 = vpop.f32.mrf.mxu1  ;;  %12540 = vmatprep.subr.bf16.mxu0 %v13216_v1 }
 0x385   : > { %v4799_v37 = vadd.f32 %v12353_v8, %v15598_v19  ;;  %v12398_v30 = vpop.f32.mrf.mxu0  ;;  %v15756_v13 = vadd.f32 %v5112_v61, %v4796_v34  ;;  %12541 = vmatpush3.bf16.msra.mxu0 %v13216_v1 }
 0x386   : > { %v15758_v39 = vpop.f32.mrf.mxu1 }
 0x387   : > { %v5144_v11 = vpop.f32.mrf.mxu0  ;;  %v15763_v62 = vadd.f32 %v12391_v0, %v4799_v37 }
 0x388   : > { %v12356_v48 = vpop.f32.mrf.mxu1  ;;  %12531 = vmatmul.mubr.msk.bf16.gmra.mxu1 %vm836_vm1, %v5944_v10  ;;  %vm6404_vm1 = vcmask 1041408  }
 0x389   : > { %19035 = vst [vmem:[#allocation24_spill] sm:$0xff] %v15763_v62  ;;  %v4802_v14 = vadd.f32 %v12356_v48, %v15608_v5  ;;  %v12399_v16 = vpop.f32.mrf.mxu0  ;;  %vm15796_vm10 = vmand %vm6404_vm1, %vm19043_vm2 }
 0x38a   : > { %v4681_v19 = vpop.f32.mrf.mxu1 }
 0x38b   : > { %v4800_v61 = vadd.f32 %v4681_v19, %v15611_v60  ;;  %v15768_v24 = vpop.f32.mrf.mxu0  ;;  %v15770_v34 = vadd.f32 %v12394_v27, %v4802_v14 }
 0x38c   : > { %v12357_v52 = vpop.f32.mrf.mxu1 }
 0x38d   : > { %19036 = vst [vmem:[#allocation17_spill] sm:$0xff] %v15770_v34  ;;  %v4803_v0 = vadd.f32 %v12357_v52, %v15617_v22  ;;  %v12402_v26 = vpop.f32.mrf.mxu0  ;;  %v15773_v8 = vadd.f32 %v5128_v7, %v4800_v61 }
 0x38e   : > { %v15775_v37 = vpop.f32.mrf.mxu1 }
 0x38f   : > { %19037 = vst [vmem:[#allocation16_spill] sm:$0xff] %v15773_v8  ;;  %v5160_v47 = vpop.f32.mrf.mxu0  ;;  %v15777_v5 = vadd.f32 %v12395_v42, %v4803_v0  ;;  %v2034_v8 = vlaneseq }
 0x390   : > { %v12360_v48 = vpop.f32.mrf.mxu1 }
 0x391   : > { %19038 = vst [vmem:[#allocation22_spill] sm:$0xff] %v15777_v5  ;;  %v4806_v10 = vadd.f32 %v12360_v48, %v15626_v31  ;;  %v12403_v1 = vpop.f32.mrf.mxu0  ;;  %v13217_v48 = vld [vmem:[#allocation4 + $0x38] sm:$0xff]  }
 0x392   : > { %v4697_v60 = vpop.f32.mrf.mxu1  ;;  %12586 = vmatprep.subr.bf16.mxu1 %v13217_v48 }
 0x393   : > { %v4804_v19 = vadd.f32 %v4697_v60, %v15629_v38  ;;  %v15781_v27 = vpop.f32.mrf.mxu0  ;;  %v15783_v14 = vadd.f32 %v12398_v30, %v4806_v10  ;;  %v15793_v30 = vshrl.u32 %v2034_v8, 7  ;;  %12587 = vmatpush3.bf16.msra.mxu1 %v13217_v48 }
 0x394   : > { %v12361_v22 = vpop.f32.mrf.mxu1 }
 0x395   : > { %19039 = vst [vmem:[#allocation20_spill] sm:$0xff] %v15783_v14  ;;  %v4807_v7 = vadd.f32 %v12361_v22, %v15635_v36  ;;  %v12406_v61 = vpop.f32.mrf.mxu0  ;;  %v15786_v52 = vadd.f32 %v5144_v11, %v4804_v19  ;;  %19042 = vst [vmem:[#allocation15_spill] sm:$0xff] %v15793_v30  ;;  %v19044_v36 = vmov 0  ;;  %v6406_v11 = vld [vmem:[#allocation3 + $0x8] sm:$0x3] }
 0x396   : > { %v15788_v42 = vpop.f32.mrf.mxu1  ;;  %v19045_v36 = vsel %vm15796_vm10, 4294967295, %v19044_v36 }
 0x397   : > { %19040 = vst [vmem:[#allocation18_spill] sm:$0xff] %v15786_v52  ;;  %v5176_v0 = vpop.f32.mrf.mxu0  ;;  %v15790_v5 = vadd.f32 %v12399_v16, %v4807_v7  ;;  %19046 = vst [vmem:[#allocation28_spill] sm:$0xff] %v19045_v36  ;;  %v6407_v16 = vsel %vm15796_vm10, 0, %v6406_v11  ;;  %v15811_v52 = vadd.s32 16, %v15793_v30  ;;  %v13218_v11 = vld [vmem:[#allocation4 + $0x30] sm:$0xff]  }
 0x398   : > { %v12364_v31 = vpop.f32.mrf.mxu1  ;;  %6408 = vst [vmem:[#allocation3 + $0x8] sm:$0x3] %v6407_v16  ;;  %12588 = vmatprep.subr.bf16.mxu1 %v13218_v11  ;;  %v13220_v16 = vld [vmem:[#allocation4 + $0x28] sm:$0xff]  }
 0x399   : > { %19041 = vst [vmem:[#allocation23_spill] sm:$0xff] %v15790_v5  ;;  %v4810_v38 = vadd.f32 %v12364_v31, %v15644_v59  ;;  %v12407_v60 = vpop.f32.mrf.mxu0  ;;  %12589 = vmatpush3.bf16.msra.mxu1 %v13218_v11 }
 0x39a   : > { %v4713_v10 = vpop.f32.mrf.mxu1  ;;  %12590 = vmatprep.subr.bf16.mxu1 %v13220_v16 }
 0x39b   : > { %v4808_v19 = vadd.f32 %v4713_v10, %v15647_v53  ;;  %v15803_v22 = vpop.f32.mrf.mxu0  ;;  %v15805_v7 = vadd.f32 %v12402_v26, %v4810_v38 }
 0x39c   : > { %v12365_v59 = vpop.f32.mrf.mxu1 }
 0x39d   : > { %19047 = vst [vmem:[#allocation29_spill] sm:$0xff] %v15805_v7  ;;  %v4811_v8 = vadd.f32 %v12365_v59, %v15653_v45  ;;  %v12410_v31 = vpop.f32.mrf.mxu0  ;;  %v15808_v5 = vadd.f32 %v5160_v47, %v4808_v19  ;;  %v15819_v38 = vmul.u32.u64.low 3817748708, %v15811_v52  ;;  %v15820_v45 = vmul.u32.u64.high 3817748708, %v15811_v52, %v15819_v38  ;;  %v13219_v47 = vld [vmem:[#allocation4 + $0x58] sm:$0xff]   ;;  %12591 = vmatpush3.bf16.msra.mxu1 %v13220_v16 }
 0x39e   : > { %v15813_v14 = vpop.f32.mrf.mxu1  ;;  %v15823_v59 = vadd.s32 24, %v15793_v30  ;;  %12542 = vmatprep.subr.bf16.mxu0 %v13219_v47  ;;  %v4362_v16 = vadd.f32 %v15549_v23, %v15578_v17 }
 0x39f   : > { %19048 = vst [vmem:[#allocation30_spill] sm:$0xff] %v15808_v5  ;;  %v5192_v36 = vpop.f32.mrf.mxu0  ;;  %v15815_v53 = vadd.f32 %v12403_v1, %v4811_v8  ;;  %12543 = vmatpush3.bf16.msra.mxu0 %v13219_v47 }
 0x3a0   : > { %v12368_v10 = vpop.f32.mrf.mxu1 }
 0x3a1   : > { %19049 = vst [vmem:[#allocation31_spill] sm:$0xff] %v15815_v53  ;;  %v4814_v26 = vadd.f32 %v12368_v10, %v15662_v57  ;;  %v12411_v48 = vpop.f32.mrf.mxu0  ;;  %v15831_v10 = vmul.u32.u64.low 3817748708, %v15793_v30  ;;  %v15832_v53 = vmul.u32.u64.high 3817748708, %v15793_v30, %v15831_v10 }
 0x3a2   : > { %v4729_v19 = vpop.f32.mrf.mxu1 }
 0x3a3   : > { %v4812_v5 = vadd.f32 %v4729_v19, %v15665_v25  ;;  %v15826_v1 = vpop.f32.mrf.mxu0  ;;  %v15828_v8 = vadd.f32 %v12406_v61, %v4814_v26  ;;  %v15842_v61 = vmul.u32.u64.low 3817748708, %v15823_v59  ;;  %v15843_v26 = vmul.u32.u64.high 3817748708, %v15823_v59, %v15842_v61 }
 0x3a4   : > { %19050 = vst [vmem:[#allocation32_spill] sm:$0xff] %v15826_v1  ;;  %v12369_v57 = vpop.f32.mrf.mxu1  ;;  %v15846_v19 = vadd.s32 8, %v15793_v30  ;;  %v2077_v62 = vshrl.u32 %v15832_v53, 4 }
 0x3a5   : > { %19051 = vst [vmem:[#allocation33_spill] sm:$0xff] %v15828_v8  ;;  %v4815_v11 = vadd.f32 %v12369_v57, %v15671_v43  ;;  %v15835_v38 = vpop.f32.mrf.mxu0  ;;  %v15837_v7 = vadd.f32 %v5176_v0, %v4812_v5  ;;  %v2099_v5 = vshrl.u32 %v15820_v45, 4  ;;  %v3395_v0 = vadd.f32 %v15529_v58, %v15555_v51  ;;  %v19056_v58 = vld [vmem:[#allocation12_spill] sm:$0xff]  ;;  %v19057_v51 = vld [vmem:[#allocation13_spill] sm:$0xff] }
 0x3a6   : > { %v15839_v25 = vpop.f32.mrf.mxu1  ;;  %v4374_v23 = vadd.f32 %v19056_v58, %v15632_v55  ;;  %v15877_v17 = vadd.f32 %v19057_v51, %v15650_v21  ;;  %v13221_v55 = vld [vmem:[#allocation4 + $0x20] sm:$0xff]   ;;  %v13223_v51 = vld [vmem:[#allocation4 + $0x18] sm:$0xff]  }
 0x3a7   : > { %19052 = vst [vmem:[#allocation34_spill] sm:$0xff] %v15837_v7  ;;  %v15848_v8 = vpop.f32.mrf.mxu0  ;;  %v15850_v10 = vadd.f32 %v12407_v60, %v4815_v11  ;;  %v15861_v7 = vmul.u32.u64.low 3817748708, %v15846_v19  ;;  %v15862_v34 = vmul.u32.u64.high 3817748708, %v15846_v19, %v15861_v7  ;;  %v19054_v60 = vld [vmem:[#allocation25_spill] sm:$0xff]  ;;  %12592 = vmatprep.subr.bf16.mxu1 %v13221_v55 }
 0x3a8   : > { %v12372_v47 = vpop.f32.mrf.mxu1  ;;  %v4366_v11 = vadd.f32 %v19054_v60, %v15596_v15  ;;  %v15881_v15 = vadd.s32 48, %v15793_v30  ;;  %v19058_v60 = vld [vmem:[#allocation14_spill] sm:$0xff]  ;;  %12593 = vmatpush3.bf16.msra.mxu1 %v13221_v55 }
 0x3a9   : > { %19053 = vst [vmem:[#allocation35_spill] sm:$0xff] %v15850_v10  ;;  %v4818_v43 = vadd.f32 %v12372_v47, %v15680_v6  ;;  %v15853_v57 = vpop.f32.mrf.mxu0  ;;  %v19055_v6 = vld [vmem:[#allocation27_spill] sm:$0xff]  ;;  %v15891_v21 = vadd.f32 %v19058_v60, %v15668_v63  ;;  %v15909_v63 = vadd.f32 %v15678_v41, %v15704_v40  ;;  %12594 = vmatprep.subr.bf16.mxu1 %v13223_v51 }
 0x3aa   : > { %v4745_v61 = vpop.f32.mrf.mxu1  ;;  %v4370_v47 = vadd.f32 %v19055_v6, %v15614_v49  ;;  %v3843_v49 = vadd.f32 %v15723_v56, %v3395_v0  ;;  %v19059_v6 = vld [vmem:[#allocation11_spill] sm:$0xff]  ;;  %v2110_v56 = vshrl.u32 %v15843_v26, 4  ;;  %v2078_v26 = vmul.u32 18, %v2077_v62 }
 0x3ab   : > { %v4816_v10 = vadd.f32 %v4745_v61, %v15683_v33  ;;  %v15869_v45 = vpop.f32.mrf.mxu0  ;;  %v15871_v1 = vadd.f32 %v12410_v31, %v4818_v43  ;;  %v2100_v43 = vmul.u32 18, %v2099_v5  ;;  %v15895_v53 = vadd.f32 %v19059_v6, %v15686_v9  ;;  %v13222_v9 = vld [vmem:[#allocation4 + $0x50] sm:$0xff]  }
 0x3ac   : > { %v12373_v7 = vpop.f32.mrf.mxu1  ;;  %v15914_v60 = vmul.u32.u64.low 3817748708, %v15881_v15  ;;  %v15915_v6 = vmul.u32.u64.high 3817748708, %v15881_v15, %v15914_v60  ;;  %v15924_v41 = vadd.f32 %v15696_v54, %v3843_v49  ;;  %12544 = vmatprep.subr.bf16.mxu0 %v13222_v9  ;;  %12595 = vmatpush3.bf16.msra.mxu1 %v13223_v51 }
 0x3ad   : > { %v4819_v33 = vadd.f32 %v12373_v7, %v15689_v46  ;;  %v15885_v61 = vpop.f32.mrf.mxu0  ;;  %v15887_v31 = vadd.f32 %v5192_v36, %v4816_v10  ;;  %v15901_v46 = vadd.s32 32, %v15793_v30  ;;  %v4793_v36 = vadd.f32 %v15740_v35, %v4362_v16  ;;  %12545 = vmatpush3.bf16.msra.mxu0 %v13222_v9 }
 0x3ae   : > { %v15897_v58 = vpop.f32.mrf.mxu1  ;;  %v4797_v10 = vadd.f32 %v15758_v39, %v4366_v11  ;;  %v15918_v35 = vadd.s32 56, %v15793_v30  ;;  %19061 = vst [vmem:[#allocation27_spill] sm:$0xff] %v15924_v41  ;;  %v15927_v40 = vsub.s32 %v15811_v52, %v2100_v43  ;;  %v2088_v11 = vshrl.u32 %v15862_v34, 4 }
 0x3af   : > { %v15905_v5 = vpop.f32.mrf.mxu0  ;;  %v15911_v0 = vadd.f32 %v12411_v48, %v4819_v33  ;;  %v2111_v48 = vmul.u32 18, %v2110_v56  ;;  %v15931_v33 = vmul.u32.u64.low 3817748708, %v15901_v46  ;;  %v15932_v60 = vmul.u32.u64.high 3817748708, %v15901_v46, %v15931_v33 }
 0x3b0   : > { %v12376_v7 = vpop.f32.mrf.mxu1  ;;  %v15938_v54 = vadd.f32 %v15716_v28, %v4793_v36  ;;  %v15941_v52 = vadd.f32 %v15733_v44, %v4797_v10  ;;  %v15947_v34 = vadd.f32 %v15775_v37, %v4370_v47  ;;  %v15950_v56 = vsub.s32 %v15793_v30, %v2078_v26  ;;  %v13224_v47 = vld [vmem:[#allocation4 + $0x10] sm:$0xff]  }
 0x3b1   : > { %19060 = vst [vmem:[#allocation25_spill] sm:$0xff] %v15911_v0  ;;  %v4822_v39 = vadd.f32 %v12376_v7, %v15698_v18  ;;  %v15921_v16 = vpop.f32.mrf.mxu0  ;;  %v15957_v28 = vadd.f32 %v15788_v42, %v4374_v23  ;;  %v15966_v37 = vadd.s32 40, %v15793_v30  ;;  %vm2469_vm15 = vcmp.ne.s32.totalorder %v15927_v40, 0  ;;  %12596 = vmatprep.subr.bf16.mxu1 %v13224_v47 }
 0x3b2   : > { %v4761_v62 = vpop.f32.mrf.mxu1  ;;  %vm2505_vm14 = vcmp.lt.s32.totalorder %v15927_v40, 0  ;;  %v15973_v42 = vsub.s32 %v15823_v59, %v2111_v48  ;;  %v2089_v23 = vmul.u32 18, %v2088_v11  ;;  %v2577_v7 = vadd.s32 18, %v15927_v40  ;;  %12597 = vmatpush3.bf16.msra.mxu1 %v13224_v47 }
 0x3b3   : > { %v4820_v18 = vadd.f32 %v4761_v62, %v15701_v50  ;;  %v15935_v55 = vpop.f32.mrf.mxu0  ;;  %v15944_v49 = vadd.f32 %v15835_v38, %v4822_v39  ;;  %v15953_v50 = vmul.u32.u64.low 3817748708, %v15918_v35  ;;  %v15954_v9 = vmul.u32.u64.high 3817748708, %v15918_v35, %v15953_v50  ;;  %vm16039_vm6 = vmand %vm2505_vm14, %vm2469_vm15 }
 0x3b4   : > { %19062 = vst [vmem:[#allocation12_spill] sm:$0xff] %v15935_v55  ;;  %v12377_v43 = vpop.f32.mrf.mxu1  ;;  %v15986_v26 = vadd.s32 80, %v15793_v30  ;;  %vm2467_vm3 = vcmp.ne.s32.totalorder %v15950_v56, 0  ;;  %vm2503_vm13 = vcmp.lt.s32.totalorder %v15950_v56, 0  ;;  %v2143_v59 = vshrl.u32 %v15915_v6, 4 }
 0x3b5   : > { %19063 = vst [vmem:[#allocation13_spill] sm:$0xff] %v15944_v49  ;;  %v4823_v44 = vadd.f32 %v12377_v43, %v15707_v3  ;;  %v15960_v36 = vpop.f32.mrf.mxu0  ;;  %v15963_v38 = vadd.f32 %v15848_v8, %v4820_v18  ;;  %v15977_v3 = vadd.f32 %v15813_v14, %v15877_v17  ;;  %v15992_v14 = vadd.s32 64, %v15793_v30  ;;  %v13225_v43 = vld [vmem:[#allocation4 + $0x48] sm:$0xff]   ;;  %vm16062_vm2 = vmand %vm2503_vm13, %vm2467_vm3  ;;  %v13235_v49 = vld [vmem:[#allocation4 + $0xb8] sm:$0xff]  }
 0x3b6   : > { %v15968_v10 = vpop.f32.mrf.mxu1  ;;  %v15998_v62 = vmul.u32.u64.low 3817748708, %v15966_v37  ;;  %v15999_v48 = vmul.u32.u64.high 3817748708, %v15966_v37, %v15998_v62  ;;  %v16002_v11 = vadd.s32 88, %v15793_v30  ;;  %vm2470_vm0 = vcmp.ne.s32.totalorder %v15973_v42, 0  ;;  %12546 = vmatprep.subr.bf16.mxu0 %v13225_v43 }
 0x3b7   : > { %19064 = vst [vmem:[#allocation14_spill] sm:$0xff] %v15963_v38  ;;  %v15979_v8 = vpop.f32.mrf.mxu0  ;;  %v15982_v51 = vadd.f32 %v15853_v57, %v4823_v44  ;;  %vm2506_vm12 = vcmp.lt.s32.totalorder %v15973_v42, 0  ;;  %v2090_v6 = vsub.s32 %v15846_v19, %v2089_v23  ;;  %v2121_v18 = vshrl.u32 %v15932_v60, 4  ;;  %12547 = vmatpush3.bf16.msra.mxu0 %v13225_v43 }
 0x3b8   : > { %v12380_v39 = vpop.f32.mrf.mxu1  ;;  %v2144_v41 = vmul.u32 18, %v2143_v59  ;;  %v16020_v19 = vmul.u32.u64.low 3817748708, %v15992_v14  ;;  %v16021_v60 = vmul.u32.u64.high 3817748708, %v15992_v14, %v16020_v19  ;;  %v4813_v43 = vadd.f32 %v15839_v25, %v15891_v21  ;;  %vm16070_vm15 = vmand %vm2506_vm12, %vm2470_vm0 }
 0x3b9   : > { %19065 = vst [vmem:[#allocation11_spill] sm:$0xff] %v15982_v51  ;;  %v4826_v57 = vadd.f32 %v12380_v39, %v15718_v29  ;;  %v15995_v17 = vpop.f32.mrf.mxu0  ;;  %v13226_v29 = vld [vmem:[#allocation4 + $0x8] sm:$0xff]   ;;  %v16015_v39 = vmul.u32.u64.low 3817748708, %v15986_v26  ;;  %v16016_v62 = vmul.u32.u64.high 3817748708, %v15986_v26, %v16015_v39  ;;  %v2154_v51 = vshrl.u32 %v15954_v9, 4 }
 0x3ba   : > { %v4777_v33 = vpop.f32.mrf.mxu1  ;;  %12598 = vmatprep.subr.bf16.mxu1 %v13226_v29  ;;  %vm2468_vm11 = vcmp.ne.s32.totalorder %v2090_v6, 0  ;;  %vm2504_vm1 = vcmp.lt.s32.totalorder %v2090_v6, 0  ;;  %v2578_v25 = vadd.s32 18, %v15973_v42  ;;  %v2576_v21 = vadd.s32 18, %v2090_v6 }
 0x3bb   : > { %v4824_v50 = vadd.f32 %v4777_v33, %v15721_v2  ;;  %v16009_v44 = vpop.f32.mrf.mxu0  ;;  %v16012_v47 = vadd.f32 %v15885_v61, %v4826_v57  ;;  %v19067_v2 = vld [vmem:[#allocation19_spill] sm:$0xff]  ;;  %v16030_v57 = vmul.u32.u64.low 3817748708, %v16002_v11  ;;  %v16031_v39 = vmul.u32.u64.high 3817748708, %v16002_v11, %v16030_v57  ;;  %12599 = vmatpush3.bf16.msra.mxu1 %v13226_v29  ;;  %vm16094_vm14 = vmand %vm2504_vm1, %vm2468_vm11 }
 0x3bc   : > { %v12381_v55 = vpop.f32.mrf.mxu1  ;;  %v2122_v57 = vmul.u32 18, %v2121_v18 }
 0x3bd   : > { %19066 = vst [vmem:[#allocation36_spill] sm:$0xff] %v16012_v47  ;;  %v4827_v23 = vadd.f32 %v12381_v55, %v19067_v2  ;;  %v16024_v33 = vpop.f32.mrf.mxu0  ;;  %v16027_v61 = vadd.f32 %v15905_v5, %v4824_v50  ;;  %v2575_v55 = vadd.s32 18, %v15950_v56  ;;  %v16045_v5 = vadd.s32 72, %v15793_v30 }
 0x3be   : > { %v16033_v9 = vpop.f32.mrf.mxu1  ;;  %v16053_v50 = vadd.f32 %v15750_v20, %v15947_v34  ;;  %v2155_v34 = vmul.u32 18, %v2154_v51  ;;  %v16101_v51 = vadd.f32 %v15781_v27, %v15977_v3  ;;  %v16121_v27 = vsub.s32 %v15901_v46, %v2122_v57  ;;  %v13228_v46 = vld [vmem:[#allocation3] sm:$0xff]  }
 0x3bf   : > { %19068 = vst [vmem:[#allocation19_spill] sm:$0xff] %v16027_v61  ;;  %19069 = vst [vmem:[#allocation37_spill] sm:$0xff] %v16033_v9  ;;  %v16049_v29 = vpop.f32.mrf.mxu0  ;;  %v16056_v19 = vadd.f32 %v15921_v16, %v4827_v23  ;;  %v16076_v16 = vsub.s32 %v15881_v15, %v2144_v41  ;;  %v16090_v61 = vsel %vm16039_vm6, %v2577_v7, %v15927_v40  ;;  %v13227_v7 = vld [vmem:[#allocation4] sm:$0xff]   ;;  %v2187_v3 = vshrl.u32 %v16016_v62, 4 }
 0x3c0   : > { %v12424_v9 = vpop.f32.mrf.mxu1  ;;  %19077 = vst [vmem:[#allocation39_spill] sm:$0xff] %v16090_v61  ;;  %12600 = vmatprep.subr.bf16.mxu1 %v13227_v7  ;;  %v2198_v20 = vshrl.u32 %v16031_v39, 4  ;;  %12602 = vmatprep.mubr.bf16.mxu1 %v13228_v46  ;;  %vm2471_vm0 = vcmp.ne.s32.totalorder %v16121_v27, 0  ;;  %vm2507_vm12 = vcmp.lt.s32.totalorder %v16121_v27, 0  ;;  %v16158_v39 = vadd.s32 96, %v15793_v30 }
 0x3c1   : > { %19072 = vst [vmem:[#allocation38_spill] sm:$0xff] %v16056_v19  ;;  %v16079_v23 = vadd.f32 %v12424_v9, %v15735_v4  ;;  %v16081_v18 = vpop.f32.mrf.mxu0  ;;  %v16085_v19 = vadd.f32 %v15768_v24, %v15957_v28  ;;  %v2132_v4 = vshrl.u32 %v15999_v48, 4  ;;  %v16106_v24 = vsel %vm16062_vm2, %v2575_v55, %v15950_v56  ;;  %12601 = vmatpush3.bf16.msra.mxu1 %v13227_v7  ;;  %vm16202_vm2 = vmand %vm2507_vm12, %vm2471_vm0 }
 0x3c2   : > { %v5409_v41 = vpop.f32.mrf.mxu1  ;;  %19080 = vst [vmem:[#allocation40_spill] sm:$0xff] %v16106_v24  ;;  %v16109_v40 = vmul.u32.u64.low 3817748708, %v16045_v5  ;;  %v16110_v28 = vmul.u32.u64.high 3817748708, %v16045_v5, %v16109_v40  ;;  %v16118_v48 = vadd.f32 %v15803_v22, %v4813_v43  ;;  %v16127_v55 = vsel %vm16070_vm15, %v2578_v25, %v15973_v42  ;;  %v19084_v43 = vld [vmem:[#allocation21_spill] sm:$0xff] }
 0x3c3   : > { %v16113_v9 = vadd.f32 %v5409_v41, %v15738_v12  ;;  %v16115_v59 = vpop.f32.mrf.mxu0  ;;  %19082 = vst [vmem:[#allocation42_spill] sm:$0xff] %v16127_v55  ;;  %v16131_v12 = vsel %vm16094_vm14, %v2576_v21, %v2090_v6  ;;  %vm2473_vm3 = vcmp.ne.s32.totalorder %v16076_v16, 0  ;;  %v16135_v22 = vsub.s32 %v15918_v35, %v2155_v34 }
 0x3c4   : > { %19081 = vst [vmem:[#allocation41_spill] sm:$0xff] %v16118_v48  ;;  %v12425_v56 = vpop.f32.mrf.mxu1  ;;  %19083 = vst [vmem:[#allocation43_spill] sm:$0xff] %v16131_v12  ;;  %v2133_v57 = vmul.u32 18, %v2132_v4  ;;  %v2165_v42 = vshrl.u32 %v16021_v60, 4  ;;  %v4817_v6 = vadd.f32 %v15897_v58, %v15895_v53  ;;  %vm2509_vm13 = vcmp.lt.s32.totalorder %v16076_v16, 0  ;;  %v19110_v48 = vld [vmem:[#allocation20_spill] sm:$0xff] }
 0x3c5   : > { %v16138_v2 = vadd.f32 %v12425_v56, %v19084_v43  ;;  %v16140_v62 = vpop.f32.mrf.mxu0  ;;  %v2581_v35 = vadd.s32 18, %v16076_v16  ;;  %v16151_v21 = vadd.s32 112, %v15793_v30  ;;  %v2188_v60 = vmul.u32 18, %v2187_v3  ;;  %vm2545_vm1 = vmand %vm2509_vm13, %vm2473_vm3 }
 0x3c6   : > { %v16146_v25 = vpop.f32.mrf.mxu1  ;;  %v4821_v53 = vadd.f32 %v15968_v10, %v15909_v63  ;;  %v2579_v15 = vadd.s32 18, %v16121_v27  ;;  %vm2474_vm6 = vcmp.ne.s32.totalorder %v16135_v22, 0  ;;  %vm2510_vm11 = vcmp.lt.s32.totalorder %v16135_v22, 0 }
 0x3c7   : > { %v16153_v34 = vpop.f32.mrf.mxu0  ;;  %v16175_v40 = vsub.s32 %v15966_v37, %v2133_v57  ;;  %v2166_v63 = vmul.u32 18, %v2165_v42  ;;  %v2199_v10 = vmul.u32 18, %v2198_v20  ;;  %v2176_v3 = vshrl.u32 %v16110_v28, 4  ;;  %v13230_v20 = vld [vmem:[#allocation4 + $0x40] sm:$0xff]   ;;  %vm16223_vm15 = vmand %vm2510_vm11, %vm2474_vm6 }
 0x3c8   : > { %v12428_v58 = vpop.f32.mrf.mxu1  ;;  %v16179_v56 = vmul.u32.u64.low 3817748708, %v16151_v21  ;;  %v16180_v46 = vmul.u32.u64.high 3817748708, %v16151_v21, %v16179_v56  ;;  %v2189_v37 = vsub.s32 %v15986_v26, %v2188_v60  ;;  %v16196_v12 = vsel %vm2545_vm1, %v2581_v35, %v16076_v16  ;;  %v19089_v16 = vld [vmem:[#allocation32_spill] sm:$0xff]  ;;  %12548 = vmatprep.subr.bf16.mxu0 %v13230_v20 }
 0x3c9   : > { %v16166_v4 = vadd.f32 %v12428_v58, %v15753_v32  ;;  %v16168_v41 = vpop.f32.mrf.mxu0  ;;  %v16183_v32 = vadd.s32 120, %v15793_v30  ;;  %v16192_v57 = vmul.u32.u64.low 3817748708, %v16158_v39  ;;  %v16193_v42 = vmul.u32.u64.high 3817748708, %v16158_v39, %v16192_v57  ;;  %19085 = vst [vmem:[#allocation21_spill] sm:$0xff] %v16196_v12  ;;  %v19088_v56 = vld [vmem:[#allocation24_spill] sm:$0xff]  ;;  %12549 = vmatpush3.bf16.msra.mxu0 %v13230_v20 }
 0x3ca   : > { %v5425_v7 = vpop.f32.mrf.mxu1  ;;  %v16217_v35 = vadd.f32 %v19089_v16, %v4817_v6  ;;  %vm2472_vm14 = vcmp.ne.s32.totalorder %v16175_v40, 0  ;;  %vm2508_vm3 = vcmp.lt.s32.totalorder %v16175_v40, 0  ;;  %v16233_v6 = vsub.s32 %v16002_v11, %v2199_v10  ;;  %12638 = vmatprep.subr.bf16.mxu0 %v13235_v49 }
 0x3cb   : > { %v16186_v43 = vadd.f32 %v5425_v7, %v15756_v13  ;;  %v16188_v58 = vpop.f32.mrf.mxu0  ;;  %v2582_v7 = vadd.s32 18, %v16135_v22  ;;  %v16208_v26 = vmul.u32.u64.low 3817748708, %v16183_v32  ;;  %v16209_v60 = vmul.u32.u64.high 3817748708, %v16183_v32, %v16208_v26  ;;  %vm16267_vm12 = vmand %vm2508_vm3, %vm2472_vm14 }
 0x3cc   : > { %v12429_v28 = vpop.f32.mrf.mxu1  ;;  %19090 = vst [vmem:[#allocation24_spill] sm:$0xff] %v16217_v35  ;;  %v2167_v26 = vsub.s32 %v15992_v14, %v2166_v63  ;;  %v16236_v16 = vadd.s32 104, %v15793_v30  ;;  %v16241_v61 = vadd.f32 %v15869_v45, %v4821_v53  ;;  %v16246_v14 = vsel %vm16202_vm2, %v2579_v15, %v16121_v27  ;;  %v19096_v45 = vld [vmem:[#allocation17_spill] sm:$0xff] }
 0x3cd   : > { %v16212_v57 = vadd.f32 %v12429_v28, %v19088_v56  ;;  %v16214_v55 = vpop.f32.mrf.mxu0  ;;  %v2177_v56 = vmul.u32 18, %v2176_v3  ;;  %19094 = vst [vmem:[#allocation44_spill] sm:$0xff] %v16246_v14  ;;  %vm2477_vm13 = vcmp.ne.s32.totalorder %v2189_v37, 0  ;;  %vm2513_vm0 = vcmp.lt.s32.totalorder %v2189_v37, 0 }
 0x3ce   : > { %v16229_v28 = vpop.f32.mrf.mxu1  ;;  %19093 = vst [vmem:[#allocation32_spill] sm:$0xff] %v16241_v61  ;;  %v16251_v11 = vsel %vm16223_vm15, %v2582_v7, %v16135_v22  ;;  %v2580_v10 = vadd.s32 18, %v16175_v40  ;;  %v16255_v3 = vmul.u32.u64.low 3817748708, %v16236_v16  ;;  %v16256_v20 = vmul.u32.u64.high 3817748708, %v16236_v16, %v16255_v3  ;;  %vm16272_vm1 = vmand %vm2513_vm0, %vm2477_vm13 }
 0x3cf   : > { %v16238_v24 = vpop.f32.mrf.mxu0  ;;  %19095 = vst [vmem:[#allocation45_spill] sm:$0xff] %v16251_v11  ;;  %v2585_v12 = vadd.s32 18, %v2189_v37  ;;  %vm2475_vm6 = vcmp.ne.s32.totalorder %v2167_v26, 0  ;;  %vm2511_vm11 = vcmp.lt.s32.totalorder %v2167_v26, 0  ;;  %v2583_v7 = vadd.s32 18, %v2167_v26 }
 0x3d0   : > { %v12432_v63 = vpop.f32.mrf.mxu1  ;;  %vm2478_vm2 = vcmp.ne.s32.totalorder %v16233_v6, 0  ;;  %v2231_v3 = vshrl.u32 %v16180_v46, 4  ;;  %vm2514_vm15 = vcmp.lt.s32.totalorder %v16233_v6, 0  ;;  %v2209_v61 = vshrl.u32 %v16193_v42, 4  ;;  %vm16298_vm14 = vmand %vm2511_vm11, %vm2475_vm6 }
 0x3d1   : > { %v16259_v53 = vadd.f32 %v12432_v63, %v19096_v45  ;;  %v16261_v13 = vpop.f32.mrf.mxu0  ;;  %v2178_v63 = vsub.s32 %v16045_v5, %v2177_v56  ;;  %v19101_v45 = vld [vmem:[#allocation16_spill] sm:$0xff]  ;;  %v2242_v47 = vshrl.u32 %v16209_v60, 4  ;;  %v16289_v38 = vadd.f32 %v15960_v36, %v16079_v23  ;;  %v19106_v23 = vld [vmem:[#allocation22_spill] sm:$0xff]  ;;  %vm16322_vm3 = vmand %vm2514_vm15, %vm2478_vm2 }
 0x3d2   : > { %v5441_v22 = vpop.f32.mrf.mxu1  ;;  %v16294_v5 = vsel %vm16267_vm12, %v2580_v10, %v16175_v40  ;;  %v2220_v42 = vshrl.u32 %v16256_v20, 4  ;;  %v16304_v60 = vadd.s32 144, %v15793_v30  ;;  %v5553_v36 = vadd.f32 %v16146_v25, %v15938_v54 }
 0x3d3   : > { %v16280_v11 = vadd.f32 %v5441_v22, %v19101_v45  ;;  %v16282_v14 = vpop.f32.mrf.mxu0  ;;  %19102 = vst [vmem:[#allocation17_spill] sm:$0xff] %v16289_v38  ;;  %19103 = vst [vmem:[#allocation16_spill] sm:$0xff] %v16294_v5  ;;  %v16315_v40 = vsel %vm16272_vm1, %v2585_v12, %v2189_v37  ;;  %v2586_v10 = vadd.s32 18, %v16233_v6  ;;  %vm2476_vm13 = vcmp.ne.s32.totalorder %v2178_v63, 0 }
 0x3d4   : > { %v12433_v35 = vpop.f32.mrf.mxu1  ;;  %19107 = vst [vmem:[#allocation22_spill] sm:$0xff] %v16315_v40  ;;  %vm2512_vm0 = vcmp.lt.s32.totalorder %v2178_v63, 0  ;;  %v2232_v54 = vmul.u32 18, %v2231_v3  ;;  %v16327_v25 = vadd.s32 128, %v15793_v30  ;;  %v16333_v37 = vadd.f32 %v15979_v8, %v16113_v9 }
 0x3d5   : > { %v16309_v56 = vadd.f32 %v12433_v35, %v19106_v23  ;;  %v16311_v27 = vpop.f32.mrf.mxu0  ;;  %v16337_v12 = vsel %vm16298_vm14, %v2583_v7, %v2167_v26  ;;  %v2210_v15 = vmul.u32 18, %v2209_v61  ;;  %v2243_v45 = vmul.u32 18, %v2242_v47  ;;  %vm2548_vm12 = vmand %vm2512_vm0, %vm2476_vm13 }
 0x3d6   : > { %v5444_v22 = vpop.f32.mrf.mxu1  ;;  %v2584_v40 = vadd.s32 18, %v2178_v63  ;;  %v2221_v5 = vmul.u32 18, %v2220_v42  ;;  %v16340_v3 = vmul.u32.u64.low 3817748708, %v16304_v60  ;;  %v16341_v38 = vmul.u32.u64.high 3817748708, %v16304_v60, %v16340_v3 }
 0x3d7   : > { %v16329_v35 = vpop.f32.mrf.mxu0  ;;  %v16348_v8 = vadd.f32 %v15995_v17, %v16138_v2  ;;  %v16353_v61 = vsel %vm16322_vm3, %v2586_v10, %v16233_v6  ;;  %v16358_v47 = vadd.s32 152, %v15793_v30  ;;  %v16361_v26 = vadd.f32 %v16009_v44, %v5553_v36  ;;  %v19111_v6 = vld [vmem:[#allocation18_spill] sm:$0xff] }
 0x3d8   : > { %v12436_v23 = vpop.f32.mrf.mxu1  ;;  %v16365_v17 = vmul.u32.u64.low 3817748708, %v16327_v25  ;;  %v16366_v2 = vmul.u32.u64.high 3817748708, %v16327_v25, %v16365_v17  ;;  %v16375_v42 = vadd.f32 %v16024_v33, %v16166_v4  ;;  %v2211_v10 = vsub.s32 %v16158_v39, %v2210_v15 }
 0x3d9   : > { %v16344_v0 = vadd.f32 %v12436_v23, %v19110_v48  ;;  %v2233_v48 = vsub.s32 %v16151_v21, %v2232_v54  ;;  %v16368_v7 = vpop.f32.mrf.mxu0  ;;  %v2244_v44 = vsub.s32 %v16183_v32, %v2243_v45  ;;  %v16381_v21 = vadd.f32 %v16049_v29, %v16186_v43  ;;  %v19113_v23 = vld [vmem:[#allocation23_spill] sm:$0xff] }
 0x3da   : > { %v5457_v9 = vpop.f32.mrf.mxu1  ;;  %v16383_v20 = vsel %vm2548_vm12, %v2584_v40, %v2178_v63  ;;  %v2222_v49 = vsub.s32 %v16236_v16, %v2221_v5  ;;  %v2275_v54 = vshrl.u32 %v16341_v38, 4  ;;  %v16395_v39 = vadd.s32 136, %v15793_v30  ;;  %v19114_v40 = vld [vmem:[#allocation29_spill] sm:$0xff] }
 0x3db   : > { %v16371_v46 = vadd.f32 %v5457_v9, %v19111_v6  ;;  %19112 = vst [vmem:[#allocation20_spill] sm:$0xff] %v16383_v20  ;;  %v16391_v33 = vmul.u32.u64.low 3817748708, %v16358_v47  ;;  %v16392_v4 = vmul.u32.u64.high 3817748708, %v16358_v47, %v16391_v33  ;;  %v5557_v29 = vadd.f32 %v16229_v28, %v15941_v52  ;;  %v16399_v16 = vpop.f32.mrf.mxu0  ;;  %v19126_v20 = vld [vmem:[#allocation31_spill] sm:$0xff]  ;;  %v19127_v52 = vld [vmem:[#allocation33_spill] sm:$0xff] }
 0x3dc   : > { %v12437_v36 = vpop.f32.mrf.mxu1  ;;  %vm2481_vm6 = vcmp.ne.s32.totalorder %v2233_v48, 0  ;;  %vm2517_vm11 = vcmp.lt.s32.totalorder %v2233_v48, 0  ;;  %v2589_v43 = vadd.s32 18, %v2233_v48  ;;  %vm2479_vm1 = vcmp.ne.s32.totalorder %v2211_v10, 0 }
 0x3dd   : > { %v16388_v3 = vadd.f32 %v12437_v36, %v19113_v23  ;;  %vm2515_vm2 = vcmp.lt.s32.totalorder %v2211_v10, 0  ;;  %vm2482_vm15 = vcmp.ne.s32.totalorder %v2244_v44, 0  ;;  %v2253_v38 = vshrl.u32 %v16366_v2, 4  ;;  %vm16406_vm0 = vmand %vm2517_vm11, %vm2481_vm6  ;;  %v16426_v33 = vpop.f32.mrf.mxu0 }
 0x3de   : > { %v5460_v32 = vpop.f32.mrf.mxu1  ;;  %vm2518_vm14 = vcmp.lt.s32.totalorder %v2244_v44, 0  ;;  %vm2480_vm3 = vcmp.ne.s32.totalorder %v2222_v49, 0  ;;  %vm2516_vm13 = vcmp.lt.s32.totalorder %v2222_v49, 0  ;;  %v2276_v5 = vmul.u32 18, %v2275_v54  ;;  %vm16422_vm12 = vmand %vm2515_vm2, %vm2479_vm1 }
 0x3df   : > { %v2286_v28 = vshrl.u32 %v16392_v4, 4  ;;  %v16412_v45 = vmul.u32.u64.low 3817748708, %v16395_v39  ;;  %v16413_v9 = vmul.u32.u64.high 3817748708, %v16395_v39, %v16412_v45  ;;  %v5561_v17 = vadd.f32 %v5444_v22, %v16053_v50  ;;  %v19119_v4 = vld [vmem:[#allocation30_spill] sm:$0xff]  ;;  %vm16436_vm6 = vmand %vm2518_vm14, %vm2482_vm15 }
 0x3e0   : > { %v12440_v63 = vpop.f32.mrf.mxu1  ;;  %v16418_v6 = vadd.f32 %v16081_v18, %v16212_v57  ;;  %v2587_v54 = vadd.s32 18, %v2211_v10  ;;  %v2590_v23 = vadd.s32 18, %v2244_v44  ;;  %v16432_v50 = vadd.f32 %v16115_v59, %v5557_v29  ;;  %vm16446_vm11 = vmand %vm2516_vm13, %vm2480_vm3 }
 0x3e1   : > { %v16403_v15 = vadd.f32 %v12440_v63, %v19114_v40  ;;  %v2588_v57 = vadd.s32 18, %v2222_v49  ;;  %v2254_v22 = vmul.u32 18, %v2253_v38  ;;  %v16442_v45 = vadd.f32 %v16140_v62, %v16259_v53 }
 0x3e2   : > { %v5473_v2 = vpop.f32.mrf.mxu1  ;;  %19120 = vst [vmem:[#allocation18_spill] sm:$0xff] %v16432_v50  ;;  %v2277_v59 = vsub.s32 %v16304_v60, %v2276_v5  ;;  %v2287_v29 = vmul.u32 18, %v2286_v28  ;;  %v16459_v38 = vadd.f32 %v16153_v34, %v16280_v11  ;;  %v16463_v62 = vsel %vm16406_vm0, %v2589_v43, %v2233_v48  ;;  %v16483_v11 = vpop.f32.mrf.mxu0 }
 0x3e3   : > { %v16429_v63 = vadd.f32 %v5473_v2, %v19119_v4  ;;  %19123 = vst [vmem:[#allocation23_spill] sm:$0xff] %v16442_v45  ;;  %v16452_v4 = vadd.s32 176, %v15793_v30  ;;  %v16466_v53 = vadd.s32 160, %v15793_v30  ;;  %v16470_v60 = vadd.f32 %v16168_v41, %v16309_v56 }
 0x3e4   : > { %v12441_v40 = vpop.f32.mrf.mxu1  ;;  %v16473_v5 = vadd.f32 %v16188_v58, %v5561_v17  ;;  %v16481_v34 = vsel %vm16436_vm6, %v2590_v23, %v2244_v44  ;;  %v16487_v48 = vadd.f32 %v16214_v55, %v16344_v0  ;;  %v16491_v41 = vadd.f32 %v16238_v24, %v16371_v46  ;;  %v19128_v17 = vld [vmem:[#allocation34_spill] sm:$0xff] }
 0x3e5   : > { %v16455_v50 = vadd.f32 %v12441_v40, %v19126_v20  ;;  %v16477_v20 = vsel %vm16422_vm12, %v2587_v54, %v2211_v10  ;;  %v16495_v58 = vsel %vm16446_vm11, %v2588_v57, %v2222_v49  ;;  %v2255_v56 = vsub.s32 %v16327_v25, %v2254_v22  ;;  %v19132_v22 = vld [vmem:[#allocation35_spill] sm:$0xff] }
 0x3e6   : > { %v5476_v45 = vpop.f32.mrf.mxu1  ;;  %v5565_v10 = vadd.f32 %v5460_v32, %v16085_v19  ;;  %vm2485_vm1 = vcmp.ne.s32.totalorder %v2277_v59, 0  ;;  %vm2521_vm2 = vcmp.lt.s32.totalorder %v2277_v59, 0  ;;  %v2288_v43 = vsub.s32 %v16358_v47, %v2287_v29  ;;  %v16515_v47 = vpop.f32.mrf.mxu0 }
 0x3e7   : > { %v2264_v55 = vshrl.u32 %v16413_v9, 4  ;;  %v16503_v24 = vmul.u32.u64.low 3817748708, %v16452_v4  ;;  %v16504_v46 = vmul.u32.u64.high 3817748708, %v16452_v4, %v16503_v24  ;;  %v16508_v49 = vadd.f32 %v16261_v13, %v16388_v3  ;;  %vm16523_vm3 = vmand %vm2521_vm2, %vm2485_vm1 }
 0x3e8   : > { %v12444_v44 = vpop.f32.mrf.mxu1  ;;  %v16511_v19 = vmul.u32.u64.low 3817748708, %v16466_v53  ;;  %v16512_v25 = vmul.u32.u64.high 3817748708, %v16466_v53, %v16511_v19  ;;  %v2058_v32 = vadd.s32 184, %v15793_v30  ;;  %v2593_v9 = vadd.s32 18, %v2277_v59  ;;  %v16542_v24 = vpop.f32.mrf.mxu0 }
 0x3e9   : > { %v5574_v0 = vadd.f32 %v12444_v44, %v19127_v52  ;;  %vm2483_vm15 = vcmp.ne.s32.totalorder %v2255_v56, 0  ;;  %vm2519_vm14 = vcmp.lt.s32.totalorder %v2255_v56, 0  ;;  %v16519_v23 = vadd.f32 %v16282_v14, %v5565_v10 }
 0x3ea   : > { %v5489_v28 = vpop.f32.mrf.mxu1  ;;  %v2591_v3 = vadd.s32 18, %v2255_v56  ;;  %v16528_v18 = vadd.s32 168, %v15793_v30  ;;  %v16531_v57 = vadd.s32 208, %v15793_v30  ;;  %vm2486_vm13 = vcmp.ne.s32.totalorder %v2288_v43, 0  ;;  %vm2555_vm0 = vmand %vm2519_vm14, %vm2483_vm15 }
 0x3eb   : > { %v5572_v36 = vadd.f32 %v5489_v28, %v19128_v17  ;;  %19129 = vst [vmem:[#allocation29_spill] sm:$0xff] %v16519_v23  ;;  %v2265_v2 = vmul.u32 18, %v2264_v55  ;;  %v2319_v14 = vshrl.u32 %v16504_v46, 4  ;;  %vm2522_vm12 = vcmp.lt.s32.totalorder %v2288_v43, 0 }
 0x3ec   : > { %v12445_v54 = vpop.f32.mrf.mxu1  ;;  %v2297_v10 = vshrl.u32 %v16512_v25, 4  ;;  %v16539_v44 = vmul.u32.u64.low 3817748708, %v2058_v32  ;;  %v16540_v52 = vmul.u32.u64.high 3817748708, %v2058_v32, %v16539_v44  ;;  %v5569_v28 = vadd.f32 %v5476_v45, %v16101_v51  ;;  %vm2558_vm6 = vmand %vm2522_vm12, %vm2486_vm13 }
 0x3ed   : > { %v16534_v40 = vadd.f32 %v12445_v54, %v19132_v22  ;;  %v16547_v19 = vsel %vm16523_vm3, %v2593_v9, %v2277_v59  ;;  %v16551_v55 = vadd.f32 %v16311_v27, %v16403_v15  ;;  %v2320_v46 = vmul.u32 18, %v2319_v14 }
 0x3ee   : > { %v5492_v29 = vpop.f32.mrf.mxu1  ;;  %v2594_v54 = vadd.s32 18, %v2288_v43  ;;  %v2298_v22 = vmul.u32 18, %v2297_v10  ;;  %v16554_v25 = vmul.u32.u64.low 3817748708, %v16528_v18  ;;  %v16555_v23 = vmul.u32.u64.high 3817748708, %v16528_v18, %v16554_v25 }
 0x3ef   : > { %v16560_v51 = vsel %vm2555_vm0, %v2591_v3, %v2255_v56  ;;  %v16564_v45 = vadd.f32 %v16329_v35, %v16429_v63  ;;  %v2266_v27 = vsub.s32 %v16395_v39, %v2265_v2  ;;  %v2330_v59 = vshrl.u32 %v16540_v52, 4  ;;  %v12486_v56 = vpop.f32.mrf.mxu0 }
 0x3f0   : > { %v12448_v17 = vpop.f32.mrf.mxu1  ;;  %v16571_v9 = vmul.u32.u64.low 3817748708, %v16531_v57  ;;  %v16572_v13 = vmul.u32.u64.high 3817748708, %v16531_v57, %v16571_v9  ;;  %v16582_v35 = vadd.f32 %v16368_v7, %v16455_v50  ;;  %v16585_v39 = vadd.f32 %v16399_v16, %v5569_v28 }
 0x3f1   : > { %v16558_v44 = vadd.f32 %v12448_v17, %v15871_v1  ;;  %v16575_v1 = vadd.s32 192, %v15793_v30  ;;  %v2321_v63 = vsub.s32 %v16452_v4, %v2320_v46  ;;  %v16588_v14 = vsel %vm2558_vm6, %v2594_v54, %v2288_v43 }
 0x3f2   : > { %v5505_v15 = vpop.f32.mrf.mxu1  ;;  %19133 = vst [vmem:[#allocation30_spill] sm:$0xff] %v16585_v39  ;;  %v16591_v10 = vadd.f32 %v16426_v33, %v5574_v0  ;;  %v2299_v52 = vsub.s32 %v16466_v53, %v2298_v22  ;;  %v2331_v17 = vmul.u32 18, %v2330_v59  ;;  %vm2484_vm11 = vcmp.ne.s32.totalorder %v2266_v27, 0  ;;  %v5818_v33 = vpop.f32.mrf.mxu0  ;;  %v19137_v0 = vld [vmem:[#allocation41_spill] sm:$0xff] }
 0x3f3   : > { %v16578_v3 = vadd.f32 %v5505_v15, %v15887_v31  ;;  %v19135_v31 = vld [vmem:[#allocation25_spill] sm:$0xff]  ;;  %vm2520_vm1 = vcmp.lt.s32.totalorder %v2266_v27, 0  ;;  %v2308_v7 = vshrl.u32 %v16555_v23, 4  ;;  %v2592_v50 = vadd.s32 18, %v2266_v27 }
 0x3f4   : > { %v12449_v2 = vpop.f32.mrf.mxu1  ;;  %19134 = vst [vmem:[#allocation31_spill] sm:$0xff] %v16591_v10  ;;  %v16599_v4 = vadd.f32 %v16483_v11, %v5572_v36  ;;  %v2332_v43 = vsub.s32 %v2058_v32, %v2331_v17  ;;  %v16602_v28 = vadd.s32 216, %v15793_v30  ;;  %v5573_v53 = vadd.f32 %v5492_v29, %v19137_v0  ;;  %vm16605_vm14 = vmand %vm2520_vm1, %vm2484_vm11  ;;  %v19140_v32 = vld [vmem:[#allocation13_spill] sm:$0xff] }
 0x3f5   : > { %v16595_v25 = vadd.f32 %v12449_v2, %v19135_v31  ;;  %vm2489_vm2 = vcmp.ne.s32.totalorder %v2321_v63, 0  ;;  %vm2525_vm15 = vcmp.lt.s32.totalorder %v2321_v63, 0  ;;  %v2309_v46 = vmul.u32 18, %v2308_v7  ;;  %v19143_v7 = vld [vmem:[#allocation14_spill] sm:$0xff] }
 0x3f6   : > { %v5508_v16 = vpop.f32.mrf.mxu1  ;;  %19136 = vst [vmem:[#allocation33_spill] sm:$0xff] %v16599_v4  ;;  %vm2487_vm3 = vcmp.ne.s32.totalorder %v2299_v52, 0  ;;  %vm2523_vm13 = vcmp.lt.s32.totalorder %v2299_v52, 0  ;;  %vm2490_vm0 = vcmp.ne.s32.totalorder %v2332_v43, 0  ;;  %v2363_v11 = vshrl.u32 %v16572_v13, 4  ;;  %vm16617_vm6 = vmand %vm2525_vm15, %vm2489_vm2  ;;  %v12487_v13 = vpop.f32.mrf.mxu0 }
 0x3f7   : > { %vm2526_vm12 = vcmp.lt.s32.totalorder %v2332_v43, 0  ;;  %v16614_v23 = vmul.u32.u64.low 3817748708, %v16575_v1  ;;  %v16615_v29 = vmul.u32.u64.high 3817748708, %v16575_v1, %v16614_v23  ;;  %v2597_v9 = vadd.s32 18, %v2321_v63  ;;  %vm16633_vm11 = vmand %vm2523_vm13, %vm2487_vm3 }
 0x3f8   : > { %v12452_v54 = vpop.f32.mrf.mxu1  ;;  %v2595_v2 = vadd.s32 18, %v2299_v52  ;;  %v2364_v17 = vmul.u32 18, %v2363_v11  ;;  %v16622_v31 = vadd.s32 200, %v15793_v30  ;;  %v2598_v23 = vadd.s32 18, %v2332_v43  ;;  %vm2562_vm1 = vmand %vm2526_vm12, %vm2490_vm0 }
 0x3f9   : > { %v16611_v36 = vadd.f32 %v12452_v54, %v19140_v32  ;;  %v16629_v54 = vsel %vm16605_vm14, %v2592_v50, %v2266_v27  ;;  %v2310_v11 = vsub.s32 %v16528_v18, %v2309_v46  ;;  %v16645_v27 = vadd.f32 %v16542_v24, %v5573_v53  ;;  %v5821_v53 = vpop.f32.mrf.mxu0 }
 0x3fa   : > { %v5521_v15 = vpop.f32.mrf.mxu1  ;;  %v16648_v50 = vsub.s32 %v16531_v57, %v2364_v17  ;;  %v16651_v22 = vadd.s32 240, %v15793_v30  ;;  %v2341_v18 = vshrl.u32 %v16615_v29, 4  ;;  %v16664_v24 = vsel %vm16617_vm6, %v2597_v9, %v2321_v63 }
 0x3fb   : > { %v16625_v0 = vadd.f32 %v5521_v15, %v19143_v7  ;;  %v16642_v15 = vadd.f32 %v16515_v47, %v16534_v40  ;;  %19147 = vst [vmem:[#allocation35_spill] sm:$0xff] %v16645_v27  ;;  %v19148_v7 = vld [vmem:[#allocation11_spill] sm:$0xff]  ;;  %v16658_v46 = vmul.u32.u64.low 3817748708, %v16602_v28  ;;  %v16659_v39 = vmul.u32.u64.high 3817748708, %v16602_v28, %v16658_v46  ;;  %v19149_v47 = vld [vmem:[#allocation24_spill] sm:$0xff] }
 0x3fc   : > { %v12453_v4 = vpop.f32.mrf.mxu1  ;;  %v5577_v40 = vadd.f32 %v5508_v16, %v19149_v47  ;;  %v16668_v57 = vsel %vm16633_vm11, %v2595_v2, %v2299_v52  ;;  %v16673_v29 = vsel %vm2562_vm1, %v2598_v23, %v2332_v43  ;;  %vm2488_vm2 = vcmp.ne.s32.totalorder %v2310_v11, 0  ;;  %v19152_v52 = vld [vmem:[#allocation36_spill] sm:$0xff]  ;;  %v19155_v46 = vld [vmem:[#allocation19_spill] sm:$0xff] }
 0x3fd   : > { %19146 = vst [vmem:[#allocation34_spill] sm:$0xff] %v16642_v15  ;;  %v16654_v10 = vadd.f32 %v12453_v4, %v19148_v7  ;;  %v16671_v4 = vadd.f32 %v12486_v56, %v16558_v44  ;;  %v2342_v17 = vmul.u32 18, %v2341_v18  ;;  %v16676_v7 = vadd.f32 %v5818_v33, %v16578_v3  ;;  %v19154_v44 = vld [vmem:[#allocation39_spill] sm:$0xff]  ;;  %v12490_v18 = vpop.f32.mrf.mxu0  ;;  %v19178_v27 = vld [vmem:[#allocation44_spill] sm:$0xff] }
 0x3fe   : > { %v5524_v15 = vpop.f32.mrf.mxu1  ;;  %vm2524_vm15 = vcmp.lt.s32.totalorder %v2310_v11, 0  ;;  %v2596_v59 = vadd.s32 18, %v2310_v11  ;;  %v16679_v63 = vmul.u32.u64.low 3817748708, %v16622_v31  ;;  %v16680_v9 = vmul.u32.u64.high 3817748708, %v16622_v31, %v16679_v63 }
 0x3ff   : > { %19150 = vst [vmem:[#allocation25_spill] sm:$0xff] %v16671_v4  ;;  %19151 = vst [vmem:[#allocation41_spill] sm:$0xff] %v16676_v7  ;;  %vm2649_vm14 = vcmp.ge.s32.totalorder %v19154_v44, 1  ;;  %vm2685_vm3 = vcmp.le.s32.totalorder %v19154_v44, 16  ;;  %vm2493_vm13 = vcmp.ne.s32.totalorder %v16648_v50, 0  ;;  %vm2529_vm0 = vcmp.lt.s32.totalorder %v16648_v50, 0 }
 0x400   : > { %v12456_v16 = vpop.f32.mrf.mxu1  ;;  %v16690_v56 = vsub.s32 %v16575_v1, %v2342_v17  ;;  %v2374_v43 = vshrl.u32 %v16659_v39, 4  ;;  %v16694_v33 = vmul.u32.u64.low 3817748708, %v16651_v22  ;;  %v16695_v32 = vmul.u32.u64.high 3817748708, %v16651_v22, %v16694_v33  ;;  %vm16707_vm11 = vmand %vm2524_vm15, %vm2488_vm2  ;;  %v19163_v7 = vld [vmem:[#allocation38_spill] sm:$0xff]  ;;  %v19174_v1 = vld [vmem:[#allocation17_spill] sm:$0xff] }
 0x401   : > { %v16683_v2 = vadd.f32 %v12456_v16, %v19152_v52  ;;  %v16698_v23 = vadd.s32 224, %v15793_v30  ;;  %v19157_v16 = vld [vmem:[#allocation40_spill] sm:$0xff]  ;;  %v2601_v39 = vadd.s32 18, %v16648_v50  ;;  %v16713_v17 = vadd.f32 %v12487_v13, %v16595_v25  ;;  %vm16731_vm2 = vmand %vm2529_vm0, %vm2493_vm13 }
 0x402   : > { %v5537_v3 = vpop.f32.mrf.mxu1  ;;  %vm2647_vm12 = vcmp.ge.s32.totalorder %v19157_v16, 1  ;;  %vm2683_vm6 = vcmp.le.s32.totalorder %v19157_v16, 16  ;;  %v16715_v63 = vadd.f32 %v5821_v53, %v5577_v40  ;;  %v2375_v33 = vmul.u32 18, %v2374_v43  ;;  %v19168_v40 = vld [vmem:[#allocation32_spill] sm:$0xff] }
 0x403   : > { %19153 = vst [vmem:[#allocation13_spill] sm:$0xff] %v16683_v2  ;;  %v16701_v47 = vadd.f32 %v5537_v3, %v19155_v46  ;;  %19160 = vst [vmem:[#allocation11_spill] sm:$0xff] %v16713_v17  ;;  %v19162_v3 = vld [vmem:[#allocation42_spill] sm:$0xff]  ;;  %v2352_v46 = vshrl.u32 %v16680_v9, 4  ;;  %vm2491_vm15 = vcmp.ne.s32.totalorder %v16690_v56, 0  ;;  %vm2527_vm4 = vcmp.lt.s32.totalorder %v16690_v56, 0 }
 0x404   : > { %19161 = vst [vmem:[#allocation24_spill] sm:$0xff] %v16715_v63  ;;  %v12457_v52 = vpop.f32.mrf.mxu1  ;;  %vm2686_vm5 = vcmp.le.s32.totalorder %v19162_v3, 16  ;;  %v16738_v13 = vadd.s32 248, %v15793_v30  ;;  %v16741_v53 = vadd.f32 %v5524_v15, %v19168_v40  ;;  %v16747_v9 = vsel %vm16707_vm11, %v2596_v59, %v2310_v11  ;;  %v16761_v11 = vld [vmem:[%s18718_s4] ss:$0 sm:$0xff]  ;;  %vm16772_vm11 = vmand %vm2527_vm4, %vm2491_vm15 }
 0x405   : > { %19156 = vst [vmem:[#allocation14_spill] sm:$0xff] %v16701_v47  ;;  %v16721_v47 = vmul.u32.u64.low 3817748708, %v16698_v23  ;;  %v16722_v2 = vmul.u32.u64.high 3817748708, %v16698_v23, %v16721_v47  ;;  %v16725_v4 = vadd.f32 %v12457_v52, %v19163_v7  ;;  %v2376_v43 = vsub.s32 %v16602_v28, %v2375_v33  ;;  %v5834_v52 = vpop.f32.mrf.mxu0 }
 0x406   : > { %19167 = vst [vmem:[#allocation39_spill] sm:$0xff] %v16738_v13  ;;  %19169 = vst [vmem:[#allocation19_spill] sm:$0xff] %v16741_v53  ;;  %v16743_v7 = vpop.f32.mrf.mxu1  ;;  %v2353_v47 = vmul.u32 18, %v2352_v46  ;;  %v2599_v63 = vadd.s32 18, %v16690_v56  ;;  %v2407_v17 = vshrl.u32 %v16695_v32, 4  ;;  %v16766_v28 = vsel %vm16731_vm2, %v2601_v39, %v16648_v50  ;;  %v19175_v46 = vld [vmem:[#allocation21_spill] sm:$0xff] }
 0x407   : > { %19164 = vst [vmem:[#allocation36_spill] sm:$0xff] %v16725_v4  ;;  %19170 = vst [vmem:[#allocation40_spill] sm:$0xff] %v16743_v7  ;;  %v19171_v4 = vld [vmem:[#allocation43_spill] sm:$0xff]  ;;  %v16755_v15 = vmul.u32.u64.low 3817748708, %v16738_v13  ;;  %v16756_v40 = vmul.u32.u64.high 3817748708, %v16738_v13, %v16755_v15  ;;  %vm2494_vm9 = vcmp.ne.s32.totalorder %v2376_v43, 0 }
 0x408   : > { %v12500_v7 = vpop.f32.mrf.mxu1  ;;  %vm2530_vm13 = vcmp.lt.s32.totalorder %v2376_v43, 0  ;;  %v2354_v32 = vsub.s32 %v16622_v31, %v2353_v47  ;;  %v2602_v50 = vadd.s32 18, %v2376_v43  ;;  %v2408_v39 = vmul.u32 18, %v2407_v17 }
 0x409   : > { %v6181_v33 = vadd.f32 %v12500_v7, %v19174_v1  ;;  %v2385_v25 = vshrl.u32 %v16722_v2, 4  ;;  %vm16781_vm2 = vmand %vm2530_vm13, %vm2494_vm9  ;;  %v16786_v31 = vadd.f32 %v12490_v18, %v16611_v36  ;;  %v12491_v7 = vpop.f32.mrf.mxu0  ;;  %vm2651_vm0 = vcmp.ge.s32.totalorder %v19178_v27, 1 }
 0x40a   : > { %v6036_v15 = vpop.f32.mrf.mxu1  ;;  %vm2492_vm4 = vcmp.ne.s32.totalorder %v2354_v32, 0  ;;  %vm2528_vm15 = vcmp.lt.s32.totalorder %v2354_v32, 0  ;;  %v2600_v13 = vadd.s32 18, %v2354_v32  ;;  %vm2687_vm1 = vcmp.le.s32.totalorder %v19178_v27, 16  ;;  %vm16804_vm13 = vmand %vm2649_vm14, %vm2685_vm3 }
 0x40b   : > { %v6224_v47 = vadd.f32 %v16761_v11, %v6181_v33  ;;  %v6179_v1 = vadd.f32 %v6036_v15, %v16333_v37  ;;  %v16795_v2 = vsel %vm16772_vm11, %v2599_v63, %v16690_v56  ;;  %vm2564_vm9 = vmand %vm2528_vm15, %vm2492_vm4  ;;  %v16798_v17 = vadd.f32 %v5834_v52, %v16625_v0 }
 0x40c   : > { %v19179_v36 = vmov 0  ;;  %v12501_v37 = vpop.f32.mrf.mxu1  ;;  %v2409_v18 = vsub.s32 %v16651_v22, %v2408_v39  ;;  %v2386_v33 = vmul.u32 18, %v2385_v25  ;;  %v2418_v59 = vshrl.u32 %v16756_v40, 4  ;;  %vm16823_vm14 = vmand %vm2647_vm12, %vm2683_vm6 }
 0x40d   : > { %v19180_v36 = vsel %vm16804_vm13, 4294967295, %v19179_v36  ;;  %v16811_v56 = vadd.f32 %v12491_v7, %v16654_v10  ;;  %v6260_v63 = vmax.f32 %v6224_v47, 0.0  ;;  %v6222_v0 = vadd.f32 %v16761_v11, %v6179_v1 }
 0x40e   : > { %19181 = vst [vmem:[#allocation42_spill] sm:$0xff] %v19180_v36  ;;  %v6182_v52 = vadd.f32 %v12501_v37, %v16348_v8  ;;  %v16817_v44 = vsel %vm16781_vm2, %v2602_v50, %v2376_v43  ;;  %v19183_v22 = vmov 0  ;;  %v6039_v40 = vpop.f32.mrf.mxu1  ;;  %v16827_v10 = vsel %vm2564_vm9, %v2600_v13, %v2354_v32 }
 0x40f   : > { %19182 = vst [vmem:[#allocation38_spill] sm:$0xff] %v16811_v56  ;;  %v19184_v22 = vsel %vm16823_vm14, 4294967295, %v19183_v22  ;;  %vm2497_vm3 = vcmp.ne.s32.totalorder %v2409_v18, 0  ;;  %vm2533_vm11 = vcmp.lt.s32.totalorder %v2409_v18, 0  ;;  %v2605_v39 = vadd.s32 18, %v2409_v18 }
 0x410   : > { %19185 = vst [vmem:[#allocation32_spill] sm:$0xff] %v19184_v22  ;;  %v6368_v8 = vsel %vm16804_vm13, %v6260_v63, 0.0  ;;  %v6258_v53 = vmax.f32 %v6222_v0, 0.0  ;;  %vm19186_vm2 = vcmp.ge.s32.totalorder %v19162_v3, 1  ;;  %v19187_v16 = vmov 0  ;;  %v12504_v50 = vpop.f32.mrf.mxu1  ;;  %vm2569_vm12 = vmand %vm2533_vm11, %vm2497_vm3 }
 0x411   : > { %vm16835_vm4 = vmand %vm19186_vm2, %vm2686_vm5  ;;  %v6225_v43 = vadd.f32 %v16761_v11, %v6182_v52  ;;  %v6180_v13 = vadd.f32 %v6039_v40, %v16361_v26  ;;  %v11595_v32 = vpack.c.bf16 %v6368_v8, %v6368_v8  ;;  %v16842_v25 = vsub.s32 %v16698_v23, %v2386_v33 }
 0x412   : > { %v19188_v16 = vsel %vm16835_vm4, 4294967295, %v19187_v16  ;;  %v16844_v15 = vmul.u32 18, %v2418_v59  ;;  %v16847_v7 = vadd.s32 232, %v15793_v30  ;;  %v6366_v3 = vsel %vm16823_vm14, %v6258_v53, 0.0  ;;  %v6052_v33 = vpop.f32.mrf.mxu1  ;;  %v19197_v53 = vld [vmem:[#allocation45_spill] sm:$0xff] }
 0x413   : > { %19189 = vst [vmem:[#allocation43_spill] sm:$0xff] %v19188_v16  ;;  %v6261_v47 = vmax.f32 %v6225_v43, 0.0  ;;  %v6223_v1 = vadd.f32 %v16761_v11, %v6180_v13  ;;  %v6185_v37 = vadd.f32 %v12504_v50, %v16375_v42  ;;  %v6544_v26 = vshrl.u32 %v11595_v32, 16  ;;  %v19203_v50 = vld [vmem:[#allocation16_spill] sm:$0xff] }
 0x414   : > { %19190 = vst [vmem:[#allocation17_spill] sm:$0xff] %v16844_v15  ;;  %19191 = vst [vmem:[#allocation21_spill] sm:$0xff] %v16847_v7  ;;  %v6547_v63 = vshll.u32 %v11595_v32, 16  ;;  %v11593_v0 = vpack.c.bf16 %v6366_v3, %v6366_v3  ;;  %vm19192_vm5 = vcmp.le.s32.totalorder %v19171_v4, 16  ;;  %vm19193_vm6 = vcmp.ge.s32.totalorder %v19171_v4, 1  ;;  %v19210_v15 = vld [vmem:[#allocation23_spill] sm:$0xff] }
 0x415   : > { %vm16857_vm15 = vmand %vm19193_vm6, %vm19192_vm5  ;;  %v19194_v23 = vmov 0  ;;  %v16861_v59 = vsel %vm2569_vm12, %v2605_v39, %v2409_v18  ;;  %v6369_v52 = vsel %vm16835_vm4, %v6261_v47, 0.0  ;;  %v6259_v40 = vmax.f32 %v6223_v1, 0.0  ;;  %v12505_v39 = vpop.f32.mrf.mxu1 }
 0x416   : > { %v19195_v23 = vsel %vm16857_vm15, 4294967295, %v19194_v23  ;;  %v6228_v42 = vadd.f32 %v16761_v11, %v6185_v37  ;;  %v6183_v8 = vadd.f32 %v6052_v33, %v16381_v21  ;;  %v6546_v4 = vrot.slane %v6544_v26, 6  ;;  %v19204_v37 = vld [vmem:[#allocation22_spill] sm:$0xff] }
 0x417   : > { %19196 = vst [vmem:[#allocation44_spill] sm:$0xff] %v19195_v23  ;;  %v6549_v43 = vrot.slane %v6547_v63, 7  ;;  %v6525_v13 = vshrl.u32 %v11593_v0, 16  ;;  %v6528_v32 = vshll.u32 %v11593_v0, 16  ;;  %vm19198_vm11 = vcmp.le.s32.totalorder %v19175_v46, 16 }
 0x418   : > { %vm19199_vm2 = vcmp.ge.s32.totalorder %v19175_v46, 1  ;;  %v19200_v18 = vmov 0  ;;  %vm2652_vm5 = vcmp.ge.s32.totalorder %v19203_v50, 1  ;;  %vm2688_vm6 = vcmp.le.s32.totalorder %v19203_v50, 16 }
 0x419   : > { %vm16873_vm12 = vmand %vm19199_vm2, %vm19198_vm11  ;;  %v11596_v21 = vpack.c.bf16 %v6369_v52, %v6369_v52  ;;  %v6367_v3 = vsel %vm16857_vm15, %v6259_v40, 0.0  ;;  %v6264_v47 = vmax.f32 %v6228_v42, 0.0  ;;  %v6226_v1 = vadd.f32 %v16761_v11, %v6183_v8  ;;  %v6055_v52 = vpop.f32.mrf.mxu1  ;;  %v6920_v40 = vld [vmem:[#allocation3 + $0x8] sm:$0xe] }
 0x41a   : > { %v19201_v18 = vsel %vm16873_vm12, 4294967295, %v19200_v18  ;;  %vm2693_vm3 = vcmp.le.s32.totalorder %v19204_v37, 16  ;;  %v6550_v46 = vor.u32 %v6549_v43, %v6546_v4  ;;  %v6527_v26 = vrot.slane %v6525_v13, 6  ;;  %vm16888_vm11 = vmand %vm2651_vm0, %vm2687_vm1 }
 0x41b   : > { %19202 = vst [vmem:[#allocation45_spill] sm:$0xff] %v19201_v18  ;;  %v6530_v63 = vrot.slane %v6528_v32, 7  ;;  %v11594_v0 = vpack.c.bf16 %v6367_v3, %v6367_v3  ;;  %v19205_v33 = vmov 0  ;;  %v6554_v42 = vshrl.u32 %v11596_v21, 16  ;;  %v12508_v3 = vpop.f32.mrf.mxu1  ;;  %vm16924_vm1 = vmand %vm2652_vm5, %vm2688_vm6 }
 0x41c   : > { %v19206_v33 = vsel %vm16888_vm11, 4294967295, %v19205_v33  ;;  %v6557_v8 = vshll.u32 %v11596_v21, 16  ;;  %v6372_v23 = vsel %vm16873_vm12, %v6264_v47, 0.0  ;;  %v6262_v22 = vmax.f32 %v6226_v1, 0.0 }
 0x41d   : > { %19207 = vst [vmem:[#allocation16_spill] sm:$0xff] %v19206_v33  ;;  %v6552_v4 = vrot.slane %v6550_v46, 4  ;;  %v6531_v43 = vor.u32 %v6530_v63, %v6527_v26  ;;  %v6534_v13 = vshrl.u32 %v11594_v0, 16  ;;  %v6537_v32 = vshll.u32 %v11594_v0, 16  ;;  %v6068_v26 = vpop.f32.mrf.mxu1  ;;  %v19209_v33 = vld [vmem:[#allocation18_spill] sm:$0xff] }
 0x41e   : > { %v6556_v16 = vrot.slane %v6554_v42, 6  ;;  %v6559_v36 = vrot.slane %v6557_v8, 7  ;;  %v11599_v27 = vpack.c.bf16 %v6372_v23, %v6372_v23  ;;  %v6370_v30 = vsel %vm16888_vm11, %v6262_v22, 0.0 }
 0x41f   : > { %vm2691_vm0 = vcmp.le.s32.totalorder %v16337_v12, 16  ;;  %v6532_v21 = vrot.slane %v6531_v43, 4  ;;  %v6921_v47 = vsel %vm14001_vm8, %v6531_v43, %v6920_v40  ;;  %v6536_v1 = vrot.slane %v6534_v13, 6  ;;  %v12509_v40 = vpop.f32.mrf.mxu1 }
 0x420   : > { %v6539_v18 = vrot.slane %v6537_v32, 7  ;;  %6922 = vst [vmem:[#allocation3 + $0x8] sm:$0xe] %v6921_v47  ;;  %v6560_v63 = vor.u32 %v6559_v36, %v6556_v16  ;;  %v6584_v0 = vshrl.u32 %v11599_v27, 16  ;;  %v6587_v42 = vshll.u32 %v11599_v27, 16 }
 0x421   : > { %v11597_v8 = vpack.c.bf16 %v6370_v30, %v6370_v30  ;;  %v6186_v23 = vadd.f32 %v12505_v39, %v16418_v6  ;;  %v6184_v56 = vadd.f32 %v6055_v52, %v19209_v33  ;;  %v6189_v7 = vadd.f32 %v12508_v3, %v19210_v15  ;;  %v6071_v15 = vpop.f32.mrf.mxu1 }
 0x422   : > { %v6540_v22 = vor.u32 %v6539_v18, %v6536_v1  ;;  %v6561_v13 = vsel %vm13775_vm7, %v6552_v4, %v6560_v63  ;;  %v6562_v32 = vrot.slane %v6560_v63, 4  ;;  %v6586_v36 = vrot.slane %v6584_v0, 6  ;;  %v19224_v0 = vld [vmem:[#allocation20_spill] sm:$0xff] }
 0x423   : > { %v6589_v16 = vrot.slane %v6587_v42, 7  ;;  %6925 = vst [vmem:[#allocation3 + $0x14] sm:$0xf] %v6561_v13  ;;  %v6564_v47 = vshrl.u32 %v11597_v8, 16  ;;  %v6567_v18 = vshll.u32 %v11597_v8, 16  ;;  %vm19212_vm8 = vcmp.le.s32.totalorder %v19197_v53, 16 }
 0x424   : > { %v6541_v30 = vsel %vm13775_vm7, %v6532_v21, %v6540_v22  ;;  %v6542_v27 = vrot.slane %v6540_v22, 4  ;;  %vm19213_vm2 = vcmp.ge.s32.totalorder %v19197_v53, 1  ;;  %v19214_v6 = vmov 0 }
 0x425   : > { %vm16913_vm9 = vmand %vm19213_vm2, %vm19212_vm8  ;;  %6923 = vst [vmem:[#allocation3 + $0xc] sm:$0xf] %v6541_v30  ;;  %v16917_v39 = vor.u32 %v6589_v16, %v6586_v36  ;;  %v6229_v33 = vadd.f32 %v16761_v11, %v6186_v23  ;;  %v19217_v52 = vmov 0  ;;  %v6227_v53 = vadd.f32 %v16761_v11, %v6184_v56  ;;  %v12512_v56 = vpop.f32.mrf.mxu1  ;;  %v16944_v23 = vld [vmem:[#allocation4 + $0xf8] sm:$0xff]  }
 0x426   : > { %v19215_v6 = vsel %vm16913_vm9, 4294967295, %v19214_v6  ;;  %v19218_v52 = vsel %vm16924_vm1, 4294967295, %v19217_v52  ;;  %v6232_v4 = vadd.f32 %v16761_v11, %v6189_v7  ;;  %v6551_v3 = vsel %vm13775_vm7, %v6542_v27, %v6550_v46  ;;  %12690 = vmatprep.subr.bf16.mxu1 %v16944_v23 }
 0x427   : > { %19216 = vst [vmem:[#allocation22_spill] sm:$0xff] %v19215_v6  ;;  %19219 = vst [vmem:[#allocation26_spill] sm:$0xff] %v19218_v52  ;;  %v6566_v21 = vrot.slane %v6564_v47, 6  ;;  %v6569_v1 = vrot.slane %v6567_v18, 7  ;;  %vm19220_vm2 = vcmp.ge.s32.totalorder %v19204_v37, 1  ;;  %v19221_v63 = vmov 0 }
 0x428   : > { %vm16936_vm8 = vmand %vm19220_vm2, %vm2693_vm3  ;;  %v6187_v50 = vadd.f32 %v6068_v26, %v16459_v38  ;;  %6924 = vst [vmem:[#allocation3 + $0x10] sm:$0xf] %v6551_v3  ;;  %v6592_v46 = vrot.slane %v16917_v39, 4  ;;  %v6265_v42 = vmax.f32 %v6229_v33, 0.0  ;;  %v6263_v8 = vmax.f32 %v6227_v53, 0.0  ;;  %v16951_v26 = vpop.f32.mrf.mxu1 }
 0x429   : > { %v19222_v63 = vsel %vm16936_vm8, 4294967295, %v19221_v63  ;;  %v6268_v22 = vmax.f32 %v6232_v4, 0.0  ;;  %v6570_v37 = vor.u32 %v6569_v1, %v6566_v21  ;;  %v6190_v13 = vadd.f32 %v12509_v40, %v16470_v60 }
 0x42a   : > { %19223 = vst [vmem:[#allocation18_spill] sm:$0xff] %v19222_v63  ;;  %v6230_v7 = vadd.f32 %v16761_v11, %v6187_v50  ;;  %v6188_v38 = vadd.f32 %v6071_v15, %v16473_v5  ;;  %v6373_v36 = vsel %vm16913_vm9, %v6265_v42, 0.0  ;;  %v6371_v16 = vsel %vm16924_vm1, %v6263_v8, 0.0  ;;  %v16971_v15 = vpop.f32.mrf.mxu1 }
 0x42b   : > { %v6376_v30 = vsel %vm16936_vm8, %v6268_v22, 0.0  ;;  %v6193_v27 = vadd.f32 %v12512_v56, %v16487_v48  ;;  %v6571_v60 = vsel %vm13775_vm7, %v6562_v32, %v6570_v37  ;;  %v6572_v5 = vrot.slane %v6570_v37, 4 }
 0x42c   : > { %v11600_v40 = vpack.c.bf16 %v6373_v36, %v6373_v36  ;;  %v11598_v47 = vpack.c.bf16 %v6371_v16, %v6371_v16  ;;  %vm19225_vm3 = vcmp.ge.s32.totalorder %v16337_v12, 1  ;;  %v19226_v18 = vmov 0  ;;  %6926 = vst [vmem:[#allocation3 + $0x18] sm:$0xf] %v6571_v60  ;;  %v6087_v22 = vpop.f32.mrf.mxu1 }
 0x42d   : > { %vm16967_vm2 = vmand %vm19225_vm3, %vm2691_vm0  ;;  %v11603_v48 = vpack.c.bf16 %v6376_v30, %v6376_v30  ;;  %v6266_v33 = vmax.f32 %v6230_v7, 0.0  ;;  %v6233_v53 = vadd.f32 %v16761_v11, %v6190_v13  ;;  %v6231_v32 = vadd.f32 %v16761_v11, %v6188_v38 }
 0x42e   : > { %v19227_v18 = vsel %vm16967_vm2, 4294967295, %v19226_v18  ;;  %v6594_v4 = vshrl.u32 %v11600_v40, 16  ;;  %v6597_v3 = vshll.u32 %v11600_v40, 16  ;;  %v6574_v21 = vshrl.u32 %v11598_v47, 16 }
 0x42f   : > { %19228 = vst [vmem:[#allocation23_spill] sm:$0xff] %v19227_v18  ;;  %v6577_v1 = vshll.u32 %v11598_v47, 16  ;;  %vm19229_vm5 = vcmp.le.s32.totalorder %v16353_v61, 16  ;;  %vm19230_vm0 = vcmp.ge.s32.totalorder %v16353_v61, 1  ;;  %v19231_v12 = vmov 0 }
 0x430   : > { %vm16979_vm3 = vmand %vm19230_vm0, %vm19229_vm5  ;;  %v6624_v50 = vshrl.u32 %v11603_v48, 16  ;;  %v6627_v56 = vshll.u32 %v11603_v48, 16  ;;  %v6374_v42 = vsel %vm16967_vm2, %v6266_v33, 0.0  ;;  %v6269_v8 = vmax.f32 %v6233_v53, 0.0  ;;  %v7658_v43 = vld [vmem:[#allocation3 + $0x10] sm:$0xc] }
 0x431   : > { %v19232_v12 = vsel %vm16979_vm3, 4294967295, %v19231_v12  ;;  %v6596_v37 = vrot.slane %v6594_v4, 6  ;;  %v6599_v7 = vrot.slane %v6597_v3, 7  ;;  %v6576_v13 = vrot.slane %v6574_v21, 6 }
 0x432   : > { %19233 = vst [vmem:[#allocation10_spill] sm:$0xff] %v19232_v12  ;;  %v6579_v38 = vrot.slane %v6577_v1, 7  ;;  %v6626_v61 = vrot.slane %v6624_v50, 6  ;;  %v6629_v36 = vrot.slane %v6627_v56, 7  ;;  %v11601_v16 = vpack.c.bf16 %v6374_v42, %v6374_v42  ;;  %v12516_v1 = vpop.f32.mrf.mxu1 }
 0x433   : > { %v6377_v30 = vsel %vm16979_vm3, %v6269_v8, 0.0  ;;  %v6600_v60 = vor.u32 %v6599_v7, %v6596_v37  ;;  %v6267_v48 = vmax.f32 %v6231_v32, 0.0  ;;  %vm19234_vm8 = vcmp.le.s32.totalorder %v19224_v0, 16 }
 0x434   : > { %v6580_v40 = vor.u32 %v6579_v38, %v6576_v13  ;;  %v11604_v47 = vpack.c.bf16 %v6377_v30, %v6377_v30  ;;  %v16993_v33 = vor.u32 %v6629_v36, %v6626_v61  ;;  %v6604_v53 = vshrl.u32 %v11601_v16, 16  ;;  %v6100_v30 = vpop.f32.mrf.mxu1 }
 0x435   : > { %v6607_v4 = vshll.u32 %v11601_v16, 16  ;;  %vm19235_vm3 = vcmp.ge.s32.totalorder %v19224_v0, 1  ;;  %v19236_v3 = vmov 0  ;;  %v6236_v21 = vadd.f32 %v16761_v11, %v6193_v27 }
 0x436   : > { %vm16999_vm1 = vmand %vm19235_vm3, %vm19234_vm8  ;;  %v6601_v32 = vsel %vm13775_vm7, %v6592_v46, %v6600_v60  ;;  %v6602_v50 = vrot.slane %v6600_v60, 4  ;;  %v6581_v56 = vsel %vm13775_vm7, %v6572_v5, %v6580_v40  ;;  %v6582_v42 = vrot.slane %v6580_v40, 4 }
 0x437   : > { %v19237_v3 = vsel %vm16999_vm1, 4294967295, %v19236_v3  ;;  %6929 = vst [vmem:[#allocation3 + $0x24] sm:$0xf] %v6601_v32  ;;  %6927 = vst [vmem:[#allocation3 + $0x1c] sm:$0xf] %v6581_v56  ;;  %v6632_v0 = vrot.slane %v16993_v33, 4  ;;  %v6191_v16 = vadd.f32 %v16951_v26, %v16491_v41 }
 0x438   : > { %19238 = vst [vmem:[#allocation20_spill] sm:$0xff] %v19237_v3  ;;  %v6606_v8 = vrot.slane %v6604_v53, 6  ;;  %v6609_v37 = vrot.slane %v6607_v4, 7  ;;  %v6634_v7 = vshrl.u32 %v11604_v47, 16  ;;  %vm19239_vm8 = vcmp.le.s32.totalorder %v16463_v62, 16 }
 0x439   : > { %vm19240_vm3 = vcmp.ge.s32.totalorder %v16463_v62, 1  ;;  %v19241_v27 = vmov 0  ;;  %v6591_v46 = vsel %vm13775_vm7, %v6582_v42, %v16917_v39  ;;  %v6637_v5 = vshll.u32 %v11604_v47, 16  ;;  %v19244_v47 = vld [vmem:[#allocation29_spill] sm:$0xff] }
 0x43a   : > { %vm17015_vm2 = vmand %vm19240_vm3, %vm19239_vm8  ;;  %v6375_v13 = vsel %vm16999_vm1, %v6267_v48, 0.0  ;;  %v6272_v38 = vmax.f32 %v6236_v21, 0.0  ;;  %6928 = vst [vmem:[#allocation3 + $0x20] sm:$0xf] %v6591_v46  ;;  %v6610_v61 = vor.u32 %v6609_v37, %v6606_v8  ;;  %v6636_v62 = vrot.slane %v6634_v7, 6  ;;  %v17053_v46 = vpop.f32.mrf.mxu1 }
 0x43b   : > { %v19242_v27 = vsel %vm17015_vm2, 4294967295, %v19241_v27  ;;  %v11602_v36 = vpack.c.bf16 %v6375_v13, %v6375_v13  ;;  %v6639_v60 = vrot.slane %v6637_v5, 7  ;;  %v6194_v39 = vadd.f32 %v16971_v15, %v16508_v49  ;;  %v17049_v7 = vld [vmem:[#allocation3 + $0xc] sm:$0xf] }
 0x43c   : > { %19243 = vst [vmem:[#allocation46_spill] sm:$0xff] %v19242_v27  ;;  %v6380_v40 = vsel %vm17015_vm2, %v6272_v38, 0.0  ;;  %v6192_v53 = vadd.f32 %v6087_v22, %v19244_v47  ;;  %v6611_v48 = vsel %vm13775_vm7, %v6602_v50, %v6610_v61  ;;  %v6612_v4 = vrot.slane %v6610_v61, 4  ;;  %v6963_v50 = vld [vmem:[#allocation3 + $0x8] sm:$0xf]  ;;  %v13248_v47 = vld [vmem:[#allocation4 + $0xf0] sm:$0xff]  }
 0x43d   : > { %v6614_v21 = vshrl.u32 %v11602_v36, 16  ;;  %v6617_v32 = vshll.u32 %v11602_v36, 16  ;;  %6930 = vst [vmem:[#allocation3 + $0x28] sm:$0xf] %v6611_v48  ;;  %v17035_v56 = vor.u32 %v6639_v60, %v6636_v62  ;;  %v11607_v41 = vpack.c.bf16 %v6380_v40, %v6380_v40 }
 0x43e   : > { %v6234_v26 = vadd.f32 %v16761_v11, %v6191_v16  ;;  %v6237_v42 = vadd.f32 %v16761_v11, %v6194_v39  ;;  %vm19245_vm8 = vcmp.le.s32.totalorder %v16477_v20, 16  ;;  %vm19246_vm3 = vcmp.ge.s32.totalorder %v16477_v20, 1  ;;  %v17075_v16 = vld [vmem:[#allocation3 + $0x10] sm:$0xff]  }
 0x43f   : > { %v6616_v8 = vrot.slane %v6614_v21, 6  ;;  %v6619_v37 = vrot.slane %v6617_v32, 7  ;;  %vm17043_vm6 = vmand %vm19246_vm3, %vm19245_vm8  ;;  %v19247_v49 = vmov 0  ;;  %v6235_v15 = vadd.f32 %v16761_v11, %v6192_v53  ;;  %v6103_v32 = vpop.f32.mrf.mxu1 }
 0x440   : > { %v19248_v49 = vsel %vm17043_vm6, 4294967295, %v19247_v49  ;;  %v6197_v22 = vadd.f32 %v12516_v1, %v16551_v55  ;;  %v6641_v20 = vsel %vm13775_vm7, %v6632_v0, %v17035_v56  ;;  %v6642_v5 = vrot.slane %v17035_v56, 4 }
 0x441   : > { %19249 = vst [vmem:[#allocation29_spill] sm:$0xff] %v19248_v49  ;;  %v6664_v13 = vshrl.u32 %v11607_v41, 16  ;;  %v6667_v38 = vshll.u32 %v11607_v41, 16  ;;  %vm19250_vm8 = vcmp.le.s32.totalorder %v16481_v34, 16  ;;  %vm19251_vm3 = vcmp.ge.s32.totalorder %v16481_v34, 1 }
 0x442   : > { %vm17063_vm2 = vmand %vm19251_vm3, %vm19250_vm8  ;;  %v19252_v55 = vmov 0  ;;  %6933 = vst [vmem:[#allocation3 + $0x34] sm:$0xf] %v6641_v20  ;;  %v6620_v1 = vor.u32 %v6619_v37, %v6616_v8  ;;  %v6270_v61 = vmax.f32 %v6234_v26, 0.0  ;;  %v6273_v62 = vmax.f32 %v6237_v42, 0.0 }
 0x443   : > { %v19253_v55 = vsel %vm17063_vm2, 4294967295, %v19252_v55  ;;  %vm19255_vm5 = vcmp.le.s32.totalorder %v16495_v58, 16  ;;  %vm19256_vm0 = vcmp.ge.s32.totalorder %v16495_v58, 1  ;;  %v19257_v0 = vmov 0 }
 0x444   : > { %19254 = vst [vmem:[#allocation47_spill] sm:$0xff] %v19253_v55  ;;  %vm17071_vm1 = vmand %vm19256_vm0, %vm19255_vm5  ;;  %v6271_v36 = vmax.f32 %v6235_v15, 0.0  ;;  %v6666_v34 = vrot.slane %v6664_v13, 6  ;;  %v6669_v60 = vrot.slane %v6667_v38, 7  ;;  %v6240_v40 = vadd.f32 %v16761_v11, %v6197_v22 }
 0x445   : > { %v19258_v0 = vsel %vm17071_vm1, 4294967295, %v19257_v0  ;;  %v11400_v39 = vcombine.low %v6963_v50, %v17049_v7  ;;  %v6621_v53 = vsel %vm13775_vm7, %v6612_v4, %v6620_v1  ;;  %v6622_v48 = vrot.slane %v6620_v1, 4 }
 0x446   : > { %19259 = vst [vmem:[#allocation48_spill] sm:$0xff] %v19258_v0  ;;  %v6378_v58 = vsel %vm17043_vm6, %v6270_v61, 0.0  ;;  %v6381_v21 = vsel %vm17063_vm2, %v6273_v62, 0.0  ;;  %6931 = vst [vmem:[#allocation3 + $0x2c] sm:$0xf] %v6621_v53  ;;  %v17085_v41 = vor.u32 %v6669_v60, %v6666_v34  ;;  %v6379_v8 = vsel %vm17071_vm1, %v6271_v36, 0.0 }
 0x447   : > { %v11605_v26 = vpack.c.bf16 %v6378_v58, %v6378_v58  ;;  %v11608_v42 = vpack.c.bf16 %v6381_v21, %v6381_v21  ;;  %vm19260_vm5 = vcmp.le.s32.totalorder %v16547_v19, 16  ;;  %vm19261_vm0 = vcmp.ge.s32.totalorder %v16547_v19, 1  ;;  %12603 = vmatmul.mubr.bf16.vlgmr.msra.gmra.mxu1 %v11400_v39  ;;  %v13251_v19 = vld [vmem:[#allocation4 + $0xe8] sm:$0xff]   ;;  %v13253_v39 = vld [vmem:[#allocation4 + $0xe0] sm:$0xff]  }
 0x448   : > { %vm17093_vm8 = vmand %vm19261_vm0, %vm19260_vm5  ;;  %v19262_v4 = vmov 0  ;;  %v6631_v37 = vsel %vm13775_vm7, %v6622_v48, %v16993_v33  ;;  %v11606_v15 = vpack.c.bf16 %v6379_v8, %v6379_v8  ;;  %v6276_v22 = vmax.f32 %v6240_v40, 0.0  ;;  %12606 = vmatprep.mubr.bf16.mxu1 %v17075_v16  ;;  %12691 = vmatpush3.bf16.msra.mxu1 %v16944_v23  ;;  %v17114_v40 = vld [vmem:[#allocation3 + $0x18] sm:$0xff]  }
 0x449   : > { %v19263_v4 = vsel %vm17093_vm8, 4294967295, %v19262_v4  ;;  %v6195_v50 = vadd.f32 %v6100_v30, %v16564_v45  ;;  %6932 = vst [vmem:[#allocation3 + $0x30] sm:$0xf] %v6631_v37  ;;  %v6672_v20 = vrot.slane %v17085_v41, 4  ;;  %v6644_v13 = vshrl.u32 %v11605_v26, 16  ;;  %12692 = vmatprep.subr.bf16.mxu1 %v13248_v47  ;;  %v17110_v30 = vpop.f32.mrf.mxu1 }
 0x44a   : > { %19264 = vst [vmem:[#allocation49_spill] sm:$0xff] %v19263_v4  ;;  %v6647_v38 = vshll.u32 %v11605_v26, 16  ;;  %v6674_v1 = vshrl.u32 %v11608_v42, 16  ;;  %v6677_v33 = vshll.u32 %v11608_v42, 16  ;;  %v6654_v61 = vshrl.u32 %v11606_v15, 16  ;;  %v17117_v26 = vld [vmem:[#allocation3 + $0x20] sm:$0xff]  }
 0x44b   : > { %v6657_v62 = vshll.u32 %v11606_v15, 16  ;;  %v6384_v45 = vsel %vm17093_vm8, %v6276_v22, 0.0  ;;  %v6646_v36 = vrot.slane %v6644_v13, 6  ;;  %v6238_v21 = vadd.f32 %v16761_v11, %v6195_v50 }
 0x44c   : > { %v6649_v34 = vrot.slane %v6647_v38, 7  ;;  %v6676_v60 = vrot.slane %v6674_v1, 6  ;;  %v11611_v23 = vpack.c.bf16 %v6384_v45, %v6384_v45  ;;  %v6679_v53 = vrot.slane %v6677_v33, 7  ;;  %12693 = vmatpush3.bf16.msra.mxu1 %v13248_v47  ;;  %v19270_v47 = vld [vmem:[#allocation30_spill] sm:$0xff]  ;;  %v6116_v33 = vpop.f32.mrf.mxu1 }
 0x44d   : > { %v6656_v48 = vrot.slane %v6654_v61, 6  ;;  %v6659_v58 = vrot.slane %v6657_v62, 7  ;;  %vm19265_vm3 = vcmp.le.s32.totalorder %v16560_v51, 16  ;;  %vm19266_vm5 = vcmp.ge.s32.totalorder %v16560_v51, 1  ;;  %12694 = vmatprep.subr.bf16.mxu1 %v13251_v19 }
 0x44e   : > { %v6650_v42 = vor.u32 %v6649_v34, %v6646_v36  ;;  %v6704_v8 = vshrl.u32 %v11611_v23, 16  ;;  %v6707_v37 = vshll.u32 %v11611_v23, 16  ;;  %vm17123_vm6 = vmand %vm19266_vm5, %vm19265_vm3  ;;  %v19267_v15 = vmov 0  ;;  %v13256_v23 = vld [vmem:[#allocation4 + $0xd8] sm:$0xff]  }
 0x44f   : > { %v19268_v15 = vsel %vm17123_vm6, 4294967295, %v19267_v15  ;;  %v6198_v22 = vadd.f32 %v17053_v46, %v16582_v35  ;;  %v17129_v13 = vor.u32 %v6679_v53, %v6676_v60  ;;  %v6660_v50 = vor.u32 %v6659_v58, %v6656_v48  ;;  %12607 = vmatmul.mubr.bf16.gmra.mxu1 %v17114_v40  ;;  %v7013_v60 = vld [vmem:[#allocation3 + $0x8] sm:$0xe] }
 0x450   : > { %19269 = vst [vmem:[#allocation50_spill] sm:$0xff] %v19268_v15  ;;  %v6274_v38 = vmax.f32 %v6238_v21, 0.0  ;;  %v6196_v1 = vadd.f32 %v6103_v32, %v19270_v47  ;;  %v6651_v51 = vsel %vm13775_vm7, %v6642_v5, %v6650_v42  ;;  %v6652_v61 = vrot.slane %v6650_v42, 4  ;;  %12610 = vmatprep.mubr.bf16.mxu1 %v17117_v26  ;;  %12695 = vmatpush3.bf16.msra.mxu1 %v13251_v19  ;;  %v12521_v42 = vpop.f32.mrf.mxu1  ;;  %v19282_v47 = vld [vmem:[#allocation33_spill] sm:$0xff] }
 0x451   : > { %v6706_v62 = vrot.slane %v6704_v8, 6  ;;  %v6709_v35 = vrot.slane %v6707_v37, 7  ;;  %6934 = vst [vmem:[#allocation3 + $0x38] sm:$0xf] %v6651_v51  ;;  %v6681_v46 = vsel %vm13775_vm7, %v6672_v20, %v17129_v13  ;;  %v6682_v32 = vrot.slane %v17129_v13, 4  ;;  %12696 = vmatprep.subr.bf16.mxu1 %v13253_v39  ;;  %v17182_v51 = vld [vmem:[#allocation3 + $0x28] sm:$0xff]  }
 0x452   : > { %v6662_v45 = vrot.slane %v6660_v50, 4  ;;  %v6382_v36 = vsel %vm17123_vm6, %v6274_v38, 0.0  ;;  %6937 = vst [vmem:[#allocation3 + $0x44] sm:$0xf] %v6681_v46  ;;  %v6661_v56 = vsel %vm13775_vm7, %v6652_v61, %v6660_v50  ;;  %v6241_v34 = vadd.f32 %v16761_v11, %v6198_v22  ;;  %v19281_v50 = vld [vmem:[#allocation31_spill] sm:$0xff] }
 0x453   : > { %v17150_v5 = vor.u32 %v6709_v35, %v6706_v62  ;;  %v11609_v20 = vpack.c.bf16 %v6382_v36, %v6382_v36  ;;  %6935 = vst [vmem:[#allocation3 + $0x3c] sm:$0xf] %v6661_v56  ;;  %vm19271_vm3 = vcmp.le.s32.totalorder %v16588_v14, 16  ;;  %vm19272_vm5 = vcmp.ge.s32.totalorder %v16588_v14, 1  ;;  %v19283_v35 = vld [vmem:[#allocation34_spill] sm:$0xff] }
 0x454   : > { %v6671_v53 = vsel %vm13775_vm7, %v6662_v45, %v17085_v41  ;;  %vm17160_vm0 = vmand %vm19272_vm5, %vm19271_vm3  ;;  %v19273_v19 = vmov 0  ;;  %v6239_v48 = vadd.f32 %v16761_v11, %v6196_v1  ;;  %v17166_v58 = vcombine.low %v7013_v60, %v17049_v7  ;;  %12697 = vmatpush3.bf16.msra.mxu1 %v13253_v39  ;;  %v17189_v45 = vld [vmem:[#allocation3 + $0x30] sm:$0xff]  }
 0x455   : > { %v19274_v19 = vsel %vm17160_vm0, 4294967295, %v19273_v19  ;;  %v7128_v21 = vrot.slane %v17075_v16, 1  ;;  %6936 = vst [vmem:[#allocation3 + $0x40] sm:$0xf] %v6671_v53  ;;  %v6712_v41 = vrot.slane %v17150_v5, 4  ;;  %v6684_v8 = vshrl.u32 %v11609_v20, 16  ;;  %12698 = vmatprep.subr.bf16.mxu1 %v13256_v23 }
 0x456   : > { %19275 = vst [vmem:[#allocation30_spill] sm:$0xff] %v19274_v19  ;;  %v6687_v37 = vshll.u32 %v11609_v20, 16  ;;  %v6277_v22 = vmax.f32 %v6241_v34, 0.0  ;;  %vm19276_vm8 = vcmp.le.s32.totalorder %v16629_v54, 16  ;;  %vm19277_vm3 = vcmp.ge.s32.totalorder %v16629_v54, 1  ;;  %v6119_v20 = vpop.f32.mrf.mxu1  ;;  %v13258_v34 = vld [vmem:[#allocation4 + $0xd0] sm:$0xff]  }
 0x457   : > { %vm17174_vm5 = vmand %vm19277_vm3, %vm19276_vm8  ;;  %v19278_v14 = vmov 0  ;;  %v6275_v13 = vmax.f32 %v6239_v48, 0.0  ;;  %v7127_v7 = vrot.slane %v17166_v58, 1  ;;  %v6201_v38 = vadd.f32 %v17110_v30, %v19281_v50  ;;  %12611 = vmatmul.mubr.bf16.gmra.mxu1 %v17182_v51 }
 0x458   : > { %v19279_v14 = vsel %vm17174_vm5, 4294967295, %v19278_v14  ;;  %v6199_v1 = vadd.f32 %v6116_v33, %v19282_v47  ;;  %v6686_v61 = vrot.slane %v6684_v8, 6  ;;  %v6689_v62 = vrot.slane %v6687_v37, 7  ;;  %12614 = vmatprep.mubr.bf16.mxu1 %v17189_v45  ;;  %12699 = vmatpush3.bf16.msra.mxu1 %v13256_v23 }
 0x459   : > { %19280 = vst [vmem:[#allocation51_spill] sm:$0xff] %v19279_v14  ;;  %v6385_v54 = vsel %vm17160_vm0, %v6277_v22, 0.0  ;;  %v6202_v46 = vadd.f32 %v12521_v42, %v19283_v35  ;;  %v6383_v33 = vsel %vm17174_vm5, %v6275_v13, 0.0  ;;  %vm19284_vm6 = vcmask 1046528   ;;  %12700 = vmatprep.subr.bf16.mxu1 %v13258_v34 }
 0x45a   : > { %v11612_v30 = vpack.c.bf16 %v6385_v54, %v6385_v54  ;;  %v7129_v39 = vsel %vm19284_vm6, %v7127_v7, %v7128_v21  ;;  %vm19285_vm1 = vcmp.le.s32.totalorder %v16664_v24, 16  ;;  %vm19286_vm0 = vcmp.ge.s32.totalorder %v16664_v24, 1 }
 0x45b   : > { %vm17200_vm2 = vmand %vm19286_vm0, %vm19285_vm1  ;;  %v19287_v36 = vmov 0  ;;  %v6244_v56 = vadd.f32 %v16761_v11, %v6201_v38  ;;  %v6690_v60 = vor.u32 %v6689_v62, %v6686_v61  ;;  %v11610_v53 = vpack.c.bf16 %v6383_v33, %v6383_v33  ;;  %12550 = vmatprep.mubr.bf16.mxu0 %v7129_v39  ;;  %v13238_v39 = vld [vmem:[#allocation4 + $0xb0] sm:$0xff]  }
 0x45c   : > { %v19288_v36 = vsel %vm17200_vm2, 4294967295, %v19287_v36  ;;  %v6242_v48 = vadd.f32 %v16761_v11, %v6199_v1  ;;  %v6245_v42 = vadd.f32 %v16761_v11, %v6202_v46  ;;  %v6714_v8 = vshrl.u32 %v11612_v30, 16  ;;  %v13261_v1 = vld [vmem:[#allocation4 + $0xc8] sm:$0xff]   ;;  %12701 = vmatpush3.bf16.msra.mxu1 %v13258_v34 }
 0x45d   : > { %19289 = vst [vmem:[#allocation31_spill] sm:$0xff] %v19288_v36  ;;  %v6717_v37 = vshll.u32 %v11612_v30, 16  ;;  %v6280_v22 = vmax.f32 %v6244_v56, 0.0  ;;  %v7130_v24 = vrot.slane %v17114_v40, 1  ;;  %v6691_v13 = vsel %vm13775_vm7, %v6682_v32, %v6690_v60  ;;  %12702 = vmatprep.subr.bf16.mxu1 %v13261_v1 }
 0x45e   : > { %v6692_v7 = vrot.slane %v6690_v60, 4  ;;  %v6694_v50 = vshrl.u32 %v11610_v53, 16  ;;  %v6697_v38 = vshll.u32 %v11610_v53, 16  ;;  %vm19290_vm1 = vcmp.le.s32.totalorder %v16668_v57, 16  ;;  %6938 = vst [vmem:[#allocation3 + $0x48] sm:$0xf] %v6691_v13 }
 0x45f   : > { %vm19291_vm6 = vcmp.ge.s32.totalorder %v16668_v57, 1  ;;  %v19292_v47 = vmov 0  ;;  %v6716_v32 = vrot.slane %v6714_v8, 6  ;;  %v6719_v61 = vrot.slane %v6717_v37, 7  ;;  %v12524_v57 = vpop.f32.mrf.mxu1  ;;  %v19301_v53 = vld [vmem:[#allocation35_spill] sm:$0xff]  ;;  %v17244_v8 = vld [vmem:[#allocation3 + $0x38] sm:$0xff]  }
 0x460   : > { %vm17215_vm0 = vmand %vm19291_vm6, %vm19290_vm1  ;;  %v6388_v62 = vsel %vm17200_vm2, %v6280_v22, 0.0  ;;  %v6278_v54 = vmax.f32 %v6242_v48, 0.0  ;;  %v6696_v35 = vrot.slane %v6694_v50, 6  ;;  %v6699_v46 = vrot.slane %v6697_v38, 7  ;;  %v13383_v38 = vld [vmem:[#allocation4 + $0xb8] sm:$0xff]   ;;  %12615 = vmatmul.mubr.bf16.gmra.mxu1 %v17244_v8 }
 0x461   : > { %v19293_v47 = vsel %vm17215_vm0, 4294967295, %v19292_v47  ;;  %v11615_v30 = vpack.c.bf16 %v6388_v62, %v6388_v62  ;;  %vm19295_vm1 = vcmp.le.s32.totalorder %v16673_v29, 16  ;;  %vm19296_vm6 = vcmp.ge.s32.totalorder %v16673_v29, 1  ;;  %v13264_v62 = vld [vmem:[#allocation4 + $0xc0] sm:$0xff]   ;;  %12703 = vmatpush3.bf16.msra.mxu1 %v13261_v1  ;;  %v17287_v1 = vld [vmem:[%s18718_s4] ss:$0 sm:$0xff] }
 0x462   : > { %19294 = vst [vmem:[#allocation33_spill] sm:$0xff] %v19293_v47  ;;  %vm17228_vm8 = vmand %vm19296_vm6, %vm19295_vm1  ;;  %v19297_v33 = vmov 0  ;;  %v6281_v23 = vmax.f32 %v6245_v42, 0.0  ;;  %v17234_v56 = vor.u32 %v6719_v61, %v6716_v32  ;;  %v6386_v60 = vsel %vm17215_vm0, %v6278_v54, 0.0  ;;  %v17246_v42 = vld [vmem:[#allocation3 + $0x40] sm:$0xff]   ;;  %v6132_v61 = vpop.f32.mrf.mxu1  ;;  %12704 = vmatprep.subr.bf16.mxu1 %v13264_v62 }
 0x463   : > { %v19298_v33 = vsel %vm17228_vm8, 4294967295, %v19297_v33  ;;  %vm19300_vm2 = vcmask 1046528   ;;  %v6200_v48 = vadd.f32 %v6119_v20, %v19301_v53  ;;  %v6700_v37 = vor.u32 %v6699_v46, %v6696_v35  ;;  %12618 = vmatprep.mubr.bf16.mxu1 %v17246_v42 }
 0x464   : > { %19299 = vst [vmem:[#allocation34_spill] sm:$0xff] %v19298_v33  ;;  %v7131_v29 = vsel %vm19300_vm2, %v7128_v21, %v7130_v24  ;;  %v6744_v22 = vshrl.u32 %v11615_v30, 16  ;;  %v6747_v13 = vshll.u32 %v11615_v30, 16  ;;  %v11613_v50 = vpack.c.bf16 %v6386_v60, %v6386_v60 }
 0x465   : > { %12551 = vmatmul.mubr.bf16.vlgmr.msra.gmra.mxu0 %v7131_v29  ;;  %v6721_v16 = vsel %vm13775_vm7, %v6712_v41, %v17234_v56  ;;  %v6722_v21 = vrot.slane %v17234_v56, 4  ;;  %v6389_v20 = vsel %vm17228_vm8, %v6281_v23, 0.0  ;;  %v6243_v32 = vadd.f32 %v16761_v11, %v6200_v48  ;;  %v13241_v41 = vld [vmem:[#allocation4 + $0xa8] sm:$0xff]   ;;  %v19307_v48 = vld [vmem:[#allocation25_spill] sm:$0xff]  ;;  %12705 = vmatpush3.bf16.msra.mxu1 %v13264_v62 }
 0x466   : > { %12639 = vmatpush3.bf16.msra.mxu0 %v13383_v38  ;;  %6941 = vst [vmem:[#allocation3 + $0x54] sm:$0xf] %v6721_v16  ;;  %v6701_v34 = vsel %vm13775_vm7, %v6692_v7, %v6700_v37  ;;  %v6702_v54 = vrot.slane %v6700_v37, 4  ;;  %v6746_v35 = vrot.slane %v6744_v22, 6  ;;  %v6749_v46 = vrot.slane %v6747_v13, 7  ;;  %v12525_v16 = vpop.f32.mrf.mxu1 }
 0x467   : > { %12640 = vmatprep.subr.bf16.mxu0 %v13238_v39  ;;  %6939 = vst [vmem:[#allocation3 + $0x4c] sm:$0xf] %v6701_v34  ;;  %v6724_v30 = vshrl.u32 %v11613_v50, 16  ;;  %v6727_v56 = vshll.u32 %v11613_v50, 16  ;;  %v11616_v23 = vpack.c.bf16 %v6389_v20, %v6389_v20  ;;  %vm19302_vm2 = vcmp.le.s32.totalorder %v16747_v9, 16 }
 0x468   : > { %vm19303_vm1 = vcmp.ge.s32.totalorder %v16747_v9, 1  ;;  %v19304_v11 = vmov 0  ;;  %v6279_v60 = vmax.f32 %v6243_v32, 0.0  ;;  %v6711_v7 = vsel %vm13775_vm7, %v6702_v54, %v17150_v5 }
 0x469   : > { %vm17265_vm6 = vmand %vm19303_vm1, %vm19302_vm2  ;;  %v17273_v29 = vor.u32 %v6749_v46, %v6746_v35  ;;  %v7132_v53 = vrot.slane %v17117_v26, 1  ;;  %v6205_v37 = vadd.f32 %v12524_v57, %v19307_v48  ;;  %6940 = vst [vmem:[#allocation3 + $0x50] sm:$0xf] %v6711_v7  ;;  %v6726_v9 = vrot.slane %v6724_v30, 6  ;;  %v19314_v35 = vld [vmem:[#allocation41_spill] sm:$0xff]  ;;  %v19315_v30 = vld [vmem:[#allocation11_spill] sm:$0xff] }
 0x46a   : > { %v19305_v11 = vsel %vm17265_vm6, 4294967295, %v19304_v11  ;;  %v6729_v22 = vrot.slane %v6727_v56, 7  ;;  %v6754_v13 = vshrl.u32 %v11616_v23, 16  ;;  %v6757_v50 = vshll.u32 %v11616_v23, 16  ;;  %12641 = vmatpush3.bf16.msra.mxu0 %v13238_v39  ;;  %v13244_v39 = vld [vmem:[#allocation4 + $0xa0] sm:$0xff]  }
 0x46b   : > { %19306 = vst [vmem:[#allocation35_spill] sm:$0xff] %v19305_v11  ;;  %v6752_v20 = vrot.slane %v17273_v29, 4  ;;  %v6387_v5 = vsel %vm17265_vm6, %v6279_v60, 0.0  ;;  %vm19308_vm1 = vcmask 1046528   ;;  %v6248_v57 = vadd.f32 %v17287_v1, %v6205_v37  ;;  %12642 = vmatprep.subr.bf16.mxu0 %v13241_v41  ;;  %v17700_v11 = vld [vmem:[#allocation3 + $0x18] sm:$0xff]  }
 0x46c   : > { %v7133_v26 = vsel %vm19308_vm1, %v7130_v24, %v7132_v53  ;;  %v6730_v38 = vor.u32 %v6729_v22, %v6726_v9  ;;  %v6756_v32 = vrot.slane %v6754_v13, 6  ;;  %v6759_v34 = vrot.slane %v6757_v50, 7  ;;  %v6135_v9 = vpop.f32.mrf.mxu1  ;;  %v13249_v13 = vld [vmem:[#allocation4 + $0x98] sm:$0xff]  }
 0x46d   : > { %v11614_v54 = vpack.c.bf16 %v6387_v5, %v6387_v5  ;;  %12554 = vmatprep.mubr.bf16.mxu0 %v7133_v26  ;;  %vm19309_vm1 = vcmp.le.s32.totalorder %v16766_v28, 16  ;;  %vm19310_vm5 = vcmp.ge.s32.totalorder %v16766_v28, 1  ;;  %v19311_v40 = vmov 0 }
 0x46e   : > { %vm17296_vm6 = vmand %vm19310_vm5, %vm19309_vm1  ;;  %v6284_v24 = vmax.f32 %v6248_v57, 0.0  ;;  %v6203_v46 = vadd.f32 %v6132_v61, %v19314_v35  ;;  %v6206_v56 = vadd.f32 %v12525_v16, %v19315_v30  ;;  %v7134_v23 = vrot.slane %v17182_v51, 1  ;;  %12643 = vmatpush3.bf16.msra.mxu0 %v13241_v41  ;;  %v17319_v22 = vld [vmem:[#allocation3 + $0x48] sm:$0xff]  }
 0x46f   : > { %v19312_v40 = vsel %vm17296_vm6, 4294967295, %v19311_v40  ;;  %v6731_v60 = vsel %vm13775_vm7, %v6722_v21, %v6730_v38  ;;  %v6732_v7 = vrot.slane %v6730_v38, 4  ;;  %v17305_v48 = vor.u32 %v6759_v34, %v6756_v32  ;;  %12644 = vmatprep.subr.bf16.mxu0 %v13244_v39  ;;  %12619 = vmatmul.mubr.bf16.gmra.mxu1 %v17319_v22 }
 0x470   : > { %19313 = vst [vmem:[#allocation25_spill] sm:$0xff] %v19312_v40  ;;  %v6734_v37 = vshrl.u32 %v11614_v54, 16  ;;  %vm19316_vm5 = vcmp.le.s32.totalorder %v16795_v2, 16  ;;  %vm19317_vm1 = vcmp.ge.s32.totalorder %v16795_v2, 1  ;;  %v19318_v28 = vmov 0 }
 0x471   : > { %vm17311_vm2 = vmand %vm19317_vm1, %vm19316_vm5  ;;  %6942 = vst [vmem:[#allocation3 + $0x58] sm:$0xf] %v6731_v60  ;;  %v6737_v61 = vshll.u32 %v11614_v54, 16  ;;  %v6392_v51 = vsel %vm17296_vm6, %v6284_v24, 0.0  ;;  %v6246_v21 = vadd.f32 %v17287_v1, %v6203_v46  ;;  %v6249_v62 = vadd.f32 %v17287_v1, %v6206_v56  ;;  %v19327_v24 = vld [vmem:[#allocation24_spill] sm:$0xff] }
 0x472   : > { %v19319_v28 = vsel %vm17311_vm2, 4294967295, %v19318_v28  ;;  %v6761_v2 = vsel %vm13775_vm7, %v6752_v20, %v17305_v48  ;;  %v6762_v41 = vrot.slane %v17305_v48, 4  ;;  %v6736_v50 = vrot.slane %v6734_v37, 6  ;;  %v17335_v20 = vld [vmem:[#allocation3 + $0x50] sm:$0xff]   ;;  %12645 = vmatpush3.bf16.msra.mxu0 %v13244_v39 }
 0x473   : > { %19320 = vst [vmem:[#allocation41_spill] sm:$0xff] %v19319_v28  ;;  %v11619_v16 = vpack.c.bf16 %v6392_v51, %v6392_v51  ;;  %vm19321_vm5 = vcmp.le.s32.totalorder %v16817_v44, 16  ;;  %vm19322_vm1 = vcmp.ge.s32.totalorder %v16817_v44, 1  ;;  %v19323_v5 = vmov 0  ;;  %6945 = vst [vmem:[#allocation3 + $0x64] sm:$0xf] %v6761_v2  ;;  %12622 = vmatprep.mubr.bf16.mxu1 %v17335_v20  ;;  %v12528_v51 = vpop.f32.mrf.mxu1  ;;  %12646 = vmatprep.subr.bf16.mxu0 %v13249_v13 }
 0x474   : > { %vm17329_vm3 = vmand %vm19322_vm1, %vm19321_vm5  ;;  %v6739_v26 = vrot.slane %v6737_v61, 7  ;;  %v6282_v57 = vmax.f32 %v6246_v21, 0.0  ;;  %v6285_v38 = vmax.f32 %v6249_v62, 0.0  ;;  %vm19326_vm6 = vcmask 1046528   ;;  %v13254_v21 = vld [vmem:[#allocation4 + $0x90] sm:$0xff]   ;;  %v17345_v62 = vld [vmem:[#allocation4 + $0x178] sm:$0xff]  }
 0x475   : > { %v19324_v5 = vsel %vm17329_vm3, 4294967295, %v19323_v5  ;;  %v7135_v32 = vsel %vm19326_vm6, %v7132_v53, %v7134_v23  ;;  %v6784_v34 = vshrl.u32 %v11619_v16, 16  ;;  %v6787_v54 = vshll.u32 %v11619_v16, 16  ;;  %vm19328_vm5 = vmmov %vm19326_vm6  ;;  %12794 = vmatprep.subr.bf16.mxu1 %v17345_v62 }
 0x476   : > { %19325 = vst [vmem:[#allocation11_spill] sm:$0xff] %v19324_v5  ;;  %12555 = vmatmul.mubr.bf16.gmra.mxu0 %v7135_v32  ;;  %v6204_v35 = vadd.f32 %v6135_v9, %v19327_v24  ;;  %v7136_v44 = vrot.slane %v17189_v45, 1  ;;  %v6740_v46 = vor.u32 %v6739_v26, %v6736_v50  ;;  %v6390_v30 = vsel %vm17311_vm2, %v6282_v57, 0.0 }
 0x477   : > { %v6393_v56 = vsel %vm17329_vm3, %v6285_v38, 0.0  ;;  %v6786_v53 = vrot.slane %v6784_v34, 6  ;;  %v6789_v60 = vrot.slane %v6787_v54, 7  ;;  %v11617_v37 = vpack.c.bf16 %v6390_v30, %v6390_v30  ;;  %12647 = vmatpush3.bf16.msra.mxu0 %v13249_v13  ;;  %v13260_v54 = vld [vmem:[#allocation4 + $0x88] sm:$0xff]   ;;  %v6148_v30 = vpop.f32.mrf.mxu1 }
 0x478   : > { %v11620_v61 = vpack.c.bf16 %v6393_v56, %v6393_v56  ;;  %v6741_v9 = vsel %vm13775_vm7, %v6732_v7, %v6740_v46  ;;  %v6742_v2 = vrot.slane %v6740_v46, 4  ;;  %v6247_v50 = vadd.f32 %v17287_v1, %v6204_v35  ;;  %12648 = vmatprep.subr.bf16.mxu0 %v13254_v21 }
 0x479   : > { %v7137_v16 = vsel %vm19328_vm5, %v7134_v23, %v7136_v44  ;;  %6943 = vst [vmem:[#allocation3 + $0x5c] sm:$0xf] %v6741_v9  ;;  %v17353_v39 = vor.u32 %v6789_v60, %v6786_v53  ;;  %v6764_v26 = vshrl.u32 %v11617_v37, 16  ;;  %v6767_v57 = vshll.u32 %v11617_v37, 16 }
 0x47a   : > { %v6794_v38 = vshrl.u32 %v11620_v61, 16  ;;  %vm19329_vm1 = vcmp.le.s32.totalorder %v16827_v10, 16  ;;  %vm19330_vm6 = vcmp.ge.s32.totalorder %v16827_v10, 1  ;;  %v19331_v32 = vmov 0  ;;  %12558 = vmatprep.mubr.bf16.mxu0 %v7137_v16  ;;  %v19335_v16 = vld [vmem:[#allocation39_spill] sm:$0xff] }
 0x47b   : > { %vm17359_vm2 = vmand %vm19330_vm6, %vm19329_vm1  ;;  %v6751_v23 = vsel %vm13775_vm7, %v6742_v2, %v17273_v29  ;;  %v6797_v7 = vshll.u32 %v11620_v61, 16  ;;  %v6283_v34 = vmax.f32 %v6247_v50, 0.0  ;;  %v6792_v10 = vrot.slane %v17353_v39, 4  ;;  %v19334_v50 = vld [vmem:[#allocation17_spill] sm:$0xff]  ;;  %12649 = vmatpush3.bf16.msra.mxu0 %v13254_v21 }
 0x47c   : > { %v19332_v32 = vsel %vm17359_vm2, 4294967295, %v19331_v32  ;;  %6944 = vst [vmem:[#allocation3 + $0x60] sm:$0xf] %v6751_v23  ;;  %v6766_v24 = vrot.slane %v6764_v26, 6  ;;  %v6769_v35 = vrot.slane %v6767_v57, 7  ;;  %v6796_v46 = vrot.slane %v6794_v38, 6  ;;  %12650 = vmatprep.subr.bf16.mxu0 %v13260_v54 }
 0x47d   : > { %19333 = vst [vmem:[#allocation24_spill] sm:$0xff] %v19332_v32  ;;  %v6799_v56 = vrot.slane %v6797_v7, 7  ;;  %v6391_v53 = vsel %vm17359_vm2, %v6283_v34, 0.0  ;;  %v6209_v29 = vadd.f32 %v12528_v51, %v16786_v31  ;;  %vm2495_vm6 = vcmp.ne.s32.totalorder %v16842_v25, 0  ;;  %v12529_v34 = vpop.f32.mrf.mxu1 }
 0x47e   : > { %v6770_v60 = vor.u32 %v6769_v35, %v6766_v24  ;;  %v11618_v37 = vpack.c.bf16 %v6391_v53, %v6391_v53  ;;  %vm2531_vm1 = vcmp.lt.s32.totalorder %v16842_v25, 0  ;;  %v2603_v13 = vadd.s32 18, %v16842_v25 }
 0x47f   : > { %v17375_v61 = vor.u32 %v6799_v56, %v6796_v46  ;;  %v6252_v9 = vadd.f32 %v17287_v1, %v6209_v29  ;;  %vm2567_vm5 = vmand %vm2531_vm1, %vm2495_vm6  ;;  %v6207_v2 = vadd.f32 %v6148_v30, %v16798_v17  ;;  %v2420_v26 = vsub.s32 %v19335_v16, %v19334_v50  ;;  %v13267_v17 = vld [vmem:[#allocation4 + $0x80] sm:$0xff]   ;;  %12651 = vmatpush3.bf16.msra.mxu0 %v13260_v54 }
 0x480   : > { %v6771_v31 = vsel %vm13775_vm7, %v6762_v41, %v6770_v60  ;;  %v6772_v51 = vrot.slane %v6770_v60, 4  ;;  %v6774_v57 = vshrl.u32 %v11618_v37, 16  ;;  %v6777_v38 = vshll.u32 %v11618_v37, 16  ;;  %v17398_v24 = vld [vmem:[#allocation3 + $0x58] sm:$0xff]   ;;  %v19344_v60 = vld [vmem:[#allocation38_spill] sm:$0xff]  ;;  %12652 = vmatprep.subr.bf16.mxu0 %v13267_v17 }
 0x481   : > { %vm19336_vm2 = vcmp.le.s32.totalorder %v16861_v59, 16  ;;  %vm19337_vm3 = vcmp.ge.s32.totalorder %v16861_v59, 1  ;;  %v19338_v23 = vmov 0  ;;  %6946 = vst [vmem:[#allocation3 + $0x68] sm:$0xf] %v6771_v31  ;;  %v6801_v48 = vsel %vm13775_vm7, %v6792_v10, %v17375_v61  ;;  %12623 = vmatmul.mubr.bf16.gmra.mxu1 %v17398_v24 }
 0x482   : > { %vm17389_vm0 = vmand %vm19337_vm3, %vm19336_vm2  ;;  %v6802_v41 = vrot.slane %v17375_v61, 4  ;;  %v6288_v21 = vmax.f32 %v6252_v9, 0.0  ;;  %v2639_v7 = vsel %vm2567_vm5, %v2603_v13, %v16842_v25  ;;  %6949 = vst [vmem:[#allocation3 + $0x74] sm:$0xf] %v6801_v48  ;;  %v6776_v59 = vrot.slane %v6774_v57, 6  ;;  %v17411_v13 = vld [vmem:[#allocation4 + $0x138] sm:$0xff]  }
 0x483   : > { %v19339_v23 = vsel %vm17389_vm0, 4294967295, %v19338_v23  ;;  %v6779_v35 = vrot.slane %v6777_v38, 7  ;;  %vm2675_vm3 = vcmp.ge.s32.totalorder %v2639_v7, 1  ;;  %vm2711_vm2 = vcmp.le.s32.totalorder %v2639_v7, 16  ;;  %v17408_v25 = vld [vmem:[#allocation3 + $0x60] sm:$0xff]   ;;  %12653 = vmatpush3.bf16.msra.mxu0 %v13267_v17 }
 0x484   : > { %19340 = vst [vmem:[#allocation17_spill] sm:$0xff] %v19339_v23  ;;  %v6396_v46 = vsel %vm17389_vm0, %v6288_v21, 0.0  ;;  %vm17402_vm6 = vmand %vm2675_vm3, %vm2711_vm2  ;;  %v19341_v30 = vmov 0  ;;  %v6250_v10 = vadd.f32 %v17287_v1, %v6207_v2  ;;  %vm2498_vm1 = vcmp.ne.s32.totalorder %v2420_v26, 0  ;;  %v19345_v2 = vld [vmem:[#allocation21_spill] sm:$0xff]  ;;  %12626 = vmatprep.mubr.bf16.mxu1 %v17408_v25  ;;  %12742 = vmatprep.subr.bf16.mxu0 %v17411_v13 }
 0x485   : > { %v19342_v30 = vsel %vm17402_vm6, 4294967295, %v19341_v30  ;;  %vm2534_vm8 = vcmp.lt.s32.totalorder %v2420_v26, 0  ;;  %v6780_v56 = vor.u32 %v6779_v35, %v6776_v59  ;;  %v11623_v53 = vpack.c.bf16 %v6396_v46, %v6396_v46  ;;  %v19348_v17 = vld [vmem:[#allocation37_spill] sm:$0xff] }
 0x486   : > { %19343 = vst [vmem:[#allocation39_spill] sm:$0xff] %v19342_v30  ;;  %vm2570_vm5 = vmand %vm2534_vm8, %vm2498_vm1  ;;  %v2606_v29 = vadd.s32 18, %v2420_v26  ;;  %v6210_v37 = vadd.f32 %v12529_v34, %v19344_v60  ;;  %v6286_v9 = vmax.f32 %v6250_v10, 0.0  ;;  %v7138_v50 = vrot.slane %v17244_v8, 1  ;;  %v5837_v10 = vpop.f32.mrf.mxu0 }
 0x487   : > { %v17415_v16 = vmul.u32.u64.low 3817748708, %v19345_v2  ;;  %v17416_v31 = vmul.u32.u64.high 3817748708, %v19345_v2, %v17415_v16  ;;  %v6781_v54 = vsel %vm13775_vm7, %v6772_v51, %v6780_v56  ;;  %v6782_v57 = vrot.slane %v6780_v56, 4  ;;  %v6151_v56 = vpop.f32.mrf.mxu1 }
 0x488   : > { %v6824_v38 = vshrl.u32 %v11623_v53, 16  ;;  %v6827_v48 = vshll.u32 %v11623_v53, 16  ;;  %6947 = vst [vmem:[#allocation3 + $0x6c] sm:$0xf] %v6781_v54  ;;  %v6394_v21 = vsel %vm17402_vm6, %v6286_v9, 0.0  ;;  %v2642_v7 = vsel %vm2570_vm5, %v2606_v29, %v2420_v26  ;;  %v19352_v54 = vld [vmem:[#allocation19_spill] sm:$0xff] }
 0x489   : > { %v6253_v34 = vadd.f32 %v17287_v1, %v6210_v37  ;;  %vm19346_vm8 = vcmask 1046528   ;;  %v6791_v59 = vsel %vm13775_vm7, %v6782_v57, %v17353_v39  ;;  %v11621_v46 = vpack.c.bf16 %v6394_v21, %v6394_v21 }
 0x48a   : > { %v7139_v8 = vsel %vm19346_vm8, %v7136_v44, %v7138_v50  ;;  %v6826_v51 = vrot.slane %v6824_v38, 6  ;;  %v6829_v35 = vrot.slane %v6827_v48, 7  ;;  %6948 = vst [vmem:[#allocation3 + $0x70] sm:$0xf] %v6791_v59  ;;  %vm2678_vm3 = vcmp.ge.s32.totalorder %v2642_v7, 1  ;;  %v19347_v44 = vld [vmem:[#allocation27_spill] sm:$0xff]  ;;  %vm19354_vm5 = vmmov %vm19346_vm8 }
 0x48b   : > { %12559 = vmatmul.mubr.bf16.gmra.mxu0 %v7139_v8  ;;  %vm2714_vm2 = vcmp.le.s32.totalorder %v2642_v7, 16  ;;  %v6289_v26 = vmax.f32 %v6253_v34, 0.0  ;;  %v2396_v45 = vshrl.u32 %v17416_v31, 4  ;;  %v4825_v53 = vadd.f32 %v19348_v17, %v19347_v44  ;;  %v19353_v7 = vld [vmem:[#allocation15_spill] sm:$0xff]  ;;  %v12494_v8 = vpop.f32.mrf.mxu0 }
 0x48c   : > { %v17434_v29 = vor.u32 %v6829_v35, %v6826_v51  ;;  %v6804_v39 = vshrl.u32 %v11621_v46, 16  ;;  %v6807_v60 = vshll.u32 %v11621_v46, 16  ;;  %vm17436_vm1 = vmand %vm2678_vm3, %vm2714_vm2  ;;  %v19349_v37 = vmov 0 }
 0x48d   : > { %v19350_v37 = vsel %vm17436_vm1, 4294967295, %v19349_v37  ;;  %v6397_v9 = vsel %vm17436_vm1, %v6289_v26, 0.0  ;;  %v2397_v16 = vmul.u32 18, %v2396_v45  ;;  %v5894_v57 = vadd.f32 %v5837_v10, %v19352_v54  ;;  %v12532_v26 = vpop.f32.mrf.mxu1 }
 0x48e   : > { %19351 = vst [vmem:[#allocation38_spill] sm:$0xff] %v19350_v37  ;;  %v18797_v31 = vrot.slane %v17246_v42, 1  ;;  %v6806_v38 = vrot.slane %v6804_v39, 6  ;;  %v6809_v48 = vrot.slane %v6807_v60, 7  ;;  %v11624_v21 = vpack.c.bf16 %v6397_v9, %v6397_v9 }
 0x48f   : > { %v17445_v34 = vadd.s32 272, %v19353_v7  ;;  %v6832_v59 = vrot.slane %v17434_v29, 4  ;;  %v2398_v51 = vsub.s32 %v19345_v2, %v2397_v16  ;;  %v6208_v35 = vadd.f32 %v6151_v56, %v5894_v57  ;;  %v17457_v39 = vld [vmem:[#allocation3 + $0x68] sm:$0xff]   ;;  %v19355_v16 = vld [vmem:[#allocation13_spill] sm:$0xff]  ;;  %v6164_v61 = vpop.f32.mrf.mxu1 }
 0x490   : > { %v7141_v46 = vsel %vm19354_vm5, %v7138_v50, %v18797_v31  ;;  %v17452_v10 = vor.u32 %v6809_v48, %v6806_v38  ;;  %v6834_v45 = vshrl.u32 %v11624_v21, 16  ;;  %v6837_v44 = vshll.u32 %v11624_v21, 16  ;;  %12627 = vmatmul.mubr.bf16.gmra.mxu1 %v17457_v39  ;;  %v5850_v38 = vpop.f32.mrf.mxu0 }
 0x491   : > { %12562 = vmatprep.mubr.bf16.mxu0 %v7141_v46  ;;  %v17455_v17 = vadd.s32 256, %v19353_v7  ;;  %vm2496_vm8 = vcmp.ne.s32.totalorder %v2398_v51, 0  ;;  %vm2532_vm3 = vcmp.lt.s32.totalorder %v2398_v51, 0  ;;  %v2604_v60 = vadd.s32 18, %v2398_v51  ;;  %v17467_v57 = vld [vmem:[#allocation3 + $0x70] sm:$0xff]  }
 0x492   : > { %v6251_v2 = vadd.f32 %v17287_v1, %v6208_v35  ;;  %v6811_v50 = vsel %vm13775_vm7, %v6802_v41, %v17452_v10  ;;  %v6836_v56 = vrot.slane %v6834_v45, 6  ;;  %v6839_v9 = vrot.slane %v6837_v44, 7  ;;  %vm2568_vm2 = vmand %vm2532_vm3, %vm2496_vm8  ;;  %12630 = vmatprep.mubr.bf16.mxu1 %v17467_v57  ;;  %v19359_v44 = vld [vmem:[#allocation14_spill] sm:$0xff] }
 0x493   : > { %v5899_v54 = vadd.f32 %v12494_v8, %v19355_v16  ;;  %6950 = vst [vmem:[#allocation3 + $0x78] sm:$0xf] %v6811_v50  ;;  %v2640_v48 = vsel %vm2568_vm2, %v2604_v60, %v2398_v51  ;;  %v17470_v35 = vmul.u32.u64.low 3817748708, %v17445_v34  ;;  %v17471_v46 = vmul.u32.u64.high 3817748708, %v17445_v34, %v17470_v35  ;;  %v19360_v50 = vld [vmem:[#allocation12_spill] sm:$0xff]  ;;  %v12495_v16 = vpop.f32.mrf.mxu0 }
 0x494   : > { %v6287_v21 = vmax.f32 %v6251_v2, 0.0  ;;  %v17473_v31 = vor.u32 %v6839_v9, %v6836_v56  ;;  %vm2676_vm5 = vcmp.ge.s32.totalorder %v2640_v48, 1  ;;  %vm2712_vm6 = vcmp.le.s32.totalorder %v2640_v48, 16 }
 0x495   : > { %v6213_v41 = vadd.f32 %v12532_v26, %v5899_v54  ;;  %vm17476_vm8 = vmand %vm2676_vm5, %vm2712_vm6  ;;  %v19356_v8 = vmov 0  ;;  %v17481_v45 = vmul.u32.u64.low 3817748708, %v17455_v17  ;;  %v17482_v51 = vmul.u32.u64.high 3817748708, %v17455_v17, %v17481_v45 }
 0x496   : > { %v19357_v8 = vsel %vm17476_vm8, 4294967295, %v19356_v8  ;;  %v5897_v60 = vadd.f32 %v5850_v38, %v19359_v44  ;;  %v2070_v2 = vadd.s32 280, %v19353_v7  ;;  %v5272_v56 = vadd.f32 %v19360_v50, %v4825_v53  ;;  %v12533_v38 = vpop.f32.mrf.mxu1  ;;  %v19361_v53 = vld [vmem:[#allocation36_spill] sm:$0xff] }
 0x497   : > { %19358 = vst [vmem:[#allocation21_spill] sm:$0xff] %v19357_v8  ;;  %v6841_v26 = vsel %vm13775_vm7, %v6832_v59, %v17473_v31  ;;  %v6395_v9 = vsel %vm17476_vm8, %v6287_v21, 0.0  ;;  %v2451_v48 = vshrl.u32 %v17471_v46, 4  ;;  %v6256_v35 = vadd.f32 %v17287_v1, %v6213_v41 }
 0x498   : > { %6953 = vst [vmem:[#allocation3 + $0x84] sm:$0xf] %v6841_v26  ;;  %v11622_v54 = vpack.c.bf16 %v6395_v9, %v6395_v9  ;;  %v6211_v45 = vadd.f32 %v6164_v61, %v5897_v60  ;;  %v17494_v44 = vmul.u32.u64.low 3817748708, %v2070_v2  ;;  %v17495_v30 = vmul.u32.u64.high 3817748708, %v2070_v2, %v17494_v44  ;;  %v19362_v26 = vld [vmem:[#allocation40_spill] sm:$0xff] }
 0x499   : > { %v5900_v50 = vadd.f32 %v12495_v16, %v19361_v53  ;;  %v7142_v37 = vrot.slane %v17319_v22, 1  ;;  %v2452_v8 = vmul.u32 18, %v2451_v48  ;;  %v2429_v21 = vshrl.u32 %v17482_v51, 4 }
 0x49a   : > { %v6814_v59 = vshrl.u32 %v11622_v54, 16  ;;  %v6817_v23 = vshll.u32 %v11622_v54, 16  ;;  %v5585_v9 = vadd.f32 %v19362_v26, %v5272_v56  ;;  %v6254_v46 = vadd.f32 %v17287_v1, %v6211_v45 }
 0x49b   : > { %v6214_v32 = vadd.f32 %v12533_v38, %v5900_v50  ;;  %v19363_v61 = vrot.slane %v17246_v42, 1  ;;  %vm19364_vm6 = vcmask 1046528   ;;  %v2453_v16 = vsub.s32 %v17445_v34, %v2452_v8 }
 0x49c   : > { %v6816_v60 = vrot.slane %v6814_v59, 6  ;;  %v6819_v44 = vrot.slane %v6817_v23, 7  ;;  %v2430_v53 = vmul.u32 18, %v2429_v21  ;;  %v6812_v22 = vrot.slane %v17452_v10, 4 }
 0x49d   : > { %v7143_v41 = vsel %vm19364_vm6, %v19363_v61, %v7142_v37  ;;  %v6292_v54 = vmax.f32 %v6256_v35, 0.0  ;;  %v2462_v51 = vshrl.u32 %v17495_v30, 4  ;;  %v17509_v56 = vadd.s32 264, %v19353_v7  ;;  %v5853_v7 = vpop.f32.mrf.mxu0 }
 0x49e   : > { %12563 = vmatmul.mubr.bf16.gmra.mxu0 %v7143_v41  ;;  %v6820_v48 = vor.u32 %v6819_v44, %v6816_v60  ;;  %vm2501_vm3 = vcmp.ne.s32.totalorder %v2453_v16, 0  ;;  %vm2537_vm2 = vcmp.lt.s32.totalorder %v2453_v16, 0  ;;  %v2609_v42 = vadd.s32 18, %v2453_v16  ;;  %v6167_v60 = vpop.f32.mrf.mxu1 }
 0x49f   : > { %vm2573_vm5 = vmand %vm2537_vm2, %vm2501_vm3  ;;  %v2431_v45 = vsub.s32 %v17455_v17, %v2430_v53  ;;  %v6290_v23 = vmax.f32 %v6254_v46, 0.0  ;;  %v2463_v38 = vmul.u32 18, %v2462_v51  ;;  %v6257_v34 = vadd.f32 %v17287_v1, %v6214_v32 }
 0x4a0   : > { %v6821_v10 = vsel %vm13775_vm7, %v6812_v22, %v6820_v48  ;;  %v6822_v8 = vrot.slane %v6820_v48, 4  ;;  %v2645_v35 = vsel %vm2573_vm5, %v2609_v42, %v2453_v16  ;;  %v7144_v30 = vrot.slane %v17335_v20, 1 }
 0x4a1   : > { %6951 = vst [vmem:[#allocation3 + $0x7c] sm:$0xf] %v6821_v10  ;;  %vm2681_vm6 = vcmp.ge.s32.totalorder %v2645_v35, 1  ;;  %vm2717_vm8 = vcmp.le.s32.totalorder %v2645_v35, 16  ;;  %vm2499_vm1 = vcmp.ne.s32.totalorder %v2431_v45, 0  ;;  %vm2535_vm0 = vcmp.lt.s32.totalorder %v2431_v45, 0 }
 0x4a2   : > { %v6831_v17 = vsel %vm13775_vm7, %v6822_v8, %v17434_v29  ;;  %vm17519_vm3 = vmand %vm2681_vm6, %vm2717_vm8  ;;  %v19365_v50 = vmov 0  ;;  %v2607_v32 = vadd.s32 18, %v2431_v45  ;;  %v2464_v59 = vsub.s32 %v2070_v2, %v2463_v38 }
 0x4a3   : > { %v19366_v50 = vsel %vm17519_vm3, 4294967295, %v19365_v50  ;;  %v5898_v21 = vadd.f32 %v5853_v7, %v5585_v9  ;;  %6952 = vst [vmem:[#allocation3 + $0x80] sm:$0xf] %v6831_v17  ;;  %v6400_v20 = vsel %vm17519_vm3, %v6292_v54, 0.0  ;;  %vm2571_vm2 = vmand %vm2535_vm0, %vm2499_vm1  ;;  %vm19368_vm5 = vcmask 1046528  }
 0x4a4   : > { %19367 = vst [vmem:[#allocation27_spill] sm:$0xff] %v19366_v50  ;;  %v17526_v26 = vmul.u32.u64.low 3817748708, %v17509_v56  ;;  %v17527_v46 = vmul.u32.u64.high 3817748708, %v17509_v56, %v17526_v26  ;;  %v7145_v61 = vsel %vm19368_vm5, %v7142_v37, %v7144_v30  ;;  %v11627_v41 = vpack.c.bf16 %v6400_v20, %v6400_v20 }
 0x4a5   : > { %v2643_v29 = vsel %vm2571_vm2, %v2607_v32, %v2431_v45  ;;  %vm2502_vm8 = vcmp.ne.s32.totalorder %v2464_v59, 0  ;;  %vm2538_vm6 = vcmp.lt.s32.totalorder %v2464_v59, 0  ;;  %12566 = vmatprep.mubr.bf16.mxu0 %v7145_v61  ;;  %v2610_v2 = vadd.s32 18, %v2464_v59  ;;  %vm19373_vm2 = vmmov %vm19368_vm5 }
 0x4a6   : > { %vm2679_vm11 = vcmp.ge.s32.totalorder %v2643_v29, 1  ;;  %vm2715_vm9 = vcmp.le.s32.totalorder %v2643_v29, 16  ;;  %vm2574_vm12 = vmand %vm2538_vm6, %vm2502_vm8  ;;  %v6293_v9 = vmax.f32 %v6257_v34, 0.0  ;;  %v6864_v44 = vshrl.u32 %v11627_v41, 16 }
 0x4a7   : > { %v6867_v16 = vshll.u32 %v11627_v41, 16  ;;  %vm17530_vm0 = vmand %vm2679_vm11, %vm2715_vm9  ;;  %v19369_v53 = vmov 0  ;;  %v7146_v22 = vrot.slane %v17398_v24, 1  ;;  %v7148_v37 = vrot.slane %v17408_v25, 1 }
 0x4a8   : > { %v19370_v53 = vsel %vm17530_vm0, 4294967295, %v19369_v53  ;;  %v6398_v54 = vsel %vm17530_vm0, %v6290_v23, 0.0  ;;  %v2646_v51 = vsel %vm2574_vm12, %v2610_v2, %v2464_v59  ;;  %v2440_v48 = vshrl.u32 %v17527_v46, 4  ;;  %v17539_v34 = vld [vmem:[#allocation3 + $0x78] sm:$0xff]   ;;  %vm19372_vm11 = vmmov %vm19368_vm5 }
 0x4a9   : > { %19371 = vst [vmem:[#allocation37_spill] sm:$0xff] %v19370_v53  ;;  %v6212_v42 = vadd.f32 %v6167_v60, %v5898_v21  ;;  %v6866_v45 = vrot.slane %v6864_v44, 6  ;;  %v11625_v38 = vpack.c.bf16 %v6398_v54, %v6398_v54  ;;  %vm2682_vm1 = vcmp.ge.s32.totalorder %v2646_v51, 1  ;;  %12631 = vmatmul.mubr.bf16.gmra.mxu1 %v17539_v34  ;;  %v17867_v3 = vld [vmem:[#allocation3 + $0x78] sm:$0xff]  }
 0x4aa   : > { %vm2718_vm9 = vcmp.le.s32.totalorder %v2646_v51, 16  ;;  %v2441_v10 = vmul.u32 18, %v2440_v48  ;;  %v7147_v8 = vsel %vm19372_vm11, %v7144_v30, %v7146_v22  ;;  %v7149_v24 = vsel %vm19373_vm2, %v7146_v22, %v7148_v37  ;;  %v17548_v17 = vld [vmem:[#allocation3 + $0x80] sm:$0xff]   ;;  %v6958_v48 = vld [vmem:[#allocation3 + $0x98] sm:$0x3] }
 0x4ab   : > { %v6869_v35 = vrot.slane %v6867_v16, 7  ;;  %v6844_v25 = vshrl.u32 %v11625_v38, 16  ;;  %v6847_v7 = vshll.u32 %v11625_v38, 16  ;;  %vm17543_vm5 = vmand %vm2682_vm1, %vm2718_vm9  ;;  %v19374_v23 = vmov 0  ;;  %12567 = vmatmul.mubr.bf16.gmra.mxu0 %v7147_v8  ;;  %12634 = vmatprep.mubr.bf16.mxu1 %v17548_v17  ;;  %v8121_v38 = vld [vmem:[#allocation3] sm:$0xf] }
 0x4ac   : > { %v19375_v23 = vsel %vm17543_vm5, 4294967295, %v19374_v23  ;;  %v6401_v32 = vsel %vm17543_vm5, %v6293_v9, 0.0  ;;  %v2442_v59 = vsub.s32 %v17509_v56, %v2441_v10  ;;  %v6255_v30 = vadd.f32 %v17287_v1, %v6212_v42  ;;  %12570 = vmatprep.mubr.bf16.mxu0 %v7149_v24  ;;  %vm19377_vm1 = vmmov %vm19373_vm2  ;;  %v8122_v10 = vld [vmem:[#allocation3 + $0x4] sm:$0xf] }
 0x4ad   : > { %19376 = vst [vmem:[#allocation19_spill] sm:$0xff] %v19375_v23  ;;  %v7150_v21 = vrot.slane %v17457_v39, 1  ;;  %v6846_v20 = vrot.slane %v6844_v25, 6  ;;  %v6849_v26 = vrot.slane %v6847_v7, 7  ;;  %v11628_v46 = vpack.c.bf16 %v6401_v32, %v6401_v32  ;;  %vm19378_vm9 = vmmov %vm19377_vm1 }
 0x4ae   : > { %v7152_v61 = vrot.slane %v17467_v57, 1  ;;  %v6842_v41 = vrot.slane %v17473_v31, 4  ;;  %vm2500_vm12 = vcmp.ne.s32.totalorder %v2442_v59, 0  ;;  %vm2536_vm8 = vcmp.lt.s32.totalorder %v2442_v59, 0 }
 0x4af   : > { %v2608_v29 = vadd.s32 18, %v2442_v59  ;;  %v6870_v60 = vor.u32 %v6869_v35, %v6866_v45  ;;  %v6850_v2 = vor.u32 %v6849_v26, %v6846_v20  ;;  %v6874_v56 = vshrl.u32 %v11628_v46, 16  ;;  %vm2572_vm6 = vmand %vm2536_vm8, %vm2500_vm12 }
 0x4b0   : > { %v6877_v9 = vshll.u32 %v11628_v46, 16  ;;  %v6291_v44 = vmax.f32 %v6255_v30, 0.0  ;;  %v7151_v39 = vsel %vm19377_vm1, %v7148_v37, %v7150_v21  ;;  %v7153_v54 = vsel %vm19378_vm9, %v7150_v21, %v7152_v61  ;;  %vm19383_vm12 = vmmov %vm19377_vm1 }
 0x4b1   : > { %v2644_v1 = vsel %vm2572_vm6, %v2608_v29, %v2442_v59  ;;  %v6851_v16 = vsel %vm13775_vm7, %v6842_v41, %v6850_v2  ;;  %v6876_v57 = vrot.slane %v6874_v56, 6  ;;  %v6872_v31 = vrot.slane %v6870_v60, 4  ;;  %vm19384_vm8 = vmmov %vm19377_vm1  ;;  %v13263_v56 = vld [vmem:[#allocation3 + $0x8] sm:$0xff]  }
 0x4b2   : > { %v6879_v22 = vrot.slane %v6877_v9, 7  ;;  %6954 = vst [vmem:[#allocation3 + $0x88] sm:$0xf] %v6851_v16  ;;  %vm2680_vm11 = vcmp.ge.s32.totalorder %v2644_v1, 1  ;;  %vm2716_vm2 = vcmp.le.s32.totalorder %v2644_v1, 16  ;;  %v19379_v42 = vmov 0  ;;  %vm19387_vm6 = vmmov %vm19377_vm1 }
 0x4b3   : > { %vm17562_vm0 = vmand %vm2680_vm11, %vm2716_vm2  ;;  %12571 = vmatmul.mubr.bf16.gmra.mxu0 %v7151_v39  ;;  %v7154_v45 = vrot.slane %v17539_v34, 1  ;;  %v7156_v25 = vrot.slane %v17548_v17, 1  ;;  %v11436_v21 = vcombine.low %v8121_v38, %v8122_v10  ;;  %v6852_v41 = vrot.slane %v6850_v2, 4 }
 0x4b4   : > { %v6880_v51 = vor.u32 %v6879_v22, %v6876_v57  ;;  %v19380_v42 = vsel %vm17562_vm0, 4294967295, %v19379_v42  ;;  %v6399_v37 = vsel %vm17562_vm0, %v6291_v44, 0.0  ;;  %12574 = vmatprep.mubr.bf16.mxu0 %v7153_v54  ;;  %v8276_v16 = vshll.u32 %v13263_v56, 16  ;;  %v13266_v57 = vld [vmem:[#allocation3 + $0x10] sm:$0xff]   ;;  %v13268_v54 = vld [vmem:[#allocation3 + $0x18] sm:$0xff]   ;;  %vm19390_vm11 = vmmov %vm19387_vm6 }
 0x4b5   : > { %19381 = vst [vmem:[#allocation15_spill] sm:$0xff] %v19380_v42  ;;  %v11626_v35 = vpack.c.bf16 %v6399_v37, %v6399_v37  ;;  %v7155_v20 = vsel %vm19383_vm12, %v7152_v61, %v7154_v45  ;;  %v7157_v46 = vsel %vm19384_vm8, %v7154_v45, %v7156_v25  ;;  %v8271_v9 = vshll.u32 %v11436_v21, 16 }
 0x4b6   : > { %v6881_v8 = vsel %vm13775_vm7, %v6872_v31, %v6880_v51  ;;  %v6882_v24 = vrot.slane %v6880_v51, 4  ;;  %v8269_v39 = vshrl.u32 %v11436_v21, 16  ;;  %v8278_v2 = vrot.slane %v8276_v16, 1 }
 0x4b7   : > { %6957 = vst [vmem:[#allocation3 + $0x94] sm:$0xf] %v6881_v8  ;;  %v6854_v59 = vshrl.u32 %v11626_v35, 16  ;;  %v6857_v30 = vshll.u32 %v11626_v35, 16  ;;  %v8273_v61 = vrot.slane %v8271_v9, 1  ;;  %v8284_v51 = vshll.u32 %v13266_v57, 16 }
 0x4b8   : > { %v6959_v32 = vsel %vm15796_vm10, %v6882_v24, %v6958_v48  ;;  %vm19385_vm10 = vsmask.f32 7424  ;;  %v8292_v38 = vshll.u32 %v13268_v54, 16  ;;  %v8280_v10 = vshrl.u32 %v13263_v56, 16  ;;  %v13272_v35 = vld [vmem:[#allocation3 + $0x20] sm:$0xff]  }
 0x4b9   : > { %6960 = vst [vmem:[#allocation3 + $0x98] sm:$0x3] %v6959_v32  ;;  %v6856_v34 = vrot.slane %v6854_v59, 6  ;;  %v6859_v26 = vrot.slane %v6857_v30, 7  ;;  %v8274_v22 = vor.u32 %v8273_v61, %v8269_v39  ;;  %v8286_v24 = vrot.slane %v8284_v51, 1  ;;  %v17582_v59 = vld [vmem:[#allocation3 + $0x18] sm:$0xff]  }
 0x4ba   : > { %v8282_v7 = vor.u32 %v8280_v10, %v8278_v2  ;;  %v7659_v32 = vld [vmem:[#allocation3 + $0x14] sm:$0xf]  ;;  %v8288_v21 = vshrl.u32 %v13266_v57, 16  ;;  %v7806_v9 = vrot.slane %v17582_v59, 2  ;;  %v8296_v61 = vshrl.u32 %v13268_v54, 16  ;;  %v13278_v54 = vld [vmem:[#allocation3 + $0x38] sm:$0xff]  }
 0x4bb   : > { %v6860_v29 = vor.u32 %v6859_v26, %v6856_v34  ;;  %12575 = vmatmul.mubr.bf16.gmra.mxu0 %v7155_v20  ;;  %v8279_v48 = vsel %vm19385_vm10, %v8274_v22, %v8278_v2  ;;  %v8294_v20 = vrot.slane %v8292_v38, 1  ;;  %v13273_v26 = vld [vmem:[#allocation3 + $0x28] sm:$0xff]   ;;  %v17593_v22 = vld [vmem:[#allocation3 + $0x20] sm:$0xff]   ;;  %v13277_v2 = vld [vmem:[#allocation3 + $0x30] sm:$0xff]   ;;  %vm19391_vm2 = vcmask 1045504  }
 0x4bc   : > { %12578 = vmatprep.mubr.bf16.mxu0 %v7157_v46  ;;  %v17585_v46 = vcombine.low %v7658_v43, %v7659_v32  ;;  %v7808_v10 = vrot.slane %v17593_v22, 2  ;;  %v8316_v43 = vshll.u32 %v13277_v2, 16  ;;  %v8324_v32 = vshll.u32 %v13278_v54, 16 }
 0x4bd   : > { %v6861_v17 = vsel %vm13775_vm7, %v6852_v41, %v6860_v29  ;;  %v6862_v1 = vrot.slane %v6860_v29, 4  ;;  %v8290_v41 = vor.u32 %v8288_v21, %v8286_v24  ;;  %v8300_v29 = vshll.u32 %v13272_v35, 16 }
 0x4be   : > { %6955 = vst [vmem:[#allocation3 + $0x8c] sm:$0xf] %v6861_v17  ;;  %v7805_v39 = vrot.slane %v17585_v46, 2 }
 0x4bf   : > { %v6871_v44 = vsel %vm13775_vm7, %v6862_v1, %v6870_v60  ;;  %vm19386_vm7 = vmmov %vm19377_vm1  ;;  %v8302_v57 = vrot.slane %v8300_v29, 1  ;;  %v13307_v29 = vld [vmem:[#allocation4 + $0x158] sm:$0xff]  }
 0x4c0   : > { %6956 = vst [vmem:[#allocation3 + $0x90] sm:$0xf] %v6871_v44  ;;  %v13269_v34 = vld [vmem:[#allocation3 + $0x98] ss:$0 sps:$4 sm:$0x11]   ;;  %vm19388_vm1 = vmmov %vm19385_vm10  ;;  %v8308_v44 = vshll.u32 %v13273_v26, 16  ;;  %v7807_v51 = vsel %vm19391_vm2, %v7805_v39, %v7806_v9 }
 0x4c1   : > { %v8287_v56 = vsel %vm19388_vm1, %v8282_v7, %v8286_v24  ;;  %vm19389_vm9 = vmmov %vm19388_vm1  ;;  %v7162_v1 = vrot.slane %v13269_v34, 1  ;;  %v17603_v34 = vld [vmem:[#allocation3 + $0x30] sm:$0xff]  }
 0x4c2   : > { %v8295_v17 = vsel %vm19389_vm9, %v8290_v41, %v8294_v20  ;;  %v8310_v38 = vrot.slane %v8308_v44, 1  ;;  %vm19392_vm12 = vmmov %vm19388_vm1  ;;  %v13282_v41 = vld [vmem:[#allocation3 + $0x40] sm:$0xff]   ;;  %v13283_v44 = vld [vmem:[#allocation3 + $0x48] sm:$0xff]  }
 0x4c3   : > { %vm19393_vm8 = vmmov %vm19388_vm1 }
 0x4c4   : > { %vm19394_vm10 = vmmov %vm19391_vm2 }
 0x4c5   : > { %v13259_v31 = vld [vmem:[#allocation3 + $0x88] sm:$0xff]   ;;  %v7809_v21 = vsel %vm19394_vm10, %v7806_v9, %v7808_v10  ;;  %vm19397_vm9 = vmmov %vm19391_vm2 }
 0x4c6   : > { %12635 = vmatmul.mubr.bf16.gmra.mxu1 %v13259_v31  ;;  %v7158_v37 = vrot.slane %v13259_v31, 1  ;;  %v13300_v31 = vld [vmem:[#allocation4 + $0x168] sm:$0xff]  }
 0x4c7   : > { %v13265_v45 = vld [vmem:[#allocation3 + $0x90] sm:$0xff]   ;;  %12706 = vmatprep.mubr.bf16.mxu1 %v8279_v48  ;;  %v8298_v48 = vor.u32 %v8296_v61, %v8294_v20  ;;  %v8318_v20 = vrot.slane %v8316_v43, 1  ;;  %v7812_v61 = vrot.slane %v17603_v34, 2 }
 0x4c8   : > { %v7159_v60 = vsel %vm19386_vm7, %v7156_v25, %v7158_v37  ;;  %v7160_v8 = vrot.slane %v13265_v45, 1  ;;  %v13297_v25 = vld [vmem:[#allocation4 + $0x170] sm:$0xff]   ;;  %v8304_v45 = vshrl.u32 %v13272_v35, 16  ;;  %vm19395_vm7 = vmmov %vm19391_vm2  ;;  %v13286_v9 = vld [vmem:[#allocation4 + $0x128] sm:$0xff]  }
 0x4c9   : > { %12579 = vmatmul.mubr.bf16.gmra.mxu0 %v7159_v60  ;;  %v13304_v60 = vld [vmem:[#allocation4 + $0x160] sm:$0xff]   ;;  %v13280_v35 = vld [vmem:[#allocation4 + $0x130] sm:$0xff]   ;;  %vm19402_vm10 = vmmov %vm19395_vm7 }
 0x4ca   : > { %v7161_v30 = vsel %vm19387_vm6, %v7158_v37, %v7160_v8  ;;  %v7163_v16 = vsel %vm19390_vm11, %v7160_v8, %v7162_v1  ;;  %v17596_v37 = vld [vmem:[#allocation3 + $0x28] sm:$0xff]   ;;  %v8303_v8 = vsel %vm19392_vm12, %v8298_v48, %v8302_v57  ;;  %v8326_v1 = vrot.slane %v8324_v32, 1  ;;  %vm19396_vm6 = vmmov %vm19388_vm1  ;;  %v13287_v43 = vld [vmem:[#allocation3 + $0x50] sm:$0xff]  }
 0x4cb   : > { %12582 = vmatprep.mubr.bf16.mxu0 %v7161_v30  ;;  %v7810_v24 = vrot.slane %v17596_v37, 2  ;;  %v8312_v30 = vshrl.u32 %v13273_v26, 16  ;;  %v8320_v26 = vshrl.u32 %v13277_v2, 16  ;;  %v8340_v2 = vshll.u32 %v13283_v44, 16  ;;  %vm19398_vm11 = vmmov %vm19391_vm2  ;;  %v13314_v32 = vld [vmem:[#allocation4 + $0x148] sm:$0xff]  }
 0x4cc   : > { %v8328_v48 = vshrl.u32 %v13278_v54, 16  ;;  %vm19399_vm2 = vmmov %vm19388_vm1  ;;  %v17898_v12 = vld [vmem:[#allocation3 + $0x90] sm:$0xff]  }
 0x4cd   : > { %v8322_v39 = vor.u32 %v8320_v26, %v8318_v20  ;;  %v8342_v54 = vrot.slane %v8340_v2, 1  ;;  %v13317_v26 = vld [vmem:[#allocation4 + $0x140] sm:$0xff]   ;;  %vm19400_vm12 = vmmov %vm19388_vm1 }
 0x4ce   : > { %12707 = vmatmul.mubr.bf16.vlgmr.msra.gmra.mxu1 %v8287_v56  ;;  %v8314_v56 = vor.u32 %v8312_v30, %v8310_v38  ;;  %v8336_v30 = vshrl.u32 %v13282_v41, 16 }
 0x4cf   : > { %12710 = vmatprep.mubr.bf16.mxu1 %v8295_v17  ;;  %12795 = vmatpush3.bf16.msra.mxu1 %v17345_v62  ;;  %v8306_v62 = vor.u32 %v8304_v45, %v8302_v57  ;;  %v17606_v17 = vld [vmem:[#allocation3 + $0x38] sm:$0xff]   ;;  %v13291_v45 = vld [vmem:[#allocation4 + $0x120] sm:$0xff]  }
 0x4d0   : > { %12796 = vmatprep.subr.bf16.mxu1 %v13297_v25  ;;  %v8319_v57 = vsel %vm19396_vm6, %v8314_v56, %v8318_v20  ;;  %vm19404_vm6 = vmmov %vm19388_vm1 }
 0x4d1   : > { %12583 = vmatmul.mubr.bf16.gmra.mxu0 %v7163_v16  ;;  %v8311_v7 = vsel %vm19393_vm8, %v8306_v62, %v8310_v38  ;;  %v8332_v16 = vshll.u32 %v13282_v41, 16  ;;  %v7813_v38 = vsel %vm19397_vm9, %v7810_v24, %v7812_v61  ;;  %vm19401_vm8 = vmmov %vm19395_vm7 }
 0x4d2   : > { %12654 = vmatprep.mubr.bf16.mxu0 %v7807_v51  ;;  %v13311_v51 = vld [vmem:[#allocation4 + $0x150] sm:$0xff]  }
 0x4d3   : > { %12797 = vmatpush3.bf16.msra.mxu1 %v13297_v25  ;;  %v7811_v25 = vsel %vm19395_vm7, %v7808_v10, %v7810_v24  ;;  %v8334_v62 = vrot.slane %v8332_v16, 1  ;;  %v17614_v10 = vld [vmem:[#allocation3 + $0x40] sm:$0xff]   ;;  %vm19403_vm7 = vmmov %vm19388_vm1 }
 0x4d4   : > { %12798 = vmatprep.subr.bf16.mxu1 %v13300_v31  ;;  %v13298_v24 = vld [vmem:[#allocation4 + $0x118] sm:$0xff]   ;;  %v7816_v20 = vrot.slane %v17614_v10, 2 }
 0x4d6   : > { %12711 = vmatmul.mubr.bf16.gmra.mxu1 %v8303_v8  ;;  %v8330_v8 = vor.u32 %v8328_v48, %v8326_v1  ;;  %v17627_v48 = vld [vmem:[#allocation3 + $0x58] sm:$0xff]  }
 0x4d7   : > { %12714 = vmatprep.mubr.bf16.mxu1 %v8311_v7  ;;  %12799 = vmatpush3.bf16.msra.mxu1 %v13300_v31  ;;  %v7814_v31 = vrot.slane %v17606_v17, 2  ;;  %v17617_v7 = vld [vmem:[#allocation3 + $0x48] sm:$0xff]  }
 0x4d8   : > { %12800 = vmatprep.subr.bf16.mxu1 %v13304_v60  ;;  %v7818_v56 = vrot.slane %v17617_v7, 2 }
 0x4d9   : > { %12655 = vmatmul.mubr.bf16.vlgmr.msra.gmra.mxu0 %v7809_v21  ;;  %v8338_v21 = vor.u32 %v8336_v30, %v8334_v62 }
 0x4da   : > { %12743 = vmatpush3.bf16.msra.mxu0 %v17411_v13  ;;  %12658 = vmatprep.mubr.bf16.mxu0 %v7811_v25  ;;  %v8327_v13 = vsel %vm19388_vm1, %v8322_v39, %v8326_v1  ;;  %v8348_v25 = vshll.u32 %v13287_v43, 16  ;;  %v13305_v39 = vld [vmem:[#allocation4 + $0x110] sm:$0xff]   ;;  %vm19405_vm1 = vmmov %vm19401_vm8 }
 0x4db   : > { %12744 = vmatprep.subr.bf16.mxu0 %v13280_v35  ;;  %12801 = vmatpush3.bf16.msra.mxu1 %v13304_v60  ;;  %v7815_v60 = vsel %vm19398_vm11, %v7812_v61, %v7814_v31  ;;  %v8343_v1 = vsel %vm19400_vm12, %v8338_v21, %v8342_v54  ;;  %v7817_v61 = vsel %vm19401_vm8, %v7814_v31, %v7816_v20  ;;  %v13313_v31 = vld [vmem:[#allocation4 + $0x108] sm:$0xff]   ;;  %vm19406_vm9 = vmmov %vm19405_vm1 }
 0x4dc   : > { %12802 = vmatprep.subr.bf16.mxu1 %v13307_v29  ;;  %v8350_v16 = vrot.slane %v8348_v25, 1  ;;  %vm19407_vm11 = vmmov %vm19399_vm2 }
 0x4dd   : > { %vm19408_vm12 = vmmov %vm19405_vm1 }
 0x4de   : > { %12715 = vmatmul.mubr.bf16.gmra.mxu1 %v8319_v57  ;;  %12745 = vmatpush3.bf16.msra.mxu0 %v13280_v35  ;;  %v13288_v35 = vld [vmem:[#allocation3 + $0x58] sm:$0xff]   ;;  %v17624_v57 = vld [vmem:[#allocation3 + $0x50] sm:$0xff]   ;;  %vm19409_vm8 = vmmov %vm19405_vm1 }
 0x4df   : > { %12718 = vmatprep.mubr.bf16.mxu1 %v8327_v13  ;;  %12746 = vmatprep.subr.bf16.mxu0 %v13286_v9  ;;  %v8356_v41 = vshll.u32 %v13288_v35, 16  ;;  %v7819_v13 = vsel %vm19402_vm10, %v7816_v20, %v7818_v56  ;;  %v13318_v20 = vld [vmem:[#allocation4 + $0x100] sm:$0xff]   ;;  %vm19410_vm10 = vmmov %vm19399_vm2 }
 0x4e0   : > { %12803 = vmatpush3.bf16.msra.mxu1 %v13307_v29  ;;  %v8335_v29 = vsel %vm19399_vm2, %v8330_v8, %v8334_v62  ;;  %v13294_v62 = vld [vmem:[#allocation3 + $0x68] sm:$0xff]   ;;  %v7820_v8 = vrot.slane %v17624_v57, 2 }
 0x4e1   : > { %12659 = vmatmul.mubr.bf16.gmra.mxu0 %v7813_v38  ;;  %12804 = vmatprep.subr.bf16.mxu1 %v13311_v51  ;;  %v17629_v38 = vld [vmem:[#allocation4 + $0x1f8] sm:$0xff]  }
 0x4e2   : > { %12662 = vmatprep.mubr.bf16.mxu0 %v7815_v60  ;;  %12747 = vmatpush3.bf16.msra.mxu0 %v13286_v9  ;;  %v8344_v9 = vshrl.u32 %v13283_v44, 16  ;;  %v8352_v44 = vshrl.u32 %v13287_v43, 16  ;;  %v8372_v43 = vshll.u32 %v13294_v62, 16  ;;  %v7821_v25 = vsel %vm19405_vm1, %v7818_v56, %v7820_v8 }
 0x4e3   : > { %12748 = vmatprep.subr.bf16.mxu0 %v13291_v45 }
 0x4e4   : > { %12805 = vmatpush3.bf16.msra.mxu1 %v13311_v51  ;;  %v13292_v51 = vld [vmem:[#allocation3 + $0x60] sm:$0xff]   ;;  %v8346_v2 = vor.u32 %v8344_v9, %v8342_v54  ;;  %v8354_v60 = vor.u32 %v8352_v44, %v8350_v16  ;;  %v7822_v54 = vrot.slane %v17627_v48, 2 }
 0x4e5   : > { %12806 = vmatprep.subr.bf16.mxu1 %v13314_v32 }
 0x4e6   : > { %12719 = vmatmul.mubr.bf16.gmra.mxu1 %v8335_v29  ;;  %12749 = vmatpush3.bf16.msra.mxu0 %v13291_v45  ;;  %v8358_v45 = vrot.slane %v8356_v41, 1  ;;  %v8351_v30 = vsel %vm19403_vm7, %v8346_v2, %v8350_v16  ;;  %v7823_v41 = vsel %vm19406_vm9, %v7820_v8, %v7822_v54  ;;  %v8368_v16 = vshrl.u32 %v13292_v51, 16  ;;  %vm19411_vm7 = vmmov %vm19399_vm2 }
 0x4e7   : > { %12722 = vmatprep.mubr.bf16.mxu1 %v8343_v1  ;;  %12750 = vmatprep.subr.bf16.mxu0 %v13298_v24  ;;  %v17637_v1 = vld [vmem:[#allocation3 + $0x60] sm:$0xff]   ;;  %vm19413_vm9 = vmmov %vm19399_vm2 }
 0x4e8   : > { %12807 = vmatpush3.bf16.msra.mxu1 %v13314_v32  ;;  %v8364_v32 = vshll.u32 %v13292_v51, 16  ;;  %v8359_v21 = vsel %vm19404_vm6, %v8354_v60, %v8358_v45  ;;  %v7824_v56 = vrot.slane %v17637_v1, 2  ;;  %v8376_v51 = vshrl.u32 %v13294_v62, 16  ;;  %vm19412_vm6 = vmmov %vm19405_vm1 }
 0x4e9   : > { %12663 = vmatmul.mubr.bf16.gmra.mxu0 %v7817_v61  ;;  %12808 = vmatprep.subr.bf16.mxu1 %v13317_v26  ;;  %v17640_v61 = vld [vmem:[#allocation3 + $0x68] sm:$0xff]  }
 0x4ea   : > { %12666 = vmatprep.mubr.bf16.mxu0 %v7819_v13  ;;  %12751 = vmatpush3.bf16.msra.mxu0 %v13298_v24  ;;  %v8360_v24 = vshrl.u32 %v13288_v35, 16  ;;  %v8366_v29 = vrot.slane %v8364_v32, 1  ;;  %v8374_v13 = vrot.slane %v8372_v43, 1  ;;  %v17642_v35 = vld [vmem:[#allocation4 + $0x1b8] sm:$0xff]   ;;  %v7826_v32 = vrot.slane %v17640_v61, 2 }
 0x4eb   : > { %12752 = vmatprep.subr.bf16.mxu0 %v13305_v39  ;;  %v13306_v43 = vld [vmem:[#allocation3 + $0x80] sm:$0xff]  }
 0x4ec   : > { %12809 = vmatpush3.bf16.msra.mxu1 %v13317_v26  ;;  %v13299_v26 = vld [vmem:[#allocation3 + $0x70] sm:$0xff]   ;;  %v8362_v9 = vor.u32 %v8360_v24, %v8358_v45  ;;  %v8370_v2 = vor.u32 %v8368_v16, %v8366_v29  ;;  %v7827_v24 = vsel %vm19409_vm8, %v7824_v56, %v7826_v32  ;;  %vm19417_vm8 = vmmov %vm19411_vm7 }
 0x4ed   : > { %12898 = vmatprep.subr.bf16.mxu1 %v17629_v38  ;;  %v8380_v44 = vshll.u32 %v13299_v26, 16 }
 0x4ee   : > { %12723 = vmatmul.mubr.bf16.gmra.mxu1 %v8351_v30  ;;  %12753 = vmatpush3.bf16.msra.mxu0 %v13305_v39  ;;  %v13301_v39 = vld [vmem:[#allocation3 + $0x78] sm:$0xff]   ;;  %v8367_v60 = vsel %vm19407_vm11, %v8362_v9, %v8366_v29  ;;  %v8375_v45 = vsel %vm19399_vm2, %v8370_v2, %v8374_v13  ;;  %v8396_v2 = vshll.u32 %v13306_v43, 16  ;;  %vm19414_vm11 = vmmov %vm19399_vm2 }
 0x4ef   : > { %12726 = vmatprep.mubr.bf16.mxu1 %v8359_v21  ;;  %12754 = vmatprep.subr.bf16.mxu0 %v13313_v31  ;;  %v8388_v8 = vshll.u32 %v13301_v39, 16  ;;  %v8382_v30 = vrot.slane %v8380_v44, 1  ;;  %v17650_v21 = vld [vmem:[#allocation3 + $0x70] sm:$0xff]   ;;  %v17653_v29 = vld [vmem:[#allocation3 + $0x78] sm:$0xff]   ;;  %vm19415_vm2 = vmmov %vm19405_vm1 }
 0x4f0   : > { %v7828_v62 = vrot.slane %v17650_v21, 2  ;;  %v7830_v44 = vrot.slane %v17653_v29, 2 }
 0x4f1   : > { %12667 = vmatmul.mubr.bf16.gmra.mxu0 %v7821_v25  ;;  %v8378_v25 = vor.u32 %v8376_v51, %v8374_v13  ;;  %v8390_v9 = vrot.slane %v8388_v8, 1  ;;  %v8392_v13 = vshrl.u32 %v13301_v39, 16  ;;  %v13312_v51 = vld [vmem:[#allocation3 + $0x90] ss:$0 sps:$4 sm:$0x11]   ;;  %v8398_v8 = vrot.slane %v8396_v2, 1 }
 0x4f2   : > { %12670 = vmatprep.mubr.bf16.mxu0 %v7823_v41  ;;  %12755 = vmatpush3.bf16.msra.mxu0 %v13313_v31  ;;  %v7825_v31 = vsel %vm19408_vm12, %v7822_v54, %v7824_v56  ;;  %v8384_v41 = vshrl.u32 %v13299_v26, 16  ;;  %v17659_v56 = vld [vmem:[#allocation3 + $0x80] sm:$0xff]   ;;  %v7829_v26 = vsel %vm19412_vm6, %v7826_v32, %v7828_v62  ;;  %v9187_v32 = vshrl.u32 %v17585_v46, 16  ;;  %vm19416_vm12 = vmmov %vm19405_vm1 }
 0x4f3   : > { %12756 = vmatprep.subr.bf16.mxu0 %v13318_v20  ;;  %v8383_v54 = vsel %vm19410_vm10, %v8378_v25, %v8382_v30  ;;  %v7832_v39 = vrot.slane %v17659_v56, 2  ;;  %v9190_v2 = vshll.u32 %v17585_v46, 16  ;;  %v9204_v46 = vshrl.u32 %v17593_v22, 16  ;;  %vm19420_vm6 = vmmov %vm19405_vm1 }
 0x4f4   : > { %v8386_v16 = vor.u32 %v8384_v41, %v8382_v30  ;;  %v17663_v41 = vld [vmem:[#allocation3 + $0x88] sm:$0xff]   ;;  %v8400_v30 = vshrl.u32 %v13306_v43, 16  ;;  %v9189_v53 = vrot.slane %v9187_v32, 2  ;;  %vm19418_vm10 = vsmask.f32 5376 }
 0x4f5   : > { %v9192_v23 = vrot.slane %v9190_v2, 3  ;;  %v9206_v32 = vrot.slane %v9204_v46, 2 }
 0x4f6   : > { %12727 = vmatmul.mubr.bf16.gmra.mxu1 %v8367_v60  ;;  %12757 = vmatpush3.bf16.msra.mxu0 %v13318_v20  ;;  %v13308_v20 = vld [vmem:[#allocation3 + $0x88] sm:$0xff]   ;;  %v8391_v60 = vsel %vm19411_vm7, %v8386_v16, %v8390_v9  ;;  %v9195_v16 = vshrl.u32 %v17582_v59, 16  ;;  %v8402_v42 = vor.u32 %v8400_v30, %v8398_v8  ;;  %v17674_v30 = vld [vmem:[#allocation3 + $0x90] sm:$0xff]   ;;  %vm19419_vm7 = vmmov %vm19405_vm1 }
 0x4f7   : > { %12730 = vmatprep.mubr.bf16.mxu1 %v8375_v45  ;;  %12846 = vmatprep.subr.bf16.mxu0 %v17642_v35  ;;  %v8404_v45 = vshll.u32 %v13308_v20, 16 }
 0x4f9   : > { %12671 = vmatmul.mubr.bf16.gmra.mxu0 %v7825_v31  ;;  %v7831_v31 = vsel %vm19405_vm1, %v7828_v62, %v7830_v44  ;;  %v8406_v25 = vrot.slane %v8404_v45, 1  ;;  %v9197_v45 = vrot.slane %v9195_v16, 2  ;;  %v9213_v16 = vshrl.u32 %v17596_v37, 16  ;;  %vm19421_vm1 = vmmov %vm19418_vm10 }
 0x4fa   : > { %12674 = vmatprep.mubr.bf16.mxu0 %v7827_v24  ;;  %v8394_v24 = vor.u32 %v8392_v13, %v8390_v9  ;;  %v7834_v9 = vrot.slane %v17663_v41, 2  ;;  %v8408_v13 = vshrl.u32 %v13308_v20, 16 }
 0x4fb   : > { %v8407_v43 = vsel %vm19414_vm11, %v8402_v42, %v8406_v25  ;;  %vm19423_vm11 = vmmov %vm19415_vm2 }
 0x4fc   : > { %v8399_v62 = vsel %vm19413_vm9, %v8394_v24, %v8398_v8  ;;  %v9207_v8 = vshll.u32 %v17593_v22, 16  ;;  %v7835_v20 = vsel %vm19416_vm12, %v7832_v39, %v7834_v9  ;;  %v17679_v24 = vld [vmem:[#allocation3 + $0x98] sm:$0xff]   ;;  %v8717_v22 = vshrl.u32 %v17166_v58, 16  ;;  %vm19422_vm9 = vmmov %vm19421_vm1 }
 0x4fd   : > { %vm19425_vm12 = vmmov %vm19421_vm1  ;;  %v9342_v27 = vshll.u32 %v17679_v24, 16 }
 0x4fe   : > { %12731 = vmatmul.mubr.bf16.gmra.mxu1 %v8383_v54  ;;  %v9198_v54 = vshll.u32 %v17582_v59, 16  ;;  %v7833_v59 = vsel %vm19415_vm2, %v7830_v44, %v7832_v39  ;;  %v9216_v44 = vshll.u32 %v17596_v37, 16  ;;  %v9209_v2 = vrot.slane %v9207_v8, 3  ;;  %v17687_v39 = vld [vmem:[#allocation3 + $0x10] sm:$0xff]  }
 0x4ff   : > { %12734 = vmatprep.mubr.bf16.mxu1 %v8391_v60  ;;  %v8412_v60 = vshll.u32 %v13312_v51, 16  ;;  %vm19424_vm2 = vsmask.f32 6400 }
 0x500   : > { %v9210_v8 = vor.u32 %v9209_v2, %v9206_v32  ;;  %v13325_v32 = vld [vmem:[#allocation4 + $0x1f0] sm:$0xff]  }
 0x501   : > { %12675 = vmatmul.mubr.bf16.gmra.mxu0 %v7829_v26  ;;  %v9200_v26 = vrot.slane %v9198_v54, 3  ;;  %v8414_v51 = vrot.slane %v8412_v60, 1  ;;  %v9193_v60 = vor.u32 %v9192_v23, %v9189_v53  ;;  %v9222_v53 = vshrl.u32 %v17603_v34, 16 }
 0x502   : > { %12678 = vmatprep.mubr.bf16.mxu0 %v7831_v31  ;;  %v8410_v31 = vor.u32 %v8408_v13, %v8406_v25  ;;  %v7836_v25 = vrot.slane %v17674_v30, 2  ;;  %v8725_v13 = vshrl.u32 %v17687_v39, 16  ;;  %v9225_v23 = vshll.u32 %v17603_v34, 16 }
 0x503   : > { %v9201_v42 = vor.u32 %v9200_v26, %v9197_v45  ;;  %v7838_v45 = vrot.slane %v17679_v24, 2  ;;  %v9215_v26 = vrot.slane %v9213_v16, 2  ;;  %v9224_v50 = vrot.slane %v9222_v53, 2 }
 0x504   : > { %v8415_v54 = vsel %vm19417_vm8, %v8410_v31, %v8414_v51  ;;  %v9234_v31 = vshll.u32 %v17606_v17, 16  ;;  %v7837_v51 = vsel %vm19419_vm7, %v7834_v9, %v7836_v25  ;;  %v8727_v16 = vrot.slane %v8725_v13, 1  ;;  %vm19426_vm8 = vmmov %vm19421_vm1 }
 0x505   : > { %v9202_v37 = vsel %vm19418_vm10, %v9193_v60, %v9201_v42  ;;  %v7839_v46 = vsel %vm19420_vm6, %v7836_v25, %v7838_v45  ;;  %v9227_v28 = vrot.slane %v9225_v23, 3  ;;  %v9211_v40 = vsel %vm19421_vm1, %v9201_v42, %v9210_v8  ;;  %vm19427_vm10 = vmmov %vm19424_vm2 }
 0x506   : > { %12735 = vmatmul.mubr.bf16.gmra.mxu1 %v8399_v62  ;;  %v8720_v62 = vshll.u32 %v17166_v58, 16  ;;  %v9231_v58 = vshrl.u32 %v17606_v17, 16  ;;  %v9236_v5 = vrot.slane %v9234_v31, 3  ;;  %v8734_v9 = vshrl.u32 %v17700_v11, 16  ;;  %vm19428_vm7 = vmmov %vm19424_vm2 }
 0x507   : > { %12738 = vmatprep.mubr.bf16.mxu1 %v8407_v43  ;;  %v8728_v43 = vshll.u32 %v17687_v39, 16  ;;  %v8737_v25 = vshll.u32 %v17700_v11, 16  ;;  %v17709_v42 = vpop.f32.mrf.mxu1  ;;  %vm19429_vm6 = vmmov %vm19421_vm1 }
 0x508   : > { %v8722_v60 = vrot.slane %v8720_v62, 2  ;;  %v9233_v34 = vrot.slane %v9231_v58, 2  ;;  %v17704_v62 = vld [vmem:[#allocation3 + $0x20] sm:$0xff]   ;;  %v8736_v58 = vrot.slane %v8734_v9, 1 }
 0x509   : > { %12679 = vmatmul.mubr.bf16.gmra.mxu0 %v7833_v59  ;;  %v9218_v59 = vrot.slane %v9216_v44, 3  ;;  %v8730_v44 = vrot.slane %v8728_v43, 2  ;;  %v8743_v13 = vshrl.u32 %v17704_v62, 16  ;;  %v8746_v43 = vshll.u32 %v17704_v62, 16  ;;  %v13328_v9 = vld [vmem:[#allocation4 + $0x1e0] sm:$0xff]  }
 0x50a   : > { %12682 = vmatprep.mubr.bf16.mxu0 %v7835_v20  ;;  %v13319_v20 = vld [vmem:[#allocation3 + $0xa0] ss:$0 sps:$4 sm:$0x33]   ;;  %v17711_v53 = vor.u32 %v9236_v5, %v9233_v34  ;;  %v8739_v31 = vrot.slane %v8737_v25, 2  ;;  %v9249_v5 = vshrl.u32 %v17617_v7, 16  ;;  %v17727_v34 = vld [vmem:[#allocation3 + $0x28] sm:$0xff]  }
 0x50b   : > { %v7840_v17 = vrot.slane %v13319_v20, 2  ;;  %v17716_v20 = vpop.f32.mrf.mxu1 }
 0x50d   : > { %v7841_v23 = vsel %vm19423_vm11, %v7838_v45, %v7840_v17  ;;  %v8752_v17 = vshrl.u32 %v17727_v34, 16  ;;  %vm19431_vm11 = vmmov %vm19424_vm2 }
 0x50e   : > { %12739 = vmatmul.mubr.bf16.gmra.mxu1 %v8415_v54  ;;  %v8719_v54 = vrot.slane %v8717_v22, 1  ;;  %v8731_v22 = vor.u32 %v8730_v44, %v8727_v16  ;;  %v8740_v16 = vor.u32 %v8739_v31, %v8736_v58  ;;  %v13321_v31 = vld [vmem:[#allocation4 + $0x1b0] sm:$0xff]  }
 0x50f   : > { %12810 = vmatprep.mubr.bf16.mxu1 %v9202_v37  ;;  %v9219_v37 = vor.u32 %v9218_v59, %v9215_v26  ;;  %v9228_v59 = vor.u32 %v9227_v28, %v9224_v50  ;;  %v9243_v28 = vshll.u32 %v17614_v10, 16  ;;  %v9252_v50 = vshll.u32 %v17617_v7, 16 }
 0x510   : > { %v8723_v2 = vor.u32 %v8722_v60, %v8719_v54  ;;  %v8748_v54 = vrot.slane %v8746_v43, 2  ;;  %v9251_v43 = vrot.slane %v9249_v5, 2  ;;  %v13330_v5 = vld [vmem:[#allocation4 + $0x1d8] sm:$0xff]  }
 0x511   : > { %12683 = vmatmul.mubr.bf16.gmra.mxu0 %v7837_v51  ;;  %v9220_v26 = vsel %vm19422_vm9, %v9210_v8, %v9219_v37  ;;  %v9240_v51 = vshrl.u32 %v17614_v10, 16  ;;  %v8745_v8 = vrot.slane %v8743_v13, 1  ;;  %v9229_v45 = vsel %vm19425_vm12, %v9219_v37, %v9228_v59  ;;  %v17733_v13 = vld [vmem:[#allocation3 + $0x30] sm:$0xff]   ;;  %vm19430_vm9 = vmmov %vm19424_vm2 }
 0x512   : > { %12686 = vmatprep.mubr.bf16.mxu0 %v7839_v46  ;;  %v13327_v46 = vld [vmem:[#allocation4 + $0x1e8] sm:$0xff]   ;;  %v9238_v60 = vsel %vm19426_vm8, %v9228_v59, %v17711_v53  ;;  %v8755_v10 = vshll.u32 %v17727_v34, 16  ;;  %v8761_v37 = vshrl.u32 %v17733_v13, 16  ;;  %v9258_v59 = vshrl.u32 %v17624_v57, 16  ;;  %vm19433_vm12 = vmmov %vm19421_vm1 }
 0x513   : > { %v9242_v44 = vrot.slane %v9240_v51, 2  ;;  %v8749_v7 = vor.u32 %v8748_v54, %v8745_v8  ;;  %v9267_v51 = vshrl.u32 %v17627_v48, 16  ;;  %v8741_v8 = vsel %vm19427_vm10, %v8731_v22, %v8740_v16  ;;  %vm19434_vm8 = vmmov %vm19428_vm7 }
 0x514   : > { %v8754_v54 = vrot.slane %v8752_v17, 1  ;;  %v8763_v47 = vrot.slane %v8761_v37, 1  ;;  %v17754_v37 = vld [vmem:[#allocation3 + $0x40] sm:$0xff]   ;;  %vm19435_vm10 = vmmov %vm19428_vm7 }
 0x516   : > { %12811 = vmatmul.mubr.bf16.vlgmr.msra.gmra.mxu1 %v9211_v40  ;;  %v8732_v40 = vsel %vm19424_vm2, %v8723_v2, %v8731_v22  ;;  %v9245_v2 = vrot.slane %v9243_v28, 3  ;;  %v8757_v28 = vrot.slane %v8755_v10, 2  ;;  %v9269_v22 = vrot.slane %v9267_v51, 2  ;;  %v17750_v10 = vld [vmem:[#allocation3 + $0x38] sm:$0xff]   ;;  %vm19432_vm2 = vmmov %vm19421_vm1 }
 0x517   : > { %12814 = vmatprep.mubr.bf16.mxu1 %v9220_v26  ;;  %12899 = vmatpush3.bf16.msra.mxu1 %v17629_v38  ;;  %v17722_v38 = vpop.f32.mrf.mxu1  ;;  %v9254_v26 = vrot.slane %v9252_v50, 3 }
 0x518   : > { %12900 = vmatprep.subr.bf16.mxu1 %v13325_v32 }
 0x519   : > { %12687 = vmatmul.mubr.bf16.gmra.mxu0 %v7841_v23  ;;  %v17731_v25 = vpop.f32.mrf.mxu1  ;;  %v9261_v23 = vshll.u32 %v17624_v57, 16  ;;  %v8750_v57 = vsel %vm19428_vm7, %v8740_v16, %v8749_v7  ;;  %v9255_v33 = vor.u32 %v9254_v26, %v9251_v43  ;;  %v8773_v16 = vshll.u32 %v17750_v10, 16  ;;  %vm19436_vm7 = vmmov %vm19421_vm1 }
 0x51a   : > { %12758 = vmatprep.mubr.bf16.mxu0 %v8732_v40  ;;  %v9270_v40 = vshll.u32 %v17627_v48, 16  ;;  %v9260_v48 = vrot.slane %v9258_v59, 2 }
 0x51b   : > { %12901 = vmatpush3.bf16.msra.mxu1 %v13325_v32  ;;  %v8764_v32 = vshll.u32 %v17733_v13, 16  ;;  %v17739_v58 = vpop.f32.mrf.mxu1 }
 0x51c   : > { %12902 = vmatprep.subr.bf16.mxu1 %v13327_v46  ;;  %v9272_v17 = vrot.slane %v9270_v40, 3 }
 0x51d   : > { %v17744_v50 = vpop.f32.mrf.mxu1 }
 0x51e   : > { %12815 = vmatmul.mubr.bf16.gmra.mxu1 %v9229_v45  ;;  %v9246_v45 = vor.u32 %v9245_v2, %v9242_v44  ;;  %v13322_v44 = vld [vmem:[#allocation4 + $0x1a8] sm:$0xff]   ;;  %v8758_v2 = vor.u32 %v8757_v28, %v8754_v54  ;;  %v17763_v40 = vor.u32 %v9272_v17, %v9269_v22  ;;  %v8775_v28 = vrot.slane %v8773_v16, 2  ;;  %v13326_v17 = vld [vmem:[#allocation4 + $0x198] sm:$0xff]  }
 0x51f   : > { %12818 = vmatprep.mubr.bf16.mxu1 %v9238_v60  ;;  %12903 = vmatpush3.bf16.msra.mxu1 %v13327_v46  ;;  %v8766_v60 = vrot.slane %v8764_v32, 2  ;;  %v9263_v46 = vrot.slane %v9261_v23, 3  ;;  %v17748_v36 = vpop.f32.mrf.mxu1  ;;  %v8782_v32 = vshll.u32 %v17754_v37, 16  ;;  %v13331_v23 = vld [vmem:[#allocation4 + $0x1d0] sm:$0xff]   ;;  %v17780_v16 = vld [vmem:[#allocation3 + $0x48] sm:$0xff]  }
 0x520   : > { %12904 = vmatprep.subr.bf16.mxu1 %v13328_v9  ;;  %v9247_v26 = vsel %vm19429_vm6, %v17711_v53, %v9246_v45  ;;  %v9256_v51 = vsel %vm19421_vm1, %v9246_v45, %v9255_v33  ;;  %v8759_v15 = vsel %vm19430_vm9, %v8749_v7, %v8758_v2  ;;  %v9279_v45 = vshll.u32 %v17637_v1, 16  ;;  %vm19437_vm6 = vmmov %vm19421_vm1 }
 0x521   : > { %12759 = vmatmul.mubr.bf16.vlgmr.msra.gmra.mxu0 %v8741_v8  ;;  %v8770_v8 = vshrl.u32 %v17750_v10, 16  ;;  %v17758_v43 = vpop.f32.mrf.mxu1  ;;  %v8767_v59 = vor.u32 %v8766_v60, %v8763_v47  ;;  %v8784_v53 = vrot.slane %v8782_v32, 2  ;;  %v9276_v47 = vshrl.u32 %v17637_v1, 16  ;;  %v13334_v60 = vld [vmem:[#allocation4 + $0x1c8] sm:$0xff]   ;;  %vm19438_vm1 = vmmov %vm19434_vm8 }
 0x522   : > { %12847 = vmatpush3.bf16.msra.mxu0 %v17642_v35  ;;  %12762 = vmatprep.mubr.bf16.mxu0 %v8750_v57  ;;  %v8779_v35 = vshrl.u32 %v17754_v37, 16  ;;  %v13323_v57 = vld [vmem:[#allocation4 + $0x1a0] sm:$0xff]   ;;  %v17784_v32 = vld [vmem:[#allocation3 + $0x50] sm:$0xff]   ;;  %vm19439_vm9 = vmmov %vm19438_vm1 }
 0x523   : > { %12848 = vmatprep.subr.bf16.mxu0 %v13321_v31  ;;  %12905 = vmatpush3.bf16.msra.mxu1 %v13328_v9  ;;  %v9264_v9 = vor.u32 %v9263_v46, %v9260_v48  ;;  %v8772_v54 = vrot.slane %v8770_v8, 1  ;;  %v17765_v14 = vpop.f32.mrf.mxu1  ;;  %v9285_v48 = vshrl.u32 %v17640_v61, 16  ;;  %v9288_v46 = vshll.u32 %v17640_v61, 16 }
 0x524   : > { %12906 = vmatprep.subr.bf16.mxu1 %v13330_v5  ;;  %v8781_v19 = vrot.slane %v8779_v35, 1  ;;  %v9278_v1 = vrot.slane %v9276_v47, 2  ;;  %v9281_v35 = vrot.slane %v9279_v45, 3  ;;  %v9306_v45 = vshll.u32 %v17653_v29, 16 }
 0x525   : > { %v17773_v22 = vpop.f32.mrf.mxu1  ;;  %v9265_v7 = vsel %vm19432_vm2, %v9255_v33, %v9264_v9  ;;  %v12552_v61 = vpop.f32.mrf.mxu0  ;;  %v8797_v33 = vshrl.u32 %v17784_v32, 16 }
 0x526   : > { %12819 = vmatmul.mubr.bf16.gmra.mxu1 %v9247_v26  ;;  %12849 = vmatpush3.bf16.msra.mxu0 %v13321_v31  ;;  %v8768_v31 = vsel %vm19431_vm11, %v8758_v2, %v8767_v59  ;;  %v17778_v8 = vor.u32 %v8784_v53, %v8781_v19  ;;  %v8791_v2 = vshll.u32 %v17780_v16, 16  ;;  %v8800_v26 = vshll.u32 %v17784_v32, 16  ;;  %v13336_v19 = vld [vmem:[#allocation4 + $0x1c0] sm:$0xff]   ;;  %vm19440_vm11 = vmmov %vm19432_vm2 }
 0x527   : > { %12822 = vmatprep.mubr.bf16.mxu1 %v9256_v51  ;;  %12850 = vmatprep.subr.bf16.mxu0 %v13322_v44  ;;  %v17789_v51 = vadd.f32 %v17709_v42, %v12552_v61  ;;  %v7264_v53 = vpop.f32.mrf.mxu0  ;;  %v17793_v47 = vpop.f32.mrf.mxu1  ;;  %v13329_v42 = vld [vmem:[#allocation4 + $0x190] sm:$0xff]   ;;  %v8799_v4 = vrot.slane %v8797_v33, 1 }
 0x528   : > { %12907 = vmatpush3.bf16.msra.mxu1 %v13330_v5  ;;  %v9274_v5 = vsel %vm19433_vm12, %v9264_v9, %v17763_v40  ;;  %v9287_v9 = vrot.slane %v9285_v48, 2  ;;  %v17798_v61 = vadd.f32 %v17716_v20, %v7264_v53  ;;  %v8802_v0 = vrot.slane %v8800_v26, 2  ;;  %vm19441_vm12 = vmmov %vm19438_vm1 }
 0x529   : > { %12763 = vmatmul.mubr.bf16.gmra.mxu0 %v8759_v15  ;;  %12908 = vmatprep.subr.bf16.mxu1 %v13331_v23  ;;  %v8776_v15 = vor.u32 %v8775_v28, %v8772_v54  ;;  %v9290_v54 = vrot.slane %v9288_v46, 3  ;;  %v9294_v28 = vshrl.u32 %v17650_v21, 16 }
 0x52a   : > { %12766 = vmatprep.mubr.bf16.mxu0 %v8768_v31  ;;  %12851 = vmatpush3.bf16.msra.mxu0 %v13322_v44  ;;  %v8788_v44 = vshrl.u32 %v17780_v16, 16  ;;  %v9303_v31 = vshrl.u32 %v17653_v29, 16  ;;  %v8803_v26 = vor.u32 %v8802_v0, %v8799_v4  ;;  %v13337_v4 = vld [vmem:[#allocation4 + $0x180] sm:$0xff]  }
 0x52b   : > { %12852 = vmatprep.subr.bf16.mxu0 %v13323_v57  ;;  %v8777_v48 = vsel %vm19434_vm8, %v8767_v59, %v8776_v15  ;;  %v9291_v20 = vor.u32 %v9290_v54, %v9287_v9  ;;  %v9296_v53 = vrot.slane %v9294_v28, 2  ;;  %v17806_v59 = vpop.f32.mrf.mxu1  ;;  %v17814_v9 = vld [vmem:[#allocation3 + $0x60] sm:$0xff]   ;;  %vm19442_vm8 = vmmov %vm19438_vm1 }
 0x52c   : > { %12909 = vmatpush3.bf16.msra.mxu1 %v13331_v23  ;;  %v9297_v23 = vshll.u32 %v17650_v21, 16  ;;  %v8790_v46 = vrot.slane %v8788_v44, 1  ;;  %v8793_v21 = vrot.slane %v8791_v2, 2  ;;  %v9308_v44 = vrot.slane %v9306_v45, 3  ;;  %v17808_v2 = vld [vmem:[#allocation3 + $0x58] sm:$0xff]  }
 0x52d   : > { %12910 = vmatprep.subr.bf16.mxu1 %v13334_v60  ;;  %v8818_v54 = vshll.u32 %v17814_v9, 16 }
 0x52e   : > { %12823 = vmatmul.mubr.bf16.gmra.mxu1 %v9265_v7  ;;  %12853 = vmatpush3.bf16.msra.mxu0 %v13323_v57  ;;  %v8786_v57 = vsel %vm19435_vm10, %v8776_v15, %v17778_v8  ;;  %v12553_v7 = vpop.f32.mrf.mxu0  ;;  %v9299_v49 = vrot.slane %v9297_v23, 3  ;;  %v9305_v15 = vrot.slane %v9303_v31, 2  ;;  %v17821_v31 = vpop.f32.mrf.mxu1  ;;  %vm19444_vm10 = vmmov %vm19432_vm2 }
 0x52f   : > { %12826 = vmatprep.mubr.bf16.mxu1 %v9274_v5  ;;  %12854 = vmatprep.subr.bf16.mxu0 %v13326_v17  ;;  %v9282_v5 = vor.u32 %v9281_v35, %v9278_v1  ;;  %v17804_v29 = vadd.f32 %v17722_v38, %v12553_v7  ;;  %v8809_v1 = vshll.u32 %v17808_v2, 16  ;;  %v13333_v35 = vld [vmem:[#allocation4 + $0x188] sm:$0xff]   ;;  %v8794_v38 = vor.u32 %v8793_v21, %v8790_v46 }
 0x530   : > { %12911 = vmatpush3.bf16.msra.mxu1 %v13334_v60  ;;  %v8806_v60 = vshrl.u32 %v17808_v2, 16  ;;  %v17818_v28 = vpop.f32.mrf.mxu0  ;;  %v17823_v45 = vor.u32 %v9308_v44, %v9305_v15  ;;  %v9315_v7 = vshll.u32 %v17659_v56, 16 }
 0x531   : > { %12767 = vmatmul.mubr.bf16.gmra.mxu0 %v8777_v48  ;;  %12912 = vmatprep.subr.bf16.mxu1 %v13336_v19  ;;  %v9283_v33 = vsel %vm19436_vm7, %v17763_v40, %v9282_v5  ;;  %v9292_v23 = vsel %vm19437_vm6, %v9282_v5, %v9291_v20  ;;  %v8811_v0 = vrot.slane %v8809_v1, 2  ;;  %v8795_v48 = vsel %vm19438_vm1, %v17778_v8, %v8794_v38  ;;  %v17835_v8 = vpop.f32.mrf.mxu1  ;;  %vm19445_vm7 = vmmov %vm19432_vm2 }
 0x532   : > { %12770 = vmatprep.mubr.bf16.mxu0 %v8786_v57  ;;  %12855 = vmatpush3.bf16.msra.mxu0 %v13326_v17  ;;  %v8815_v17 = vshrl.u32 %v17814_v9, 16  ;;  %v8808_v40 = vrot.slane %v8806_v60, 1  ;;  %v9312_v57 = vshrl.u32 %v17659_v56, 16  ;;  %v8804_v46 = vsel %vm19439_vm9, %v8794_v38, %v8803_v26  ;;  %v17840_v56 = vld [vmem:[#allocation4 + $0x238] sm:$0xff]   ;;  %vm19446_vm6 = vmmov %vm19438_vm1 }
 0x533   : > { %12856 = vmatprep.subr.bf16.mxu0 %v13329_v42  ;;  %vm19447_vm9 = vmmov %vm19432_vm2 }
 0x534   : > { %12913 = vmatpush3.bf16.msra.mxu1 %v13336_v19  ;;  %v9300_v19 = vor.u32 %v9299_v49, %v9296_v53  ;;  %v8817_v21 = vrot.slane %v8815_v17, 1  ;;  %v9321_v49 = vshrl.u32 %v17663_v41, 16  ;;  %v9324_v53 = vshll.u32 %v17663_v41, 16  ;;  %v17842_v17 = vld [vmem:[#allocation3 + $0x68] sm:$0xff]  }
 0x535   : > { %v8812_v1 = vor.u32 %v8811_v0, %v8808_v40  ;;  %v8824_v41 = vshrl.u32 %v17842_v17, 16 }
 0x536   : > { %12827 = vmatmul.mubr.bf16.gmra.mxu1 %v9283_v33  ;;  %12857 = vmatpush3.bf16.msra.mxu0 %v13329_v42  ;;  %v8820_v42 = vrot.slane %v8818_v54, 2  ;;  %v12556_v5 = vpop.f32.mrf.mxu0  ;;  %v9301_v44 = vsel %vm19440_vm11, %v9291_v20, %v9300_v19  ;;  %v9310_v60 = vsel %vm19432_vm2, %v9300_v19, %v17823_v45  ;;  %v9314_v33 = vrot.slane %v9312_v57, 2  ;;  %vm19448_vm11 = vmmov %vm19432_vm2 }
 0x537   : > { %12830 = vmatprep.mubr.bf16.mxu1 %v9292_v23  ;;  %12858 = vmatprep.subr.bf16.mxu0 %v13333_v35  ;;  %v17833_v15 = vadd.f32 %v17739_v58, %v12556_v5  ;;  %v8827_v58 = vshll.u32 %v17842_v17, 16  ;;  %v9317_v20 = vrot.slane %v9315_v7, 3  ;;  %v17849_v23 = vld [vmem:[#allocation3 + $0x70] sm:$0xff]   ;;  %v9326_v57 = vrot.slane %v9324_v53, 3  ;;  %vm19449_vm2 = vmmov %vm19438_vm1 }
 0x538   : > { %v7280_v38 = vpop.f32.mrf.mxu0  ;;  %v8821_v54 = vor.u32 %v8820_v42, %v8817_v21  ;;  %v8833_v19 = vshrl.u32 %v17849_v23, 16  ;;  %v8836_v40 = vshll.u32 %v17849_v23, 16  ;;  %v9333_v21 = vshll.u32 %v17674_v30, 16 }
 0x539   : > { %12771 = vmatmul.mubr.bf16.gmra.mxu0 %v8795_v48  ;;  %v9323_v48 = vrot.slane %v9321_v49, 2  ;;  %v8813_v42 = vsel %vm19441_vm12, %v8803_v26, %v8812_v1  ;;  %v8826_v7 = vrot.slane %v8824_v41, 1  ;;  %v9318_v53 = vor.u32 %v9317_v20, %v9314_v33  ;;  %v17871_v33 = vld [vmem:[#allocation3 + $0xa0] ss:$0 sps:$4 sm:$0x77]   ;;  %vm19450_vm12 = vmmov %vm19438_vm1 }
 0x53a   : > { %12774 = vmatprep.mubr.bf16.mxu0 %v8804_v46  ;;  %12859 = vmatpush3.bf16.msra.mxu0 %v13333_v35  ;;  %v17847_v35 = vadd.f32 %v17744_v50, %v7280_v38  ;;  %v12557_v0 = vpop.f32.mrf.mxu0  ;;  %v9330_v46 = vshrl.u32 %v17674_v30, 16  ;;  %v17857_v50 = vpop.f32.mrf.mxu1  ;;  %v8829_v38 = vrot.slane %v8827_v58, 2  ;;  %v8822_v49 = vsel %vm19442_vm8, %v8812_v1, %v8821_v54  ;;  %19443 = vst [vmem:[#allocation13_spill] sm:$0xff] %v17871_v33  ;;  %vm19451_vm8 = vmmov %vm19445_vm7 }
 0x53b   : > { %12860 = vmatprep.subr.bf16.mxu0 %v13337_v4  ;;  %v17855_v5 = vadd.f32 %v17748_v36, %v12557_v0  ;;  %v8838_v55 = vrot.slane %v8836_v40, 2  ;;  %v9327_v36 = vor.u32 %v9326_v57, %v9323_v48  ;;  %v9339_v0 = vshrl.u32 %v17679_v24, 16 }
 0x53c   : > { %v9335_v30 = vrot.slane %v9333_v21, 3  ;;  %v8842_v26 = vshrl.u32 %v17867_v3, 16  ;;  %v8845_v41 = vshll.u32 %v17867_v3, 16  ;;  %v8830_v1 = vor.u32 %v8829_v38, %v8826_v7 }
 0x53d   : > { %v9319_v58 = vsel %vm19444_vm10, %v17823_v45, %v9318_v53  ;;  %v9328_v24 = vsel %vm19445_vm7, %v9318_v53, %v9327_v36  ;;  %v9341_v57 = vrot.slane %v9339_v0, 2  ;;  %v9348_v45 = vshrl.u32 %v17871_v33, 16  ;;  %vm19453_vm7 = vmmov %vm19438_vm1 }
 0x53e   : > { %12831 = vmatmul.mubr.bf16.gmra.mxu1 %v9301_v44  ;;  %12861 = vmatpush3.bf16.msra.mxu0 %v13337_v4  ;;  %v8835_v44 = vrot.slane %v8833_v19, 1  ;;  %v9332_v4 = vrot.slane %v9330_v46, 2  ;;  %v17875_v19 = vld [vmem:[#allocation3 + $0x80] sm:$0xff]   ;;  %v8844_v7 = vrot.slane %v8842_v26, 1  ;;  %v8847_v38 = vrot.slane %v8845_v41, 2 }
 0x53f   : > { %12834 = vmatprep.mubr.bf16.mxu1 %v9310_v60  ;;  %12950 = vmatprep.subr.bf16.mxu0 %v17840_v56  ;;  %v17864_v60 = vpop.f32.mrf.mxu1  ;;  %v8851_v40 = vshrl.u32 %v17875_v19, 16  ;;  %v8854_v48 = vshll.u32 %v17875_v19, 16  ;;  %v9351_v53 = vshll.u32 %v17871_v33, 16  ;;  %v9350_v41 = vrot.slane %v9348_v45, 2 }
 0x540   : > { %v8839_v20 = vor.u32 %v8838_v55, %v8835_v44  ;;  %v9336_v21 = vor.u32 %v9335_v30, %v9332_v4  ;;  %v8831_v55 = vsel %vm19446_vm6, %v8821_v54, %v8830_v1  ;;  %v8848_v30 = vor.u32 %v8847_v38, %v8844_v7  ;;  %v13402_v38 = vld [vmem:[#allocation3 + $0xc] sm:$0xf]  ;;  %vm19454_vm6 = vmmov %vm19438_vm1 }
 0x541   : > { %12775 = vmatmul.mubr.bf16.gmra.mxu0 %v8813_v42  ;;  %v17880_v46 = vpop.f32.mrf.mxu1  ;;  %v9344_v42 = vrot.slane %v9342_v27, 3  ;;  %v8856_v18 = vrot.slane %v8854_v48, 2  ;;  %v9353_v48 = vrot.slane %v9351_v53, 3  ;;  %vm19452_vm10 = vcmask 1045504  }
 0x542   : > { %12778 = vmatprep.mubr.bf16.mxu0 %v8822_v49  ;;  %v17882_v49 = vpop.f32.mrf.mxu0  ;;  %v8840_v44 = vsel %vm19438_vm1, %v8830_v1, %v8839_v20  ;;  %v9337_v27 = vsel %vm19447_vm9, %v9327_v36, %v9336_v21  ;;  %v8869_v36 = vshrl.u32 %v17898_v12, 16  ;;  %vm19455_vm1 = vmmov %vm19452_vm10 }
 0x543   : > { %v17888_v0 = vpop.f32.mrf.mxu1  ;;  %v9345_v4 = vor.u32 %v9344_v42, %v9341_v57  ;;  %v8872_v57 = vshll.u32 %v17898_v12, 16  ;;  %vm19456_vm9 = vmmov %vm19455_vm1 }
 0x544   : > { %v8871_v6 = vrot.slane %v8869_v36, 1 }
 0x545   : > { %v9346_v7 = vsel %vm19448_vm11, %v9336_v21, %v9345_v4  ;;  %v9354_v21 = vor.u32 %v9353_v48, %v9350_v41  ;;  %v9635_v48 = vld [vmem:[#allocation3] sm:$0xe]  ;;  %vm19457_vm11 = vmmov %vm19449_vm2 }
 0x546   : > { %12835 = vmatmul.mubr.bf16.gmra.mxu1 %v9319_v58  ;;  %v8853_v58 = vrot.slane %v8851_v40, 1 }
 0x547   : > { %12838 = vmatprep.mubr.bf16.mxu1 %v9328_v24  ;;  %v17891_v24 = vld [vmem:[#allocation3 + $0x88] sm:$0xff]  }
 0x548   : > { %v8860_v54 = vshrl.u32 %v17891_v24, 16  ;;  %v8857_v40 = vor.u32 %v8856_v18, %v8853_v58  ;;  %v8849_v58 = vsel %vm19449_vm2, %v8839_v20, %v8848_v30  ;;  %vm19458_vm2 = vcmask 1046528  }
 0x549   : > { %12779 = vmatmul.mubr.bf16.gmra.mxu0 %v8831_v55  ;;  %v8863_v55 = vshll.u32 %v17891_v24, 16 }
 0x54a   : > { %12782 = vmatprep.mubr.bf16.mxu0 %v8840_v44  ;;  %v9972_v44 = vld [vmem:[#allocation3 + $0x8] sm:$0xc]  ;;  %v8862_v53 = vrot.slane %v8860_v54, 1  ;;  %v9355_v54 = vsel %vm19451_vm8, %v9345_v4, %v9354_v21  ;;  %v13403_v4 = vld [vmem:[#allocation3 + $0x4] sm:$0xf]  ;;  %vm19460_vm8 = vmmov %vm19455_vm1 }
 0x54b   : > { %v12560_v26 = vpop.f32.mrf.mxu0  ;;  %v11490_v45 = vcombine.low %v9972_v44, %v13402_v38  ;;  %v8874_v44 = vrot.slane %v8872_v57, 2  ;;  %v17914_v38 = vld [vmem:[#allocation3 + $0x98] ss:$0 sps:$4 sm:$0x33]  }
 0x54c   : > { %v17896_v1 = vadd.f32 %v17765_v14, %v12560_v26  ;;  %v17906_v14 = vpop.f32.mrf.mxu1  ;;  %v8865_v26 = vrot.slane %v8863_v55, 2  ;;  %v8881_v41 = vshll.u32 %v17914_v38, 16 }
 0x54d   : > { %v7296_v42 = vpop.f32.mrf.mxu0  ;;  %v8875_v55 = vor.u32 %v8874_v44, %v8871_v6  ;;  %v9996_v6 = vrot.slane %v17700_v11, 2 }
 0x54e   : > { %12839 = vmatmul.mubr.bf16.gmra.mxu1 %v9337_v27  ;;  %v17904_v63 = vadd.f32 %v17773_v22, %v7296_v42  ;;  %v8858_v27 = vsel %vm19450_vm12, %v8848_v30, %v8857_v40  ;;  %v9993_v22 = vrot.slane %v11490_v45, 2  ;;  %v9994_v42 = vrot.slane %v17687_v39, 2  ;;  %vm19459_vm12 = vmmov %vm19455_vm1 }
 0x54f   : > { %12842 = vmatprep.mubr.bf16.mxu1 %v9346_v7  ;;  %v12561_v18 = vpop.f32.mrf.mxu0  ;;  %v17916_v7 = vpop.f32.mrf.mxu1  ;;  %v8866_v20 = vor.u32 %v8865_v26, %v8862_v53  ;;  %v8878_v30 = vshrl.u32 %v17914_v38, 16  ;;  %v8883_v26 = vrot.slane %v8881_v41, 2 }
 0x550   : > { %v17910_v52 = vadd.f32 %v17793_v47, %v12561_v18  ;;  %v9995_v47 = vsel %vm19452_vm10, %v9993_v22, %v9994_v42  ;;  %v11481_v18 = vcombine.low %v9635_v48, %v13403_v4  ;;  %v9997_v44 = vsel %vm19455_vm1, %v9994_v42, %v9996_v6  ;;  %v13404_v22 = vld [vmem:[#allocation3 + $0x8] sm:$0xff]   ;;  %vm19461_vm10 = vmmov %vm19458_vm2 }
 0x551   : > { %12783 = vmatmul.mubr.bf16.gmra.mxu0 %v8849_v58  ;;  %v17922_v36 = vpop.f32.mrf.mxu1  ;;  %v8867_v39 = vsel %vm19453_vm7, %v8857_v40, %v8866_v20  ;;  %v17925_v57 = vpop.f32.mrf.mxu0  ;;  %v8876_v45 = vsel %vm19454_vm6, %v8866_v20, %v8875_v55  ;;  %v9998_v58 = vrot.slane %v17704_v62, 2  ;;  %v8880_v53 = vrot.slane %v8878_v30, 1  ;;  %vm19462_vm7 = vmmov %vm19458_vm2 }
 0x552   : > { %12786 = vmatprep.mubr.bf16.mxu0 %v8858_v27  ;;  %v9656_v40 = vrot.slane %v11481_v18, 1  ;;  %v13405_v18 = vld [vmem:[#allocation3 + $0x10] sm:$0xff]   ;;  %vm19463_vm6 = vmmov %vm19455_vm1 }
 0x553   : > { %v17930_v27 = vpop.f32.mrf.mxu1  ;;  %v9999_v11 = vsel %vm19456_vm9, %v9996_v6, %v9998_v58  ;;  %v8884_v20 = vor.u32 %v8883_v26, %v8880_v53  ;;  %v10002_v6 = vrot.slane %v17733_v13, 2  ;;  %v9659_v53 = vrot.slane %v13405_v18, 1  ;;  %v13406_v26 = vld [vmem:[#allocation3 + $0x18] sm:$0xff]   ;;  %v13408_v18 = vld [vmem:[#allocation3 + $0x28] sm:$0xff]   ;;  %vm19464_vm9 = vmmov %vm19458_vm2 }
 0x555   : > { %v8885_v30 = vsel %vm19457_vm11, %v8875_v55, %v8884_v20  ;;  %v9661_v55 = vrot.slane %v13406_v26, 1  ;;  %v13343_v26 = vld [vmem:[#allocation4 + $0x220] sm:$0xff]   ;;  %vm19465_vm11 = vmmov %vm19458_vm2 }
 0x556   : > { %12843 = vmatmul.mubr.bf16.gmra.mxu1 %v9355_v54  ;;  %v9657_v54 = vrot.slane %v13404_v22, 1  ;;  %v10004_v22 = vrot.slane %v17750_v10, 2  ;;  %v9665_v10 = vrot.slane %v13408_v18, 1 }
 0x557   : > { %12914 = vmatprep.mubr.bf16.mxu1 %v9995_v47  ;;  %v9662_v13 = vsel %vm19462_vm7, %v9659_v53, %v9661_v55 }
 0x558   : > { %v9658_v41 = vsel %vm19458_vm2, %v9656_v40, %v9657_v54  ;;  %v9660_v40 = vsel %vm19461_vm10, %v9657_v54, %v9659_v53  ;;  %vm19466_vm2 = vmmov %vm19455_vm1 }
 0x559   : > { %12787 = vmatmul.mubr.bf16.gmra.mxu0 %v8867_v39  ;;  %v17937_v39 = vpop.f32.mrf.mxu1  ;;  %vm19469_vm10 = vmmov %vm19462_vm7 }
 0x55a   : > { %12790 = vmatprep.mubr.bf16.mxu0 %v8876_v45 }
 0x55b   : > { %v17949_v4 = vpop.f32.mrf.mxu1 }
 0x55e   : > { %v12564_v21 = vpop.f32.mrf.mxu0  ;;  %12915 = vmatmul.mubr.bf16.vlgmr.msra.gmra.mxu1 %v9997_v44 }
 0x55f   : > { %v17934_v47 = vadd.f32 %v17821_v31, %v12564_v21  ;;  %12918 = vmatprep.mubr.bf16.mxu1 %v9999_v11  ;;  %v10000_v31 = vrot.slane %v17727_v34, 2  ;;  %v17955_v34 = vpop.f32.mrf.mxu1 }
 0x560   : > { %v7312_v48 = vpop.f32.mrf.mxu0 }
 0x561   : > { %v17940_v62 = vadd.f32 %v17835_v8, %v7312_v48  ;;  %12791 = vmatmul.mubr.bf16.gmra.mxu0 %v8885_v30  ;;  %v10001_v8 = vsel %vm19459_vm12, %v9998_v58, %v10000_v31  ;;  %v10003_v21 = vsel %vm19460_vm8, %v10000_v31, %v10002_v6  ;;  %v10006_v58 = vrot.slane %v17754_v37, 2  ;;  %v17962_v20 = vpop.f32.mrf.mxu1  ;;  %v13342_v30 = vld [vmem:[#allocation4 + $0x228] sm:$0xff]   ;;  %vm19467_vm12 = vmmov %vm19455_vm1 }
 0x562   : > { %v12565_v42 = vpop.f32.mrf.mxu0  ;;  %12862 = vmatprep.mubr.bf16.mxu0 %v9658_v41  ;;  %v10005_v31 = vsel %vm19463_vm6, %v10002_v6, %v10004_v22  ;;  %vm19468_vm8 = vmmov %vm19462_vm7 }
 0x563   : > { %v17946_v45 = vadd.f32 %v17857_v50, %v12565_v42  ;;  %v13341_v50 = vld [vmem:[#allocation4 + $0x230] sm:$0xff]   ;;  %v13407_v42 = vld [vmem:[#allocation3 + $0x20] sm:$0xff]   ;;  %v10007_v37 = vsel %vm19455_vm1, %v10004_v22, %v10006_v58  ;;  %vm19470_vm7 = vmmov %vm19455_vm1 }
 0x564   : > { %v17953_v44 = vpop.f32.mrf.mxu0  ;;  %v9663_v54 = vrot.slane %v13407_v42, 1  ;;  %v13409_v42 = vld [vmem:[#allocation3 + $0x30] sm:$0xff]   ;;  %vm19471_vm6 = vmmov %vm19455_vm1 }
 0x565   : > { %vm19472_vm1 = vmmov %vm19468_vm8 }
 0x566   : > { %12919 = vmatmul.mubr.bf16.gmra.mxu1 %v10001_v8  ;;  %v12629_v8 = vpop.f32.mrf.mxu1 }
 0x567   : > { %12922 = vmatprep.mubr.bf16.mxu1 %v10003_v21  ;;  %v9664_v21 = vsel %vm19464_vm9, %v9661_v55, %v9663_v54  ;;  %v13344_v55 = vld [vmem:[#allocation4 + $0x218] sm:$0xff]   ;;  %vm19473_vm9 = vmmov %vm19472_vm1 }
 0x569   : > { %12863 = vmatmul.mubr.bf16.vlgmr.msra.gmra.mxu0 %v9660_v40  ;;  %v9666_v40 = vsel %vm19465_vm11, %v9663_v54, %v9665_v10  ;;  %vm19474_vm11 = vmmov %vm19466_vm2 }
 0x56a   : > { %12951 = vmatpush3.bf16.msra.mxu0 %v17840_v56  ;;  %12866 = vmatprep.mubr.bf16.mxu0 %v9662_v13 }
 0x56b   : > { %v12568_v11 = vpop.f32.mrf.mxu0  ;;  %12952 = vmatprep.subr.bf16.mxu0 %v13341_v50 }
 0x56c   : > { %v17965_v48 = vadd.f32 %v17880_v46, %v12568_v11 }
 0x56d   : > { %v7328_v41 = vpop.f32.mrf.mxu0 }
 0x56e   : > { %v17969_v56 = vadd.f32 %v17888_v0, %v7328_v41  ;;  %12923 = vmatmul.mubr.bf16.gmra.mxu1 %v10005_v31  ;;  %12953 = vmatpush3.bf16.msra.mxu0 %v13341_v50  ;;  %v10008_v0 = vrot.slane %v17780_v16, 2  ;;  %v10010_v50 = vrot.slane %v17784_v32, 2  ;;  %v9667_v41 = vrot.slane %v13409_v42, 1  ;;  %v13410_v16 = vld [vmem:[#allocation3 + $0x38] sm:$0xff]   ;;  %v13411_v42 = vld [vmem:[#allocation3 + $0x40] sm:$0xff]  }
 0x56f   : > { %v12569_v53 = vpop.f32.mrf.mxu0  ;;  %12926 = vmatprep.mubr.bf16.mxu1 %v10007_v37  ;;  %12954 = vmatprep.subr.bf16.mxu0 %v13342_v30  ;;  %v9669_v18 = vrot.slane %v13410_v16, 1 }
 0x570   : > { %v17973_v46 = vadd.f32 %v17906_v14, %v12569_v53  ;;  %v7614_v14 = vpop.f32.mrf.mxu1  ;;  %v10009_v54 = vsel %vm19466_vm2, %v10006_v58, %v10008_v0  ;;  %v10011_v32 = vsel %vm19467_vm12, %v10008_v0, %v10010_v50  ;;  %v13345_v53 = vld [vmem:[#allocation4 + $0x210] sm:$0xff]   ;;  %v9668_v58 = vsel %vm19468_vm8, %v9665_v10, %v9667_v41  ;;  %v13346_v10 = vld [vmem:[#allocation4 + $0x208] sm:$0xff]   ;;  %vm19475_vm12 = vmmov %vm19472_vm1 }
 0x571   : > { %v7331_v6 = vpop.f32.mrf.mxu0  ;;  %12867 = vmatmul.mubr.bf16.gmra.mxu0 %v9664_v21  ;;  %vm19476_vm8 = vmmov %vm19472_vm1 }
 0x572   : > { %v17979_v13 = vadd.f32 %v17916_v7, %v7331_v6  ;;  %12870 = vmatprep.mubr.bf16.mxu0 %v9666_v40  ;;  %12955 = vmatpush3.bf16.msra.mxu0 %v13342_v30  ;;  %v17990_v37 = vpop.f32.mrf.mxu1  ;;  %v10012_v6 = vrot.slane %v17808_v2, 2  ;;  %v13412_v2 = vld [vmem:[#allocation3 + $0x48] sm:$0xff]  }
 0x573   : > { %v12572_v22 = vpop.f32.mrf.mxu0  ;;  %12956 = vmatprep.subr.bf16.mxu0 %v13343_v26  ;;  %v9673_v16 = vrot.slane %v13412_v2, 1 }
 0x574   : > { %v17983_v11 = vadd.f32 %v17922_v36, %v12572_v22  ;;  %v7627_v0 = vpop.f32.mrf.mxu1 }
 0x575   : > { %v7344_v31 = vpop.f32.mrf.mxu0 }
 0x576   : > { %v17987_v7 = vadd.f32 %v17930_v27, %v7344_v31  ;;  %12927 = vmatmul.mubr.bf16.gmra.mxu1 %v10009_v54  ;;  %12957 = vmatpush3.bf16.msra.mxu0 %v13343_v26  ;;  %v9670_v27 = vsel %vm19469_vm10, %v9667_v41, %v9669_v18  ;;  %v10014_v26 = vrot.slane %v17814_v9, 2  ;;  %v9671_v31 = vrot.slane %v13411_v42, 1  ;;  %vm19477_vm10 = vmmov %vm19466_vm2 }
 0x577   : > { %v12573_v30 = vpop.f32.mrf.mxu0  ;;  %12930 = vmatprep.mubr.bf16.mxu1 %v10011_v32  ;;  %12958 = vmatprep.subr.bf16.mxu0 %v13344_v55  ;;  %v10013_v41 = vsel %vm19470_vm7, %v10010_v50, %v10012_v6  ;;  %v12633_v32 = vpop.f32.mrf.mxu1  ;;  %vm19478_vm7 = vmmov %vm19466_vm2 }
 0x578   : > { %v17993_v36 = vadd.f32 %v17937_v39, %v12573_v30  ;;  %v10015_v9 = vsel %vm19471_vm6, %v10012_v6, %v10014_v26  ;;  %v13347_v30 = vld [vmem:[#allocation4 + $0x200] sm:$0xff]   ;;  %v9674_v50 = vsel %vm19473_vm9, %v9671_v31, %v9673_v16  ;;  %vm19479_vm6 = vmmov %vm19472_vm1 }
 0x579   : > { %v7347_v21 = vpop.f32.mrf.mxu0  ;;  %12871 = vmatmul.mubr.bf16.gmra.mxu0 %v9668_v58  ;;  %v9672_v58 = vsel %vm19472_vm1, %v9669_v18, %v9671_v31  ;;  %v7630_v6 = vpop.f32.mrf.mxu1  ;;  %vm19480_vm9 = vmmov %vm19466_vm2 }
 0x57a   : > { %v17999_v40 = vadd.f32 %v17949_v4, %v7347_v21  ;;  %12874 = vmatprep.mubr.bf16.mxu0 %v9670_v27  ;;  %12959 = vmatpush3.bf16.msra.mxu0 %v13344_v55 }
 0x57b   : > { %v12576_v22 = vpop.f32.mrf.mxu0  ;;  %12960 = vmatprep.subr.bf16.mxu0 %v13345_v53 }
 0x57c   : > { %v18003_v39 = vadd.f32 %v17955_v34, %v12576_v22  ;;  %v10018_v22 = vrot.slane %v17849_v23, 2 }
 0x57d   : > { %v7360_v54 = vpop.f32.mrf.mxu0 }
 0x57e   : > { %v18007_v4 = vadd.f32 %v17962_v20, %v7360_v54  ;;  %12931 = vmatmul.mubr.bf16.gmra.mxu1 %v10013_v41  ;;  %12961 = vmatpush3.bf16.msra.mxu0 %v13345_v53  ;;  %v10016_v20 = vrot.slane %v17842_v17, 2  ;;  %v13414_v54 = vld [vmem:[#allocation3 + $0x58] sm:$0xff]  }
 0x57f   : > { %v12577_v55 = vpop.f32.mrf.mxu0  ;;  %12934 = vmatprep.mubr.bf16.mxu1 %v10015_v9  ;;  %12962 = vmatprep.subr.bf16.mxu0 %v13346_v10  ;;  %v9677_v18 = vrot.slane %v13414_v54, 1 }
 0x580   : > { %v18010_v34 = vadd.f32 %v12629_v8, %v12577_v55  ;;  %v13413_v8 = vld [vmem:[#allocation3 + $0x50] sm:$0xff]   ;;  %v10017_v42 = vsel %vm19474_vm11, %v10014_v26, %v10016_v20  ;;  %v10019_v31 = vsel %vm19466_vm2, %v10016_v20, %v10018_v22  ;;  %v10022_v55 = vrot.slane %v17875_v19, 2  ;;  %vm19481_vm11 = vmmov %vm19466_vm2 }
 0x581   : > { %v7363_v21 = vpop.f32.mrf.mxu0  ;;  %12875 = vmatmul.mubr.bf16.gmra.mxu0 %v9672_v58  ;;  %v9675_v53 = vrot.slane %v13413_v8, 1  ;;  %vm19483_vm2 = vmmov %vm19472_vm1 }
 0x582   : > { %v18015_v27 = vadd.f32 %v7614_v14, %v7363_v21  ;;  %12878 = vmatprep.mubr.bf16.mxu0 %v9674_v50  ;;  %12963 = vmatpush3.bf16.msra.mxu0 %v13346_v10  ;;  %v10020_v10 = vrot.slane %v17867_v3, 2  ;;  %v13415_v50 = vld [vmem:[#allocation3 + $0x60] sm:$0xff]  }
 0x583   : > { %12964 = vmatprep.subr.bf16.mxu0 %v13347_v30  ;;  %v9676_v14 = vsel %vm19475_vm12, %v9673_v16, %v9675_v53  ;;  %v9678_v23 = vsel %vm19476_vm8, %v9675_v53, %v9677_v18  ;;  %v9679_v20 = vrot.slane %v13415_v50, 1  ;;  %v10026_v50 = vrot.slane %v17898_v12, 2  ;;  %vm19484_vm12 = vmmov %vm19472_vm1 }
 0x584   : > { %v10021_v8 = vsel %vm19477_vm10, %v10018_v22, %v10020_v10  ;;  %v10024_v22 = vrot.slane %v17891_v24, 2  ;;  %vm19485_vm8 = vmmov %vm19478_vm7 }
 0x585   : > { %vm19486_vm10 = vmmov %vm19472_vm1 }
 0x586   : > { %v12636_v41 = vpop.f32.mrf.mxu1  ;;  %12935 = vmatmul.mubr.bf16.gmra.mxu1 %v10017_v42  ;;  %12965 = vmatpush3.bf16.msra.mxu0 %v13347_v30  ;;  %v13416_v42 = vld [vmem:[#allocation3 + $0x68] sm:$0xff]  }
 0x587   : > { %12938 = vmatprep.mubr.bf16.mxu1 %v10019_v31  ;;  %v9681_v53 = vrot.slane %v13416_v42, 1 }
 0x588   : > { %v7643_v17 = vpop.f32.mrf.mxu1 }
 0x589   : > { %v12580_v2 = vpop.f32.mrf.mxu0  ;;  %12879 = vmatmul.mubr.bf16.gmra.mxu0 %v9676_v14  ;;  %v9680_v14 = vsel %vm19479_vm6, %v9677_v18, %v9679_v20  ;;  %v10025_v18 = vsel %vm19480_vm9, %v10022_v55, %v10024_v22  ;;  %vm19488_vm6 = vmmov %vm19472_vm1 }
 0x58a   : > { %v18024_v9 = vadd.f32 %v17990_v37, %v12580_v2  ;;  %v12637_v26 = vpop.f32.mrf.mxu1  ;;  %12882 = vmatprep.mubr.bf16.mxu0 %v9678_v23  ;;  %v10023_v37 = vsel %vm19478_vm7, %v10020_v10, %v10022_v55  ;;  %v9682_v23 = vsel %vm19472_vm1, %v9679_v20, %v9681_v53  ;;  %vm19487_vm7 = vmmov %vm19472_vm1  ;;  %vm19489_vm1 = vcmask 1044480  }
 0x58b   : > { %v7376_v58 = vpop.f32.mrf.mxu0  ;;  %vm19490_vm9 = vmmov %vm19489_vm1 }
 0x58c   : > { %v18027_v21 = vadd.f32 %v7627_v0, %v7376_v58  ;;  %v7646_v30 = vpop.f32.mrf.mxu1 }
 0x58d   : > { %v12581_v16 = vpop.f32.mrf.mxu0 }
 0x58e   : > { %v18030_v54 = vadd.f32 %v12633_v32, %v12581_v16  ;;  %v12708_v3 = vpop.f32.mrf.mxu1  ;;  %12939 = vmatmul.mubr.bf16.gmra.mxu1 %v10021_v8  ;;  %v13417_v8 = vld [vmem:[#allocation3 + $0x70] sm:$0xff]  }
 0x58f   : > { %v7379_v31 = vpop.f32.mrf.mxu0  ;;  %12942 = vmatprep.mubr.bf16.mxu1 %v10023_v37  ;;  %v9683_v42 = vrot.slane %v13417_v8, 1 }
 0x590   : > { %v18033_v19 = vadd.f32 %v7630_v6, %v7379_v31  ;;  %v8516_v0 = vpop.f32.mrf.mxu1  ;;  %v13418_v31 = vld [vmem:[#allocation3 + $0x78] sm:$0xff]  }
 0x591   : > { %v12584_v2 = vpop.f32.mrf.mxu0  ;;  %12883 = vmatmul.mubr.bf16.gmra.mxu0 %v9680_v14  ;;  %v9685_v14 = vrot.slane %v13418_v31, 1 }
 0x592   : > { %v18038_v58 = vadd.f32 %v12636_v41, %v12584_v2  ;;  %v12709_v32 = vpop.f32.mrf.mxu1  ;;  %12886 = vmatprep.mubr.bf16.mxu0 %v9682_v23  ;;  %v10027_v41 = vsel %vm19481_vm11, %v10024_v22, %v10026_v50  ;;  %v9684_v23 = vsel %vm19483_vm2, %v9681_v53, %v9683_v42  ;;  %vm19491_vm11 = vmmov %vm19489_vm1 }
 0x593   : > { %v7392_v10 = vpop.f32.mrf.mxu0  ;;  %v9686_v8 = vsel %vm19484_vm12, %v9683_v42, %v9685_v14  ;;  %vm19492_vm2 = vmmov %vm19489_vm1 }
 0x594   : > { %v18041_v16 = vadd.f32 %v7643_v17, %v7392_v10  ;;  %v8519_v6 = vpop.f32.mrf.mxu1  ;;  %vm19493_vm12 = vmmov %vm19489_vm1 }
 0x595   : > { %v12585_v37 = vpop.f32.mrf.mxu0 }
 0x596   : > { %v18044_v20 = vadd.f32 %v12637_v26, %v12585_v37  ;;  %v12712_v24 = vpop.f32.mrf.mxu1  ;;  %12943 = vmatmul.mubr.bf16.gmra.mxu1 %v10025_v18  ;;  %v10028_v37 = vrot.slane %v17914_v38, 2 }
 0x597   : > { %v7395_v2 = vpop.f32.mrf.mxu0  ;;  %12946 = vmatprep.mubr.bf16.mxu1 %v10027_v41  ;;  %v13419_v41 = vld [vmem:[#allocation3 + $0x80] sm:$0xff]  }
 0x598   : > { %v18047_v12 = vadd.f32 %v7646_v30, %v7395_v2  ;;  %v8532_v17 = vpop.f32.mrf.mxu1  ;;  %v9687_v30 = vrot.slane %v13419_v41, 1  ;;  %v10029_v53 = vsel %vm19485_vm8, %v10026_v50, %v10028_v37  ;;  %vm19494_vm8 = vmmov %vm19489_vm1 }
 0x599   : > { %v12656_v10 = vpop.f32.mrf.mxu0  ;;  %12887 = vmatmul.mubr.bf16.gmra.mxu0 %v9684_v23  ;;  %v13420_v23 = vld [vmem:[#allocation3 + $0x88] sm:$0xff]  }
 0x59a   : > { %19482 = vst [vmem:[#allocation14_spill] sm:$0xff] %v18047_v12  ;;  %v8087_v55 = vadd.f32 %v12656_v10, %v17789_v51  ;;  %v12713_v31 = vpop.f32.mrf.mxu1  ;;  %12890 = vmatprep.mubr.bf16.mxu0 %v9686_v8  ;;  %v9689_v12 = vrot.slane %v13420_v23, 1  ;;  %v7519_v51 = vadd.f32 %v17731_v25, %v17818_v28 }
 0x59b   : > { %v7942_v26 = vpop.f32.mrf.mxu0 }
 0x59c   : > { %v8085_v22 = vadd.f32 %v7942_v26, %v17798_v61  ;;  %v8535_v18 = vpop.f32.mrf.mxu1  ;;  %v18054_v2 = vadd.f32 %v12708_v3, %v8087_v55  ;;  %v9688_v3 = vsel %vm19486_vm10, %v9685_v14, %v9687_v30  ;;  %v10309_v55 = vld [vmem:[#allocation3 + $0x10] sm:$0x8]  ;;  %v9690_v37 = vsel %vm19487_vm7, %v9687_v30, %v9689_v12  ;;  %v13422_v14 = vld [vmem:[#allocation3 + $0x90] ss:$0 sps:$4 sm:$0x11]   ;;  %vm19495_vm10 = vmmov %vm19489_vm1 }
 0x59d   : > { %v12657_v33 = vpop.f32.mrf.mxu0  ;;  %vm19496_vm7 = vmmov %vm19489_vm1 }
 0x59e   : > { %v8088_v42 = vadd.f32 %v12657_v33, %v17804_v29  ;;  %v12716_v10 = vpop.f32.mrf.mxu1  ;;  %12947 = vmatmul.mubr.bf16.gmra.mxu1 %v10029_v53  ;;  %v18060_v38 = vadd.f32 %v8516_v0, %v8085_v22  ;;  %v13421_v0 = vld [vmem:[#allocation3 + $0x14] sm:$0xf] }
 0x59f   : > { %v7945_v61 = vpop.f32.mrf.mxu0  ;;  %v11499_v22 = vcombine.low %v10309_v55, %v13421_v0 }
 0x5a0   : > { %v8086_v8 = vadd.f32 %v7945_v61, %v7519_v51  ;;  %v8548_v26 = vpop.f32.mrf.mxu1  ;;  %v18063_v41 = vadd.f32 %v12709_v32, %v8088_v42  ;;  %v9691_v51 = vrot.slane %v13422_v14, 1  ;;  %v13423_v61 = vld [vmem:[#allocation3 + $0x18] sm:$0xff]  }
 0x5a1   : > { %v12660_v50 = vpop.f32.mrf.mxu0  ;;  %12891 = vmatmul.mubr.bf16.gmra.mxu0 %v9688_v3  ;;  %v10331_v3 = vrot.slane %v13423_v61, 3  ;;  %v10330_v55 = vrot.slane %v11499_v22, 3 }
 0x5a2   : > { %v8091_v25 = vadd.f32 %v12660_v50, %v17833_v15  ;;  %v12717_v28 = vpop.f32.mrf.mxu1  ;;  %12894 = vmatprep.mubr.bf16.mxu0 %v9690_v37  ;;  %v18067_v29 = vadd.f32 %v8519_v6, %v8086_v8  ;;  %v7535_v15 = vadd.f32 %v17758_v43, %v17882_v49 }
 0x5a3   : > { %v7958_v33 = vpop.f32.mrf.mxu0 }
 0x5a4   : > { %v8089_v53 = vadd.f32 %v7958_v33, %v17847_v35  ;;  %v8551_v23 = vpop.f32.mrf.mxu1  ;;  %v18070_v32 = vadd.f32 %v12712_v24, %v8091_v25  ;;  %v9692_v33 = vsel %vm19488_vm6, %v9689_v12, %v9691_v51  ;;  %v10332_v25 = vsel %vm19489_vm1, %v10330_v55, %v10331_v3  ;;  %vm19497_vm6 = vmmov %vm19489_vm1 }
 0x5a5   : > { %v12661_v42 = vpop.f32.mrf.mxu0 }
 0x5a6   : > { %v8092_v30 = vadd.f32 %v12661_v42, %v17855_v5  ;;  %v12720_v6 = vpop.f32.mrf.mxu1  ;;  %v18075_v8 = vadd.f32 %v8532_v17, %v8089_v53  ;;  %v13424_v53 = vld [vmem:[#allocation3 + $0x20] sm:$0xff]  }
 0x5a7   : > { %v7961_v50 = vpop.f32.mrf.mxu0  ;;  %v10333_v42 = vrot.slane %v13424_v53, 3 }
 0x5a8   : > { %v8090_v37 = vadd.f32 %v7961_v50, %v7535_v15  ;;  %v8564_v35 = vpop.f32.mrf.mxu1  ;;  %v18078_v0 = vadd.f32 %v12713_v31, %v8092_v30  ;;  %v13425_v31 = vld [vmem:[#allocation3 + $0x28] sm:$0xff]   ;;  %v7551_v15 = vadd.f32 %v17806_v59, %v17925_v57 }
 0x5a9   : > { %v12664_v24 = vpop.f32.mrf.mxu0  ;;  %12895 = vmatmul.mubr.bf16.gmra.mxu0 %v9692_v33  ;;  %v10335_v51 = vrot.slane %v13425_v31, 3 }
 0x5aa   : > { %v8095_v14 = vadd.f32 %v12664_v24, %v17896_v1  ;;  %v12721_v43 = vpop.f32.mrf.mxu1  ;;  %12966 = vmatprep.mubr.bf16.mxu0 %v10332_v25  ;;  %v18082_v5 = vadd.f32 %v8535_v18, %v8090_v37 }
 0x5ab   : > { %v7974_v49 = vpop.f32.mrf.mxu0  ;;  %v10336_v24 = vsel %vm19491_vm11, %v10333_v42, %v10335_v51  ;;  %vm19499_vm11 = vmmov %vm19489_vm1 }
 0x5ac   : > { %v8093_v17 = vadd.f32 %v7974_v49, %v17904_v63  ;;  %v8567_v22 = vpop.f32.mrf.mxu1  ;;  %v18085_v61 = vadd.f32 %v12716_v10, %v8095_v14  ;;  %v10334_v63 = vsel %vm19490_vm9, %v10331_v3, %v10333_v42  ;;  %v13426_v49 = vld [vmem:[#allocation3 + $0x30] sm:$0xff]   ;;  %v13427_v3 = vld [vmem:[#allocation3 + $0x38] sm:$0xff]   ;;  %v7567_v42 = vadd.f32 %v17864_v60, %v17953_v44  ;;  %vm19498_vm9 = vmmov %vm19489_vm1 }
 0x5ad   : > { %v12665_v12 = vpop.f32.mrf.mxu0 }
 0x5ae   : > { %v8096_v1 = vadd.f32 %v12665_v12, %v17910_v52  ;;  %v12724_v30 = vpop.f32.mrf.mxu1  ;;  %v18090_v50 = vadd.f32 %v8548_v26, %v8093_v17  ;;  %v10337_v17 = vrot.slane %v13426_v49, 3  ;;  %v10339_v12 = vrot.slane %v13427_v3, 3 }
 0x5af   : > { %v7977_v18 = vpop.f32.mrf.mxu0 }
 0x5b0   : > { %v8094_v55 = vadd.f32 %v7977_v18, %v7551_v15  ;;  %v8580_v37 = vpop.f32.mrf.mxu1  ;;  %v18093_v33 = vadd.f32 %v12717_v28, %v8096_v1 }
 0x5b1   : > { %v12668_v10 = vpop.f32.mrf.mxu0  ;;  %12967 = vmatmul.mubr.bf16.vlgmr.msra.gmra.mxu0 %v10334_v63  ;;  %v10340_v63 = vsel %vm19493_vm12, %v10337_v17, %v10339_v12  ;;  %vm19502_vm12 = vmmov %vm19489_vm1 }
 0x5b2   : > { %v8099_v25 = vadd.f32 %v12668_v10, %v17934_v47  ;;  %v12725_v14 = vpop.f32.mrf.mxu1  ;;  %12970 = vmatprep.mubr.bf16.mxu0 %v10336_v24  ;;  %v18097_v59 = vadd.f32 %v8551_v23, %v8094_v55 }
 0x5b3   : > { %v7990_v52 = vpop.f32.mrf.mxu0 }
 0x5b4   : > { %v8097_v57 = vadd.f32 %v7990_v52, %v17940_v62  ;;  %v8583_v26 = vpop.f32.mrf.mxu1  ;;  %v18100_v53 = vadd.f32 %v12720_v6, %v8099_v25  ;;  %v10338_v62 = vsel %vm19492_vm2, %v10335_v51, %v10337_v17  ;;  %v13428_v25 = vld [vmem:[#allocation3 + $0x40] sm:$0xff]   ;;  %v13429_v51 = vld [vmem:[#allocation3 + $0x48] sm:$0xff]   ;;  %vm19500_vm2 = vmmov %vm19489_vm1 }
 0x5b5   : > { %v12669_v28 = vpop.f32.mrf.mxu0  ;;  %v10341_v52 = vrot.slane %v13428_v25, 3  ;;  %v10343_v49 = vrot.slane %v13429_v51, 3 }
 0x5b6   : > { %v8100_v47 = vadd.f32 %v12669_v28, %v17946_v45  ;;  %v12728_v31 = vpop.f32.mrf.mxu1  ;;  %v18105_v15 = vadd.f32 %v8564_v35, %v8097_v57 }
 0x5b7   : > { %v7993_v23 = vpop.f32.mrf.mxu0 }
 0x5b8   : > { %v8098_v1 = vadd.f32 %v7993_v23, %v7567_v42  ;;  %v8596_v18 = vpop.f32.mrf.mxu1  ;;  %v18108_v55 = vadd.f32 %v12721_v43, %v8100_v47  ;;  %v10342_v47 = vsel %vm19494_vm8, %v10339_v12, %v10341_v52  ;;  %v13431_v12 = vld [vmem:[#allocation3 + $0x58] sm:$0xff]   ;;  %vm19503_vm8 = vmmov %vm19489_vm1 }
 0x5b9   : > { %v12672_v6 = vpop.f32.mrf.mxu0  ;;  %12971 = vmatmul.mubr.bf16.gmra.mxu0 %v10338_v62 }
 0x5ba   : > { %v8103_v10 = vadd.f32 %v12672_v6, %v17965_v48  ;;  %v12729_v24 = vpop.f32.mrf.mxu1  ;;  %12974 = vmatprep.mubr.bf16.mxu0 %v10340_v63  ;;  %v18112_v60 = vadd.f32 %v8567_v22, %v8098_v1 }
 0x5bb   : > { %v8006_v45 = vpop.f32.mrf.mxu0 }
 0x5bc   : > { %v8101_v44 = vadd.f32 %v8006_v45, %v17969_v56  ;;  %v8599_v35 = vpop.f32.mrf.mxu1  ;;  %v18115_v57 = vadd.f32 %v12724_v30, %v8103_v10  ;;  %v10344_v30 = vsel %vm19495_vm10, %v10341_v52, %v10343_v49  ;;  %vm19504_vm10 = vmmov %vm19489_vm1 }
 0x5bd   : > { %v12673_v43 = vpop.f32.mrf.mxu0 }
 0x5be   : > { %v8104_v28 = vadd.f32 %v12673_v43, %v17973_v46  ;;  %v12732_v17 = vpop.f32.mrf.mxu1  ;;  %v18118_v3 = vadd.f32 %v8580_v37, %v8101_v44  ;;  %v10347_v44 = vrot.slane %v13431_v12, 3 }
 0x5bf   : > { %v8009_v48 = vpop.f32.mrf.mxu0 }
 0x5c0   : > { %v8102_v22 = vadd.f32 %v8009_v48, %v17979_v13  ;;  %v8612_v42 = vpop.f32.mrf.mxu1  ;;  %v18122_v56 = vadd.f32 %v12725_v14, %v8104_v28  ;;  %v13430_v13 = vld [vmem:[#allocation3 + $0x50] sm:$0xff]  }
 0x5c1   : > { %v12676_v23 = vpop.f32.mrf.mxu0  ;;  %12975 = vmatmul.mubr.bf16.gmra.mxu0 %v10342_v47  ;;  %v10345_v10 = vrot.slane %v13430_v13, 3 }
 0x5c2   : > { %v8107_v1 = vadd.f32 %v12676_v23, %v17983_v11  ;;  %v12733_v62 = vpop.f32.mrf.mxu1  ;;  %12978 = vmatprep.mubr.bf16.mxu0 %v10344_v30  ;;  %v18126_v46 = vadd.f32 %v8583_v26, %v8102_v22 }
 0x5c3   : > { %v8022_v37 = vpop.f32.mrf.mxu0  ;;  %v10346_v28 = vsel %vm19496_vm7, %v10343_v49, %v10345_v10  ;;  %v13433_v49 = vld [vmem:[#allocation3 + $0x68] sm:$0xff]   ;;  %vm19505_vm7 = vmmov %vm19489_vm1 }
 0x5c4   : > { %v8105_v6 = vadd.f32 %v8022_v37, %v17987_v7  ;;  %v8615_v63 = vpop.f32.mrf.mxu1  ;;  %v18129_v45 = vadd.f32 %v12728_v31, %v8107_v1  ;;  %v10348_v31 = vsel %vm19497_vm6, %v10345_v10, %v10347_v44  ;;  %vm19507_vm6 = vmmov %vm19489_vm1 }
 0x5c5   : > { %v12677_v14 = vpop.f32.mrf.mxu0 }
 0x5c6   : > { %v8108_v25 = vadd.f32 %v12677_v14, %v17993_v36  ;;  %v12736_v52 = vpop.f32.mrf.mxu1  ;;  %v18132_v43 = vadd.f32 %v8596_v18, %v8105_v6  ;;  %v10351_v6 = vrot.slane %v13433_v49, 3 }
 0x5c7   : > { %v8025_v11 = vpop.f32.mrf.mxu0 }
 0x5c8   : > { %v8106_v26 = vadd.f32 %v8025_v11, %v17999_v40  ;;  %v8628_v51 = vpop.f32.mrf.mxu1  ;;  %v18136_v7 = vadd.f32 %v12729_v24, %v8108_v25  ;;  %v13432_v40 = vld [vmem:[#allocation3 + $0x60] sm:$0xff]  }
 0x5c9   : > { %v12680_v48 = vpop.f32.mrf.mxu0  ;;  %12979 = vmatmul.mubr.bf16.gmra.mxu0 %v10346_v28  ;;  %v10349_v1 = vrot.slane %v13432_v40, 3 }
 0x5ca   : > { %v8111_v22 = vadd.f32 %v12680_v48, %v18003_v39  ;;  %v12737_v47 = vpop.f32.mrf.mxu1  ;;  %12982 = vmatprep.mubr.bf16.mxu0 %v10348_v31  ;;  %v18140_v36 = vadd.f32 %v8599_v35, %v8106_v26 }
 0x5cb   : > { %v8038_v18 = vpop.f32.mrf.mxu0  ;;  %v10350_v25 = vsel %vm19489_vm1, %v10347_v44, %v10349_v1  ;;  %v13435_v44 = vld [vmem:[#allocation3 + $0x78] sm:$0xff]  }
 0x5cc   : > { %v8109_v23 = vadd.f32 %v8038_v18, %v18007_v4  ;;  %v8631_v30 = vpop.f32.mrf.mxu1  ;;  %v18143_v37 = vadd.f32 %v12732_v17, %v8111_v22  ;;  %v10352_v17 = vsel %vm19498_vm9, %v10349_v1, %v10351_v6 }
 0x5cd   : > { %v12681_v24 = vpop.f32.mrf.mxu0 }
 0x5ce   : > { %v8112_v13 = vadd.f32 %v12681_v24, %v18010_v34  ;;  %v12740_v10 = vpop.f32.mrf.mxu1  ;;  %v18146_v14 = vadd.f32 %v8612_v42, %v8109_v23  ;;  %v10355_v23 = vrot.slane %v13435_v44, 3  ;;  %v19501_v44 = vld [vmem:[#allocation14_spill] sm:$0xff] }
 0x5cf   : > { %v8041_v39 = vpop.f32.mrf.mxu0 }
 0x5d0   : > { %v8110_v35 = vadd.f32 %v8041_v39, %v18015_v27  ;;  %v8644_v12 = vpop.f32.mrf.mxu1  ;;  %v18150_v4 = vadd.f32 %v12733_v62, %v8112_v13  ;;  %v13434_v27 = vld [vmem:[#allocation3 + $0x70] sm:$0xff]  }
 0x5d1   : > { %v12684_v11 = vpop.f32.mrf.mxu0  ;;  %12983 = vmatmul.mubr.bf16.gmra.mxu0 %v10350_v25  ;;  %v10353_v22 = vrot.slane %v13434_v27, 3 }
 0x5d2   : > { %v8115_v26 = vadd.f32 %v12684_v11, %v18024_v9  ;;  %v12741_v28 = vpop.f32.mrf.mxu1  ;;  %12986 = vmatprep.mubr.bf16.mxu0 %v10352_v17  ;;  %v18154_v34 = vadd.f32 %v8615_v63, %v8110_v35 }
 0x5d3   : > { %v8054_v42 = vpop.f32.mrf.mxu0  ;;  %v10354_v13 = vsel %vm19499_vm11, %v10351_v6, %v10353_v22  ;;  %v13437_v6 = vld [vmem:[#allocation3 + $0x88] sm:$0xff]  }
 0x5d4   : > { %v8113_v48 = vadd.f32 %v8054_v42, %v18027_v21  ;;  %v8647_v31 = vpop.f32.mrf.mxu1  ;;  %v18157_v18 = vadd.f32 %v12736_v52, %v8115_v26  ;;  %v10356_v52 = vsel %vm19500_vm2, %v10353_v22, %v10355_v23 }
 0x5d5   : > { %v12685_v62 = vpop.f32.mrf.mxu0 }
 0x5d6   : > { %v8116_v40 = vadd.f32 %v12685_v62, %v18030_v54  ;;  %v12812_v1 = vpop.f32.mrf.mxu1  ;;  %v18160_v24 = vadd.f32 %v8628_v51, %v8113_v48  ;;  %v10359_v48 = vrot.slane %v13437_v6, 3 }
 0x5d7   : > { %v8057_v9 = vpop.f32.mrf.mxu0 }
 0x5d8   : > { %v8114_v63 = vadd.f32 %v8057_v9, %v18033_v19  ;;  %v9456_v49 = vpop.f32.mrf.mxu1  ;;  %v18164_v21 = vadd.f32 %v12737_v47, %v8116_v40  ;;  %v13436_v19 = vld [vmem:[#allocation3 + $0x80] sm:$0xff]  }
 0x5d9   : > { %v12688_v39 = vpop.f32.mrf.mxu0  ;;  %12987 = vmatmul.mubr.bf16.gmra.mxu0 %v10354_v13  ;;  %v10357_v26 = vrot.slane %v13436_v19, 3 }
 0x5da   : > { %v8119_v35 = vadd.f32 %v12688_v39, %v18038_v58  ;;  %v12813_v25 = vpop.f32.mrf.mxu1  ;;  %12990 = vmatprep.mubr.bf16.mxu0 %v10356_v52  ;;  %v18168_v54 = vadd.f32 %v8631_v30, %v8114_v63 }
 0x5db   : > { %v8070_v51 = vpop.f32.mrf.mxu0  ;;  %v10358_v9 = vsel %vm19502_vm12, %v10355_v23, %v10357_v26 }
 0x5dc   : > { %v8117_v11 = vadd.f32 %v8070_v51, %v18041_v16  ;;  %v9459_v17 = vpop.f32.mrf.mxu1  ;;  %v18171_v42 = vadd.f32 %v12740_v10, %v8119_v35  ;;  %v10360_v10 = vsel %vm19503_vm8, %v10357_v26, %v10359_v48  ;;  %v13438_v51 = vld [vmem:[#allocation3 + $0x90] sm:$0xff]  }
 0x5dd   : > { %v12689_v47 = vpop.f32.mrf.mxu0 }
 0x5de   : > { %v8120_v27 = vadd.f32 %v12689_v47, %v18044_v20  ;;  %v12816_v22 = vpop.f32.mrf.mxu1  ;;  %v18174_v62 = vadd.f32 %v8644_v12, %v8117_v11  ;;  %v10361_v11 = vrot.slane %v13438_v51, 3 }
 0x5df   : > { %v8073_v58 = vpop.f32.mrf.mxu0 }
 0x5e0   : > { %v8118_v30 = vadd.f32 %v8073_v58, %v19501_v44  ;;  %v9472_v40 = vpop.f32.mrf.mxu1  ;;  %v18178_v16 = vadd.f32 %v12741_v28, %v8120_v27  ;;  %v10362_v44 = vsel %vm19504_vm10, %v10359_v48, %v10361_v11 }
 0x5e1   : > { %v12760_v63 = vpop.f32.mrf.mxu0  ;;  %12991 = vmatmul.mubr.bf16.gmra.mxu0 %v10358_v9 }
 0x5e2   : > { %v9131_v13 = vadd.f32 %v12760_v63, %v18054_v2  ;;  %v12817_v39 = vpop.f32.mrf.mxu1  ;;  %12994 = vmatprep.mubr.bf16.mxu0 %v10360_v10  ;;  %v18182_v20 = vadd.f32 %v8647_v31, %v8118_v30  ;;  %v13439_v2 = vld [vmem:[#allocation3 + $0x98] sm:$0xff]  }
 0x5e3   : > { %v8986_v12 = vpop.f32.mrf.mxu0  ;;  %v10363_v27 = vrot.slane %v13439_v2, 3 }
 0x5e4   : > { %v9129_v52 = vadd.f32 %v8986_v12, %v18060_v38  ;;  %v9475_v35 = vpop.f32.mrf.mxu1  ;;  %v18185_v19 = vadd.f32 %v12812_v1, %v9131_v13 }
 0x5e5   : > { %v12761_v28 = vpop.f32.mrf.mxu0  ;;  %v10364_v1 = vsel %vm19505_vm7, %v10361_v11, %v10363_v27 }
 0x5e6   : > { %v9132_v23 = vadd.f32 %v12761_v28, %v18063_v41  ;;  %v12820_v47 = vpop.f32.mrf.mxu1  ;;  %v18188_v6 = vadd.f32 %v9456_v49, %v9129_v52 }
 0x5e7   : > { %v8989_v26 = vpop.f32.mrf.mxu0 }
 0x5e8   : > { %v9130_v31 = vadd.f32 %v8989_v26, %v18067_v29  ;;  %v9488_v58 = vpop.f32.mrf.mxu1  ;;  %v18192_v38 = vadd.f32 %v12813_v25, %v9132_v23  ;;  %v19506_v29 = vld [vmem:[#allocation13_spill] sm:$0xff] }
 0x5e9   : > { %v12764_v30 = vpop.f32.mrf.mxu0  ;;  %12995 = vmatmul.mubr.bf16.gmra.mxu0 %v10362_v44  ;;  %v10365_v12 = vrot.slane %v19506_v29, 3 }
 0x5ea   : > { %v9135_v9 = vadd.f32 %v12764_v30, %v18070_v32  ;;  %v12821_v41 = vpop.f32.mrf.mxu1  ;;  %12998 = vmatprep.mubr.bf16.mxu0 %v10364_v1  ;;  %v18196_v49 = vadd.f32 %v9459_v17, %v9130_v31 }
 0x5eb   : > { %v9002_v63 = vpop.f32.mrf.mxu0  ;;  %v10366_v17 = vsel %vm19507_vm6, %v10363_v27, %v10365_v12 }
 0x5ec   : > { %v9133_v10 = vadd.f32 %v9002_v63, %v18075_v8  ;;  %v9491_v13 = vpop.f32.mrf.mxu1  ;;  %v18200_v52 = vadd.f32 %v12816_v22, %v9135_v9 }
 0x5ed   : > { %v12765_v25 = vpop.f32.mrf.mxu0 }
 0x5ee   : > { %v9136_v48 = vadd.f32 %v12765_v25, %v18078_v0  ;;  %v12824_v51 = vpop.f32.mrf.mxu1  ;;  %v18203_v28 = vadd.f32 %v9472_v40, %v9133_v10 }
 0x5ef   : > { %v9005_v11 = vpop.f32.mrf.mxu0 }
 0x5f0   : > { %v9134_v32 = vadd.f32 %v9005_v11, %v18082_v5  ;;  %v9504_v23 = vpop.f32.mrf.mxu1  ;;  %v18207_v26 = vadd.f32 %v12817_v39, %v9136_v48 }
 0x5f1   : > { %v12768_v8 = vpop.f32.mrf.mxu0  ;;  %12999 = vmatmul.mubr.bf16.gmra.mxu0 %v10366_v17 }
 0x5f2   : > { %v9139_v2 = vadd.f32 %v12768_v8, %v18085_v61  ;;  %v12825_v22 = vpop.f32.mrf.mxu1  ;;  %v18210_v31 = vadd.f32 %v9475_v35, %v9134_v32 }
 0x5f3   : > { %v9018_v44 = vpop.f32.mrf.mxu0 }
 0x5f4   : > { %v9137_v0 = vadd.f32 %v9018_v44, %v18090_v50  ;;  %v9507_v40 = vpop.f32.mrf.mxu1  ;;  %v18213_v30 = vadd.f32 %v12820_v47, %v9139_v2 }
 0x5f5   : > { %v12769_v1 = vpop.f32.mrf.mxu0 }
 0x5f6   : > { %v9140_v5 = vadd.f32 %v12769_v1, %v18093_v33  ;;  %v12828_v9 = vpop.f32.mrf.mxu1  ;;  %v18216_v27 = vadd.f32 %v9488_v58, %v9137_v0 }
 0x5f7   : > { %v9021_v39 = vpop.f32.mrf.mxu0 }
 0x5f8   : > { %v9138_v63 = vadd.f32 %v9021_v39, %v18097_v59  ;;  %v9520_v10 = vpop.f32.mrf.mxu1  ;;  %v18219_v61 = vadd.f32 %v12821_v41, %v9140_v5 }
 0x5f9   : > { %v12772_v35 = vpop.f32.mrf.mxu0 }
 0x5fa   : > { %v9143_v29 = vadd.f32 %v12772_v35, %v18100_v53  ;;  %v12829_v12 = vpop.f32.mrf.mxu1  ;;  %v18222_v50 = vadd.f32 %v9491_v13, %v9138_v63 }
 0x5fb   : > { %v9034_v47 = vpop.f32.mrf.mxu0 }
 0x5fc   : > { %v9141_v25 = vadd.f32 %v9034_v47, %v18105_v15  ;;  %v9523_v48 = vpop.f32.mrf.mxu1  ;;  %v18225_v33 = vadd.f32 %v12824_v51, %v9143_v29 }
 0x5fd   : > { %v12773_v58 = vpop.f32.mrf.mxu0 }
 0x5fe   : > { %v9144_v11 = vadd.f32 %v12773_v58, %v18108_v55  ;;  %v12832_v32 = vpop.f32.mrf.mxu1  ;;  %v18228_v59 = vadd.f32 %v9504_v23, %v9141_v25 }
 0x5ff   : > { %v9037_v41 = vpop.f32.mrf.mxu0 }
 0x600   : > { %v9142_v17 = vadd.f32 %v9037_v41, %v18112_v60  ;;  %v9536_v8 = vpop.f32.mrf.mxu1  ;;  %v18231_v53 = vadd.f32 %v12825_v22, %v9144_v11 }
 0x601   : > { %v12776_v13 = vpop.f32.mrf.mxu0 }
 0x602   : > { %v9147_v2 = vadd.f32 %v12776_v13, %v18115_v57  ;;  %v12833_v44 = vpop.f32.mrf.mxu1  ;;  %v18234_v15 = vadd.f32 %v9507_v40, %v9142_v17 }
 0x603   : > { %v9050_v51 = vpop.f32.mrf.mxu0 }
 0x604   : > { %v9145_v0 = vadd.f32 %v9050_v51, %v18118_v3  ;;  %v9539_v1 = vpop.f32.mrf.mxu1  ;;  %v18237_v55 = vadd.f32 %v12828_v9, %v9147_v2 }
 0x605   : > { %v12777_v23 = vpop.f32.mrf.mxu0 }
 0x606   : > { %v9148_v5 = vadd.f32 %v12777_v23, %v18122_v56  ;;  %v12836_v39 = vpop.f32.mrf.mxu1  ;;  %v18240_v60 = vadd.f32 %v9520_v10, %v9145_v0 }
 0x607   : > { %v9053_v22 = vpop.f32.mrf.mxu0 }
 0x608   : > { %v9146_v63 = vadd.f32 %v9053_v22, %v18126_v46  ;;  %v9552_v35 = vpop.f32.mrf.mxu1  ;;  %v18243_v57 = vadd.f32 %v12829_v12, %v9148_v5 }
 0x609   : > { %v12780_v40 = vpop.f32.mrf.mxu0 }
 0x60a   : > { %v9151_v29 = vadd.f32 %v12780_v40, %v18129_v45  ;;  %v12837_v47 = vpop.f32.mrf.mxu1  ;;  %v18246_v3 = vadd.f32 %v9523_v48, %v9146_v63 }
 0x60b   : > { %v9066_v9 = vpop.f32.mrf.mxu0 }
 0x60c   : > { %v9149_v25 = vadd.f32 %v9066_v9, %v18132_v43  ;;  %v9555_v58 = vpop.f32.mrf.mxu1  ;;  %v18249_v56 = vadd.f32 %v12832_v32, %v9151_v29 }
 0x60d   : > { %v12781_v10 = vpop.f32.mrf.mxu0 }
 0x60e   : > { %v9152_v11 = vadd.f32 %v12781_v10, %v18136_v7  ;;  %v12840_v41 = vpop.f32.mrf.mxu1  ;;  %v18252_v46 = vadd.f32 %v9536_v8, %v9149_v25 }
 0x60f   : > { %v9069_v12 = vpop.f32.mrf.mxu0 }
 0x610   : > { %v9150_v17 = vadd.f32 %v9069_v12, %v18140_v36  ;;  %v9568_v13 = vpop.f32.mrf.mxu1  ;;  %v18255_v45 = vadd.f32 %v12833_v44, %v9152_v11 }
 0x611   : > { %v12784_v48 = vpop.f32.mrf.mxu0 }
 0x612   : > { %v9155_v2 = vadd.f32 %v12784_v48, %v18143_v37  ;;  %v12841_v51 = vpop.f32.mrf.mxu1  ;;  %v18258_v43 = vadd.f32 %v9539_v1, %v9150_v17 }
 0x613   : > { %v9082_v32 = vpop.f32.mrf.mxu0 }
 0x614   : > { %v9153_v0 = vadd.f32 %v9082_v32, %v18146_v14  ;;  %v9571_v23 = vpop.f32.mrf.mxu1  ;;  %v18261_v7 = vadd.f32 %v12836_v39, %v9155_v2 }
 0x615   : > { %v12785_v8 = vpop.f32.mrf.mxu0 }
 0x616   : > { %v9156_v5 = vadd.f32 %v12785_v8, %v18150_v4  ;;  %v18264_v22 = vadd.f32 %v9552_v35, %v9153_v0  ;;  %v12844_v44 = vpop.f32.mrf.mxu1 }
 0x617   : > { %v9085_v36 = vpop.f32.mrf.mxu0 }
 0x618   : > { %v9154_v63 = vadd.f32 %v9085_v36, %v18154_v34  ;;  %v18267_v40 = vadd.f32 %v12837_v47, %v9156_v5  ;;  %v9584_v9 = vpop.f32.mrf.mxu1 }
 0x619   : > { %v12788_v37 = vpop.f32.mrf.mxu0 }
 0x61a   : > { %v9159_v1 = vadd.f32 %v12788_v37, %v18157_v18  ;;  %v18270_v29 = vadd.f32 %v9555_v58, %v9154_v63  ;;  %v12845_v34 = vpop.f32.mrf.mxu1 }
 0x61b   : > { %v9098_v14 = vpop.f32.mrf.mxu0 }
 0x61c   : > { %v9157_v39 = vadd.f32 %v9098_v14, %v18160_v24  ;;  %v18273_v25 = vadd.f32 %v12840_v41, %v9159_v1  ;;  %v9587_v24 = vpop.f32.mrf.mxu1 }
 0x61d   : > { %v12789_v4 = vpop.f32.mrf.mxu0 }
 0x61e   : > { %v9160_v35 = vadd.f32 %v12789_v4, %v18164_v21  ;;  %v18276_v10 = vadd.f32 %v9568_v13, %v9157_v39 }
 0x61f   : > { %v9101_v11 = vpop.f32.mrf.mxu0 }
 0x620   : > { %v9158_v47 = vadd.f32 %v9101_v11, %v18168_v54  ;;  %v18279_v12 = vadd.f32 %v12841_v51, %v9160_v35  ;;  %v18290_v54 = vpop.f32.mrf.mxu1 }
 0x621   : > { %v12792_v18 = vpop.f32.mrf.mxu0 }
 0x622   : > { %v9163_v58 = vadd.f32 %v12792_v18, %v18171_v42  ;;  %v18282_v17 = vadd.f32 %v9571_v23, %v9158_v47  ;;  %v18300_v36 = vpop.f32.mrf.mxu1 }
 0x623   : > { %v9114_v48 = vpop.f32.mrf.mxu0 }
 0x624   : > { %v9161_v41 = vadd.f32 %v9114_v48, %v18174_v62  ;;  %v18285_v2 = vadd.f32 %v12844_v44, %v9163_v58 }
 0x625   : > { %v12793_v21 = vpop.f32.mrf.mxu0 }
 0x626   : > { %v9164_v13 = vadd.f32 %v12793_v21, %v18178_v16  ;;  %v18288_v32 = vadd.f32 %v9584_v9, %v9161_v41 }
 0x627   : > { %v9117_v0 = vpop.f32.mrf.mxu0 }
 0x628   : > { %v9162_v51 = vadd.f32 %v9117_v0, %v18182_v20  ;;  %v18293_v8 = vadd.f32 %v12845_v34, %v9164_v13  ;;  %v18308_v20 = vpop.f32.mrf.mxu1 }
 0x629   : > { %v12864_v42 = vpop.f32.mrf.mxu0 }
 0x62a   : > { %v18296_v23 = vadd.f32 %v12864_v42, %v18185_v19  ;;  %v18298_v5 = vadd.f32 %v9587_v24, %v9162_v51  ;;  %v18316_v39 = vpop.f32.mrf.mxu1 }
 0x62b   : > { %v9793_v62 = vpop.f32.mrf.mxu0 }
 0x62c   : > { %v18303_v16 = vadd.f32 %v9793_v62, %v18188_v6  ;;  %v18324_v11 = vpop.f32.mrf.mxu1 }
 0x62d   : > { %v12865_v44 = vpop.f32.mrf.mxu0 }
 0x62e   : > { %v18306_v63 = vadd.f32 %v12865_v44, %v18192_v38  ;;  %v18332_v18 = vpop.f32.mrf.mxu1 }
 0x62f   : > { %v9796_v37 = vpop.f32.mrf.mxu0 }
 0x630   : > { %v18311_v1 = vadd.f32 %v9796_v37, %v18196_v49  ;;  %v18340_v24 = vpop.f32.mrf.mxu1 }
 0x631   : > { %v12868_v19 = vpop.f32.mrf.mxu0 }
 0x632   : > { %v18314_v14 = vadd.f32 %v12868_v19, %v18200_v52  ;;  %v18348_v13 = vpop.f32.mrf.mxu1 }
 0x633   : > { %v9809_v9 = vpop.f32.mrf.mxu0 }
 0x634   : > { %v18319_v6 = vadd.f32 %v9809_v9, %v18203_v28  ;;  %v18356_v42 = vpop.f32.mrf.mxu1 }
 0x635   : > { %v12869_v4 = vpop.f32.mrf.mxu0 }
 0x636   : > { %v18322_v38 = vadd.f32 %v12869_v4, %v18207_v26  ;;  %v18364_v37 = vpop.f32.mrf.mxu1 }
 0x637   : > { %v9812_v35 = vpop.f32.mrf.mxu0 }
 0x638   : > { %v18327_v49 = vadd.f32 %v9812_v35, %v18210_v31  ;;  %v18372_v4 = vpop.f32.mrf.mxu1 }
 0x639   : > { %v12872_v34 = vpop.f32.mrf.mxu0 }
 0x63a   : > { %v18330_v52 = vadd.f32 %v12872_v34, %v18213_v30 }
 0x63b   : > { %v9825_v47 = vpop.f32.mrf.mxu0 }
 0x63c   : > { %v18335_v28 = vadd.f32 %v9825_v47, %v18216_v27  ;;  %v18380_v47 = vpop.f32.mrf.mxu1 }
 0x63d   : > { %v12873_v58 = vpop.f32.mrf.mxu0 }
 0x63e   : > { %v18338_v26 = vadd.f32 %v12873_v58, %v18219_v61 }
 0x63f   : > { %v9828_v48 = vpop.f32.mrf.mxu0 }
 0x640   : > { %v18343_v31 = vadd.f32 %v9828_v48, %v18222_v50 }
 0x641   : > { %v12876_v41 = vpop.f32.mrf.mxu0 }
 0x642   : > { %v18346_v30 = vadd.f32 %v12876_v41, %v18225_v33  ;;  %v18388_v41 = vpop.f32.mrf.mxu1 }
 0x643   : > { %v9841_v21 = vpop.f32.mrf.mxu0 }
 0x644   : > { %v18351_v27 = vadd.f32 %v9841_v21, %v18228_v59 }
 0x645   : > { %v12877_v0 = vpop.f32.mrf.mxu0 }
 0x646   : > { %v18354_v61 = vadd.f32 %v12877_v0, %v18231_v53 }
 0x647   : > { %v9844_v51 = vpop.f32.mrf.mxu0 }
 0x648   : > { %v18359_v50 = vadd.f32 %v9844_v51, %v18234_v15  ;;  %v18396_v51 = vpop.f32.mrf.mxu1 }
 0x649   : > { %v12880_v62 = vpop.f32.mrf.mxu0 }
 0x64a   : > { %v18362_v33 = vadd.f32 %v12880_v62, %v18237_v55 }
 0x64b   : > { %v9857_v44 = vpop.f32.mrf.mxu0 }
 0x64c   : > { %v18367_v59 = vadd.f32 %v9857_v44, %v18240_v60 }
 0x64d   : > { %v12881_v19 = vpop.f32.mrf.mxu0 }
 0x64e   : > { %v18370_v53 = vadd.f32 %v12881_v19, %v18243_v57  ;;  %v18404_v19 = vpop.f32.mrf.mxu1 }
 0x64f   : > { %v9860_v9 = vpop.f32.mrf.mxu0 }
 0x650   : > { %v18375_v15 = vadd.f32 %v9860_v9, %v18246_v3 }
 0x651   : > { %v12884_v35 = vpop.f32.mrf.mxu0 }
 0x652   : > { %v18378_v55 = vadd.f32 %v12884_v35, %v18249_v56 }
 0x653   : > { %v9873_v34 = vpop.f32.mrf.mxu0 }
 0x654   : > { %v18383_v60 = vadd.f32 %v9873_v34, %v18252_v46  ;;  %v18412_v34 = vpop.f32.mrf.mxu1 }
 0x655   : > { %v12885_v58 = vpop.f32.mrf.mxu0 }
 0x656   : > { %v18386_v57 = vadd.f32 %v12885_v58, %v18255_v45 }
 0x657   : > { %v9876_v48 = vpop.f32.mrf.mxu0 }
 0x658   : > { %v18391_v3 = vadd.f32 %v9876_v48, %v18258_v43 }
 0x659   : > { %v12888_v21 = vpop.f32.mrf.mxu0 }
 0x65a   : > { %v18394_v56 = vadd.f32 %v12888_v21, %v18261_v7  ;;  %v18420_v21 = vpop.f32.mrf.mxu1 }
 0x65b   : > { %v9889_v0 = vpop.f32.mrf.mxu0 }
 0x65c   : > { %v18399_v46 = vadd.f32 %v9889_v0, %v18264_v22 }
 0x65d   : > { %v12889_v62 = vpop.f32.mrf.mxu0 }
 0x65e   : > { %v18402_v45 = vadd.f32 %v12889_v62, %v18267_v40 }
 0x65f   : > { %v9892_v44 = vpop.f32.mrf.mxu0 }
 0x660   : > { %v18407_v43 = vadd.f32 %v9892_v44, %v18270_v29  ;;  %v18428_v44 = vpop.f32.mrf.mxu1 }
 0x661   : > { %v12892_v9 = vpop.f32.mrf.mxu0 }
 0x662   : > { %v18410_v7 = vadd.f32 %v12892_v9, %v18273_v25 }
 0x663   : > { %v9905_v35 = vpop.f32.mrf.mxu0 }
 0x664   : > { %v18415_v22 = vadd.f32 %v9905_v35, %v18276_v10 }
 0x665   : > { %v12893_v58 = vpop.f32.mrf.mxu0 }
 0x666   : > { %v18418_v40 = vadd.f32 %v12893_v58, %v18279_v12  ;;  %v18436_v58 = vpop.f32.mrf.mxu1 }
 0x667   : > { %v9908_v48 = vpop.f32.mrf.mxu0 }
 0x668   : > { %v18423_v29 = vadd.f32 %v9908_v48, %v18282_v17 }
 0x669   : > { %v12896_v0 = vpop.f32.mrf.mxu0 }
 0x66a   : > { %v18426_v25 = vadd.f32 %v12896_v0, %v18285_v2  ;;  %v10275_v2 = vadd.f32 %v18290_v54, %v18296_v23  ;;  %v10276_v54 = vadd.f32 %v18308_v20, %v18306_v63  ;;  %v10279_v63 = vadd.f32 %v18324_v11, %v18314_v14 }
 0x66b   : > { %v9921_v62 = vpop.f32.mrf.mxu0 }
 0x66c   : > { %v18431_v10 = vadd.f32 %v9921_v62, %v18288_v32  ;;  %v18446_v32 = vld [vmem:[%s18720_s6] ss:$0 sm:$0xff] }
 0x66d   : > { %v12897_v9 = vpop.f32.mrf.mxu0 }
 0x66e   : > { %19508 = vst [vmem:[#allocation12_spill] sm:$0xff] %v18431_v10  ;;  %v18434_v12 = vadd.f32 %v12897_v9, %v18293_v8  ;;  %v10273_v8 = vadd.f32 %v18300_v36, %v18303_v16  ;;  %v18450_v9 = vpop.f32.mrf.mxu1 }
 0x66f   : > { %v9924_v35 = vpop.f32.mrf.mxu0 }
 0x670   : > { %19509 = vst [vmem:[#allocation36_spill] sm:$0xff] %v18434_v12  ;;  %v18439_v17 = vadd.f32 %v9924_v35, %v18298_v5  ;;  %v18459_v36 = vpop.f32.mrf.mxu1 }
 0x671   : > { %v12968_v48 = vpop.f32.mrf.mxu0 }
 0x672   : > { %19510 = vst [vmem:[#allocation40_spill] sm:$0xff] %v18439_v17  ;;  %v10612_v0 = vadd.f32 %v12968_v48, %v10275_v2  ;;  %v10274_v2 = vadd.f32 %v18316_v39, %v18311_v1 }
 0x673   : > { %v10467_v62 = vpop.f32.mrf.mxu0 }
 0x674   : > { %v10655_v5 = vadd.f32 %v18446_v32, %v10612_v0  ;;  %v10610_v35 = vadd.f32 %v10467_v62, %v10273_v8  ;;  %v10277_v8 = vadd.f32 %v18332_v18, %v18319_v6 }
 0x675   : > { %v12969_v23 = vpop.f32.mrf.mxu0 }
 0x676   : > { %v10653_v17 = vadd.f32 %v18446_v32, %v10610_v35  ;;  %v10613_v12 = vadd.f32 %v12969_v23, %v10276_v54  ;;  %v10691_v48 = vmax.f32 %v10655_v5, 0.0 }
 0x677   : > { %v10470_v10 = vpop.f32.mrf.mxu0 }
 0x678   : > { %v10656_v16 = vadd.f32 %v18446_v32, %v10613_v12  ;;  %v10611_v0 = vadd.f32 %v10470_v10, %v10274_v2  ;;  %v10689_v62 = vmax.f32 %v10653_v17, 0.0  ;;  %v10727_v54 = vsel %vm16804_vm13, %v10691_v48, 0.0  ;;  %v18473_v10 = vpop.f32.mrf.mxu1 }
 0x679   : > { %v12972_v20 = vpop.f32.mrf.mxu0  ;;  %v10280_v12 = vadd.f32 %v18340_v24, %v18322_v38 }
 0x67a   : > { %v10692_v35 = vmax.f32 %v10656_v16, 0.0  ;;  %v10654_v1 = vadd.f32 %v18446_v32, %v10611_v0  ;;  %v10616_v39 = vadd.f32 %v12972_v20, %v10279_v63  ;;  %v10278_v0 = vadd.f32 %v18348_v13, %v18327_v49 }
 0x67b   : > { %v10483_v23 = vpop.f32.mrf.mxu0  ;;  %v10725_v48 = vsel %vm16823_vm14, %v10689_v62, 0.0  ;;  %v10283_v62 = vadd.f32 %v18356_v42, %v18330_v52  ;;  %v19517_v52 = vld [vmem:[#allocation22_spill] sm:$0xff] }
 0x67c   : > { %v10728_v14 = vsel %vm16835_vm4, %v10692_v35, 0.0  ;;  %v10690_v11 = vmax.f32 %v10654_v1, 0.0  ;;  %v10659_v6 = vadd.f32 %v18446_v32, %v10616_v39  ;;  %v10614_v18 = vadd.f32 %v10483_v23, %v10277_v8  ;;  %v18488_v39 = vpop.f32.mrf.mxu1 }
 0x67d   : > { %v11673_v17 = vpack.c.bf16 %v10728_v14, %v10727_v54  ;;  %v12973_v16 = vpop.f32.mrf.mxu0  ;;  %v10281_v23 = vadd.f32 %v18364_v37, %v18335_v28  ;;  %vm19518_vm14 = vnez %v19517_v52  ;;  %v10288_v52 = vadd.f32 %v18404_v19, %v18354_v61 }
 0x67e   : > { %v10726_v38 = vsel %vm16857_vm15, %v10690_v11, 0.0  ;;  %v10657_v24 = vadd.f32 %v18446_v32, %v10614_v18  ;;  %v10617_v5 = vadd.f32 %v12973_v16, %v10280_v12  ;;  %v10695_v35 = vmax.f32 %v10659_v6, 0.0  ;;  %v19515_v6 = vld [vmem:[#allocation45_spill] sm:$0xff] }
 0x67f   : > { %11755 = vst [vmem:[%s18485_s15 + $0x8] sm:$0xff] %v11673_v17   ;;  %v11668_v8 = vpack.c.bf16 %v10726_v38, %v10725_v48  ;;  %v10486_v1 = vpop.f32.mrf.mxu0  ;;  %vm19516_vm13 = vnez %v19515_v6  ;;  %v10284_v16 = vadd.f32 %v18372_v4, %v18338_v26  ;;  %v10282_v38 = vadd.f32 %v18380_v47, %v18343_v31 }
 0x680   : > { %v10660_v49 = vadd.f32 %v18446_v32, %v10617_v5  ;;  %v10615_v13 = vadd.f32 %v10486_v1, %v10278_v0  ;;  %v10693_v12 = vmax.f32 %v10657_v24, 0.0  ;;  %v10731_v18 = vsel %vm19516_vm13, %v10695_v35, 0.0  ;;  %v18501_v0 = vpop.f32.mrf.mxu1  ;;  %v19519_v24 = vld [vmem:[#allocation16_spill] sm:$0xff] }
 0x681   : > { %11669 = vst [vmem:[%s18485_s15] sm:$0xff] %v11668_v8   ;;  %v12976_v54 = vpop.f32.mrf.mxu0  ;;  %vm19520_vm4 = vnez %v19519_v24  ;;  %v19521_v8 = vld [vmem:[#allocation26_spill] sm:$0xff]  ;;  %v10287_v31 = vadd.f32 %v18388_v41, %v18346_v30  ;;  %v19529_v24 = vld [vmem:[#allocation20_spill] sm:$0xff] }
 0x682   : > { %v10696_v2 = vmax.f32 %v10660_v49, 0.0  ;;  %v10658_v14 = vadd.f32 %v18446_v32, %v10615_v13  ;;  %v10620_v11 = vadd.f32 %v12976_v54, %v10283_v62  ;;  %v10729_v5 = vsel %vm19520_vm4, %v10693_v12, 0.0  ;;  %v18514_v62 = vpop.f32.mrf.mxu1  ;;  %v19525_v30 = vld [vmem:[#allocation10_spill] sm:$0xff] }
 0x683   : > { %v10499_v17 = vpop.f32.mrf.mxu0  ;;  %vm19522_vm15 = vnez %v19521_v8  ;;  %v10285_v12 = vadd.f32 %v18396_v51, %v18351_v27  ;;  %vm19526_vm9 = vnez %v19525_v30  ;;  %vm19530_vm2 = vnez %v19529_v24  ;;  %v19535_v30 = vld [vmem:[#allocation29_spill] sm:$0xff] }
 0x684   : > { %v10732_v42 = vsel %vm19518_vm14, %v10696_v2, 0.0  ;;  %v10694_v63 = vmax.f32 %v10658_v14, 0.0  ;;  %v10663_v28 = vadd.f32 %v18446_v32, %v10620_v11  ;;  %v10618_v37 = vadd.f32 %v10499_v17, %v10281_v23 }
 0x685   : > { %v11683_v48 = vpack.c.bf16 %v10732_v42, %v10731_v18  ;;  %v12977_v20 = vpop.f32.mrf.mxu0  ;;  %v19523_v18 = vld [vmem:[#allocation18_spill] sm:$0xff]  ;;  %v18527_v42 = vpop.f32.mrf.mxu1  ;;  %vm19536_vm10 = vnez %v19535_v30  ;;  %v10293_v24 = vadd.f32 %v18473_v10, %v18383_v60 }
 0x686   : > { %v10730_v26 = vsel %vm19522_vm15, %v10694_v63, 0.0  ;;  %v10661_v4 = vadd.f32 %v18446_v32, %v10618_v37  ;;  %v10621_v35 = vadd.f32 %v12977_v20, %v10284_v16  ;;  %v10699_v49 = vmax.f32 %v10663_v28, 0.0  ;;  %v19527_v20 = vld [vmem:[#allocation23_spill] sm:$0xff] }
 0x687   : > { %11757 = vst [vmem:[%s18485_s15 + $0x18] sm:$0xff] %v11683_v48   ;;  %v11678_v1 = vpack.c.bf16 %v10730_v26, %v10729_v5  ;;  %v10502_v13 = vpop.f32.mrf.mxu0  ;;  %vm19524_vm1 = vnez %v19523_v18  ;;  %v10286_v48 = vadd.f32 %v18412_v34, %v18359_v50  ;;  %vm19528_vm11 = vnez %v19527_v20 }
 0x688   : > { %v10664_v54 = vadd.f32 %v18446_v32, %v10621_v35  ;;  %v10619_v23 = vadd.f32 %v10502_v13, %v10282_v38  ;;  %v10697_v2 = vmax.f32 %v10661_v4, 0.0  ;;  %v10735_v17 = vsel %vm19524_vm1, %v10699_v49, 0.0  ;;  %v18540_v35 = vpop.f32.mrf.mxu1 }
 0x689   : > { %11756 = vst [vmem:[%s18485_s15 + $0x10] sm:$0xff] %v11678_v1   ;;  %v12980_v47 = vpop.f32.mrf.mxu0  ;;  %v10291_v50 = vadd.f32 %v18420_v21, %v18362_v33  ;;  %v10289_v13 = vadd.f32 %v18428_v44, %v18367_v59  ;;  %v19533_v33 = vld [vmem:[#allocation47_spill] sm:$0xff] }
 0x68a   : > { %v10700_v14 = vmax.f32 %v10664_v54, 0.0  ;;  %v10662_v11 = vadd.f32 %v18446_v32, %v10619_v23  ;;  %v10624_v6 = vadd.f32 %v12980_v47, %v10287_v31  ;;  %v10733_v38 = vsel %vm19528_vm11, %v10697_v2, 0.0 }
 0x68b   : > { %v10515_v16 = vpop.f32.mrf.mxu0  ;;  %vm19534_vm8 = vnez %v19533_v33 }
 0x68c   : > { %v10736_v41 = vsel %vm19526_vm9, %v10700_v14, 0.0  ;;  %v10698_v63 = vmax.f32 %v10662_v11, 0.0  ;;  %v10667_v27 = vadd.f32 %v18446_v32, %v10624_v6  ;;  %v10622_v51 = vadd.f32 %v10515_v16, %v10285_v12  ;;  %v19531_v12 = vld [vmem:[#allocation46_spill] sm:$0xff]  ;;  %v18553_v6 = vpop.f32.mrf.mxu1 }
 0x68d   : > { %v11693_v28 = vpack.c.bf16 %v10736_v41, %v10735_v17  ;;  %v12981_v37 = vpop.f32.mrf.mxu0  ;;  %vm19532_vm12 = vnez %v19531_v12  ;;  %v10292_v11 = vadd.f32 %v18436_v58, %v18370_v53  ;;  %v19545_v12 = vld [vmem:[#allocation51_spill] sm:$0xff] }
 0x68e   : > { %v10734_v61 = vsel %vm19530_vm2, %v10698_v63, 0.0  ;;  %v10665_v19 = vadd.f32 %v18446_v32, %v10622_v51  ;;  %v10625_v5 = vadd.f32 %v12981_v37, %v10288_v52  ;;  %v10703_v26 = vmax.f32 %v10667_v27, 0.0  ;;  %v19537_v63 = vld [vmem:[#allocation48_spill] sm:$0xff] }
 0x68f   : > { %11759 = vst [vmem:[%s18485_s15 + $0x28] sm:$0xff] %v11693_v28   ;;  %v11688_v8 = vpack.c.bf16 %v10734_v61, %v10733_v38  ;;  %v10518_v4 = vpop.f32.mrf.mxu0  ;;  %v10290_v52 = vadd.f32 %v18450_v9, %v18375_v15  ;;  %vm19538_vm7 = vnez %v19537_v63  ;;  %v10295_v15 = vadd.f32 %v18459_v36, %v18378_v55  ;;  %v19541_v55 = vld [vmem:[#allocation30_spill] sm:$0xff] }
 0x690   : > { %v10668_v1 = vadd.f32 %v18446_v32, %v10625_v5  ;;  %v10623_v49 = vadd.f32 %v10518_v4, %v10286_v48  ;;  %v10701_v54 = vmax.f32 %v10665_v19, 0.0  ;;  %v10739_v2 = vsel %vm19532_vm12, %v10703_v26, 0.0  ;;  %v18566_v48 = vpop.f32.mrf.mxu1  ;;  %v19539_v26 = vld [vmem:[#allocation49_spill] sm:$0xff] }
 0x691   : > { %11758 = vst [vmem:[%s18485_s15 + $0x20] sm:$0xff] %v11688_v8   ;;  %v12984_v34 = vpop.f32.mrf.mxu0  ;;  %vm19540_vm6 = vnez %v19539_v26  ;;  %vm19542_vm13 = vnez %v19541_v55  ;;  %vm19546_vm4 = vnez %v19545_v12 }
 0x692   : > { %v10704_v23 = vmax.f32 %v10668_v1, 0.0  ;;  %v10666_v31 = vadd.f32 %v18446_v32, %v10623_v49  ;;  %v10628_v47 = vadd.f32 %v12984_v34, %v10291_v50  ;;  %v10737_v41 = vsel %vm19536_vm10, %v10701_v54, 0.0  ;;  %v10242_v50 = vpop.f32.mrf.mxu1 }
 0x693   : > { %v10531_v14 = vpop.f32.mrf.mxu0  ;;  %v10296_v49 = vadd.f32 %v18488_v39, %v18386_v57 }
 0x694   : > { %v10740_v21 = vsel %vm19534_vm8, %v10704_v23, 0.0  ;;  %v10702_v18 = vmax.f32 %v10666_v31, 0.0  ;;  %v10671_v59 = vadd.f32 %v18446_v32, %v10628_v47  ;;  %v10626_v44 = vadd.f32 %v10531_v14, %v10289_v13  ;;  %v19543_v31 = vld [vmem:[#allocation50_spill] sm:$0xff] }
 0x695   : > { %v11703_v17 = vpack.c.bf16 %v10740_v21, %v10739_v2  ;;  %v12985_v16 = vpop.f32.mrf.mxu0  ;;  %v10294_v23 = vadd.f32 %v18501_v0, %v18391_v3  ;;  %vm19544_vm14 = vnez %v19543_v31  ;;  %v12945_v21 = vpop.f32.mrf.mxu1  ;;  %v10299_v3 = vadd.f32 %v18514_v62, %v18394_v56  ;;  %v19549_v56 = vld [vmem:[#allocation34_spill] sm:$0xff]  ;;  %v19557_v31 = vld [vmem:[#allocation11_spill] sm:$0xff] }
 0x696   : > { %v10738_v53 = vsel %vm19538_vm7, %v10702_v18, 0.0  ;;  %v10669_v58 = vadd.f32 %v18446_v32, %v10626_v44  ;;  %v10629_v27 = vadd.f32 %v12985_v16, %v10292_v11  ;;  %v10707_v28 = vmax.f32 %v10671_v59, 0.0 }
 0x697   : > { %11761 = vst [vmem:[%s18485_s15 + $0x38] sm:$0xff] %v11703_v17   ;;  %v11698_v51 = vpack.c.bf16 %v10738_v53, %v10737_v41  ;;  %v10534_v37 = vpop.f32.mrf.mxu0  ;;  %v10297_v44 = vadd.f32 %v18527_v42, %v18399_v46  ;;  %v19547_v41 = vld [vmem:[#allocation31_spill] sm:$0xff]  ;;  %vm19550_vm1 = vnez %v19549_v56  ;;  %vm19558_vm12 = vnez %v19557_v31  ;;  %v19576_v31 = vld [vmem:[#allocation37_spill] sm:$0xff] }
 0x698   : > { %v10672_v20 = vadd.f32 %v18446_v32, %v10629_v27  ;;  %v10627_v38 = vadd.f32 %v10534_v37, %v10290_v52  ;;  %v10705_v61 = vmax.f32 %v10669_v58, 0.0  ;;  %v10743_v4 = vsel %vm19540_vm6, %v10707_v28, 0.0  ;;  %v10245_v27 = vpop.f32.mrf.mxu1 }
 0x699   : > { %11760 = vst [vmem:[%s18485_s15 + $0x30] sm:$0xff] %v11698_v51   ;;  %v12988_v9 = vpop.f32.mrf.mxu0  ;;  %vm19548_vm15 = vnez %v19547_v41  ;;  %v10300_v58 = vadd.f32 %v18540_v35, %v18402_v45 }
 0x69a   : > { %v10708_v19 = vmax.f32 %v10672_v20, 0.0  ;;  %v10670_v5 = vadd.f32 %v18446_v32, %v10627_v38  ;;  %v10632_v8 = vadd.f32 %v12988_v9, %v10295_v15  ;;  %v10741_v47 = vsel %vm19544_vm14, %v10705_v61, 0.0  ;;  %v19551_v38 = vld [vmem:[#allocation33_spill] sm:$0xff]  ;;  %v19553_v9 = vld [vmem:[#allocation35_spill] sm:$0xff] }
 0x69b   : > { %v10547_v1 = vpop.f32.mrf.mxu0  ;;  %v10298_v20 = vadd.f32 %v18553_v6, %v18407_v43  ;;  %vm19552_vm9 = vnez %v19551_v38  ;;  %vm19554_vm11 = vnez %v19553_v9  ;;  %v10303_v43 = vadd.f32 %v18566_v48, %v18410_v7  ;;  %v19569_v9 = vld [vmem:[#allocation40_spill] sm:$0xff] }
 0x69c   : > { %v10744_v36 = vsel %vm19542_vm13, %v10708_v19, 0.0  ;;  %v10706_v34 = vmax.f32 %v10670_v5, 0.0  ;;  %v10675_v60 = vadd.f32 %v18446_v32, %v10632_v8  ;;  %v10630_v10 = vadd.f32 %v10547_v1, %v10293_v24  ;;  %v12948_v8 = vpop.f32.mrf.mxu1 }
 0x69d   : > { %v11713_v13 = vpack.c.bf16 %v10744_v36, %v10743_v4  ;;  %v12989_v54 = vpop.f32.mrf.mxu0  ;;  %v10301_v1 = vadd.f32 %v10242_v50, %v18415_v22 }
 0x69e   : > { %v10742_v57 = vsel %vm19546_vm4, %v10706_v34, 0.0  ;;  %v10673_v39 = vadd.f32 %v18446_v32, %v10630_v10  ;;  %v10633_v2 = vadd.f32 %v12989_v54, %v10296_v49  ;;  %v10711_v11 = vmax.f32 %v10675_v60, 0.0  ;;  %v19555_v60 = vld [vmem:[#allocation25_spill] sm:$0xff] }
 0x69f   : > { %11763 = vst [vmem:[%s18485_s15 + $0x48] sm:$0xff] %v11713_v13   ;;  %v11708_v14 = vpack.c.bf16 %v10742_v57, %v10741_v47  ;;  %v10550_v33 = vpop.f32.mrf.mxu0  ;;  %vm19556_vm2 = vnez %v19555_v60  ;;  %v10304_v54 = vadd.f32 %v12945_v21, %v18418_v40  ;;  %v10302_v57 = vadd.f32 %v10245_v27, %v18423_v29 }
 0x6a0   : > { %v10676_v18 = vadd.f32 %v18446_v32, %v10633_v2  ;;  %v10631_v59 = vadd.f32 %v10550_v33, %v10294_v23  ;;  %v10709_v17 = vmax.f32 %v10673_v39, 0.0  ;;  %v10747_v63 = vsel %vm19548_vm15, %v10711_v11, 0.0  ;;  %v10258_v23 = vpop.f32.mrf.mxu1  ;;  %v19559_v39 = vld [vmem:[#allocation41_spill] sm:$0xff] }
 0x6a1   : > { %11762 = vst [vmem:[%s18485_s15 + $0x40] sm:$0xff] %v11708_v14   ;;  %v12992_v0 = vpop.f32.mrf.mxu0  ;;  %vm19560_vm8 = vnez %v19559_v39  ;;  %v19561_v14 = vld [vmem:[#allocation24_spill] sm:$0xff]  ;;  %vm19577_vm4 = vnez %v19576_v31 }
 0x6a2   : > { %v10712_v16 = vmax.f32 %v10676_v18, 0.0  ;;  %v10674_v52 = vadd.f32 %v18446_v32, %v10631_v59  ;;  %v10636_v30 = vadd.f32 %v12992_v0, %v10299_v3  ;;  %v10745_v15 = vsel %vm19552_vm9, %v10709_v17, 0.0  ;;  %v12949_v3 = vpop.f32.mrf.mxu1 }
 0x6a3   : > { %v10563_v53 = vpop.f32.mrf.mxu0  ;;  %vm19562_vm10 = vnez %v19561_v14  ;;  %v10307_v17 = vadd.f32 %v12948_v8, %v18426_v25 }
 0x6a4   : > { %v10748_v62 = vsel %vm19550_vm1, %v10712_v16, 0.0  ;;  %v10710_v51 = vmax.f32 %v10674_v52, 0.0  ;;  %v10679_v46 = vadd.f32 %v18446_v32, %v10636_v30  ;;  %v10634_v42 = vadd.f32 %v10563_v53, %v10297_v44  ;;  %v19563_v16 = vld [vmem:[#allocation12_spill] sm:$0xff] }
 0x6a5   : > { %v11723_v28 = vpack.c.bf16 %v10748_v62, %v10747_v63  ;;  %v12993_v37 = vpop.f32.mrf.mxu0  ;;  %v10305_v52 = vadd.f32 %v10258_v23, %v19563_v16  ;;  %v19566_v62 = vld [vmem:[#allocation36_spill] sm:$0xff] }
 0x6a6   : > { %v10746_v45 = vsel %vm19554_vm11, %v10710_v51, 0.0  ;;  %v10677_v35 = vadd.f32 %v18446_v32, %v10634_v42  ;;  %v10637_v24 = vadd.f32 %v12993_v37, %v10300_v58  ;;  %v10715_v19 = vmax.f32 %v10679_v46, 0.0  ;;  %v19564_v58 = vld [vmem:[#allocation17_spill] sm:$0xff]  ;;  %v10261_v46 = vpop.f32.mrf.mxu1  ;;  %v19567_v42 = vld [vmem:[#allocation38_spill] sm:$0xff] }
 0x6a7   : > { %11765 = vst [vmem:[%s18485_s15 + $0x58] sm:$0xff] %v11723_v28   ;;  %v11718_v61 = vpack.c.bf16 %v10746_v45, %v10745_v15  ;;  %v10566_v5 = vpop.f32.mrf.mxu0  ;;  %vm19565_vm7 = vnez %v19564_v58  ;;  %v10308_v51 = vadd.f32 %v12949_v3, %v19566_v62  ;;  %vm19568_vm6 = vnez %v19567_v42 }
 0x6a8   : > { %v10680_v26 = vadd.f32 %v18446_v32, %v10637_v24  ;;  %v10635_v4 = vadd.f32 %v10566_v5, %v10298_v20  ;;  %v10713_v49 = vmax.f32 %v10677_v35, 0.0  ;;  %v10751_v10 = vsel %vm19556_vm2, %v10715_v19, 0.0  ;;  %v19570_v35 = vld [vmem:[#allocation39_spill] sm:$0xff] }
 0x6a9   : > { %11764 = vst [vmem:[%s18485_s15 + $0x50] sm:$0xff] %v11718_v61   ;;  %v12996_v6 = vpop.f32.mrf.mxu0  ;;  %v10306_v45 = vadd.f32 %v10261_v46, %v19569_v9  ;;  %vm19571_vm13 = vnez %v19570_v35  ;;  %v19572_v61 = vld [vmem:[#allocation21_spill] sm:$0xff] }
 0x6aa   : > { %v10716_v55 = vmax.f32 %v10680_v26, 0.0  ;;  %v10678_v36 = vadd.f32 %v18446_v32, %v10635_v4  ;;  %v10640_v34 = vadd.f32 %v12996_v6, %v10303_v43  ;;  %v10749_v2 = vsel %vm19560_vm8, %v10713_v49, 0.0 }
 0x6ab   : > { %v10579_v13 = vpop.f32.mrf.mxu0  ;;  %vm19573_vm14 = vnez %v19572_v61 }
 0x6ac   : > { %v10752_v7 = vsel %vm19558_vm12, %v10716_v55, 0.0  ;;  %v10714_v48 = vmax.f32 %v10678_v36, 0.0  ;;  %v10683_v47 = vadd.f32 %v18446_v32, %v10640_v34  ;;  %v10638_v22 = vadd.f32 %v10579_v13, %v10301_v1 }
 0x6ad   : > { %v11733_v50 = vpack.c.bf16 %v10752_v7, %v10751_v10  ;;  %v12997_v12 = vpop.f32.mrf.mxu0 }
 0x6ae   : > { %v10750_v11 = vsel %vm19562_vm10, %v10714_v48, 0.0  ;;  %v10681_v40 = vadd.f32 %v18446_v32, %v10638_v22  ;;  %v10641_v33 = vadd.f32 %v12997_v12, %v10304_v54  ;;  %v10719_v18 = vmax.f32 %v10683_v47, 0.0 }
 0x6af   : > { %11767 = vst [vmem:[%s18485_s15 + $0x68] sm:$0xff] %v11733_v50   ;;  %v11728_v21 = vpack.c.bf16 %v10750_v11, %v10749_v2  ;;  %v10582_v59 = vpop.f32.mrf.mxu0 }
 0x6b0   : > { %v10684_v0 = vadd.f32 %v18446_v32, %v10641_v33  ;;  %v10639_v44 = vadd.f32 %v10582_v59, %v10302_v57  ;;  %v10717_v30 = vmax.f32 %v10681_v40, 0.0  ;;  %v10755_v27 = vsel %vm19565_vm7, %v10719_v18, 0.0 }
 0x6b1   : > { %11766 = vst [vmem:[%s18485_s15 + $0x60] sm:$0xff] %v11728_v21   ;;  %v13000_v29 = vpop.f32.mrf.mxu0 }
 0x6b2   : > { %v10720_v41 = vmax.f32 %v10684_v0, 0.0  ;;  %v10682_v63 = vadd.f32 %v18446_v32, %v10639_v44  ;;  %v10644_v53 = vadd.f32 %v13000_v29, %v10307_v17  ;;  %v10753_v24 = vsel %vm19571_vm13, %v10717_v30, 0.0 }
 0x6b3   : > { %v10595_v56 = vpop.f32.mrf.mxu0 }
 0x6b4   : > { %v10756_v25 = vsel %vm19568_vm6, %v10720_v41, 0.0  ;;  %v10718_v28 = vmax.f32 %v10682_v63, 0.0  ;;  %v10687_v37 = vadd.f32 %v18446_v32, %v10644_v53  ;;  %v10642_v20 = vadd.f32 %v10595_v56, %v10305_v52 }
 0x6b5   : > { %v11743_v38 = vpack.c.bf16 %v10756_v25, %v10755_v27  ;;  %v13001_v15 = vpop.f32.mrf.mxu0 }
 0x6b6   : > { %v10754_v19 = vsel %vm19573_vm14, %v10718_v28, 0.0  ;;  %v10685_v5 = vadd.f32 %v18446_v32, %v10642_v20  ;;  %v10645_v8 = vadd.f32 %v13001_v15, %v10308_v51  ;;  %v10723_v43 = vmax.f32 %v10687_v37, 0.0 }
 0x6b7   : > { %11769 = vst [vmem:[%s18485_s15 + $0x78] sm:$0xff] %v11743_v38   ;;  %v11738_v26 = vpack.c.bf16 %v10754_v19, %v10753_v24  ;;  %v10598_v4 = vpop.f32.mrf.mxu0 }
 0x6b8   : > { %v10688_v6 = vadd.f32 %v18446_v32, %v10645_v8  ;;  %v10643_v1 = vadd.f32 %v10598_v4, %v10306_v45  ;;  %v10721_v49 = vmax.f32 %v10685_v5, 0.0  ;;  %v10759_v60 = vsel %vm17519_vm3, %v10723_v43, 0.0 }
 0x6b9   : > { %11768 = vst [vmem:[%s18485_s15 + $0x70] sm:$0xff] %v11738_v26  }
 0x6ba   : > { %v10724_v55 = vmax.f32 %v10688_v6, 0.0  ;;  %v10686_v36 = vadd.f32 %v18446_v32, %v10643_v1  ;;  %v10757_v7 = vsel %vm19577_vm4, %v10721_v49, 0.0 }
 0x6bc   : > { %v10760_v13 = vsel %vm17543_vm5, %v10724_v55, 0.0  ;;  %v10722_v54 = vmax.f32 %v10686_v36, 0.0 }
 0x6bd   : > { %v11753_v23 = vpack.c.bf16 %v10760_v13, %v10759_v60 }
 0x6be   : > { %v10758_v47 = vsel %vm17562_vm0, %v10722_v54, 0.0 }
 0x6bf   : > { %11771 = vst [vmem:[%s18485_s15 + $0x88] sm:$0xff] %v11753_v23   ;;  %v11748_v32 = vpack.c.bf16 %v10758_v47, %v10757_v7 }
 0x6c1   : > { %11770 = vst [vmem:[%s18485_s15 + $0x80] sm:$0xff] %v11748_v32  }
 0x6c2   : > { %13479 = shalt.err (!%p13476_p0)
}
 0x6c3   : > { %s13480_s9 = scalar_lea.hbm %s18668_s19, 2304  ;;  %s13484_s15 = scalar_lea.hbm %s18721_s7, 4608 }
 0x6c4   : > { %p13481_p1 = scmp.ne.s32.totalorder %s18668_s19, %s13480_s9  ;;  %p13485_p4 = scmp.lt.s32.totalorder %s18668_s19, %s18721_s7 }
 0x6c5   : > { %p13486_p7 = scmp.lt.s32.totalorder %s13484_s15, %s13480_s9 }
 0x6c6   : > { %p13482_p2 = pnand %p13481_p1, %p13625_p5 }
 0x6c7   : > { %p13487_p8 = por %p13486_p7, %p13485_p4 }
 0x6c8   : > { %p13483_p3 = pneg %p13482_p2 }
 0x6ca   : > { %p13488_p6 = pnand %p13487_p8, %p13483_p3 }
 0x6cc   : > { %13491 = shalt.err (!%p13488_p6)
}
 0x6cd   : > { %s13546_s18 = smov 64  }
 0x6ce   : > { %13092 = dma.vmem_to_hbm [thread:$0]  (%p13625_p5), %s18662_s17, 2304, %s18668_s19, %s18673_s20, %s13546_s18, %s13546_s18, %s13539_s23  }
 0x6cf PF: > { %p13104_p9 = scmp.ge.s32.totalorder %s13530_s27, 2  ;;  %s10970_s21 = sand.u32 1, %s13518_s24  }
 0x6d0   : > { %p19579_p10 = scmp.ne.s32.totalorder %s18838_s12, 0  ;;  %s10971_s29 = scalar_lea.sflag [#allocation6], %s10970_s21 }
 0x6d2   : > { %p13099_p11 = pnand %p13104_p9, %p19579_p10 }
 0x6d4   : > { %p13100_p12 = pneg %p13099_p11 }
 0x6d6   : > { %13513 = dma.done.wait (%p13100_p12), %s10971_s29, 2304  }
 0x6d7   : > { %13515 = vsyncadd (%p13100_p12), %s10971_s29, 4294964992  ;;  %p18_p13 = scmp.ge.s32.totalorder %s13612_s30, 4   ;;  %s19580_s24 = smov %s13522_s25 }
 0x6d8   : > { %s19581_s25 = smov %s13526_s26  ;;  %s19582_s26 = smov %s13623_s10 }
 0x6d9   : > { %s19583_s27 = smov %s13612_s30  ;;  %20 = sbr.rel (!%p18_p13) target bundleno = 4 (0x4), region = 107 }
 0x6de   :  { %10976 = vsyncpa [#allocation5], 1 }
 0x6df   :  { %10978 = vsyncpa [#allocation5 + $0x1], 1 }
 0x6e0   :  { %10979 = vsyncpa [#allocation6], 1 }
 0x6e1   :  { %10981 = vsyncpa [#allocation6 + $0x1], 1 }

</bundles_post_ra>
